<compile_context>
chip_gen: v5e
topology: v5e:2x2
jax: 0.10.0
libtpu: 0.0.40
codegen_flags: <defaults>
</compile_context>

<pallas_src>
import functools

import jax
import jax.numpy as jnp
from jax.experimental import pallas as pl
from jax.experimental.pallas import tpu as pltpu


def _triplane_kernel(mu_ref, planes_ref, out_ref, *, H, R, TN):
    # mu_ref: (TN, 3); planes_ref: (3*R*R, 3*H) block-diagonal; out_ref: (TN, H)
    RR = R * R
    mu = jnp.clip(mu_ref[...], 0.0, 1.0 - 1e-6) * R            # (TN, 3) pixel coords

    # One iota reused by all three planes; flat tap index k = y*R + x.
    cols = jax.lax.broadcasted_iota(jnp.int32, (TN, RR), 1)

    pairs = ((0, 1), (1, 2), (2, 0))                            # project() index pairs
    w_blocks = []
    for a, b in pairs:
        x = mu[:, a:a + 1]                                      # grid x -> width index
        y = mu[:, b:b + 1]                                      # grid y -> height index
        x0f = jnp.floor(x)
        y0f = jnp.floor(y)
        fx = x - x0f
        fy = y - y0f
        x0 = x0f.astype(jnp.int32)                              # in [0, R-1]
        y0 = y0f.astype(jnp.int32)                              # in [0, R-1]
        x1 = x0 + 1
        y1 = y0 + 1
        # grid_sample padding_mode='zeros': the +1 tap may land at index R.
        # Zero its weight so a possible in-range alias (y0*R + R == (y0+1)*R)
        # contributes nothing; y1 == R indices fall outside [0, R*R) anyway.
        fx1 = jnp.where(x1 < R, fx, 0.0)
        fy1 = jnp.where(y1 < R, fy, 0.0)
        gx = 1.0 - fx
        gy = 1.0 - fy
        w = (jnp.where(cols == y0 * R + x0, gx * gy, 0.0)
             + jnp.where(cols == y0 * R + x1, fx1 * gy, 0.0)
             + jnp.where(cols == y1 * R + x0, gx * fy1, 0.0)
             + jnp.where(cols == y1 * R + x1, fx1 * fy1, 0.0))  # (TN, R*R)
        w_blocks.append(w)

    # Combined bilinear weights for all three planes, concatenated along K
    # (each block is a multiple of 128 lanes when R >= 12, so no relayout).
    W = jnp.concatenate(w_blocks, axis=1)                       # (TN, 3*R*R)

    # Single MXU matmul against the block-diagonal plane matrix.
    feat = jnp.dot(W, planes_ref[...],
                   preferred_element_type=jnp.float32)          # (TN, 3*H)

    # Product over the three planes.
    out_ref[...] = feat[:, 0:H] * feat[:, H:2 * H] * feat[:, 2 * H:3 * H]


def triplane_forward(mu, plane_params, resolution, tile_n=512):
    """mu: (N, 3) f32; plane_params: list of 3 arrays of shape (1, H, R, R)."""
    N = mu.shape[0]
    H = plane_params[0].shape[1]
    R = resolution
    RR = R * R

    # Tile size: big enough to amortize the ~0.35us per-grid-step overhead,
    # but capped so there are >=2 grid steps when N allows (keeps both v7x
    # TensorCores busy via the 'parallel' axis). Always a multiple of 8.
    tile_n = max(8, min(tile_n, pl.next_power_of_2(max(1, (N + 1) // 2))))
    npad = pl.cdiv(N, tile_n) * tile_n
    mu_p = jnp.pad(mu.astype(jnp.float32), ((0, npad - N), (0, 0)))

    # Glue (one-time, outside the kernel):
    #   plane_flat_j[y*R + x, c] = plane_j[0, c, y, x]
    # stacked block-diagonally -> (3*R*R, 3*H).
    blocks = []
    for j, p in enumerate(plane_params):
        pf = jnp.transpose(p[0].astype(jnp.float32), (1, 2, 0)).reshape(RR, H)
        row = [jnp.zeros((RR, H), jnp.float32) for _ in range(3)]
        row[j] = pf
        blocks.append(jnp.concatenate(row, axis=1))
    planes_bd = jnp.concatenate(blocks, axis=0)                 # (3*R*R, 3*H)

    kernel = functools.partial(_triplane_kernel, H=H, R=R, TN=tile_n)
    out = pl.pallas_call(
        kernel,
        out_shape=jax.ShapeDtypeStruct((npad, H), jnp.float32),
        grid_spec=pltpu.PrefetchScalarGridSpec(
            num_scalar_prefetch=0,
            grid=(npad // tile_n,),
            in_specs=[
                pl.BlockSpec((tile_n, 3), lambda i: (i, 0)),
                pl.BlockSpec((3 * RR, 3 * H), lambda i: (0, 0)),
            ],
            out_specs=pl.BlockSpec((tile_n, H), lambda i: (i, 0)),
        ),
        compiler_params=pltpu.CompilerParams(
            dimension_semantics=("parallel",)),
    )(mu_p, planes_bd)
    return out[:N]


def _reference_forward(mu, plane_params, resolution):
    """Pure-JAX emulation of the PyTorch forward (grid_sample bilinear, zeros pad)."""
    R = resolution
    mu = jnp.clip(mu, 0.0, 1.0 - 1e-6)
    ms = mu * R
    pairs = ((0, 1), (1, 2), (2, 0))
    feats = []
    for j, (a, b) in enumerate(pairs):
        x = ms[:, a]
        y = ms[:, b]
        x0 = jnp.floor(x).astype(jnp.int32)
        y0 = jnp.floor(y).astype(jnp.int32)
        fx = x - x0
        fy = y - y0
        x1 = x0 + 1
        y1 = y0 + 1
        plane = plane_params[j][0]  # (H, R, R)

        def gather(yy, xx):
            valid = (xx < R) & (yy < R)
            v = plane[:, jnp.minimum(yy, R - 1), jnp.minimum(xx, R - 1)]  # (H, N)
            return jnp.where(valid[None, :], v, 0.0)

        val = (gather(y0, x0) * (1 - fx) * (1 - fy)
               + gather(y0, x1) * fx * (1 - fy)
               + gather(y1, x0) * (1 - fx) * fy
               + gather(y1, x1) * fx * fy)            # (H, N)
        feats.append(val.T)                           # (N, H)
    return feats[0] * feats[1] * feats[2]


if __name__ == "__main__":
    hidden_dim = 32
    resolution = 16
    n_points = 200

    key = jax.random.PRNGKey(0)
    k_planes, k_mu = jax.random.split(key)
    plane_keys = jax.random.split(k_planes, 3)
    # FeaturePlane: nn.Parameter(torch.randn(1, hidden_dim, resolution, resolution))
    plane_params = [
        jax.random.normal(k, (1, hidden_dim, resolution, resolution),
                          dtype=jnp.float32) for k in plane_keys
    ]
    mu = jax.random.uniform(k_mu, (n_points, 3), dtype=jnp.float32)

    out = triplane_forward(mu, plane_params, resolution)
    out = jax.block_until_ready(out)

    ref = _reference_forward(mu, plane_params, resolution)
    assert out.shape == (n_points, hidden_dim), out.shape
    max_err = float(jnp.max(jnp.abs(out - ref)))
    assert jnp.allclose(out, ref, atol=1e-4, rtol=1e-4), max_err

    print("KERNEL_OK")
</pallas_src>

<mosaic_0001>
module attributes {stable_mosaic.version = 11 : i64} {
  func.func @_triplane_kernel(%arg0: i32, %arg1: memref<128x3xf32, #tpu.memory_space<vmem>>, %arg2: memref<768x96xf32, #tpu.memory_space<vmem>>, %arg3: memref<128x32xf32, #tpu.memory_space<vmem>>) attributes {dimension_semantics = [#tpu.dimension_semantics<parallel>], iteration_bounds = array<i64: 2>, scalar_prefetch = 0 : i64, scratch_operands = 0 : i64, tpu.core_type = #tpu.core_type<tc>, window_params = [{transform_indices = @transform_0, window_bounds = array<i64: 128, 3>}, {pipeline_mode = #tpu.pipeline_mode<synchronous>, transform_indices = @transform_1, window_bounds = array<i64: 768, 96>}, {transform_indices = @transform_2, window_bounds = array<i64: 128, 32>}]} {
    %c0 = arith.constant 0 : index
    %c0_0 = arith.constant 0 : index
    %0 = vector.load %arg1[%c0, %c0_0] : memref<128x3xf32, #tpu.memory_space<vmem>>, vector<128x3xf32>
    %cst = arith.constant 0.000000e+00 : f32
    %cst_1 = arith.constant 0.999998986 : f32
    %1 = vector.broadcast %cst : f32 to vector<128x3xf32>
    %2 = arith.maximumf %1, %0 : vector<128x3xf32>
    %3 = vector.broadcast %cst_1 : f32 to vector<128x3xf32>
    %4 = arith.minimumf %3, %2 : vector<128x3xf32>
    %cst_2 = arith.constant 1.600000e+01 : f32
    %5 = vector.broadcast %cst_2 : f32 to vector<128x3xf32>
    %6 = arith.mulf %4, %5 : vector<128x3xf32>
    %7 = tpu.iota {dimensions = array<i32: 1>} : vector<128x256xi32>
    %8 = vector.extract_strided_slice %6 {offsets = [0, 0], sizes = [128, 1], strides = [1, 1]} : vector<128x3xf32> to vector<128x1xf32>
    %9 = vector.extract_strided_slice %6 {offsets = [0, 1], sizes = [128, 1], strides = [1, 1]} : vector<128x3xf32> to vector<128x1xf32>
    %10 = math.floor %8 : vector<128x1xf32>
    %11 = math.floor %9 : vector<128x1xf32>
    %12 = arith.subf %8, %10 : vector<128x1xf32>
    %13 = arith.subf %9, %11 : vector<128x1xf32>
    %14 = arith.fptosi %10 : vector<128x1xf32> to vector<128x1xi32>
    %15 = arith.fptosi %11 : vector<128x1xf32> to vector<128x1xi32>
    %c1_i32 = arith.constant 1 : i32
    %16 = vector.broadcast %c1_i32 : i32 to vector<128x1xi32>
    %17 = arith.addi %14, %16 : vector<128x1xi32>
    %c1_i32_3 = arith.constant 1 : i32
    %18 = vector.broadcast %c1_i32_3 : i32 to vector<128x1xi32>
    %19 = arith.addi %15, %18 : vector<128x1xi32>
    %c16_i32 = arith.constant 16 : i32
    %20 = vector.broadcast %c16_i32 : i32 to vector<128x1xi32>
    %21 = arith.cmpi slt, %17, %20 : vector<128x1xi32>
    %cst_4 = arith.constant 0.000000e+00 : f32
    %22 = vector.broadcast %cst_4 : f32 to vector<128x1xf32>
    %23 = arith.select %21, %12, %22 : vector<128x1xi1>, vector<128x1xf32>
    %c16_i32_5 = arith.constant 16 : i32
    %24 = vector.broadcast %c16_i32_5 : i32 to vector<128x1xi32>
    %25 = arith.cmpi slt, %19, %24 : vector<128x1xi32>
    %cst_6 = arith.constant 0.000000e+00 : f32
    %26 = vector.broadcast %cst_6 : f32 to vector<128x1xf32>
    %27 = arith.select %25, %13, %26 : vector<128x1xi1>, vector<128x1xf32>
    %cst_7 = arith.constant 1.000000e+00 : f32
    %28 = vector.broadcast %cst_7 : f32 to vector<128x1xf32>
    %29 = arith.subf %28, %12 : vector<128x1xf32>
    %cst_8 = arith.constant 1.000000e+00 : f32
    %30 = vector.broadcast %cst_8 : f32 to vector<128x1xf32>
    %31 = arith.subf %30, %13 : vector<128x1xf32>
    %c16_i32_9 = arith.constant 16 : i32
    %32 = vector.broadcast %c16_i32_9 : i32 to vector<128x1xi32>
    %33 = arith.muli %15, %32 : vector<128x1xi32>
    %34 = arith.addi %33, %14 : vector<128x1xi32>
    %35 = vector.broadcast %34 : vector<128x1xi32> to vector<128x256xi32>
    %36 = arith.cmpi eq, %7, %35 : vector<128x256xi32>
    %37 = arith.mulf %29, %31 : vector<128x1xf32>
    %cst_10 = arith.constant 0.000000e+00 : f32
    %38 = vector.shape_cast %37 : vector<128x1xf32> to vector<128x1xf32>
    %39 = vector.broadcast %38 : vector<128x1xf32> to vector<128x256xf32>
    %40 = vector.broadcast %cst_10 : f32 to vector<128x256xf32>
    %41 = arith.select %36, %39, %40 : vector<128x256xi1>, vector<128x256xf32>
    %c16_i32_11 = arith.constant 16 : i32
    %42 = vector.broadcast %c16_i32_11 : i32 to vector<128x1xi32>
    %43 = arith.muli %15, %42 : vector<128x1xi32>
    %44 = arith.addi %43, %17 : vector<128x1xi32>
    %45 = vector.broadcast %44 : vector<128x1xi32> to vector<128x256xi32>
    %46 = arith.cmpi eq, %7, %45 : vector<128x256xi32>
    %47 = arith.mulf %23, %31 : vector<128x1xf32>
    %cst_12 = arith.constant 0.000000e+00 : f32
    %48 = vector.shape_cast %47 : vector<128x1xf32> to vector<128x1xf32>
    %49 = vector.broadcast %48 : vector<128x1xf32> to vector<128x256xf32>
    %50 = vector.broadcast %cst_12 : f32 to vector<128x256xf32>
    %51 = arith.select %46, %49, %50 : vector<128x256xi1>, vector<128x256xf32>
    %52 = arith.addf %41, %51 : vector<128x256xf32>
    %c16_i32_13 = arith.constant 16 : i32
    %53 = vector.broadcast %c16_i32_13 : i32 to vector<128x1xi32>
    %54 = arith.muli %19, %53 : vector<128x1xi32>
    %55 = arith.addi %54, %14 : vector<128x1xi32>
    %56 = vector.broadcast %55 : vector<128x1xi32> to vector<128x256xi32>
    %57 = arith.cmpi eq, %7, %56 : vector<128x256xi32>
    %58 = arith.mulf %29, %27 : vector<128x1xf32>
    %cst_14 = arith.constant 0.000000e+00 : f32
    %59 = vector.shape_cast %58 : vector<128x1xf32> to vector<128x1xf32>
    %60 = vector.broadcast %59 : vector<128x1xf32> to vector<128x256xf32>
    %61 = vector.broadcast %cst_14 : f32 to vector<128x256xf32>
    %62 = arith.select %57, %60, %61 : vector<128x256xi1>, vector<128x256xf32>
    %63 = arith.addf %52, %62 : vector<128x256xf32>
    %c16_i32_15 = arith.constant 16 : i32
    %64 = vector.broadcast %c16_i32_15 : i32 to vector<128x1xi32>
    %65 = arith.muli %19, %64 : vector<128x1xi32>
    %66 = arith.addi %65, %17 : vector<128x1xi32>
    %67 = vector.broadcast %66 : vector<128x1xi32> to vector<128x256xi32>
    %68 = arith.cmpi eq, %7, %67 : vector<128x256xi32>
    %69 = arith.mulf %23, %27 : vector<128x1xf32>
    %cst_16 = arith.constant 0.000000e+00 : f32
    %70 = vector.shape_cast %69 : vector<128x1xf32> to vector<128x1xf32>
    %71 = vector.broadcast %70 : vector<128x1xf32> to vector<128x256xf32>
    %72 = vector.broadcast %cst_16 : f32 to vector<128x256xf32>
    %73 = arith.select %68, %71, %72 : vector<128x256xi1>, vector<128x256xf32>
    %74 = arith.addf %63, %73 : vector<128x256xf32>
    %75 = vector.extract_strided_slice %6 {offsets = [0, 1], sizes = [128, 1], strides = [1, 1]} : vector<128x3xf32> to vector<128x1xf32>
    %76 = vector.extract_strided_slice %6 {offsets = [0, 2], sizes = [128, 1], strides = [1, 1]} : vector<128x3xf32> to vector<128x1xf32>
    %77 = math.floor %75 : vector<128x1xf32>
    %78 = math.floor %76 : vector<128x1xf32>
    %79 = arith.subf %75, %77 : vector<128x1xf32>
    %80 = arith.subf %76, %78 : vector<128x1xf32>
    %81 = arith.fptosi %77 : vector<128x1xf32> to vector<128x1xi32>
    %82 = arith.fptosi %78 : vector<128x1xf32> to vector<128x1xi32>
    %c1_i32_17 = arith.constant 1 : i32
    %83 = vector.broadcast %c1_i32_17 : i32 to vector<128x1xi32>
    %84 = arith.addi %81, %83 : vector<128x1xi32>
    %c1_i32_18 = arith.constant 1 : i32
    %85 = vector.broadcast %c1_i32_18 : i32 to vector<128x1xi32>
    %86 = arith.addi %82, %85 : vector<128x1xi32>
    %c16_i32_19 = arith.constant 16 : i32
    %87 = vector.broadcast %c16_i32_19 : i32 to vector<128x1xi32>
    %88 = arith.cmpi slt, %84, %87 : vector<128x1xi32>
    %cst_20 = arith.constant 0.000000e+00 : f32
    %89 = vector.broadcast %cst_20 : f32 to vector<128x1xf32>
    %90 = arith.select %88, %79, %89 : vector<128x1xi1>, vector<128x1xf32>
    %c16_i32_21 = arith.constant 16 : i32
    %91 = vector.broadcast %c16_i32_21 : i32 to vector<128x1xi32>
    %92 = arith.cmpi slt, %86, %91 : vector<128x1xi32>
    %cst_22 = arith.constant 0.000000e+00 : f32
    %93 = vector.broadcast %cst_22 : f32 to vector<128x1xf32>
    %94 = arith.select %92, %80, %93 : vector<128x1xi1>, vector<128x1xf32>
    %cst_23 = arith.constant 1.000000e+00 : f32
    %95 = vector.broadcast %cst_23 : f32 to vector<128x1xf32>
    %96 = arith.subf %95, %79 : vector<128x1xf32>
    %cst_24 = arith.constant 1.000000e+00 : f32
    %97 = vector.broadcast %cst_24 : f32 to vector<128x1xf32>
    %98 = arith.subf %97, %80 : vector<128x1xf32>
    %c16_i32_25 = arith.constant 16 : i32
    %99 = vector.broadcast %c16_i32_25 : i32 to vector<128x1xi32>
    %100 = arith.muli %82, %99 : vector<128x1xi32>
    %101 = arith.addi %100, %81 : vector<128x1xi32>
    %102 = vector.broadcast %101 : vector<128x1xi32> to vector<128x256xi32>
    %103 = arith.cmpi eq, %7, %102 : vector<128x256xi32>
    %104 = arith.mulf %96, %98 : vector<128x1xf32>
    %cst_26 = arith.constant 0.000000e+00 : f32
    %105 = vector.shape_cast %104 : vector<128x1xf32> to vector<128x1xf32>
    %106 = vector.broadcast %105 : vector<128x1xf32> to vector<128x256xf32>
    %107 = vector.broadcast %cst_26 : f32 to vector<128x256xf32>
    %108 = arith.select %103, %106, %107 : vector<128x256xi1>, vector<128x256xf32>
    %c16_i32_27 = arith.constant 16 : i32
    %109 = vector.broadcast %c16_i32_27 : i32 to vector<128x1xi32>
    %110 = arith.muli %82, %109 : vector<128x1xi32>
    %111 = arith.addi %110, %84 : vector<128x1xi32>
    %112 = vector.broadcast %111 : vector<128x1xi32> to vector<128x256xi32>
    %113 = arith.cmpi eq, %7, %112 : vector<128x256xi32>
    %114 = arith.mulf %90, %98 : vector<128x1xf32>
    %cst_28 = arith.constant 0.000000e+00 : f32
    %115 = vector.shape_cast %114 : vector<128x1xf32> to vector<128x1xf32>
    %116 = vector.broadcast %115 : vector<128x1xf32> to vector<128x256xf32>
    %117 = vector.broadcast %cst_28 : f32 to vector<128x256xf32>
    %118 = arith.select %113, %116, %117 : vector<128x256xi1>, vector<128x256xf32>
    %119 = arith.addf %108, %118 : vector<128x256xf32>
    %c16_i32_29 = arith.constant 16 : i32
    %120 = vector.broadcast %c16_i32_29 : i32 to vector<128x1xi32>
    %121 = arith.muli %86, %120 : vector<128x1xi32>
    %122 = arith.addi %121, %81 : vector<128x1xi32>
    %123 = vector.broadcast %122 : vector<128x1xi32> to vector<128x256xi32>
    %124 = arith.cmpi eq, %7, %123 : vector<128x256xi32>
    %125 = arith.mulf %96, %94 : vector<128x1xf32>
    %cst_30 = arith.constant 0.000000e+00 : f32
    %126 = vector.shape_cast %125 : vector<128x1xf32> to vector<128x1xf32>
    %127 = vector.broadcast %126 : vector<128x1xf32> to vector<128x256xf32>
    %128 = vector.broadcast %cst_30 : f32 to vector<128x256xf32>
    %129 = arith.select %124, %127, %128 : vector<128x256xi1>, vector<128x256xf32>
    %130 = arith.addf %119, %129 : vector<128x256xf32>
    %c16_i32_31 = arith.constant 16 : i32
    %131 = vector.broadcast %c16_i32_31 : i32 to vector<128x1xi32>
    %132 = arith.muli %86, %131 : vector<128x1xi32>
    %133 = arith.addi %132, %84 : vector<128x1xi32>
    %134 = vector.broadcast %133 : vector<128x1xi32> to vector<128x256xi32>
    %135 = arith.cmpi eq, %7, %134 : vector<128x256xi32>
    %136 = arith.mulf %90, %94 : vector<128x1xf32>
    %cst_32 = arith.constant 0.000000e+00 : f32
    %137 = vector.shape_cast %136 : vector<128x1xf32> to vector<128x1xf32>
    %138 = vector.broadcast %137 : vector<128x1xf32> to vector<128x256xf32>
    %139 = vector.broadcast %cst_32 : f32 to vector<128x256xf32>
    %140 = arith.select %135, %138, %139 : vector<128x256xi1>, vector<128x256xf32>
    %141 = arith.addf %130, %140 : vector<128x256xf32>
    %142 = vector.extract_strided_slice %6 {offsets = [0, 2], sizes = [128, 1], strides = [1, 1]} : vector<128x3xf32> to vector<128x1xf32>
    %143 = vector.extract_strided_slice %6 {offsets = [0, 0], sizes = [128, 1], strides = [1, 1]} : vector<128x3xf32> to vector<128x1xf32>
    %144 = math.floor %142 : vector<128x1xf32>
    %145 = math.floor %143 : vector<128x1xf32>
    %146 = arith.subf %142, %144 : vector<128x1xf32>
    %147 = arith.subf %143, %145 : vector<128x1xf32>
    %148 = arith.fptosi %144 : vector<128x1xf32> to vector<128x1xi32>
    %149 = arith.fptosi %145 : vector<128x1xf32> to vector<128x1xi32>
    %c1_i32_33 = arith.constant 1 : i32
    %150 = vector.broadcast %c1_i32_33 : i32 to vector<128x1xi32>
    %151 = arith.addi %148, %150 : vector<128x1xi32>
    %c1_i32_34 = arith.constant 1 : i32
    %152 = vector.broadcast %c1_i32_34 : i32 to vector<128x1xi32>
    %153 = arith.addi %149, %152 : vector<128x1xi32>
    %c16_i32_35 = arith.constant 16 : i32
    %154 = vector.broadcast %c16_i32_35 : i32 to vector<128x1xi32>
    %155 = arith.cmpi slt, %151, %154 : vector<128x1xi32>
    %cst_36 = arith.constant 0.000000e+00 : f32
    %156 = vector.broadcast %cst_36 : f32 to vector<128x1xf32>
    %157 = arith.select %155, %146, %156 : vector<128x1xi1>, vector<128x1xf32>
    %c16_i32_37 = arith.constant 16 : i32
    %158 = vector.broadcast %c16_i32_37 : i32 to vector<128x1xi32>
    %159 = arith.cmpi slt, %153, %158 : vector<128x1xi32>
    %cst_38 = arith.constant 0.000000e+00 : f32
    %160 = vector.broadcast %cst_38 : f32 to vector<128x1xf32>
    %161 = arith.select %159, %147, %160 : vector<128x1xi1>, vector<128x1xf32>
    %cst_39 = arith.constant 1.000000e+00 : f32
    %162 = vector.broadcast %cst_39 : f32 to vector<128x1xf32>
    %163 = arith.subf %162, %146 : vector<128x1xf32>
    %cst_40 = arith.constant 1.000000e+00 : f32
    %164 = vector.broadcast %cst_40 : f32 to vector<128x1xf32>
    %165 = arith.subf %164, %147 : vector<128x1xf32>
    %c16_i32_41 = arith.constant 16 : i32
    %166 = vector.broadcast %c16_i32_41 : i32 to vector<128x1xi32>
    %167 = arith.muli %149, %166 : vector<128x1xi32>
    %168 = arith.addi %167, %148 : vector<128x1xi32>
    %169 = vector.broadcast %168 : vector<128x1xi32> to vector<128x256xi32>
    %170 = arith.cmpi eq, %7, %169 : vector<128x256xi32>
    %171 = arith.mulf %163, %165 : vector<128x1xf32>
    %cst_42 = arith.constant 0.000000e+00 : f32
    %172 = vector.shape_cast %171 : vector<128x1xf32> to vector<128x1xf32>
    %173 = vector.broadcast %172 : vector<128x1xf32> to vector<128x256xf32>
    %174 = vector.broadcast %cst_42 : f32 to vector<128x256xf32>
    %175 = arith.select %170, %173, %174 : vector<128x256xi1>, vector<128x256xf32>
    %c16_i32_43 = arith.constant 16 : i32
    %176 = vector.broadcast %c16_i32_43 : i32 to vector<128x1xi32>
    %177 = arith.muli %149, %176 : vector<128x1xi32>
    %178 = arith.addi %177, %151 : vector<128x1xi32>
    %179 = vector.broadcast %178 : vector<128x1xi32> to vector<128x256xi32>
    %180 = arith.cmpi eq, %7, %179 : vector<128x256xi32>
    %181 = arith.mulf %157, %165 : vector<128x1xf32>
    %cst_44 = arith.constant 0.000000e+00 : f32
    %182 = vector.shape_cast %181 : vector<128x1xf32> to vector<128x1xf32>
    %183 = vector.broadcast %182 : vector<128x1xf32> to vector<128x256xf32>
    %184 = vector.broadcast %cst_44 : f32 to vector<128x256xf32>
    %185 = arith.select %180, %183, %184 : vector<128x256xi1>, vector<128x256xf32>
    %186 = arith.addf %175, %185 : vector<128x256xf32>
    %c16_i32_45 = arith.constant 16 : i32
    %187 = vector.broadcast %c16_i32_45 : i32 to vector<128x1xi32>
    %188 = arith.muli %153, %187 : vector<128x1xi32>
    %189 = arith.addi %188, %148 : vector<128x1xi32>
    %190 = vector.broadcast %189 : vector<128x1xi32> to vector<128x256xi32>
    %191 = arith.cmpi eq, %7, %190 : vector<128x256xi32>
    %192 = arith.mulf %163, %161 : vector<128x1xf32>
    %cst_46 = arith.constant 0.000000e+00 : f32
    %193 = vector.shape_cast %192 : vector<128x1xf32> to vector<128x1xf32>
    %194 = vector.broadcast %193 : vector<128x1xf32> to vector<128x256xf32>
    %195 = vector.broadcast %cst_46 : f32 to vector<128x256xf32>
    %196 = arith.select %191, %194, %195 : vector<128x256xi1>, vector<128x256xf32>
    %197 = arith.addf %186, %196 : vector<128x256xf32>
    %c16_i32_47 = arith.constant 16 : i32
    %198 = vector.broadcast %c16_i32_47 : i32 to vector<128x1xi32>
    %199 = arith.muli %153, %198 : vector<128x1xi32>
    %200 = arith.addi %199, %151 : vector<128x1xi32>
    %201 = vector.broadcast %200 : vector<128x1xi32> to vector<128x256xi32>
    %202 = arith.cmpi eq, %7, %201 : vector<128x256xi32>
    %203 = arith.mulf %157, %161 : vector<128x1xf32>
    %cst_48 = arith.constant 0.000000e+00 : f32
    %204 = vector.shape_cast %203 : vector<128x1xf32> to vector<128x1xf32>
    %205 = vector.broadcast %204 : vector<128x1xf32> to vector<128x256xf32>
    %206 = vector.broadcast %cst_48 : f32 to vector<128x256xf32>
    %207 = arith.select %202, %205, %206 : vector<128x256xi1>, vector<128x256xf32>
    %208 = arith.addf %197, %207 : vector<128x256xf32>
    %209 = tpu.concatenate %74, %141, %208 in 1 : vector<128x256xf32>, vector<128x256xf32>, vector<128x256xf32> -> vector<128x768xf32>
    %c0_49 = arith.constant 0 : index
    %c0_50 = arith.constant 0 : index
    %210 = vector.load %arg2[%c0_49, %c0_50] : memref<768x96xf32, #tpu.memory_space<vmem>>, vector<768x96xf32>
    %cst_51 = arith.constant dense<0.000000e+00> : vector<128x96xf32>
    %211 = tpu.matmul %209, %210, %cst_51 {dimension_numbers = #tpu.dot_dimension_numbers<[1], [0], [0], [1], [0, 0, 1, 1], [], []>} : vector<128x768xf32>, vector<768x96xf32>, vector<128x96xf32> -> vector<128x96xf32>
    %212 = vector.extract_strided_slice %211 {offsets = [0, 0], sizes = [128, 32], strides = [1, 1]} : vector<128x96xf32> to vector<128x32xf32>
    %213 = vector.extract_strided_slice %211 {offsets = [0, 32], sizes = [128, 32], strides = [1, 1]} : vector<128x96xf32> to vector<128x32xf32>
    %214 = arith.mulf %212, %213 : vector<128x32xf32>
    %215 = vector.extract_strided_slice %211 {offsets = [0, 64], sizes = [128, 32], strides = [1, 1]} : vector<128x96xf32> to vector<128x32xf32>
    %216 = arith.mulf %214, %215 : vector<128x32xf32>
    %c0_52 = arith.constant 0 : index
    %c0_53 = arith.constant 0 : index
    %217 = vector.load %arg3[%c0_52, %c0_53] : memref<128x32xf32, #tpu.memory_space<vmem>>, vector<128x32xf32>
    tpu.vector_store %arg3[%c0_52, %c0_53], %216 {strides = array<i32>} : memref<128x32xf32, #tpu.memory_space<vmem>>, vector<128x32xf32>,
    return
  }
  func.func @transform_0(%arg0: i32) -> (i32, i32) {
    %c0_i32 = arith.constant 0 : i32
    %c0_i32_0 = arith.constant 0 : i32
    return %arg0, %c0_i32 : i32, i32
  }
  func.func @transform_1(%arg0: i32) -> (i32, i32) {
    %c0_i32 = arith.constant 0 : i32
    %c0_i32_0 = arith.constant 0 : i32
    %c0_i32_1 = arith.constant 0 : i32
    return %c0_i32, %c0_i32_0 : i32, i32
  }
  func.func @transform_2(%arg0: i32) -> (i32, i32) {
    %c0_i32 = arith.constant 0 : i32
    %c0_i32_0 = arith.constant 0 : i32
    return %arg0, %c0_i32 : i32, i32
  }
}

</mosaic_0001>

<bundles_post_ra>
// kernel: tpu_custom_call.1
= control target key start
LH: loop header
LB: loop body
LE: loop exit
PB: predicated region body
PF: predicated region fallthrough
CT: control target
= control target key end

     0   :  { %s4382_s9 = smov 0   ;;  %s9292_s0 = inlined_call_operand.vmem [shape: f32[256,3], index: 0, kind: input, shape index: {}]   ;;  %s9293_s1 = inlined_call_operand.vmem [shape: f32[768,96], index: 1, kind: input, shape index: {}]   ;;  %s9294_s2 = inlined_call_operand.vmem [shape: f32[256,32], index: 2, kind: output, shape index: {}]  }
   0x1 LB: > { %s4197_s10 = sadd.s32 4294967295, %s4356_s9   ;;  %p4201_p0 = scmp.ge.s32.totalorder %s4356_s9, 1  ;;  %s4356_s9 = sphi %s4382_s9, %s12_s9  }
   0x2   : > { %p113_p1 = scmp.lt.s32.totalorder %s4356_s9, 3 }
   0x4   : > { %p114_p2 = pnand %p4201_p0, %p113_p1 }
   0x6   : > { %117 = sbr.rel (%p114_p2) target bundleno = 2577 (0xa11), region = 28 }
   0xb   : > { %s4202_s11 = sshll.u32 %s4197_s10, 4  ;;  %s4358_s16 = smov 1  }
   0xc   : > { %p136_p3 = scmp.lt.s32.totalorder %s4202_s11, 31  ;;  %s4359_s17 = smov 127  }
   0xd   : > { %s4363_s18 = smov 126   ;;  %s4364_s19 = smov 2  }
   0xe   : > { %s11069_s11 = smov (!%p136_p3, %s4202_s11), 31  ;;  %s4365_s10 = smov 96  }
   0xf   : > { %s4203_s12 = sshll.u32 %s11069_s11, 3  ;;  %s4366_s13 = smov 64  }
  0x10   : > { %s4398_s15 = scalar_lea.vmem %s9292_s0, %s4203_s12 }
  0x11   : > { %v149_v0 = vld [vmem:[%s4398_s15 + $0x10] sm:$0xff]  ;;  %v147_v1 = vld [vmem:[%s4398_s15] sm:$0xff]  ;;  %v150_v2 = vld [vmem:[%s4398_s15 + $0x18] sm:$0xff] }
  0x12   : > { %v165_v3 = vmax.f32 %v149_v0, 0.0  ;;  %v163_v4 = vmax.f32 %v147_v1, 0.0  ;;  %v166_v5 = vmax.f32 %v150_v2, 0.0  ;;  %v148_v6 = vld [vmem:[%s4398_s15 + $0x8] sm:$0xff]  ;;  %v153_v8 = vld [vmem:[%s4398_s15 + $0x30] sm:$0xff]  ;;  %v154_v9 = vld [vmem:[%s4398_s15 + $0x38] sm:$0xff] }
  0x13   : > { %v164_v7 = vmax.f32 %v148_v6, 0.0  ;;  %v151_v10 = vld [vmem:[%s4398_s15 + $0x20] sm:$0xff]  ;;  %v169_v17 = vmax.f32 %v153_v8, 0.0  ;;  %v170_v18 = vmax.f32 %v154_v9, 0.0  ;;  %v156_v31 = vld [vmem:[%s4398_s15 + $0x48] sm:$0xff]  ;;  %v157_v33 = vld [vmem:[%s4398_s15 + $0x50] sm:$0xff] }
  0x14   : > { %v181_v11 = vmin.f32 %v165_v3, 0.999999  ;;  %v179_v12 = vmin.f32 %v163_v4, 0.999999  ;;  %v182_v13 = vmin.f32 %v166_v5, 0.999999 }
  0x15   : > { %v180_v14 = vmin.f32 %v164_v7, 0.999999  ;;  %v167_v19 = vmax.f32 %v151_v10, 0.0  ;;  %v185_v27 = vmin.f32 %v169_v17, 0.999999  ;;  %v152_v32 = vld [vmem:[%s4398_s15 + $0x28] sm:$0xff] }
  0x16   : > { %v4407_v15 = vmul.f32 16.0, %v181_v11  ;;  %v4409_v16 = vmul.f32 16.0, %v179_v12  ;;  %v4413_v22 = vmul.f32 16.0, %v182_v13  ;;  %v186_v28 = vmin.f32 %v170_v18, 0.999999  ;;  %v155_v45 = vld [vmem:[%s4398_s15 + $0x40] sm:$0xff] }
  0x17   : > { %v4415_v23 = vmul.f32 16.0, %v180_v14  ;;  %v183_v26 = vmin.f32 %v167_v19, 0.999999  ;;  %v4436_v35 = vmul.f32 16.0, %v185_v27  ;;  %v172_v37 = vmax.f32 %v156_v31, 0.0  ;;  %v159_v52 = vld [vmem:[%s4398_s15 + $0x60] sm:$0xff] }
  0x18   : > { %v216_v20 = vfloor.f32 %v4407_v15  ;;  %v214_v21 = vfloor.f32 %v4409_v16  ;;  %v217_v29 = vfloor.f32 %v4413_v22  ;;  %v4438_v36 = vmul.f32 16.0, %v186_v28  ;;  %v160_v54 = vld [vmem:[%s4398_s15 + $0x68] sm:$0xff]  ;;  %v158_v0 = vld [vmem:[%s4398_s15 + $0x58] sm:$0xff]  ;;  %v161_v18 = vld [vmem:[%s4398_s15 + $0x70] sm:$0xff] }
  0x19   : > { %v215_v30 = vfloor.f32 %v4415_v23  ;;  %v4434_v34 = vmul.f32 16.0, %v183_v26  ;;  %v168_v38 = vmax.f32 %v152_v32, 0.0  ;;  %v173_v42 = vmax.f32 %v157_v33, 0.0  ;;  %v162_v6 = vld [vmem:[%s4398_s15 + $0x78] sm:$0xff] }
  0x1a   : > { %v4419_v24 = vcvt.f32.s32 %v216_v20  ;;  %v4423_v25 = vcvt.f32.s32 %v214_v21  ;;  %v4442_v39 = vcvt.f32.s32 %v217_v29  ;;  %v220_v46 = vfloor.f32 %v4436_v35 }
  0x1b   : > { %v4446_v40 = vcvt.f32.s32 %v215_v30  ;;  %v218_v41 = vfloor.f32 %v4434_v34  ;;  %v184_v43 = vmin.f32 %v168_v38, 0.999999  ;;  %v221_v47 = vfloor.f32 %v4438_v36 }
  0x1c   : > { %9908 = vst [vmem:[#allocation2_spill] sm:$0xff] %v4419_v24  ;;  %346 = vrot.lane.b32.xlu1 %v4419_v24, %s4358_s16  ;;  %342 = vrot.lane.b32.xlu0 %v4423_v25, %s4358_s16  ;;  %v188_v49 = vmin.f32 %v172_v37, 0.999999  ;;  %v189_v50 = vmin.f32 %v173_v42, 0.999999  ;;  %v171_v51 = vmax.f32 %v155_v45, 0.0  ;;  %v4469_v56 = vcvt.f32.s32 %v220_v46 }
  0x1d   : > { %9909 = vst [vmem:[#allocation3_spill] sm:$0xff] %v4423_v25  ;;  %v4451_v44 = vcvt.f32.s32 %v218_v41  ;;  %v4456_v48 = vmul.f32 16.0, %v184_v43  ;;  %v4473_v57 = vcvt.f32.s32 %v221_v47  ;;  %v175_v60 = vmax.f32 %v159_v52, 0.0 }
  0x1e   : > { %9910 = vst [vmem:[#allocation4_spill] sm:$0xff] %v4442_v39  ;;  %v187_v55 = vmin.f32 %v171_v51, 0.999999  ;;  %v4475_v58 = vmul.f32 16.0, %v188_v49  ;;  %v4477_v59 = vmul.f32 16.0, %v189_v50  ;;  %v176_v61 = vmax.f32 %v160_v54, 0.0 }
  0x1f   : > { %9911 = vst [vmem:[#allocation5_spill] sm:$0xff] %v4446_v40  ;;  %350 = vrot.lane.b32.xlu2 %v4451_v44, %s4358_s16  ;;  %v219_v53 = vfloor.f32 %v4456_v48  ;;  %v174_v1 = vmax.f32 %v158_v0, 0.0  ;;  %v191_v4 = vmin.f32 %v175_v60, 0.999999  ;;  %v178_v9 = vmax.f32 %v162_v6, 0.0 }
  0x20   : > { %9912 = vst [vmem:[#allocation6_spill] sm:$0xff] %v4451_v44  ;;  %v4483_v63 = vmul.f32 16.0, %v187_v55  ;;  %v223_v2 = vfloor.f32 %v4475_v58  ;;  %v224_v3 = vfloor.f32 %v4477_v59  ;;  %v192_v5 = vmin.f32 %v176_v61, 0.999999 }
  0x21   : > { %9913 = vst [vmem:[#allocation7_spill] sm:$0xff] %v4469_v56  ;;  %v4481_v62 = vcvt.f32.s32 %v219_v53  ;;  %v190_v8 = vmin.f32 %v174_v1, 0.999999  ;;  %v4502_v12 = vmul.f32 16.0, %v191_v4  ;;  %v177_v19 = vmax.f32 %v161_v18, 0.0 }
  0x22   : > { %9914 = vst [vmem:[#allocation8_spill] sm:$0xff] %v4473_v57  ;;  %v222_v7 = vfloor.f32 %v4483_v63  ;;  %v4498_v10 = vcvt.f32.s32 %v223_v2  ;;  %v4500_v11 = vcvt.f32.s32 %v224_v3  ;;  %v208_v13 = vmul.f32 16.0, %v192_v5 }
  0x23   : > { %9915 = vst [vmem:[#allocation9_spill] sm:$0xff] %v4481_v62  ;;  %v206_v17 = vmul.f32 16.0, %v190_v8  ;;  %v226_v26 = vfloor.f32 %v4502_v12  ;;  %v194_v28 = vmin.f32 %v178_v9, 0.999999  ;;  %v193_v32 = vmin.f32 %v177_v19, 0.999999 }
  0x24   : > { %348 = vrot.lane.b32.xlu1 %v4442_v39, %s4358_s16  ;;  %344 = vrot.lane.b32.xlu0 %v4446_v40, %s4358_s16  ;;  %9916 = vst [vmem:[#allocation10_spill] sm:$0xff] %v4498_v10  ;;  %v4504_v14 = vcvt.f32.s32 %v222_v7  ;;  %v227_v27 = vfloor.f32 %v208_v13  ;;  %v4523_v45 = vsub.f32 %v4415_v23, %v215_v30  ;;  %v4541_v23 = vsub.f32 %v4409_v16, %v214_v21 }
  0x25   : > { %9917 = vst [vmem:[#allocation11_spill] sm:$0xff] %v4500_v11  ;;  %v225_v31 = vfloor.f32 %v206_v17  ;;  %v4514_v33 = vcvt.f32.s32 %v226_v26  ;;  %v210_v38 = vmul.f32 16.0, %v194_v28  ;;  %v209_v43 = vmul.f32 16.0, %v193_v32 }
  0x26   : > { %9918 = vst [vmem:[#allocation12_spill] sm:$0xff] %v4504_v14  ;;  %v4516_v37 = vcvt.f32.s32 %v227_v27  ;;  %v4532_v51 = vsub.f32 1.0, %v4523_v45  ;;  %v4546_v30 = vsub.f32 %v4434_v34, %v218_v41  ;;  %v4555_v55 = vsub.f32 %v4407_v15, %v216_v20 }
  0x27   : > { %352 = vrot.lane.b32.xlu2 %v4481_v62, %s4358_s16  ;;  %9919 = vst [vmem:[#allocation13_spill] sm:$0xff] %v4514_v33  ;;  %v4518_v42 = vcvt.f32.s32 %v225_v31  ;;  %v229_v49 = vfloor.f32 %v210_v38  ;;  %v228_v50 = vfloor.f32 %v209_v43  ;;  %v4560_v16 = vsub.f32 1.0, %v4541_v23 }
  0x28   : > { %9920 = vst [vmem:[#allocation14_spill] sm:$0xff] %v4516_v37  ;;  %v4563_v21 = vsub.f32 1.0, %v4546_v30  ;;  %v4566_v34 = vsub.f32 1.0, %v4555_v55  ;;  %v4571_v41 = vsub.f32 %v4413_v22, %v217_v29  ;;  %v4576_v15 = vsub.f32 %v4438_v36, %v221_v47 }
  0x29   : > { %9921 = vst [vmem:[#allocation15_spill] sm:$0xff] %v4518_v42  ;;  %v4534_v52 = vcvt.f32.s32 %v229_v49  ;;  %v4536_v54 = vcvt.f32.s32 %v228_v50  ;;  %v4585_v20 = vsub.f32 %v4456_v48, %v219_v53  ;;  %v4601_v47 = vsub.f32 %v4436_v35, %v220_v46 }
  0x2a   : > { %9922 = vst [vmem:[#allocation16_spill] sm:$0xff] %v4532_v51  ;;  %v4590_v22 = vsub.f32 1.0, %v4571_v41  ;;  %v4593_v29 = vsub.f32 1.0, %v4576_v15  ;;  %v4604_v48 = vsub.f32 %v4477_v59, %v224_v3  ;;  %v4611_v53 = vsub.f32 %v4483_v63, %v222_v7 }
  0x2b   : > { %9923 = vst [vmem:[#allocation17_spill] sm:$0xff] %v4534_v52  ;;  %v4596_v36 = vsub.f32 1.0, %v4585_v20  ;;  %v4616_v60 = vsub.f32 1.0, %v4601_v47  ;;  %v4627_v59 = vsub.f32 %v4475_v58, %v223_v2  ;;  %v4629_v61 = vsub.f32 %v208_v13, %v227_v27 }
  0x2c   : > { %354 = vrot.lane.b32.xlu0 %v4469_v56, %s4358_s16  ;;  %356 = vrot.lane.b32.xlu1 %v4473_v57, %s4358_s16  ;;  %9924 = vst [vmem:[#allocation18_spill] sm:$0xff] %v4536_v54  ;;  %v4619_v35 = vsub.f32 1.0, %v4604_v48  ;;  %v4622_v46 = vsub.f32 1.0, %v4611_v53  ;;  %v4635_v63 = vsub.f32 %v206_v17, %v225_v31  ;;  %v4649_v2 = vsub.f32 %v4502_v12, %v226_v26 }
  0x2d   : > { %9925 = vst [vmem:[#allocation19_spill] sm:$0xff] %v4541_v23  ;;  %v4640_v0 = vsub.f32 1.0, %v4627_v59  ;;  %v4643_v1 = vsub.f32 1.0, %v4629_v61  ;;  %v4655_v3 = vsub.f32 %v209_v43, %v228_v50  ;;  %v4665_v6 = vsub.f32 %v210_v38, %v229_v49 }
  0x2e   : > { %9926 = vst [vmem:[#allocation20_spill] sm:$0xff] %v4560_v16  ;;  %v4646_v58 = vsub.f32 1.0, %v4635_v63  ;;  %v4660_v4 = vsub.f32 1.0, %v4649_v2  ;;  %v9295_v8 = vmov 1   ;;  %v4682_v12 = vmul.u32 16, %v4419_v24 }
  0x2f   : > { %358 = vrot.lane.b32.xlu2 %v4504_v14, %s4358_s16  ;;  %9927 = vst [vmem:[#allocation21_spill] sm:$0xff] %v4563_v21  ;;  %v4663_v5 = vsub.f32 1.0, %v4655_v3  ;;  %v4672_v7 = vsub.f32 1.0, %v4665_v6  ;;  %4289 = vset.pattern.permute.xlu1 %v9295_v8  ;;  %v4685_v13 = vmul.u32 16, %v4423_v25  ;;  %v4702_v27 = vmul.u32 16, %v4442_v39 }
  0x30   : > { %9928 = vst [vmem:[#allocation22_spill] sm:$0xff] %v4566_v34  ;;  %4291 = vset.pattern.permute.xlu0 %v9295_v8  ;;  %4290 = vset.pattern.permute.xlu2 %v9295_v8  ;;  %v4705_v28 = vmul.u32 16, %v4446_v40  ;;  %v4722_v50 = vmul.u32 16, %v4451_v44  ;;  %v4727_v8 = vmul.u32 16, %v4481_v62  ;;  %v4756_v23 = vmul.u32 16, %v4504_v14 }
  0x31   : > { %9929 = vst [vmem:[#allocation23_spill] sm:$0xff] %v4585_v20 }
  0x32   : > { %9930 = vst [vmem:[#allocation24_spill] sm:$0xff] %v4590_v22 }
  0x33   : > { %9931 = vst [vmem:[#allocation25_spill] sm:$0xff] %v4593_v29 }
  0x34   : > { %360 = vrot.lane.b32.xlu0 %v4498_v10, %s4358_s16  ;;  %362 = vrot.lane.b32.xlu1 %v4500_v11, %s4358_s16  ;;  %9932 = vst [vmem:[#allocation26_spill] sm:$0xff] %v4596_v36 }
  0x35   : > { %9933 = vst [vmem:[#allocation27_spill] sm:$0xff] %v4604_v48 }
  0x36   : > { %9934 = vst [vmem:[#allocation28_spill] sm:$0xff] %v4611_v53  ;;  %v4781_v53 = vmul.u32 16, %v4498_v10 }
  0x37   : > { %364 = vrot.lane.b32.xlu2 %v4518_v42, %s4358_s16  ;;  %9935 = vst [vmem:[#allocation29_spill] sm:$0xff] %v4616_v60 }
  0x38   : > { %9936 = vst [vmem:[#allocation30_spill] sm:$0xff] %v4619_v35 }
  0x39   : > { %9937 = vst [vmem:[#allocation31_spill] sm:$0xff] %v4622_v46 }
  0x3a   : > { %9938 = vst [vmem:[#allocation32_spill] sm:$0xff] %v4629_v61 }
  0x3b   : > { %9939 = vst [vmem:[#allocation33_spill] sm:$0xff] %v4635_v63 }
  0x3c   : > { %366 = vrot.lane.b32.xlu0 %v4514_v33, %s4358_s16  ;;  %368 = vrot.lane.b32.xlu1 %v4516_v37, %s4358_s16  ;;  %9940 = vst [vmem:[#allocation34_spill] sm:$0xff] %v4640_v0 }
  0x3d   : > { %9941 = vst [vmem:[#allocation35_spill] sm:$0xff] %v4643_v1 }
  0x3e   : > { %9942 = vst [vmem:[#allocation36_spill] sm:$0xff] %v4646_v58 }
  0x3f   : > { %370 = vrot.lane.b32.xlu2 %v4536_v54, %s4358_s16  ;;  %9943 = vst [vmem:[#allocation37_spill] sm:$0xff] %v4655_v3  ;;  %v4760_v3 = vmul.u32 16, %v4500_v11 }
  0x40   : > { %9944 = vst [vmem:[#allocation38_spill] sm:$0xff] %v4660_v4 }
  0x41   : > { %9945 = vst [vmem:[#allocation39_spill] sm:$0xff] %v4663_v5 }
  0x42   : > { %9946 = vst [vmem:[#allocation40_spill] sm:$0xff] %v4672_v7 }
  0x43   : > { %9948 = vst [vmem:[#allocation42_spill] sm:$0xff] %v4682_v12 }
  0x44   : > { %372 = vrot.lane.b32.xlu0 %v4534_v52, %s4358_s16  ;;  %488 = vrot.lane.b32.xlu1 %v4532_v51, %s4359_s17  ;;  %9949 = vst [vmem:[#allocation43_spill] sm:$0xff] %v4685_v13 }
  0x45   : > { %9954 = vst [vmem:[#allocation48_spill] sm:$0xff] %v4702_v27 }
  0x46   : > { %9955 = vst [vmem:[#allocation49_spill] sm:$0xff] %v4705_v28 }
  0x47   : > { %490 = vrot.lane.b32.xlu2 %v4566_v34, %s4359_s17  ;;  %9960 = vst [vmem:[#allocation54_spill] sm:$0xff] %v4722_v50  ;;  %v4751_v34 = vmul.u32 16, %v4469_v56 }
  0x48   : > { %9961 = vst [vmem:[#allocation55_spill] sm:$0xff] %v4727_v8 }
  0x49   : > { %9968 = vst [vmem:[#allocation62_spill] sm:$0xff] %v4751_v34 }
  0x4a   : > { %9969 = vst [vmem:[#allocation63_spill] sm:$0xff] %v4756_v23 }
  0x4b   : > { %9970 = vst [vmem:[#allocation64_spill] sm:$0xff] %v4760_v3 }
  0x4c   : > { %486 = vrot.lane.b32.xlu0 %v4560_v16, %s4359_s17  ;;  %494 = vrot.lane.b32.xlu1 %v4563_v21, %s4359_s17  ;;  %9976 = vst [vmem:[#allocation70_spill] sm:$0xff] %v4781_v53 }
  0x4f   : > { %496 = vrot.lane.b32.xlu2 %v4596_v36, %s4359_s17 }
  0x54   : > { %492 = vrot.lane.b32.xlu0 %v4590_v22, %s4359_s17  ;;  %500 = vrot.lane.b32.xlu1 %v4593_v29, %s4359_s17 }
  0x57   : > { %502 = vrot.lane.b32.xlu2 %v4622_v46, %s4359_s17 }
  0x5c   : > { %498 = vrot.lane.b32.xlu0 %v4616_v60, %s4359_s17  ;;  %506 = vrot.lane.b32.xlu1 %v4619_v35, %s4359_s17 }
  0x5f   : > { %508 = vrot.lane.b32.xlu2 %v4646_v58, %s4359_s17 }
  0x64   : > { %504 = vrot.lane.b32.xlu0 %v4640_v0, %s4359_s17  ;;  %512 = vrot.lane.b32.xlu1 %v4643_v1, %s4359_s17 }
  0x67   : > { %514 = vrot.lane.b32.xlu2 %v4663_v5, %s4359_s17 }
  0x6c   : > { %510 = vrot.lane.b32.xlu0 %v4660_v4, %s4359_s17 }
  0x74   : > { %516 = vrot.lane.b32.xlu0 %v4672_v7, %s4359_s17 }
  0x79   : > { %v4679_v9 = vpop.permute.xlu2 %350 }
  0x7a   : > { %9947 = vst [vmem:[#allocation41_spill] sm:$0xff] %v4679_v9 }
  0x81   : > { %v4707_v31 = vpop.permute.xlu2 %352 }
  0x82   : > { %9956 = vst [vmem:[#allocation50_spill] sm:$0xff] %v4707_v31  ;;  %v4738_v1 = vadd.s32 %v4707_v31, %v4727_v8 }
  0x84   : > { %9964 = vst [vmem:[#allocation58_spill] sm:$0xff] %v4738_v1 }
  0x89   : > { %v4740_v35 = vpop.permute.xlu2 %358 }
  0x8a   : > { %9965 = vst [vmem:[#allocation59_spill] sm:$0xff] %v4740_v35  ;;  %v4768_v63 = vadd.s32 %v4740_v35, %v4756_v23  ;;  %v4786_v35 = vmul.u32 16, %v4518_v42 }
  0x8c   : > { %9972 = vst [vmem:[#allocation66_spill] sm:$0xff] %v4768_v63 }
  0x8d   : > { %9977 = vst [vmem:[#allocation71_spill] sm:$0xff] %v4786_v35 }
  0x8e   : > { %v4687_v17 = vpop.permute.xlu1 %346  ;;  %v4689_v18 = vpop.permute.xlu0 %342 }
  0x8f   : > { %9950 = vst [vmem:[#allocation44_spill] sm:$0xff] %v4687_v17  ;;  %v4693_v19 = vadd.s32 %v4687_v17, %v4682_v12  ;;  %v4697_v26 = vadd.s32 %v4689_v18, %v4685_v13 }
  0x90   : > { %9951 = vst [vmem:[#allocation45_spill] sm:$0xff] %v4689_v18  ;;  %v4790_v18 = vmul.u32 16, %v4516_v37 }
  0x91   : > { %9952 = vst [vmem:[#allocation46_spill] sm:$0xff] %v4693_v19  ;;  %391 = vperm.xlu1 %4289, %v4697_v26   ;;  %397 = vperm.xlu0 %4291, %v4693_v19   ;;  %v4730_v19 = vmul.u32 16, %v4473_v57 }
  0x92   : > { %9953 = vst [vmem:[#allocation47_spill] sm:$0xff] %v4697_v26  ;;  %v4734_v26 = vadd.s32 %v4679_v9, %v4722_v50  ;;  %v4814_v9 = vmul.u32 16, %v4536_v54 }
  0x93   : > { %9962 = vst [vmem:[#allocation56_spill] sm:$0xff] %v4730_v19 }
  0x94   : > { %9963 = vst [vmem:[#allocation57_spill] sm:$0xff] %v4734_v26 }
  0x95   : > { %9978 = vst [vmem:[#allocation72_spill] sm:$0xff] %v4790_v18 }
  0x96   : > { %v4709_v32 = vpop.permute.xlu1 %348  ;;  %v4711_v38 = vpop.permute.xlu0 %344  ;;  %9985 = vst [vmem:[#allocation79_spill] sm:$0xff] %v4814_v9 }
  0x97   : > { %9957 = vst [vmem:[#allocation51_spill] sm:$0xff] %v4709_v32  ;;  %v4715_v43 = vadd.s32 %v4709_v32, %v4702_v27  ;;  %v4719_v49 = vadd.s32 %v4711_v38, %v4705_v28 }
  0x99   : > { %9958 = vst [vmem:[#allocation52_spill] sm:$0xff] %v4715_v43  ;;  %394 = vperm.xlu2 %4290, %v4719_v49   ;;  %400 = vperm.xlu1 %4289, %v4715_v43  }
  0x9a   : > { %9959 = vst [vmem:[#allocation53_spill] sm:$0xff] %v4719_v49 }
  0x9e   : > { %v4742_v29 = vpop.permute.xlu0 %354  ;;  %v4744_v49 = vpop.permute.xlu1 %356 }
  0x9f   : > { %9966 = vst [vmem:[#allocation60_spill] sm:$0xff] %v4744_v49  ;;  %v4748_v43 = vadd.s32 %v4744_v49, %v4730_v19  ;;  %v4764_v31 = vadd.s32 %v4742_v29, %v4751_v34 }
  0xa1   : > { %9967 = vst [vmem:[#allocation61_spill] sm:$0xff] %v4748_v43  ;;  %403 = vperm.xlu2 %4290, %v4734_v26   ;;  %406 = vperm.xlu1 %4289, %v4738_v1  }
  0xa2   : > { %412 = vperm.xlu0 %4291, %v4748_v43   ;;  %9971 = vst [vmem:[#allocation65_spill] sm:$0xff] %v4764_v31  ;;  %v4778_v43 = vpop.permute.xlu2 %364 }
  0xa3   : > { %9975 = vst [vmem:[#allocation69_spill] sm:$0xff] %v4778_v43  ;;  %v4798_v49 = vadd.s32 %v4778_v43, %v4786_v35 }
  0xa5   : > { %9980 = vst [vmem:[#allocation74_spill] sm:$0xff] %v4798_v49 }
  0xa6   : > { %v4770_v32 = vpop.permute.xlu0 %360  ;;  %v4772_v26 = vpop.permute.xlu1 %362 }
  0xa7   : > { %9973 = vst [vmem:[#allocation67_spill] sm:$0xff] %v4772_v26  ;;  %v4776_v1 = vadd.s32 %v4772_v26, %v4760_v3  ;;  %v4794_v26 = vadd.s32 %v4770_v32, %v4781_v53 }
  0xa9   : > { %9974 = vst [vmem:[#allocation68_spill] sm:$0xff] %v4776_v1  ;;  %409 = vperm.xlu2 %4290, %v4764_v31   ;;  %415 = vperm.xlu1 %4289, %v4768_v63  }
  0xaa   : > { %421 = vperm.xlu0 %4291, %v4776_v1   ;;  %9979 = vst [vmem:[#allocation73_spill] sm:$0xff] %v4794_v26  ;;  %v4809_v1 = vmul.u32 16, %v4514_v33  ;;  %v4816_v43 = vpop.permute.xlu2 %370 }
  0xab   : > { %9986 = vst [vmem:[#allocation80_spill] sm:$0xff] %v4816_v43 }
  0xac   : > { %9984 = vst [vmem:[#allocation78_spill] sm:$0xff] %v4809_v1 }
  0xae   : > { %v4800_v20 = vpop.permute.xlu0 %366  ;;  %v4802_v31 = vpop.permute.xlu1 %368 }
  0xaf   : > { %9981 = vst [vmem:[#allocation75_spill] sm:$0xff] %v4800_v20  ;;  %v4806_v63 = vadd.s32 %v4802_v31, %v4790_v18  ;;  %v4821_v61 = vadd.s32 %v4800_v20, %v4809_v1  ;;  %v4852_v20 = vadd.s32 1, %v4442_v39 }
  0xb0   : > { %9982 = vst [vmem:[#allocation76_spill] sm:$0xff] %v4802_v31  ;;  %v4825_v31 = vadd.s32 %v4816_v43, %v4814_v9 }
  0xb1   : > { %9983 = vst [vmem:[#allocation77_spill] sm:$0xff] %v4806_v63  ;;  %418 = vperm.xlu2 %4290, %v4794_v26   ;;  %424 = vperm.xlu1 %4289, %v4798_v49   ;;  %v4830_v26 = vadd.s32 1, %v4423_v25  ;;  %v4833_v49 = vmul.u32 16, %v4534_v52  ;;  %vm281_vm1 = vcmp.lt.s32.totalorder %v4852_v20, 16 }
  0xb2   : > { %430 = vperm.xlu0 %4291, %v4806_v63   ;;  %9987 = vst [vmem:[#allocation81_spill] sm:$0xff] %v4821_v61  ;;  %v4839_v63 = vpop.permute.xlu2 %490 }
  0xb3   : > { %9988 = vst [vmem:[#allocation82_spill] sm:$0xff] %v4825_v31 }
  0xb4   : > { %9990 = vst [vmem:[#allocation84_spill] sm:$0xff] %v4830_v26 }
  0xb5   : > { %9991 = vst [vmem:[#allocation85_spill] sm:$0xff] %v4833_v49 }
  0xb6   : > { %v4827_v17 = vpop.permute.xlu0 %372  ;;  %9995 = vst [vmem:[#allocation89_spill] sm:$0xff] %v4852_v20 }
  0xb7   : > { %9989 = vst [vmem:[#allocation83_spill] sm:$0xff] %v4827_v17  ;;  %v4843_v43 = vadd.s32 %v4827_v17, %v4833_v49 }
  0xb9   : > { %427 = vperm.xlu2 %4290, %v4821_v61   ;;  %433 = vperm.xlu1 %4289, %v4825_v31   ;;  %9992 = vst [vmem:[#allocation86_spill] sm:$0xff] %v4843_v43  ;;  %v9345_v31 = vmov 0   ;;  %v4856_v61 = vpop.permute.xlu1 %488 }
  0xba   : > { %662 = vrot.lane.b32.xlu0 %v4830_v26, %s4358_s16  ;;  %v4861_v26 = vpop.permute.xlu2 %496 }
  0xbb   : > { %9996 = vst [vmem:[#allocation90_spill] sm:$0xff] %v4861_v26 }
  0xbe   : > { %v4845_v48 = vpop.permute.xlu0 %486 }
  0xbf   : > { %9993 = vst [vmem:[#allocation87_spill] sm:$0xff] %v4845_v48  ;;  %v4849_v25 = vmul.f32 %v4845_v48, %v4560_v16  ;;  %v4865_v48 = vmul.f32 %v4856_v61, %v4532_v51  ;;  %v10000_v16 = vmov 0   ;;  %v4885_v51 = vmul.f32 %v4861_v26, %v4596_v36 }
  0xc1   : > { %9994 = vst [vmem:[#allocation88_spill] sm:$0xff] %v4849_v25  ;;  %436 = vperm.xlu2 %4290, %v4843_v43   ;;  %4292 = vset.pattern.permute.xlu1 %v9345_v31  ;;  %v4874_v31 = vadd.s32 1, %v4469_v56 }
  0xc2   : > { %552 = vperm.xlu1 %4292, %v4849_v25   ;;  %668 = vrot.lane.b32.xlu0 %v4852_v20, %s4358_s16  ;;  %9997 = vst [vmem:[#allocation91_spill] sm:$0xff] %v4865_v48  ;;  %v4879_v25 = vpop.permute.xlu1 %494  ;;  %v4893_v17 = vpop.permute.xlu2 %502 }
  0xc3   : > { %9999 = vst [vmem:[#allocation93_spill] sm:$0xff] %v4874_v31  ;;  %v4904_v26 = vmul.f32 %v4893_v17, %v4622_v46  ;;  %vm284_vm2 = vcmp.lt.s32.totalorder %v4874_v31, 16 }
  0xc4   : > { %10001 = vst [vmem:[#allocation94_spill] sm:$0xff] %v4885_v51 }
  0xc5   : > { %10003 = vst [vmem:[#allocation96_spill] sm:$0xff] %v4893_v17 }
  0xc6   : > { %v4867_v39 = vpop.permute.xlu0 %492  ;;  %10005 = vst [vmem:[#allocation98_spill] sm:$0xff] %v4904_v26 }
  0xc7   : > { %v4871_v43 = vmul.f32 %v4867_v39, %v4590_v22  ;;  %v4889_v22 = vmul.f32 %v4879_v25, %v4563_v21 }
  0xc9   : > { %9998 = vst [vmem:[#allocation92_spill] sm:$0xff] %v4871_v43  ;;  %4293 = vset.pattern.permute.xlu2 %v10000_v16 }
  0xca   : > { %557 = vperm.xlu2 %4293, %v4865_v48   ;;  %567 = vperm.xlu1 %4292, %v4871_v43   ;;  %10002 = vst [vmem:[#allocation95_spill] sm:$0xff] %v4889_v22  ;;  %v4896_v48 = vadd.s32 1, %v4498_v10  ;;  %v4913_v10 = vadd.s32 1, %v4514_v33  ;;  %v4915_v36 = vpop.permute.xlu2 %508  ;;  %v4930_v33 = vadd.s32 1, %v4534_v52 }
  0xcb   : > { %674 = vrot.lane.b32.xlu0 %v4874_v31, %s4358_s16  ;;  %10008 = vst [vmem:[#allocation101_spill] sm:$0xff] %v4915_v36  ;;  %v4923_v17 = vmul.f32 %v4915_v36, %v4646_v58  ;;  %v4940_v36 = vpop.permute.xlu1 %500 }
  0xcc   : > { %10004 = vst [vmem:[#allocation97_spill] sm:$0xff] %v4896_v48  ;;  %vm287_vm3 = vcmp.lt.s32.totalorder %v4896_v48, 16  ;;  %vm290_vm5 = vcmp.lt.s32.totalorder %v4913_v10, 16  ;;  %vm293_vm7 = vcmp.lt.s32.totalorder %v4930_v33, 16 }
  0xcd   : > { %10007 = vst [vmem:[#allocation100_spill] sm:$0xff] %v4913_v10 }
  0xce   : > { %v4891_v56 = vpop.permute.xlu0 %498  ;;  %10009 = vst [vmem:[#allocation102_spill] sm:$0xff] %v4923_v17 }
  0xcf   : > { %v4908_v43 = vmul.f32 %v4891_v56, %v4616_v60  ;;  %10011 = vst [vmem:[#allocation104_spill] sm:$0xff] %v4930_v33 }
  0xd1   : > { %10006 = vst [vmem:[#allocation99_spill] sm:$0xff] %v4908_v43 }
  0xd2   : > { %572 = vperm.xlu2 %4293, %v4889_v22   ;;  %577 = vperm.xlu1 %4292, %v4885_v51   ;;  %v4961_v22 = vadd.s32 1, %v4446_v40 }
  0xd3   : > { %680 = vrot.lane.b32.xlu0 %v4896_v48, %s4358_s16 }
  0xd4   : > { %10016 = vst [vmem:[#allocation109_spill] sm:$0xff] %v4961_v22  ;;  %vm279_vm0 = vcmp.lt.s32.totalorder %v4961_v22, 16 }
  0xd6   : > { %v4910_v21 = vpop.permute.xlu0 %504 }
  0xd7   : > { %v4927_v60 = vmul.f32 %v4910_v21, %v4640_v0 }
  0xd9   : > { %10010 = vst [vmem:[#allocation103_spill] sm:$0xff] %v4927_v60 }
  0xda   : > { %592 = vperm.xlu1 %4292, %v4904_v26   ;;  %582 = vperm.xlu2 %4293, %v4908_v43   ;;  %v4936_v26 = vpop.permute.xlu2 %514  ;;  %v4958_v43 = vpop.permute.xlu1 %506 }
  0xdb   : > { %686 = vrot.lane.b32.xlu0 %v4913_v10, %s4358_s16  ;;  %10012 = vst [vmem:[#allocation105_spill] sm:$0xff] %v4936_v26  ;;  %v4944_v0 = vmul.f32 %v4936_v26, %v4663_v5  ;;  %v10018_v26 = vmov 1   ;;  %v5002_v5 = vadd.s32 1, %v4500_v11 }
  0xdd   : > { %10013 = vst [vmem:[#allocation106_spill] sm:$0xff] %v4944_v0  ;;  %vm288_vm9 = vcmp.lt.s32.totalorder %v5002_v5, 16 }
  0xde   : > { %v4932_v51 = vpop.permute.xlu0 %510  ;;  %10027 = vst [vmem:[#allocation119_spill] sm:$0xff] %v5002_v5 }
  0xdf   : > { %v4948_v52 = vmul.f32 %v4932_v51, %v4660_v4 }
  0xe1   : > { %10014 = vst [vmem:[#allocation107_spill] sm:$0xff] %v4948_v52 }
  0xe2   : > { %607 = vperm.xlu1 %4292, %v4923_v17   ;;  %597 = vperm.xlu2 %4293, %v4927_v60  }
  0xe3   : > { %692 = vrot.lane.b32.xlu0 %v4930_v33, %s4358_s16 }
  0xe6   : > { %v4952_v17 = vpop.permute.xlu0 %516 }
  0xe7   : > { %v4956_v60 = vmul.f32 %v4952_v17, %v4672_v7  ;;  %v4973_v7 = vadd.s32 1, %v4451_v44 }
  0xe9   : > { %10015 = vst [vmem:[#allocation108_spill] sm:$0xff] %v4956_v60  ;;  %vm282_vm6 = vcmp.lt.s32.totalorder %v4973_v7, 16 }
  0xea   : > { %622 = vperm.xlu1 %4292, %v4944_v0   ;;  %612 = vperm.xlu2 %4293, %v4948_v52   ;;  %v4970_v0 = vadd.s32 1, %v4419_v24  ;;  %10020 = vst [vmem:[#allocation112_spill] sm:$0xff] %v4973_v7  ;;  %v4975_v52 = vpop.permute.xlu1 %512  ;;  %v4988_v24 = vadd.s32 1, %v4473_v57 }
  0xec   : > { %10019 = vst [vmem:[#allocation111_spill] sm:$0xff] %v4970_v0  ;;  %vm280_vm4 = vcmp.lt.s32.totalorder %v4970_v0, 16  ;;  %vm285_vm8 = vcmp.lt.s32.totalorder %v4988_v24, 16 }
  0xed   : > { %10023 = vst [vmem:[#allocation115_spill] sm:$0xff] %v4988_v24 }
  0xf2   : > { %664 = vrot.lane.b32.xlu1 %v4961_v22, %s4358_s16  ;;  %627 = vperm.xlu2 %4293, %v4956_v60  }
  0xf3   : > { %v4966_v4 = vpop.permute.xlu2 %394  ;;  %4294 = vset.pattern.permute.xlu1 %v10018_v26 }
  0xf4   : > { %10017 = vst [vmem:[#allocation110_spill] sm:$0xff] %v4966_v4  ;;  %v4985_v4 = vadd.s32 1, %v4481_v62 }
  0xf6   : > { %10022 = vst [vmem:[#allocation114_spill] sm:$0xff] %v4985_v4  ;;  %vm283_vm11 = vcmp.lt.s32.totalorder %v4985_v4, 16 }
  0xfa   : > { %670 = vrot.lane.b32.xlu1 %v4973_v7, %s4358_s16  ;;  %666 = vrot.lane.b32.xlu2 %v4970_v0, %s4358_s16 }
  0xfb   : > { %v4981_v40 = vpop.permute.xlu2 %403  ;;  %4295 = vset.pattern.permute.xlu2 %v10018_v26 }
  0xfc   : > { %10021 = vst [vmem:[#allocation113_spill] sm:$0xff] %v4981_v40  ;;  %v4999_v40 = vadd.s32 1, %v4504_v14 }
  0xfe   : > { %10026 = vst [vmem:[#allocation118_spill] sm:$0xff] %v4999_v40  ;;  %vm286_vm12 = vcmp.lt.s32.totalorder %v4999_v40, 16 }
 0x102   : > { %676 = vrot.lane.b32.xlu1 %v4988_v24, %s4358_s16  ;;  %672 = vrot.lane.b32.xlu2 %v4985_v4, %s4358_s16 }
 0x103   : > { %v4994_v44 = vpop.permute.xlu2 %409  ;;  %v4996_v60 = vpop.permute.xlu1 %391 }
 0x104   : > { %10024 = vst [vmem:[#allocation116_spill] sm:$0xff] %v4994_v44  ;;  %v5012_v58 = vpop.permute.xlu0 %397  ;;  %v5018_v44 = vadd.s32 1, %v4516_v37 }
 0x105   : > { %10025 = vst [vmem:[#allocation117_spill] sm:$0xff] %v4996_v60  ;;  %v5015_v60 = vadd.s32 1, %v4518_v42 }
 0x106   : > { %10030 = vst [vmem:[#allocation122_spill] sm:$0xff] %v5012_v58  ;;  %v5031_v58 = vadd.s32 1, %v4536_v54  ;;  %vm291_vm10 = vcmp.lt.s32.totalorder %v5018_v44, 16 }
 0x107   : > { %10031 = vst [vmem:[#allocation123_spill] sm:$0xff] %v5015_v60 }
 0x108   : > { %10032 = vst [vmem:[#allocation124_spill] sm:$0xff] %v5018_v44 }
 0x109   : > { %10036 = vst [vmem:[#allocation128_spill] sm:$0xff] %v5031_v58 }
 0x10a   : > { %682 = vrot.lane.b32.xlu1 %v5002_v5, %s4358_s16  ;;  %678 = vrot.lane.b32.xlu2 %v4999_v40, %s4358_s16 }
 0x10b   : > { %v5008_v57 = vpop.permute.xlu2 %418  ;;  %v5010_v62 = vpop.permute.xlu1 %400 }
 0x10c   : > { %10028 = vst [vmem:[#allocation120_spill] sm:$0xff] %v5008_v57 }
 0x10d   : > { %10029 = vst [vmem:[#allocation121_spill] sm:$0xff] %v5010_v62 }
 0x112   : > { %688 = vrot.lane.b32.xlu1 %v5018_v44, %s4358_s16  ;;  %684 = vrot.lane.b32.xlu2 %v5015_v60, %s4358_s16 }
 0x113   : > { %v5024_v11 = vpop.permute.xlu2 %427  ;;  %v5026_v14 = vpop.permute.xlu1 %406 }
 0x114   : > { %10033 = vst [vmem:[#allocation125_spill] sm:$0xff] %v5024_v11  ;;  %v5028_v57 = vpop.permute.xlu0 %412 }
 0x115   : > { %10034 = vst [vmem:[#allocation126_spill] sm:$0xff] %v5026_v14 }
 0x116   : > { %10035 = vst [vmem:[#allocation127_spill] sm:$0xff] %v5028_v57 }
 0x11a   : > { %690 = vrot.lane.b32.xlu2 %v5031_v58, %s4358_s16  ;;  %s9240_s16 = scalar_lea.vmem %s9294_s2, %s4203_s12 }
 0x11b   : > { %v5035_v62 = vpop.permute.xlu2 %436  ;;  %v5037_v37 = vpop.permute.xlu1 %415 }
 0x11c   : > { %10037 = vst [vmem:[#allocation129_spill] sm:$0xff] %v5035_v62  ;;  %v5039_v42 = vpop.permute.xlu0 %421 }
 0x11d   : > { %10038 = vst [vmem:[#allocation130_spill] sm:$0xff] %v5037_v37 }
 0x11e   : > { %10039 = vst [vmem:[#allocation131_spill] sm:$0xff] %v5039_v42 }
 0x123   : > { %v5041_v46 = vpop.permute.xlu1 %424 }
 0x124   : > { %10040 = vst [vmem:[#allocation132_spill] sm:$0xff] %v5041_v46  ;;  %v5043_v60 = vpop.permute.xlu2 %557  ;;  %v5045_v11 = vpop.permute.xlu0 %430 }
 0x125   : > { %10041 = vst [vmem:[#allocation133_spill] sm:$0xff] %v5043_v60 }
 0x126   : > { %10042 = vst [vmem:[#allocation134_spill] sm:$0xff] %v5045_v11 }
 0x12b   : > { %v5047_v14 = vpop.permute.xlu1 %433 }
 0x12c   : > { %10043 = vst [vmem:[#allocation135_spill] sm:$0xff] %v5047_v14  ;;  %v5049_v57 = vpop.permute.xlu2 %572  ;;  %v5051_v54 = vpop.permute.xlu0 %662 }
 0x12d   : > { %10044 = vst [vmem:[#allocation136_spill] sm:$0xff] %v5049_v57  ;;  %v5055_v58 = vadd.s32 %v5051_v54, %v4685_v13 }
 0x12f   : > { %10045 = vst [vmem:[#allocation137_spill] sm:$0xff] %v5055_v58  ;;  %711 = vperm.xlu1 %4294, %v5055_v58  }
 0x134   : > { %v5058_v37 = vpop.permute.xlu1 %552  ;;  %v5060_v42 = vpop.permute.xlu2 %582 }
 0x135   : > { %10046 = vst [vmem:[#allocation138_spill] sm:$0xff] %v5058_v37  ;;  %v5062_v46 = vpop.permute.xlu0 %668 }
 0x136   : > { %10047 = vst [vmem:[#allocation139_spill] sm:$0xff] %v5060_v42  ;;  %v5066_v11 = vadd.s32 %v5062_v46, %v4702_v27 }
 0x138   : > { %10048 = vst [vmem:[#allocation140_spill] sm:$0xff] %v5066_v11  ;;  %720 = vperm.xlu1 %4294, %v5066_v11  }
 0x13c   : > { %v5069_v14 = vpop.permute.xlu1 %567  ;;  %v5071_v57 = vpop.permute.xlu2 %597 }
 0x13d   : > { %10049 = vst [vmem:[#allocation141_spill] sm:$0xff] %v5069_v14 }
 0x13e   : > { %10050 = vst [vmem:[#allocation142_spill] sm:$0xff] %v5071_v57 }
 0x144   : > { %v5073_v60 = vpop.permute.xlu1 %577  ;;  %v5075_v62 = vpop.permute.xlu2 %612 }
 0x145   : > { %10051 = vst [vmem:[#allocation143_spill] sm:$0xff] %v5073_v60 }
 0x146   : > { %10052 = vst [vmem:[#allocation144_spill] sm:$0xff] %v5075_v62 }
 0x14c   : > { %v5077_v13 = vpop.permute.xlu1 %592  ;;  %v5079_v37 = vpop.permute.xlu2 %627 }
 0x14d   : > { %10053 = vst [vmem:[#allocation145_spill] sm:$0xff] %v5077_v13 }
 0x14e   : > { %10054 = vst [vmem:[#allocation146_spill] sm:$0xff] %v5079_v37 }
 0x154   : > { %v5081_v42 = vpop.permute.xlu1 %607  ;;  %v5083_v58 = vpop.permute.xlu2 %666 }
 0x155   : > { %10055 = vst [vmem:[#allocation147_spill] sm:$0xff] %v5081_v42  ;;  %v5087_v27 = vadd.s32 %v5083_v58, %v4682_v12 }
 0x157   : > { %10056 = vst [vmem:[#allocation148_spill] sm:$0xff] %v5087_v27  ;;  %717 = vperm.xlu0 %4291, %v5087_v27  }
 0x15c   : > { %v5090_v14 = vpop.permute.xlu1 %622  ;;  %v5092_v57 = vpop.permute.xlu2 %672 }
 0x15d   : > { %10057 = vst [vmem:[#allocation149_spill] sm:$0xff] %v5090_v14  ;;  %v5096_v62 = vadd.s32 %v5092_v57, %v4727_v8  ;;  %v5113_v14 = vpop.permute.xlu0 %674 }
 0x15f   : > { %726 = vperm.xlu1 %4294, %v5096_v62  }
 0x164   : > { %v5099_v37 = vpop.permute.xlu1 %664  ;;  %v5101_v42 = vpop.permute.xlu2 %678 }
 0x165   : > { %v5105_v13 = vadd.s32 %v5099_v37, %v4705_v28  ;;  %v5109_v60 = vadd.s32 %v5101_v42, %v4756_v23 }
 0x167   : > { %10058 = vst [vmem:[#allocation150_spill] sm:$0xff] %v5105_v13  ;;  %714 = vperm.xlu2 %4295, %v5105_v13   ;;  %735 = vperm.xlu1 %4294, %v5109_v60   ;;  %v5135_v13 = vadd.s32 %v5113_v14, %v4751_v34  ;;  %v5152_v34 = vsel %vm279_vm0, %v4523_v45, 0.0 }
 0x168   : > { %10059 = vst [vmem:[#allocation151_spill] sm:$0xff] %v5109_v60  ;;  %v5145_v60 = vpop.permute.xlu0 %680 }
 0x169   : > { %10062 = vst [vmem:[#allocation154_spill] sm:$0xff] %v5135_v13 }
 0x16c   : > { %v5115_v12 = vpop.permute.xlu1 %670  ;;  %v5117_v8 = vpop.permute.xlu2 %684 }
 0x16d   : > { %v5121_v11 = vadd.s32 %v5115_v12, %v4722_v50  ;;  %v5125_v28 = vadd.s32 %v5117_v8, %v4786_v35 }
 0x16f   : > { %10060 = vst [vmem:[#allocation152_spill] sm:$0xff] %v5121_v11  ;;  %723 = vperm.xlu2 %4295, %v5121_v11   ;;  %744 = vperm.xlu1 %4294, %v5125_v28  }
 0x170   : > { %10061 = vst [vmem:[#allocation153_spill] sm:$0xff] %v5125_v28  ;;  %v5170_v45 = vpop.permute.xlu0 %686 }
 0x174   : > { %v5129_v23 = vpop.permute.xlu1 %676  ;;  %v5131_v27 = vpop.permute.xlu2 %690 }
 0x175   : > { %v5139_v50 = vadd.s32 %v5129_v23, %v4730_v19  ;;  %v5143_v35 = vadd.s32 %v5131_v27, %v4814_v9  ;;  %v5158_v19 = vadd.s32 %v5145_v60, %v4781_v53  ;;  %v5176_v53 = vsel %vm281_vm1, %v4571_v41, 0.0 }
 0x176   : > { %v5197_v41 = vmul.u32 16, %v4961_v22  ;;  %v5228_v22 = vsel %vm280_vm4, %v4555_v55, 0.0  ;;  %v5247_v55 = vmul.u32 16, %v4896_v48 }
 0x177   : > { %10063 = vst [vmem:[#allocation155_spill] sm:$0xff] %v5139_v50  ;;  %732 = vperm.xlu0 %4291, %v5139_v50   ;;  %753 = vperm.xlu1 %4294, %v5143_v35   ;;  %v5166_v50 = vmul.f32 %v4856_v61, %v5152_v34  ;;  %v5182_v61 = vadd.s32 %v5170_v45, %v4809_v1 }
 0x178   : > { %10064 = vst [vmem:[#allocation156_spill] sm:$0xff] %v5143_v35  ;;  %729 = vperm.xlu2 %4295, %v5135_v13   ;;  %v5190_v13 = vmul.f32 %v4867_v39, %v5176_v53  ;;  %v5199_v1 = vpop.permute.xlu0 %692 }
 0x179   : > { %10065 = vst [vmem:[#allocation157_spill] sm:$0xff] %v5158_v19  ;;  %v5206_v39 = vadd.s32 %v5199_v1, %v4833_v49 }
 0x17a   : > { %10067 = vst [vmem:[#allocation159_spill] sm:$0xff] %v5182_v61 }
 0x17b   : > { %10069 = vst [vmem:[#allocation161_spill] sm:$0xff] %v5190_v13 }
 0x17c   : > { %v5154_v11 = vpop.permute.xlu1 %682  ;;  %10070 = vst [vmem:[#allocation162_spill] sm:$0xff] %v5197_v41 }
 0x17d   : > { %v5162_v9 = vadd.s32 %v5154_v11, %v4760_v3  ;;  %10071 = vst [vmem:[#allocation163_spill] sm:$0xff] %v5206_v39 }
 0x17e   : > { %10076 = vst [vmem:[#allocation168_spill] sm:$0xff] %v5247_v55 }
 0x17f   : > { %10066 = vst [vmem:[#allocation158_spill] sm:$0xff] %v5162_v9  ;;  %741 = vperm.xlu0 %4291, %v5162_v9   ;;  %4296 = vset.pattern.permute.xlu1 %v10000_v16 }
 0x180   : > { %738 = vperm.xlu2 %4295, %v5158_v19   ;;  %813 = vperm.xlu1 %4296, %v5166_v50  }
 0x184   : > { %v5178_v3 = vpop.permute.xlu1 %688 }
 0x185   : > { %v5186_v9 = vadd.s32 %v5178_v3, %v4790_v18  ;;  %v5202_v18 = vsel %vm284_vm2, %v4601_v47, 0.0  ;;  %v5221_v47 = vmul.u32 16, %v4874_v31  ;;  %v5240_v31 = vmul.f32 %v4839_v63, %v5228_v22 }
 0x187   : > { %10068 = vst [vmem:[#allocation160_spill] sm:$0xff] %v5186_v9  ;;  %750 = vperm.xlu0 %4291, %v5186_v9   ;;  %v5210_v9 = vadd.s32 %v5197_v41, %v4711_v38  ;;  %v5225_v38 = vsel %vm287_vm3, %v4627_v59, 0.0  ;;  %v5259_v59 = vadd.s32 %v5247_v55, %v4770_v32 }
 0x188   : > { %747 = vperm.xlu2 %4295, %v5182_v61   ;;  %823 = vperm.xlu1 %4296, %v5190_v13   ;;  %v5214_v61 = vmul.f32 %v4891_v56, %v5202_v18  ;;  %10073 = vst [vmem:[#allocation165_spill] sm:$0xff] %v5221_v47  ;;  %v5232_v56 = vadd.s32 %v5221_v47, %v4742_v29  ;;  %v5255_v29 = vsel %vm282_vm6, %v4546_v30, 0.0  ;;  %v5273_v30 = vmul.u32 16, %v4913_v10 }
 0x189   : > { %10072 = vst [vmem:[#allocation164_spill] sm:$0xff] %v5210_v9  ;;  %v5236_v49 = vmul.f32 %v4910_v21, %v5225_v38  ;;  %v5252_v21 = vsel %vm290_vm5, %v4649_v2, 0.0  ;;  %v5267_v48 = vmul.f32 %v4879_v25, %v5255_v29  ;;  %v5281_v2 = vsel %vm285_vm8, %v4576_v15, 0.0  ;;  %v10083_v25 = vld [vmem:[#allocation75_spill] sm:$0xff] }
 0x18a   : > { %10074 = vst [vmem:[#allocation166_spill] sm:$0xff] %v5232_v56  ;;  %v5285_v32 = vadd.s32 %v5273_v30, %v10083_v25  ;;  %v5293_v10 = vmul.f32 %v4940_v36, %v5281_v2  ;;  %v5303_v15 = vmul.u32 16, %v4970_v0  ;;  %v10098_v0 = vld [vmem:[#allocation41_spill] sm:$0xff] }
 0x18b   : > { %10075 = vst [vmem:[#allocation167_spill] sm:$0xff] %v5240_v31 }
 0x18c   : > { %10077 = vst [vmem:[#allocation169_spill] sm:$0xff] %v5252_v21 }
 0x18d   : > { %10078 = vst [vmem:[#allocation170_spill] sm:$0xff] %v5255_v29 }
 0x18e   : > { %10079 = vst [vmem:[#allocation171_spill] sm:$0xff] %v5259_v59 }
 0x18f   : > { %986 = vperm.xlu0 %4291, %v5210_v9   ;;  %10080 = vst [vmem:[#allocation172_spill] sm:$0xff] %v5267_v48  ;;  %v10090_v9 = vld [vmem:[#allocation83_spill] sm:$0xff] }
 0x190   : > { %756 = vperm.xlu2 %4295, %v5206_v39   ;;  %838 = vperm.xlu1 %4296, %v5214_v61   ;;  %10081 = vst [vmem:[#allocation173_spill] sm:$0xff] %v5273_v30  ;;  %v10105_v39 = vld [vmem:[#allocation60_spill] sm:$0xff] }
 0x191   : > { %10084 = vst [vmem:[#allocation75_spill] sm:$0xff] %v5285_v32 }
 0x192   : > { %10085 = vst [vmem:[#allocation175_spill] sm:$0xff] %v5293_v10 }
 0x193   : > { %10087 = vst [vmem:[#allocation177_spill] sm:$0xff] %v5303_v15 }
 0x197   : > { %1001 = vperm.xlu0 %4291, %v5232_v56   ;;  %v5263_v56 = vmul.f32 %v4932_v51, %v5252_v21  ;;  %v5278_v51 = vsel %vm293_vm7, %v4665_v6, 0.0  ;;  %v5298_v6 = vmul.u32 16, %v4930_v33 }
 0x198   : > { %4297 = vset.pattern.permute.xlu2 %v10000_v16  ;;  %853 = vperm.xlu1 %4296, %v5236_v49   ;;  %10082 = vst [vmem:[#allocation174_spill] sm:$0xff] %v5278_v51 }
 0x199   : > { %818 = vperm.xlu2 %4297, %v5240_v31   ;;  %10086 = vst [vmem:[#allocation176_spill] sm:$0xff] %v5298_v6 }
 0x19f   : > { %1010 = vperm.xlu0 %4291, %v5259_v59   ;;  %v5289_v59 = vmul.f32 %v4952_v17, %v5278_v51  ;;  %v10088_v17 = vld [vmem:[#allocation27_spill] sm:$0xff] }
 0x1a0   : > { %868 = vperm.xlu1 %4296, %v5263_v56   ;;  %v5306_v25 = vsel %vm288_vm9, %v10088_v17, 0.0  ;;  %v10096_v17 = vld [vmem:[#allocation32_spill] sm:$0xff] }
 0x1a1   : > { %828 = vperm.xlu2 %4297, %v5267_v48   ;;  %10089 = vst [vmem:[#allocation27_spill] sm:$0xff] %v5306_v25  ;;  %v5310_v48 = vadd.s32 %v5298_v6, %v10090_v9  ;;  %v5318_v33 = vmul.f32 %v4958_v43, %v5306_v25  ;;  %v5326_v9 = vmul.u32 16, %v4973_v7  ;;  %v5344_v7 = vmul.u32 16, %v4988_v24 }
 0x1a3   : > { %10091 = vst [vmem:[#allocation83_spill] sm:$0xff] %v5310_v48  ;;  %v5355_v19 = vadd.s32 %v5344_v7, %v10105_v39  ;;  %v5371_v39 = vmul.u32 16, %v5002_v5 }
 0x1a4   : > { %10094 = vst [vmem:[#allocation178_spill] sm:$0xff] %v5318_v33 }
 0x1a5   : > { %10095 = vst [vmem:[#allocation179_spill] sm:$0xff] %v5326_v9 }
 0x1a6   : > { %10101 = vst [vmem:[#allocation181_spill] sm:$0xff] %v5344_v7 }
 0x1a7   : > { %1019 = vperm.xlu0 %4291, %v5285_v32   ;;  %v10092_v32 = vld [vmem:[#allocation44_spill] sm:$0xff]  ;;  %10106 = vst [vmem:[#allocation60_spill] sm:$0xff] %v5355_v19 }
 0x1a8   : > { %883 = vperm.xlu1 %4296, %v5289_v59   ;;  %v5314_v13 = vadd.s32 %v5303_v15, %v10092_v32  ;;  %v5329_v32 = vsel %vm291_vm10, %v10096_v17, 0.0  ;;  %v10102_v17 = vld [vmem:[#allocation84_spill] sm:$0xff]  ;;  %10111 = vst [vmem:[#allocation184_spill] sm:$0xff] %v5371_v39 }
 0x1a9   : > { %843 = vperm.xlu2 %4297, %v5293_v10   ;;  %10097 = vst [vmem:[#allocation32_spill] sm:$0xff] %v5329_v32  ;;  %v5333_v10 = vadd.s32 %v5326_v9, %v10098_v0  ;;  %v10103_v0 = vld [vmem:[#allocation23_spill] sm:$0xff]  ;;  %vm278_vm15 = vcmp.lt.s32.totalorder %v10102_v17, 16 }
 0x1aa   : > { %10093 = vst [vmem:[#allocation44_spill] sm:$0xff] %v5314_v13  ;;  %v5351_v31 = vsel %vm283_vm11, %v10103_v0, 0.0  ;;  %v5375_v0 = vmul.u32 16, %v4852_v20  ;;  %v5401_v20 = vmul.u32 16, %v4985_v4 }
 0x1ab   : > { %10099 = vst [vmem:[#allocation41_spill] sm:$0xff] %v5333_v10 }
 0x1ac   : > { %10104 = vst [vmem:[#allocation23_spill] sm:$0xff] %v5351_v31 }
 0x1ad   : > { %10122 = vst [vmem:[#allocation188_spill] sm:$0xff] %v5401_v20 }
 0x1af   : > { %1028 = vperm.xlu0 %4291, %v5310_v48   ;;  %v5337_v48 = vmul.f32 %v4975_v52, %v5329_v32 }
 0x1b0   : > { %4299 = vset.pattern.permute.xlu1 %v10018_v26 }
 0x1b1   : > { %858 = vperm.xlu2 %4297, %v5318_v33   ;;  %989 = vperm.xlu1 %4299, %v5314_v13   ;;  %10100 = vst [vmem:[#allocation180_spill] sm:$0xff] %v5337_v48  ;;  %v5348_v33 = vmul.u32 16, %v10102_v17  ;;  %v5357_v13 = vpop.permute.xlu1 %711 }
 0x1b2   : > { %10107 = vst [vmem:[#allocation182_spill] sm:$0xff] %v5357_v13  ;;  %v10112_v13 = vld [vmem:[#allocation28_spill] sm:$0xff] }
 0x1b7   : > { %1082 = vrot.lane.b32.xlu0 %v5228_v22, %s4359_s17 }
 0x1b9   : > { %873 = vperm.xlu2 %4297, %v5337_v48   ;;  %995 = vperm.xlu1 %4299, %v5333_v10   ;;  %v10108_v10 = vld [vmem:[#allocation45_spill] sm:$0xff]  ;;  %v5390_v5 = vpop.permute.xlu1 %720 }
 0x1ba   : > { %v5363_v24 = vadd.s32 %v5348_v33, %v10108_v10  ;;  %v10114_v10 = vld [vmem:[#allocation67_spill] sm:$0xff]  ;;  %10118 = vst [vmem:[#allocation185_spill] sm:$0xff] %v5390_v5 }
 0x1bb   : > { %v5382_v35 = vadd.s32 %v5371_v39, %v10114_v10  ;;  %v10121_v10 = vld [vmem:[#allocation123_spill] sm:$0xff] }
 0x1bc   : > { %10109 = vst [vmem:[#allocation45_spill] sm:$0xff] %v5363_v24  ;;  %vm289_vm13 = vcmp.lt.s32.totalorder %v10121_v10, 16 }
 0x1bd   : > { %10115 = vst [vmem:[#allocation67_spill] sm:$0xff] %v5382_v35 }
 0x1bf   : > { %1088 = vrot.lane.b32.xlu0 %v5351_v31, %s4359_s17  ;;  %v5378_v31 = vsel %vm286_vm12, %v10112_v13, 0.0  ;;  %v5397_v13 = vmul.u32 16, %v5018_v44 }
 0x1c0   : > { %10113 = vst [vmem:[#allocation28_spill] sm:$0xff] %v5378_v31 }
 0x1c1   : > { %4298 = vset.pattern.permute.xlu2 %v10018_v26  ;;  %v5366_v48 = vpop.permute.xlu2 %714  ;;  %1004 = vperm.xlu1 %4299, %v5355_v19   ;;  %10120 = vst [vmem:[#allocation187_spill] sm:$0xff] %v5397_v13 }
 0x1c2   : > { %10110 = vst [vmem:[#allocation183_spill] sm:$0xff] %v5366_v48  ;;  %983 = vperm.xlu2 %4298, %v5363_v24   ;;  %v10116_v48 = vld [vmem:[#allocation51_spill] sm:$0xff] }
 0x1c3   : > { %v5388_v24 = vadd.s32 %v5375_v0, %v10116_v48  ;;  %v10125_v48 = vld [vmem:[#allocation76_spill] sm:$0xff] }
 0x1c4   : > { %v5408_v5 = vadd.s32 %v5397_v13, %v10125_v48  ;;  %v5424_v48 = vmul.u32 16, %v4999_v40 }
 0x1c5   : > { %10117 = vst [vmem:[#allocation51_spill] sm:$0xff] %v5388_v24 }
 0x1c6   : > { %10126 = vst [vmem:[#allocation76_spill] sm:$0xff] %v5408_v5 }
 0x1c7   : > { %1094 = vrot.lane.b32.xlu0 %v5378_v31, %s4359_s17  ;;  %v10123_v31 = vld [vmem:[#allocation33_spill] sm:$0xff]  ;;  %10132 = vst [vmem:[#allocation191_spill] sm:$0xff] %v5424_v48 }
 0x1c8   : > { %v5404_v28 = vsel %vm289_vm13, %v10123_v31, 0.0  ;;  %v10131_v31 = vld [vmem:[#allocation128_spill] sm:$0xff] }
 0x1c9   : > { %v5392_v19 = vpop.permute.xlu2 %723  ;;  %1013 = vperm.xlu1 %4299, %v5382_v35   ;;  %10124 = vst [vmem:[#allocation33_spill] sm:$0xff] %v5404_v28  ;;  %vm292_vm14 = vcmp.lt.s32.totalorder %v10131_v31, 16  ;;  %v5459_v17 = vpop.permute.xlu0 %717 }
 0x1ca   : > { %10119 = vst [vmem:[#allocation186_spill] sm:$0xff] %v5392_v19  ;;  %992 = vperm.xlu2 %4298, %v5388_v24   ;;  %v10127_v19 = vld [vmem:[#allocation50_spill] sm:$0xff] }
 0x1cb   : > { %v5414_v24 = vadd.s32 %v5401_v20, %v10127_v19  ;;  %v10135_v19 = vld [vmem:[#allocation59_spill] sm:$0xff] }
 0x1cd   : > { %10128 = vst [vmem:[#allocation50_spill] sm:$0xff] %v5414_v24 }
 0x1cf   : > { %1100 = vrot.lane.b32.xlu0 %v5404_v28, %s4359_s17  ;;  %v10133_v28 = vld [vmem:[#allocation37_spill] sm:$0xff] }
 0x1d0   : > { %v5428_v35 = vsel %vm292_vm14, %v10133_v28, 0.0  ;;  %v5448_v28 = vmul.u32 16, %v10121_v10 }
 0x1d1   : > { %1022 = vperm.xlu1 %4299, %v5408_v5   ;;  %v5417_v44 = vpop.permute.xlu1 %726  ;;  %10134 = vst [vmem:[#allocation37_spill] sm:$0xff] %v5428_v35 }
 0x1d2   : > { %10129 = vst [vmem:[#allocation189_spill] sm:$0xff] %v5417_v44  ;;  %v5419_v4 = vpop.permute.xlu2 %729  ;;  %998 = vperm.xlu2 %4298, %v5414_v24   ;;  %v5434_v44 = vadd.s32 %v5424_v48, %v10135_v19  ;;  %v5452_v19 = vadd.s32 %v5303_v15, %v5083_v58  ;;  %v5469_v58 = vmul.u32 16, %v10131_v31  ;;  %v5473_v15 = vadd.s32 %v5344_v7, %v5129_v23 }
 0x1d3   : > { %10130 = vst [vmem:[#allocation190_spill] sm:$0xff] %v5419_v4  ;;  %v10137_v4 = vld [vmem:[#allocation19_spill] sm:$0xff]  ;;  %v5491_v23 = vadd.s32 %v5371_v39, %v5154_v11  ;;  %v5507_v11 = vadd.s32 %v5397_v13, %v5178_v3  ;;  %v10170_v39 = vld [vmem:[#allocation30_spill] sm:$0xff] }
 0x1d4   : > { %10136 = vst [vmem:[#allocation59_spill] sm:$0xff] %v5434_v44  ;;  %v5437_v5 = vsel %vm278_vm15, %v10137_v4, 0.0  ;;  %v10142_v4 = vld [vmem:[#allocation69_spill] sm:$0xff] }
 0x1d5   : > { %10140 = vst [vmem:[#allocation193_spill] sm:$0xff] %v5448_v28 }
 0x1d6   : > { %10141 = vst [vmem:[#allocation194_spill] sm:$0xff] %v5452_v19 }
 0x1d7   : > { %1106 = vrot.lane.b32.xlu0 %v5428_v35, %s4359_s17  ;;  %10143 = vst [vmem:[#allocation69_spill] sm:$0xff] %v5459_v17 }
 0x1d8   : > { %10146 = vst [vmem:[#allocation197_spill] sm:$0xff] %v5469_v58 }
 0x1d9   : > { %v5439_v24 = vpop.permute.xlu1 %735  ;;  %1078 = vrot.lane.b32.xlu1 %v5437_v5, %s4359_s17  ;;  %10147 = vst [vmem:[#allocation198_spill] sm:$0xff] %v5473_v15 }
 0x1da   : > { %10138 = vst [vmem:[#allocation19_spill] sm:$0xff] %v5439_v24  ;;  %v5443_v40 = vpop.permute.xlu2 %738  ;;  %1007 = vperm.xlu2 %4298, %v5434_v44   ;;  %4301 = vset.pattern.permute.xlu1 %v10000_v16  ;;  %v5457_v24 = vadd.s32 %v5448_v28, %v10142_v4  ;;  %v10148_v4 = vld [vmem:[#allocation80_spill] sm:$0xff] }
 0x1db   : > { %10139 = vst [vmem:[#allocation192_spill] sm:$0xff] %v5443_v40  ;;  %v5478_v17 = vadd.s32 %v5469_v58, %v10148_v4 }
 0x1dc   : > { %10152 = vst [vmem:[#allocation201_spill] sm:$0xff] %v5491_v23 }
 0x1dd   : > { %10156 = vst [vmem:[#allocation205_spill] sm:$0xff] %v5507_v11 }
 0x1df   : > { %1309 = vperm.xlu0 %4291, %v5452_v19  }
 0x1e1   : > { %v5461_v40 = vpop.permute.xlu1 %744  ;;  %1084 = vrot.lane.b32.xlu1 %v5176_v53, %s4359_s17 }
 0x1e2   : > { %10144 = vst [vmem:[#allocation195_spill] sm:$0xff] %v5461_v40  ;;  %v5465_v44 = vpop.permute.xlu2 %747  ;;  %1016 = vperm.xlu2 %4298, %v5457_v24  }
 0x1e3   : > { %10145 = vst [vmem:[#allocation196_spill] sm:$0xff] %v5465_v44 }
 0x1e7   : > { %1324 = vperm.xlu0 %4291, %v5473_v15  }
 0x1e9   : > { %v5480_v40 = vpop.permute.xlu1 %753  ;;  %v5482_v10 = vpop.permute.xlu0 %732  ;;  %1090 = vrot.lane.b32.xlu1 %v5202_v18, %s4359_s17 }
 0x1ea   : > { %10149 = vst [vmem:[#allocation80_spill] sm:$0xff] %v5480_v40  ;;  %1025 = vperm.xlu2 %4298, %v5478_v17   ;;  %v5487_v44 = vpop.permute.xlu2 %756 }
 0x1eb   : > { %10150 = vst [vmem:[#allocation199_spill] sm:$0xff] %v5482_v10 }
 0x1ec   : > { %10151 = vst [vmem:[#allocation200_spill] sm:$0xff] %v5487_v44 }
 0x1ef   : > { %1333 = vperm.xlu0 %4291, %v5491_v23  }
 0x1f1   : > { %v5494_v7 = vpop.permute.xlu0 %741  ;;  %1096 = vrot.lane.b32.xlu1 %v5225_v38, %s4359_s17 }
 0x1f2   : > { %10153 = vst [vmem:[#allocation202_spill] sm:$0xff] %v5494_v7  ;;  %1080 = vrot.lane.b32.xlu2 %v5152_v34, %s4359_s17  ;;  %v5500_v4 = vpop.permute.xlu1 %813 }
 0x1f3   : > { %10154 = vst [vmem:[#allocation203_spill] sm:$0xff] %v5500_v4  ;;  %v5502_v40 = vpop.permute.xlu2 %818  ;;  %4300 = vset.pattern.permute.xlu2 %v10000_v16 }
 0x1f4   : > { %10155 = vst [vmem:[#allocation204_spill] sm:$0xff] %v5502_v40  ;;  %v10160_v40 = vld [vmem:[#allocation22_spill] sm:$0xff] }
 0x1f5   : > { %v5522_v4 = vmul.f32 %v4839_v63, %v10160_v40 }
 0x1f7   : > { %1342 = vperm.xlu0 %4291, %v5507_v11   ;;  %10161 = vst [vmem:[#allocation209_spill] sm:$0xff] %v5522_v4 }
 0x1f9   : > { %v5510_v10 = vpop.permute.xlu0 %750  ;;  %1102 = vrot.lane.b32.xlu1 %v5252_v21, %s4359_s17 }
 0x1fa   : > { %10157 = vst [vmem:[#allocation206_spill] sm:$0xff] %v5510_v10  ;;  %1086 = vrot.lane.b32.xlu2 %v5255_v29, %s4359_s17  ;;  %v5516_v44 = vpop.permute.xlu1 %823 }
 0x1fb   : > { %10158 = vst [vmem:[#allocation207_spill] sm:$0xff] %v5516_v44  ;;  %v5518_v7 = vpop.permute.xlu2 %828  ;;  %v10165_v44 = vld [vmem:[#allocation25_spill] sm:$0xff] }
 0x1fc   : > { %10159 = vst [vmem:[#allocation208_spill] sm:$0xff] %v5518_v7  ;;  %v5537_v7 = vmul.f32 %v4940_v36, %v10165_v44 }
 0x1fe   : > { %10166 = vst [vmem:[#allocation213_spill] sm:$0xff] %v5537_v7 }
 0x1ff   : > { %1631 = vperm.xlu0 %4291, %v5522_v4  }
 0x201   : > { %v5525_v3 = vpop.permute.xlu0 %986  ;;  %1108 = vrot.lane.b32.xlu1 %v5278_v51, %s4359_s17 }
 0x202   : > { %10162 = vst [vmem:[#allocation210_spill] sm:$0xff] %v5525_v3  ;;  %1092 = vrot.lane.b32.xlu2 %v5281_v2, %s4359_s17  ;;  %v5531_v10 = vpop.permute.xlu1 %838 }
 0x203   : > { %10163 = vst [vmem:[#allocation211_spill] sm:$0xff] %v5531_v10  ;;  %v5533_v13 = vpop.permute.xlu2 %843  ;;  %v5550_v10 = vmul.f32 %v4958_v43, %v10170_v39 }
 0x204   : > { %10164 = vst [vmem:[#allocation212_spill] sm:$0xff] %v5533_v13 }
 0x205   : > { %10171 = vst [vmem:[#allocation30_spill] sm:$0xff] %v5550_v10 }
 0x207   : > { %1651 = vperm.xlu0 %4291, %v5537_v7   ;;  %v10175_v7 = vld [vmem:[#allocation35_spill] sm:$0xff] }
 0x209   : > { %v5540_v63 = vpop.permute.xlu0 %1001 }
 0x20a   : > { %10167 = vst [vmem:[#allocation214_spill] sm:$0xff] %v5540_v63  ;;  %1098 = vrot.lane.b32.xlu2 %v5306_v25, %s4359_s17  ;;  %v5544_v3 = vpop.permute.xlu1 %853 }
 0x20b   : > { %10168 = vst [vmem:[#allocation215_spill] sm:$0xff] %v5544_v3  ;;  %v5546_v4 = vpop.permute.xlu2 %858  ;;  %v5563_v3 = vmul.f32 %v4975_v52, %v10175_v7 }
 0x20c   : > { %10169 = vst [vmem:[#allocation216_spill] sm:$0xff] %v5546_v4 }
 0x20d   : > { %10176 = vst [vmem:[#allocation220_spill] sm:$0xff] %v5563_v3 }
 0x20f   : > { %1663 = vperm.xlu0 %4291, %v5550_v10  }
 0x211   : > { %v5553_v13 = vpop.permute.xlu0 %1010 }
 0x212   : > { %10172 = vst [vmem:[#allocation217_spill] sm:$0xff] %v5553_v13  ;;  %1104 = vrot.lane.b32.xlu2 %v5329_v32, %s4359_s17  ;;  %v5557_v36 = vpop.permute.xlu1 %868 }
 0x213   : > { %10173 = vst [vmem:[#allocation218_spill] sm:$0xff] %v5557_v36  ;;  %v5559_v63 = vpop.permute.xlu2 %873 }
 0x214   : > { %10174 = vst [vmem:[#allocation219_spill] sm:$0xff] %v5559_v63 }
 0x217   : > { %1675 = vperm.xlu0 %4291, %v5563_v3  }
 0x219   : > { %v5566_v4 = vpop.permute.xlu0 %1019 }
 0x21a   : > { %10177 = vst [vmem:[#allocation221_spill] sm:$0xff] %v5566_v4  ;;  %v5568_v43 = vpop.permute.xlu1 %883 }
 0x21b   : > { %10178 = vst [vmem:[#allocation222_spill] sm:$0xff] %v5568_v43 }
 0x21c   : > { %v5570_v10 = vpop.permute.xlu2 %983 }
 0x21d   : > { %10179 = vst [vmem:[#allocation223_spill] sm:$0xff] %v5570_v10 }
 0x21f   : > { %1803 = vperm.xlu0 %4291, %v5166_v50  }
 0x221   : > { %v5573_v13 = vpop.permute.xlu0 %1028 }
 0x222   : > { %10180 = vst [vmem:[#allocation224_spill] sm:$0xff] %v5573_v13 }
 0x223   : > { %v5575_v31 = vpop.permute.xlu1 %989 }
 0x224   : > { %10181 = vst [vmem:[#allocation225_spill] sm:$0xff] %v5575_v31  ;;  %v5577_v36 = vpop.permute.xlu2 %992 }
 0x225   : > { %10182 = vst [vmem:[#allocation226_spill] sm:$0xff] %v5577_v36 }
 0x227   : > { %1823 = vperm.xlu0 %4291, %v5214_v61  }
 0x229   : > { %v1083_v52 = vpop.permute.xlu0 %1082 }
 0x22a   : > { %v5581_v63 = vmul.f32 %v1083_v52, %v10160_v40  ;;  %v10197_v40 = vld [vmem:[#allocation21_spill] sm:$0xff] }
 0x22b   : > { %v5583_v3 = vpop.permute.xlu1 %995 }
 0x22c   : > { %10183 = vst [vmem:[#allocation227_spill] sm:$0xff] %v5583_v3  ;;  %v5585_v4 = vpop.permute.xlu2 %998  ;;  %1154 = vperm.xlu1 %4301, %v5581_v63  }
 0x22d   : > { %10184 = vst [vmem:[#allocation228_spill] sm:$0xff] %v5585_v4 }
 0x22f   : > { %1835 = vperm.xlu0 %4291, %v5236_v49  }
 0x231   : > { %v5603_v4 = vpop.permute.xlu0 %1088 }
 0x232   : > { %10191 = vst [vmem:[#allocation235_spill] sm:$0xff] %v5603_v4 }
 0x233   : > { %v5589_v50 = vpop.permute.xlu1 %1004 }
 0x234   : > { %10185 = vst [vmem:[#allocation229_spill] sm:$0xff] %v5589_v50  ;;  %v5591_v13 = vpop.permute.xlu2 %1007  ;;  %v10193_v50 = vld [vmem:[#allocation20_spill] sm:$0xff] }
 0x235   : > { %10186 = vst [vmem:[#allocation230_spill] sm:$0xff] %v5591_v13 }
 0x237   : > { %1847 = vperm.xlu0 %4291, %v5263_v56   ;;  %v10194_v56 = vld [vmem:[#allocation26_spill] sm:$0xff] }
 0x239   : > { %v5621_v10 = vpop.permute.xlu0 %1094 }
 0x23a   : > { %10196 = vst [vmem:[#allocation237_spill] sm:$0xff] %v5621_v10 }
 0x23b   : > { %v5594_v43 = vpop.permute.xlu1 %1013 }
 0x23c   : > { %10187 = vst [vmem:[#allocation231_spill] sm:$0xff] %v5594_v43  ;;  %v5596_v61 = vpop.permute.xlu2 %1016 }
 0x23d   : > { %10188 = vst [vmem:[#allocation232_spill] sm:$0xff] %v5596_v61  ;;  %v1131_v61 = vmul.f32 %v5603_v4, %v10194_v56 }
 0x23f   : > { %1859 = vperm.xlu0 %4291, %v5289_v59  }
 0x243   : > { %v5599_v36 = vpop.permute.xlu1 %1022 }
 0x244   : > { %10189 = vst [vmem:[#allocation233_spill] sm:$0xff] %v5599_v36  ;;  %v5601_v3 = vpop.permute.xlu2 %1025  ;;  %v10195_v36 = vld [vmem:[#allocation24_spill] sm:$0xff] }
 0x245   : > { %10190 = vst [vmem:[#allocation234_spill] sm:$0xff] %v5601_v3 }
 0x24b   : > { %v5605_v31 = vpop.permute.xlu1 %1078 }
 0x24c   : > { %10192 = vst [vmem:[#allocation236_spill] sm:$0xff] %v5605_v31  ;;  %v5607_v49 = vpop.permute.xlu2 %1080  ;;  %v1126_v13 = vmul.f32 %v5605_v31, %v10193_v50 }
 0x24e   : > { %2007 = vperm.xlu0 %4291, %v1126_v13   ;;  %1144 = vperm.xlu2 %4300, %v1126_v13   ;;  %v10198_v13 = vld [vmem:[#allocation31_spill] sm:$0xff] }
 0x24f   : > { %v1134_v56 = vmul.f32 %v5621_v10, %v10198_v13 }
 0x253   : > { %v5613_v43 = vpop.permute.xlu1 %1084 }
 0x254   : > { %v5615_v59 = vpop.permute.xlu2 %1086  ;;  %v5619_v3 = vmul.f32 %v5613_v43, %v10195_v36  ;;  %v5634_v36 = vpop.permute.xlu0 %1100 }
 0x255   : > { %v5625_v11 = vmul.f32 %v5615_v59, %v10197_v40  ;;  %v10199_v40 = vld [vmem:[#allocation36_spill] sm:$0xff] }
 0x256   : > { %2027 = vperm.xlu0 %4291, %v1131_v61   ;;  %1159 = vperm.xlu2 %4300, %v5619_v3   ;;  %v1137_v23 = vmul.f32 %v5634_v36, %v10199_v40  ;;  %v1384_v40 = vmul.f32 %v1083_v52, %v5228_v22  ;;  %v5684_v52 = vadd.s32 %v5221_v47, %v5113_v14  ;;  %v10201_v14 = vld [vmem:[#allocation53_spill] sm:$0xff] }
 0x257   : > { %1164 = vperm.xlu1 %4301, %v5625_v11  }
 0x25c   : > { %v1093_v4 = vpop.permute.xlu2 %1092  ;;  %v5643_v13 = vpop.permute.xlu0 %1106 }
 0x25d   : > { %v5632_v31 = vmul.f32 %v1093_v4, %v10165_v44  ;;  %v10200_v44 = vld [vmem:[#allocation39_spill] sm:$0xff] }
 0x25e   : > { %2039 = vperm.xlu0 %4291, %v1134_v56   ;;  %1169 = vperm.xlu2 %4300, %v1131_v61   ;;  %v1140_v61 = vmul.f32 %v5643_v13, %v10200_v44  ;;  %v1389_v44 = vmul.f32 %v1093_v4, %v5281_v2  ;;  %v5673_v4 = vadd.s32 %v5326_v9, %v5115_v12 }
 0x25f   : > { %1179 = vperm.xlu1 %4301, %v5632_v31   ;;  %v5698_v12 = vadd.s32 %v5448_v28, %v5117_v8  ;;  %v10202_v8 = vld [vmem:[#allocation65_spill] sm:$0xff] }
 0x264   : > { %v1099_v50 = vpop.permute.xlu2 %1098 }
 0x265   : > { %v5640_v15 = vmul.f32 %v1099_v50, %v10170_v39 }
 0x266   : > { %2051 = vperm.xlu0 %4291, %v1137_v23   ;;  %1184 = vperm.xlu2 %4300, %v1134_v56   ;;  %v5654_v56 = vadd.s32 %v5348_v33, %v5051_v54  ;;  %v1392_v54 = vmul.f32 %v1099_v50, %v5306_v25  ;;  %v5688_v50 = vadd.s32 %v5424_v48, %v5101_v42  ;;  %v5704_v42 = vpop.permute.xlu1 %1090 }
 0x267   : > { %1194 = vperm.xlu1 %4301, %v5640_v15  }
 0x26c   : > { %v1105_v10 = vpop.permute.xlu2 %1104 }
 0x26d   : > { %v5648_v19 = vmul.f32 %v1105_v10, %v10175_v7  ;;  %v5661_v7 = vadd.s32 %v5197_v41, %v5099_v37  ;;  %v5677_v37 = vadd.s32 %v5401_v20, %v5092_v57  ;;  %v5694_v57 = vadd.s32 %v5247_v55, %v5145_v60  ;;  %v10228_v20 = vld [vmem:[#allocation57_spill] sm:$0xff] }
 0x26e   : > { %2063 = vperm.xlu0 %4291, %v1140_v61   ;;  %1199 = vperm.xlu2 %4300, %v1137_v23   ;;  %v5665_v23 = vadd.s32 %v5375_v0, %v5062_v46  ;;  %v1395_v46 = vmul.f32 %v1105_v10, %v5329_v32  ;;  %v9588_v10 = vmov 2   ;;  %v5712_v60 = vadd.s32 %v5469_v58, %v5131_v27 }
 0x26f   : > { %1209 = vperm.xlu1 %4301, %v5648_v19   ;;  %v5750_v55 = vmul.f32 %v5704_v42, %v5202_v18 }
 0x276   : > { %2223 = vperm.xlu0 %4291, %v1384_v40   ;;  %1214 = vperm.xlu2 %4300, %v1140_v61   ;;  %v5708_v61 = vadd.s32 %v5273_v30, %v5170_v45  ;;  %v5725_v45 = vmul.f32 %v5607_v49, %v5152_v34  ;;  %v10203_v30 = vld [vmem:[#allocation73_spill] sm:$0xff] }
 0x277   : > { %4302 = vset.pattern.permute.xlu1 %v10018_v26 }
 0x278   : > { %1303 = vperm.xlu1 %4302, %v5654_v56  }
 0x27e   : > { %2243 = vperm.xlu0 %4291, %v1389_v44   ;;  %4303 = vset.pattern.permute.xlu2 %v10018_v26 }
 0x27f   : > { %1306 = vperm.xlu2 %4303, %v5661_v7  }
 0x280   : > { %1312 = vperm.xlu1 %4302, %v5665_v23  }
 0x286   : > { %2255 = vperm.xlu0 %4291, %v1392_v54  }
 0x287   : > { %1315 = vperm.xlu2 %4303, %v5673_v4  }
 0x288   : > { %1318 = vperm.xlu1 %4302, %v5677_v37  }
 0x28e   : > { %2267 = vperm.xlu0 %4291, %v1395_v46  }
 0x28f   : > { %1321 = vperm.xlu2 %4303, %v5684_v52  }
 0x290   : > { %1327 = vperm.xlu1 %4302, %v5688_v50  }
 0x296   : > { %4322 = vset.pattern.permute.xlu0 %v9588_v10  ;;  %v5721_v10 = vadd.s32 %v5298_v6, %v5199_v1  ;;  %v5737_v1 = vmul.f32 %v5613_v43, %v5176_v53  ;;  %v10205_v6 = vld [vmem:[#allocation81_spill] sm:$0xff]  ;;  %v10207_v43 = vld [vmem:[#allocation86_spill] sm:$0xff] }
 0x297   : > { %1546 = vperm.xlu0 %4322, %v10201_v14   ;;  %1330 = vperm.xlu2 %4303, %v5694_v57   ;;  %v5717_v14 = vpop.permute.xlu1 %1096 }
 0x298   : > { %1336 = vperm.xlu1 %4302, %v5698_v12  }
 0x29f   : > { %1561 = vperm.xlu0 %4322, %v10202_v8   ;;  %1339 = vperm.xlu2 %4303, %v5708_v61   ;;  %v5733_v8 = vpop.permute.xlu1 %1102 }
 0x2a0   : > { %1345 = vperm.xlu1 %4302, %v5712_v60  }
 0x2a7   : > { %1570 = vperm.xlu0 %4322, %v10203_v30   ;;  %1348 = vperm.xlu2 %4303, %v5721_v10   ;;  %v5752_v47 = vpop.permute.xlu1 %1108 }
 0x2a8   : > { %4304 = vset.pattern.permute.xlu1 %v10000_v16  ;;  %v5730_v27 = vpop.permute.xlu2 %1144 }
 0x2a9   : > { %10204 = vst [vmem:[#allocation53_spill] sm:$0xff] %v5730_v27  ;;  %1405 = vperm.xlu1 %4304, %v5725_v45   ;;  %v5746_v27 = vmul.f32 %v5615_v59, %v5255_v29  ;;  %v10209_v59 = vld [vmem:[#allocation137_spill] sm:$0xff] }
 0x2af   : > { %1579 = vperm.xlu0 %4322, %v10205_v6   ;;  %4305 = vset.pattern.permute.xlu2 %v10000_v16  ;;  %v5766_v41 = vpop.permute.xlu1 %1154 }
 0x2b0   : > { %1410 = vperm.xlu2 %4305, %v1384_v40   ;;  %v5741_v30 = vpop.permute.xlu2 %1159  ;;  %v5761_v40 = vmul.f32 %v5717_v14, %v5225_v38  ;;  %10211 = vst [vmem:[#allocation86_spill] sm:$0xff] %v5766_v41 }
 0x2b1   : > { %10206 = vst [vmem:[#allocation65_spill] sm:$0xff] %v5741_v30  ;;  %1415 = vperm.xlu1 %4304, %v5737_v1  }
 0x2b7   : > { %1588 = vperm.xlu0 %4322, %v10207_v43   ;;  %v5771_v43 = vmul.f32 %v5733_v8, %v5252_v21 }
 0x2b8   : > { %1420 = vperm.xlu2 %4305, %v5746_v27   ;;  %v5756_v6 = vpop.permute.xlu2 %1169 }
 0x2b9   : > { %10208 = vst [vmem:[#allocation73_spill] sm:$0xff] %v5756_v6  ;;  %1430 = vperm.xlu1 %4304, %v5750_v55  }
 0x2bf   : > { %1719 = vperm.xlu0 %4322, %v10209_v59   ;;  %v10214_v59 = vld [vmem:[#allocation151_spill] sm:$0xff] }
 0x2c0   : > { %1435 = vperm.xlu2 %4305, %v1389_v44   ;;  %v5764_v30 = vpop.permute.xlu2 %1184  ;;  %v5781_v44 = vmul.f32 %v5752_v47, %v5278_v51 }
 0x2c1   : > { %10210 = vst [vmem:[#allocation81_spill] sm:$0xff] %v5764_v30  ;;  %1445 = vperm.xlu1 %4304, %v5761_v40  }
 0x2c7   : > { %1734 = vperm.xlu0 %4322, %v5096_v62   ;;  %v10217_v62 = vld [vmem:[#allocation153_spill] sm:$0xff] }
 0x2c8   : > { %1450 = vperm.xlu2 %4305, %v1392_v54   ;;  %v5774_v6 = vpop.permute.xlu2 %1199  ;;  %v10218_v54 = vmov 2  }
 0x2c9   : > { %10212 = vst [vmem:[#allocation137_spill] sm:$0xff] %v5774_v6  ;;  %1460 = vperm.xlu1 %4304, %v5771_v43   ;;  %v5777_v58 = vpop.permute.xlu1 %1164 }
 0x2ca   : > { %10213 = vst [vmem:[#allocation238_spill] sm:$0xff] %v5777_v58  ;;  %v10220_v58 = vld [vmem:[#allocation47_spill] sm:$0xff] }
 0x2cf   : > { %1743 = vperm.xlu0 %4322, %v10214_v59   ;;  %v10222_v59 = vld [vmem:[#allocation46_spill] sm:$0xff] }
 0x2d0   : > { %1465 = vperm.xlu2 %4305, %v1395_v46   ;;  %v5784_v30 = vpop.permute.xlu2 %1214  ;;  %v5798_v46 = vpop.permute.xlu0 %1309 }
 0x2d1   : > { %10215 = vst [vmem:[#allocation151_spill] sm:$0xff] %v5784_v30  ;;  %1475 = vperm.xlu1 %4304, %v5781_v44   ;;  %v5787_v41 = vpop.permute.xlu1 %1179  ;;  %v10224_v30 = vld [vmem:[#allocation156_spill] sm:$0xff] }
 0x2d2   : > { %10216 = vst [vmem:[#allocation239_spill] sm:$0xff] %v5787_v41  ;;  %v10226_v41 = vld [vmem:[#allocation52_spill] sm:$0xff] }
 0x2d3   : > { %10223 = vst [vmem:[#allocation46_spill] sm:$0xff] %v5798_v46 }
 0x2d7   : > { %1752 = vperm.xlu0 %4322, %v10217_v62  }
 0x2d8   : > { %4306 = vset.pattern.permute.xlu2 %v10218_v54  ;;  %v5807_v9 = vpop.permute.xlu0 %1324 }
 0x2d9   : > { %4307 = vset.pattern.permute.xlu1 %v10218_v54  ;;  %v5792_v6 = vpop.permute.xlu1 %1194  ;;  %1543 = vperm.xlu2 %4306, %v10220_v58   ;;  %v5795_v28 = vpop.permute.xlu2 %1306  ;;  %10229 = vst [vmem:[#allocation57_spill] sm:$0xff] %v5807_v9  ;;  %v10231_v58 = vld [vmem:[#allocation58_spill] sm:$0xff] }
 0x2da   : > { %10219 = vst [vmem:[#allocation153_spill] sm:$0xff] %v5792_v6  ;;  %1549 = vperm.xlu1 %4307, %v10222_v59   ;;  %v10230_v6 = vld [vmem:[#allocation44_spill] sm:$0xff]  ;;  %v10233_v59 = vld [vmem:[#allocation61_spill] sm:$0xff] }
 0x2db   : > { %10221 = vst [vmem:[#allocation47_spill] sm:$0xff] %v5795_v28 }
 0x2df   : > { %1761 = vperm.xlu0 %4322, %v10224_v30   ;;  %v10235_v30 = vld [vmem:[#allocation60_spill] sm:$0xff] }
 0x2e1   : > { %v5801_v48 = vpop.permute.xlu1 %1209  ;;  %1552 = vperm.xlu2 %4306, %v10226_v41   ;;  %v5804_v62 = vpop.permute.xlu2 %1315  ;;  %v10237_v41 = vld [vmem:[#allocation66_spill] sm:$0xff] }
 0x2e2   : > { %10225 = vst [vmem:[#allocation156_spill] sm:$0xff] %v5801_v48  ;;  %1555 = vperm.xlu1 %4307, %v10228_v20   ;;  %v5817_v48 = vpop.permute.xlu0 %1333  ;;  %v10239_v20 = vld [vmem:[#allocation68_spill] sm:$0xff] }
 0x2e3   : > { %10227 = vst [vmem:[#allocation52_spill] sm:$0xff] %v5804_v62 }
 0x2e4   : > { %10236 = vst [vmem:[#allocation61_spill] sm:$0xff] %v5817_v48  ;;  %v10247_v48 = vld [vmem:[#allocation76_spill] sm:$0xff] }
 0x2e7   : > { %1933 = vperm.xlu0 %4322, %v10230_v6   ;;  %v10241_v6 = vld [vmem:[#allocation67_spill] sm:$0xff] }
 0x2e9   : > { %1558 = vperm.xlu2 %4306, %v10231_v58   ;;  %v5811_v28 = vpop.permute.xlu2 %1321  ;;  %v10242_v58 = vld [vmem:[#allocation74_spill] sm:$0xff] }
 0x2ea   : > { %10232 = vst [vmem:[#allocation44_spill] sm:$0xff] %v5811_v28  ;;  %1564 = vperm.xlu1 %4307, %v10233_v59   ;;  %v5814_v46 = vpop.permute.xlu1 %1303  ;;  %v10244_v59 = vld [vmem:[#allocation77_spill] sm:$0xff] }
 0x2eb   : > { %10234 = vst [vmem:[#allocation58_spill] sm:$0xff] %v5814_v46 }
 0x2ef   : > { %1948 = vperm.xlu0 %4322, %v10235_v30   ;;  %v5832_v30 = vpop.permute.xlu0 %1342 }
 0x2f0   : > { %10246 = vst [vmem:[#allocation74_spill] sm:$0xff] %v5832_v30 }
 0x2f1   : > { %1567 = vperm.xlu2 %4306, %v10237_v41   ;;  %v5820_v62 = vpop.permute.xlu2 %1330  ;;  %v10248_v41 = vld [vmem:[#allocation82_spill] sm:$0xff] }
 0x2f2   : > { %10238 = vst [vmem:[#allocation60_spill] sm:$0xff] %v5820_v62  ;;  %1573 = vperm.xlu1 %4307, %v10239_v20   ;;  %v5823_v9 = vpop.permute.xlu1 %1312 }
 0x2f3   : > { %10240 = vst [vmem:[#allocation66_spill] sm:$0xff] %v5823_v9 }
 0x2f7   : > { %1957 = vperm.xlu0 %4322, %v10241_v6   ;;  %v10251_v6 = vld [vmem:[#allocation88_spill] sm:$0xff] }
 0x2f9   : > { %1576 = vperm.xlu2 %4306, %v10242_v58   ;;  %v5827_v28 = vpop.permute.xlu2 %1339  ;;  %v5842_v58 = vpop.permute.xlu0 %1631 }
 0x2fa   : > { %10243 = vst [vmem:[#allocation68_spill] sm:$0xff] %v5827_v28  ;;  %1582 = vperm.xlu1 %4307, %v10244_v59   ;;  %v5830_v46 = vpop.permute.xlu1 %1318  ;;  %v10254_v28 = vld [vmem:[#allocation91_spill] sm:$0xff] }
 0x2fb   : > { %10245 = vst [vmem:[#allocation67_spill] sm:$0xff] %v5830_v46 }
 0x2fc   : > { %10252 = vst [vmem:[#allocation82_spill] sm:$0xff] %v5842_v58 }
 0x2ff   : > { %1966 = vperm.xlu0 %4322, %v10247_v48  }
 0x301   : > { %1585 = vperm.xlu2 %4306, %v10248_v41   ;;  %v5836_v62 = vpop.permute.xlu2 %1348  ;;  %v10256_v41 = vld [vmem:[#allocation92_spill] sm:$0xff] }
 0x302   : > { %10249 = vst [vmem:[#allocation77_spill] sm:$0xff] %v5836_v62  ;;  %4308 = vset.pattern.permute.xlu1 %v10018_v26  ;;  %v5839_v20 = vpop.permute.xlu1 %1327  ;;  %v5852_v62 = vpop.permute.xlu0 %1651 }
 0x303   : > { %10250 = vst [vmem:[#allocation76_spill] sm:$0xff] %v5839_v20  ;;  %1623 = vperm.xlu1 %4308, %v10251_v6   ;;  %v10259_v6 = vld [vmem:[#allocation95_spill] sm:$0xff] }
 0x304   : > { %10257 = vst [vmem:[#allocation92_spill] sm:$0xff] %v5852_v62 }
 0x307   : > { %2138 = vperm.xlu0 %4322, %v5661_v7   ;;  %v10261_v7 = vld [vmem:[#allocation94_spill] sm:$0xff] }
 0x309   : > { %4309 = vset.pattern.permute.xlu2 %v10018_v26 }
 0x30a   : > { %v5846_v59 = vpop.permute.xlu1 %1336  ;;  %1627 = vperm.xlu2 %4309, %v10254_v28   ;;  %v5849_v48 = vpop.permute.xlu2 %1410  ;;  %v10263_v28 = vld [vmem:[#allocation99_spill] sm:$0xff] }
 0x30b   : > { %10253 = vst [vmem:[#allocation88_spill] sm:$0xff] %v5846_v59  ;;  %1635 = vperm.xlu1 %4308, %v10256_v41   ;;  %v5862_v59 = vpop.permute.xlu0 %1663  ;;  %v10265_v41 = vld [vmem:[#allocation98_spill] sm:$0xff] }
 0x30c   : > { %10255 = vst [vmem:[#allocation91_spill] sm:$0xff] %v5849_v48  ;;  %v10331_v48 = vld [vmem:[#allocation101_spill] sm:$0xff] }
 0x30d   : > { %10262 = vst [vmem:[#allocation94_spill] sm:$0xff] %v5862_v59 }
 0x30f   : > { %2153 = vperm.xlu0 %4322, %v5684_v52   ;;  %v10267_v52 = vld [vmem:[#allocation103_spill] sm:$0xff] }
 0x312   : > { %v5855_v30 = vpop.permute.xlu1 %1345  ;;  %1639 = vperm.xlu2 %4309, %v10259_v6   ;;  %v5858_v58 = vpop.permute.xlu2 %1420 }
 0x313   : > { %10258 = vst [vmem:[#allocation240_spill] sm:$0xff] %v5855_v30  ;;  %1643 = vperm.xlu1 %4308, %v10261_v7   ;;  %v5874_v30 = vpop.permute.xlu0 %1675  ;;  %v10270_v7 = vld [vmem:[#allocation102_spill] sm:$0xff] }
 0x314   : > { %10260 = vst [vmem:[#allocation95_spill] sm:$0xff] %v5858_v58  ;;  %v10288_v58 = vld [vmem:[#allocation152_spill] sm:$0xff] }
 0x315   : > { %10269 = vst [vmem:[#allocation241_spill] sm:$0xff] %v5874_v30 }
 0x317   : > { %2162 = vperm.xlu0 %4322, %v5694_v57  }
 0x31a   : > { %1647 = vperm.xlu2 %4309, %v10263_v28   ;;  %v5865_v46 = vpop.permute.xlu2 %1435  ;;  %v10272_v28 = vld [vmem:[#allocation107_spill] sm:$0xff] }
 0x31b   : > { %10264 = vst [vmem:[#allocation99_spill] sm:$0xff] %v5865_v46  ;;  %1655 = vperm.xlu1 %4308, %v10265_v41   ;;  %v5868_v62 = vpop.permute.xlu1 %1405  ;;  %v10274_v41 = vld [vmem:[#allocation106_spill] sm:$0xff] }
 0x31c   : > { %10266 = vst [vmem:[#allocation98_spill] sm:$0xff] %v5868_v62 }
 0x31f   : > { %2171 = vperm.xlu0 %4322, %v5708_v61   ;;  %v5886_v61 = vpop.permute.xlu0 %1803 }
 0x320   : > { %10276 = vst [vmem:[#allocation242_spill] sm:$0xff] %v5886_v61  ;;  %v10285_v61 = vld [vmem:[#allocation140_spill] sm:$0xff] }
 0x322   : > { %1659 = vperm.xlu2 %4309, %v10267_v52   ;;  %v5872_v6 = vpop.permute.xlu2 %1450  ;;  %v10277_v52 = vld [vmem:[#allocation108_spill] sm:$0xff] }
 0x323   : > { %10268 = vst [vmem:[#allocation103_spill] sm:$0xff] %v5872_v6  ;;  %1667 = vperm.xlu1 %4308, %v10270_v7   ;;  %v5877_v57 = vpop.permute.xlu1 %1415  ;;  %v10280_v6 = vld [vmem:[#allocation150_spill] sm:$0xff] }
 0x324   : > { %10271 = vst [vmem:[#allocation102_spill] sm:$0xff] %v5877_v57 }
 0x327   : > { %2180 = vperm.xlu0 %4322, %v5721_v10   ;;  %v5895_v10 = vpop.permute.xlu0 %1823 }
 0x328   : > { %10281 = vst [vmem:[#allocation150_spill] sm:$0xff] %v5895_v10 }
 0x32a   : > { %1671 = vperm.xlu2 %4309, %v10272_v28   ;;  %v5881_v59 = vpop.permute.xlu2 %1465 }
 0x32b   : > { %10273 = vst [vmem:[#allocation107_spill] sm:$0xff] %v5881_v59  ;;  %1679 = vperm.xlu1 %4308, %v10274_v41   ;;  %v5884_v46 = vpop.permute.xlu1 %1430  ;;  %v10283_v41 = vld [vmem:[#allocation148_spill] sm:$0xff] }
 0x32c   : > { %10275 = vst [vmem:[#allocation106_spill] sm:$0xff] %v5884_v46 }
 0x332   : > { %1683 = vperm.xlu2 %4309, %v10277_v52   ;;  %v5904_v52 = vpop.permute.xlu0 %1835 }
 0x333   : > { %4310 = vset.pattern.permute.xlu1 %v10218_v54  ;;  %v5890_v30 = vpop.permute.xlu1 %1445  ;;  %v5892_v7 = vpop.permute.xlu2 %1543  ;;  %10286 = vst [vmem:[#allocation140_spill] sm:$0xff] %v5904_v52 }
 0x334   : > { %10278 = vst [vmem:[#allocation108_spill] sm:$0xff] %v5890_v30  ;;  %1722 = vperm.xlu1 %4310, %v10280_v6   ;;  %v10290_v6 = vld [vmem:[#allocation154_spill] sm:$0xff]  ;;  %v10292_v30 = vld [vmem:[#allocation155_spill] sm:$0xff] }
 0x335   : > { %10279 = vst [vmem:[#allocation243_spill] sm:$0xff] %v5892_v7 }
 0x33a   : > { %4311 = vset.pattern.permute.xlu2 %v10218_v54  ;;  %v5912_v10 = vpop.permute.xlu0 %1847 }
 0x33b   : > { %v5898_v28 = vpop.permute.xlu1 %1460  ;;  %1725 = vperm.xlu2 %4311, %v10283_v41   ;;  %v5901_v59 = vpop.permute.xlu2 %1552  ;;  %10291 = vst [vmem:[#allocation154_spill] sm:$0xff] %v5912_v10  ;;  %v10294_v41 = vld [vmem:[#allocation157_spill] sm:$0xff] }
 0x33c   : > { %10282 = vst [vmem:[#allocation244_spill] sm:$0xff] %v5898_v28  ;;  %1728 = vperm.xlu1 %4310, %v10285_v61   ;;  %v10296_v61 = vld [vmem:[#allocation158_spill] sm:$0xff] }
 0x33d   : > { %10284 = vst [vmem:[#allocation148_spill] sm:$0xff] %v5901_v59 }
 0x343   : > { %v5906_v46 = vpop.permute.xlu1 %1475  ;;  %1731 = vperm.xlu2 %4311, %v10288_v58   ;;  %v5909_v7 = vpop.permute.xlu2 %1558 }
 0x344   : > { %10287 = vst [vmem:[#allocation245_spill] sm:$0xff] %v5906_v46  ;;  %1737 = vperm.xlu1 %4310, %v10290_v6   ;;  %v10298_v46 = vld [vmem:[#allocation159_spill] sm:$0xff]  ;;  %v10301_v6 = vld [vmem:[#allocation160_spill] sm:$0xff] }
 0x345   : > { %10289 = vst [vmem:[#allocation152_spill] sm:$0xff] %v5909_v7  ;;  %v5926_v7 = vpop.permute.xlu0 %1859 }
 0x346   : > { %10300 = vst [vmem:[#allocation246_spill] sm:$0xff] %v5926_v7 }
 0x34b   : > { %1740 = vperm.xlu2 %4311, %v10292_v30   ;;  %v5915_v28 = vpop.permute.xlu2 %1567  ;;  %v10303_v30 = vld [vmem:[#allocation163_spill] sm:$0xff] }
 0x34c   : > { %10293 = vst [vmem:[#allocation155_spill] sm:$0xff] %v5915_v28  ;;  %1746 = vperm.xlu1 %4310, %v10294_v41   ;;  %v5918_v59 = vpop.permute.xlu1 %1549 }
 0x34d   : > { %10295 = vst [vmem:[#allocation157_spill] sm:$0xff] %v5918_v59  ;;  %v5934_v41 = vpop.permute.xlu0 %2007 }
 0x34e   : > { %10305 = vst [vmem:[#allocation247_spill] sm:$0xff] %v5934_v41 }
 0x353   : > { %1749 = vperm.xlu2 %4311, %v10296_v61   ;;  %v5921_v52 = vpop.permute.xlu2 %1576  ;;  %v10306_v61 = vld [vmem:[#allocation87_spill] sm:$0xff] }
 0x354   : > { %10297 = vst [vmem:[#allocation158_spill] sm:$0xff] %v5921_v52  ;;  %1755 = vperm.xlu1 %4310, %v10298_v46   ;;  %v5924_v58 = vpop.permute.xlu1 %1555  ;;  %v5938_v59 = vmul.f32 %v10306_v61, %v5437_v5  ;;  %v10314_v61 = vld [vmem:[#allocation161_spill] sm:$0xff] }
 0x355   : > { %10299 = vst [vmem:[#allocation159_spill] sm:$0xff] %v5924_v58  ;;  %v10317_v58 = vld [vmem:[#allocation23_spill] sm:$0xff] }
 0x356   : > { %10307 = vst [vmem:[#allocation87_spill] sm:$0xff] %v5938_v59 }
 0x35b   : > { %1758 = vperm.xlu2 %4311, %v10301_v6   ;;  %v5929_v10 = vpop.permute.xlu2 %1585  ;;  %v10310_v6 = vld [vmem:[#allocation167_spill] sm:$0xff] }
 0x35c   : > { %10302 = vst [vmem:[#allocation160_spill] sm:$0xff] %v5929_v10  ;;  %1764 = vperm.xlu1 %4310, %v10303_v30   ;;  %v5932_v28 = vpop.permute.xlu1 %1564  ;;  %v5948_v30 = vpop.permute.xlu0 %2027 }
 0x35d   : > { %10304 = vst [vmem:[#allocation163_spill] sm:$0xff] %v5932_v28  ;;  %v10315_v28 = vld [vmem:[#allocation172_spill] sm:$0xff] }
 0x35e   : > { %10311 = vst [vmem:[#allocation167_spill] sm:$0xff] %v5948_v30 }
 0x363   : > { %4312 = vset.pattern.permute.xlu2 %v10018_v26 }
 0x364   : > { %4313 = vset.pattern.permute.xlu1 %v10018_v26  ;;  %v5942_v46 = vpop.permute.xlu1 %1573  ;;  %v5944_v7 = vpop.permute.xlu2 %1627  ;;  %1799 = vperm.xlu2 %4312, %v5938_v59  }
 0x365   : > { %10308 = vst [vmem:[#allocation248_spill] sm:$0xff] %v5942_v46  ;;  %1807 = vperm.xlu1 %4313, %v10310_v6   ;;  %v5956_v41 = vpop.permute.xlu0 %2039  ;;  %v10318_v46 = vld [vmem:[#allocation90_spill] sm:$0xff]  ;;  %v10321_v6 = vld [vmem:[#allocation175_spill] sm:$0xff] }
 0x366   : > { %10309 = vst [vmem:[#allocation249_spill] sm:$0xff] %v5944_v7  ;;  %v5960_v57 = vmul.f32 %v10318_v46, %v10317_v58  ;;  %v10328_v46 = vld [vmem:[#allocation178_spill] sm:$0xff] }
 0x367   : > { %10316 = vst [vmem:[#allocation161_spill] sm:$0xff] %v5956_v41 }
 0x368   : > { %10319 = vst [vmem:[#allocation172_spill] sm:$0xff] %v5960_v57 }
 0x36c   : > { %v5950_v10 = vpop.permute.xlu1 %1582  ;;  %v5952_v52 = vpop.permute.xlu2 %1639  ;;  %1811 = vperm.xlu2 %4312, %v10314_v61  }
 0x36d   : > { %10312 = vst [vmem:[#allocation250_spill] sm:$0xff] %v5950_v10  ;;  %1815 = vperm.xlu1 %4313, %v10315_v28   ;;  %v10323_v10 = vld [vmem:[#allocation28_spill] sm:$0xff]  ;;  %v5972_v61 = vpop.permute.xlu0 %2051 }
 0x36e   : > { %10313 = vst [vmem:[#allocation251_spill] sm:$0xff] %v5952_v52  ;;  %v10324_v52 = vld [vmem:[#allocation96_spill] sm:$0xff] }
 0x36f   : > { %v5970_v9 = vmul.f32 %v10324_v52, %v10323_v10  ;;  %10326 = vst [vmem:[#allocation28_spill] sm:$0xff] %v5972_v61 }
 0x371   : > { %10325 = vst [vmem:[#allocation175_spill] sm:$0xff] %v5970_v9 }
 0x374   : > { %v5962_v7 = vpop.permute.xlu2 %1647  ;;  %1819 = vperm.xlu2 %4312, %v5960_v57   ;;  %v10516_v57 = vld [vmem:[#allocation39_spill] sm:$0xff] }
 0x375   : > { %10320 = vst [vmem:[#allocation23_spill] sm:$0xff] %v5962_v7  ;;  %1827 = vperm.xlu1 %4313, %v10321_v6   ;;  %v5966_v30 = vpop.permute.xlu1 %1623  ;;  %v10330_v7 = vld [vmem:[#allocation33_spill] sm:$0xff]  ;;  %v5987_v52 = vpop.permute.xlu0 %2063 }
 0x376   : > { %10322 = vst [vmem:[#allocation90_spill] sm:$0xff] %v5966_v30  ;;  %v5982_v20 = vmul.f32 %v10331_v48, %v10330_v7  ;;  %v10335_v30 = vld [vmem:[#allocation180_spill] sm:$0xff] }
 0x377   : > { %10334 = vst [vmem:[#allocation253_spill] sm:$0xff] %v5987_v52 }
 0x378   : > { %10332 = vst [vmem:[#allocation101_spill] sm:$0xff] %v5982_v20 }
 0x37c   : > { %v5974_v28 = vpop.permute.xlu2 %1659  ;;  %1831 = vperm.xlu2 %4312, %v5970_v9  }
 0x37d   : > { %10327 = vst [vmem:[#allocation96_spill] sm:$0xff] %v5974_v28  ;;  %1839 = vperm.xlu1 %4313, %v10328_v46   ;;  %v5978_v41 = vpop.permute.xlu1 %1635  ;;  %v10337_v28 = vld [vmem:[#allocation105_spill] sm:$0xff] }
 0x37e   : > { %10329 = vst [vmem:[#allocation178_spill] sm:$0xff] %v5978_v41  ;;  %v5994_v62 = vmul.f32 %v10337_v28, %v5428_v35  ;;  %v6003_v41 = vpop.permute.xlu0 %2223  ;;  %v10345_v28 = vld [vmem:[#allocation164_spill] sm:$0xff] }
 0x380   : > { %10338 = vst [vmem:[#allocation105_spill] sm:$0xff] %v5994_v62 }
 0x384   : > { %v5984_v6 = vpop.permute.xlu2 %1671  ;;  %1843 = vperm.xlu2 %4312, %v5982_v20  }
 0x385   : > { %10333 = vst [vmem:[#allocation252_spill] sm:$0xff] %v5984_v6  ;;  %1851 = vperm.xlu1 %4313, %v10335_v30   ;;  %v5990_v61 = vpop.permute.xlu1 %1643  ;;  %v10341_v6 = vld [vmem:[#allocation45_spill] sm:$0xff] }
 0x386   : > { %10336 = vst [vmem:[#allocation180_spill] sm:$0xff] %v5990_v61  ;;  %v10346_v61 = vld [vmem:[#allocation51_spill] sm:$0xff] }
 0x387   : > { %10342 = vst [vmem:[#allocation45_spill] sm:$0xff] %v6003_v41 }
 0x38c   : > { %v5996_v46 = vpop.permute.xlu2 %1683  ;;  %1855 = vperm.xlu2 %4312, %v5994_v62  }
 0x38d   : > { %10339 = vst [vmem:[#allocation254_spill] sm:$0xff] %v5996_v46  ;;  %4314 = vset.pattern.permute.xlu1 %v10218_v54  ;;  %v6000_v48 = vpop.permute.xlu1 %1655  ;;  %v6012_v46 = vpop.permute.xlu0 %2243 }
 0x38e   : > { %10340 = vst [vmem:[#allocation255_spill] sm:$0xff] %v6000_v48  ;;  %1927 = vperm.xlu1 %4314, %v10341_v6   ;;  %v10350_v48 = vld [vmem:[#allocation41_spill] sm:$0xff]  ;;  %v10351_v6 = vld [vmem:[#allocation50_spill] sm:$0xff] }
 0x38f   : > { %10347 = vst [vmem:[#allocation164_spill] sm:$0xff] %v6012_v46 }
 0x394   : > { %4315 = vset.pattern.permute.xlu2 %v10218_v54 }
 0x395   : > { %v6006_v30 = vpop.permute.xlu1 %1667  ;;  %v6008_v52 = vpop.permute.xlu2 %1725  ;;  %1930 = vperm.xlu2 %4315, %v10345_v28  }
 0x396   : > { %10343 = vst [vmem:[#allocation256_spill] sm:$0xff] %v6006_v30  ;;  %1936 = vperm.xlu1 %4314, %v10346_v61   ;;  %v6020_v41 = vpop.permute.xlu0 %2255  ;;  %v10354_v30 = vld [vmem:[#allocation166_spill] sm:$0xff]  ;;  %v10357_v61 = vld [vmem:[#allocation3_spill] sm:$0xff] }
 0x397   : > { %10344 = vst [vmem:[#allocation257_spill] sm:$0xff] %v6008_v52  ;;  %v10355_v52 = vld [vmem:[#allocation59_spill] sm:$0xff]  ;;  %2342 = vrot.lane.b32.xlu0 %v10357_v61, %s4363_s18 }
 0x398   : > { %10352 = vst [vmem:[#allocation41_spill] sm:$0xff] %v6020_v41  ;;  %v10364_v41 = vld [vmem:[#allocation75_spill] sm:$0xff] }
 0x39d   : > { %v6014_v62 = vpop.permute.xlu1 %1679  ;;  %v6016_v20 = vpop.permute.xlu2 %1731  ;;  %1939 = vperm.xlu2 %4315, %v10350_v48   ;;  %v10360_v48 = vld [vmem:[#allocation171_spill] sm:$0xff] }
 0x39e   : > { %10348 = vst [vmem:[#allocation51_spill] sm:$0xff] %v6014_v62  ;;  %1942 = vperm.xlu1 %4314, %v10351_v6   ;;  %v6030_v62 = vpop.permute.xlu0 %2267 }
 0x39f   : > { %10349 = vst [vmem:[#allocation258_spill] sm:$0xff] %v6016_v20 }
 0x3a0   : > { %10358 = vst [vmem:[#allocation59_spill] sm:$0xff] %v6030_v62 }
 0x3a5   : > { %v6022_v9 = vpop.permute.xlu2 %1740  ;;  %1945 = vperm.xlu2 %4315, %v10354_v30   ;;  %v10362_v30 = vld [vmem:[#allocation4_spill] sm:$0xff] }
 0x3a6   : > { %10353 = vst [vmem:[#allocation50_spill] sm:$0xff] %v6022_v9  ;;  %1951 = vperm.xlu1 %4314, %v10355_v52   ;;  %v6026_v28 = vpop.permute.xlu1 %1722  ;;  %2348 = vrot.lane.b32.xlu0 %v10362_v30, %s4363_s18  ;;  %v6046_v62 = vpop.permute.xlu0 %1546  ;;  %v10370_v9 = vld [vmem:[#allocation83_spill] sm:$0xff] }
 0x3a7   : > { %10356 = vst [vmem:[#allocation166_spill] sm:$0xff] %v6026_v28 }
 0x3a8   : > { %10366 = vst [vmem:[#allocation259_spill] sm:$0xff] %v6046_v62 }
 0x3ad   : > { %v6032_v46 = vpop.permute.xlu2 %1749  ;;  %1954 = vperm.xlu2 %4315, %v10360_v48   ;;  %v10368_v48 = vld [vmem:[#allocation16_spill] sm:$0xff] }
 0x3ae   : > { %10359 = vst [vmem:[#allocation3_spill] sm:$0xff] %v6032_v46  ;;  %1960 = vperm.xlu1 %4314, %v5457_v24   ;;  %v6036_v6 = vpop.permute.xlu1 %1728  ;;  %v10367_v46 = vld [vmem:[#allocation7_spill] sm:$0xff]  ;;  %v6052_v24 = vmul.f32 %v5607_v49, %v10368_v48  ;;  %v10377_v49 = vld [vmem:[#allocation13_spill] sm:$0xff] }
 0x3af   : > { %10361 = vst [vmem:[#allocation171_spill] sm:$0xff] %v6036_v6  ;;  %2354 = vrot.lane.b32.xlu0 %v10367_v46, %s4363_s18 }
 0x3b0   : > { %10369 = vst [vmem:[#allocation7_spill] sm:$0xff] %v6052_v24 }
 0x3b5   : > { %v6040_v52 = vpop.permute.xlu2 %1758  ;;  %1963 = vperm.xlu2 %4315, %v10364_v41  }
 0x3b6   : > { %10363 = vst [vmem:[#allocation4_spill] sm:$0xff] %v6040_v52  ;;  %1969 = vperm.xlu1 %4314, %v5478_v17   ;;  %v6044_v61 = vpop.permute.xlu1 %1737  ;;  %v6061_v17 = vpop.permute.xlu0 %1561  ;;  %v10374_v52 = vld [vmem:[#allocation10_spill] sm:$0xff] }
 0x3b7   : > { %10365 = vst [vmem:[#allocation75_spill] sm:$0xff] %v6044_v61  ;;  %2360 = vrot.lane.b32.xlu0 %v10374_v52, %s4363_s18  ;;  %v10379_v61 = vld [vmem:[#allocation29_spill] sm:$0xff] }
 0x3b8   : > { %10373 = vst [vmem:[#allocation261_spill] sm:$0xff] %v6061_v17  ;;  %v6078_v17 = vmul.f32 %v5704_v42, %v10379_v61 }
 0x3ba   : > { %10380 = vst [vmem:[#allocation263_spill] sm:$0xff] %v6078_v17 }
 0x3bd   : > { %1972 = vperm.xlu2 %4315, %v10370_v9  }
 0x3be   : > { %4316 = vset.pattern.permute.xlu1 %v10018_v26  ;;  %v6056_v30 = vpop.permute.xlu1 %1746  ;;  %v6058_v41 = vpop.permute.xlu2 %1799 }
 0x3bf   : > { %10371 = vst [vmem:[#allocation83_spill] sm:$0xff] %v6056_v30  ;;  %2011 = vperm.xlu1 %4316, %v6052_v24   ;;  %2366 = vrot.lane.b32.xlu0 %v10377_v49, %s4363_s18  ;;  %v6074_v30 = vpop.permute.xlu0 %1570 }
 0x3c0   : > { %10372 = vst [vmem:[#allocation260_spill] sm:$0xff] %v6058_v41  ;;  %v10497_v41 = vld [vmem:[#allocation62_spill] sm:$0xff] }
 0x3c1   : > { %10378 = vst [vmem:[#allocation13_spill] sm:$0xff] %v6074_v30 }
 0x3c5   : > { %4317 = vset.pattern.permute.xlu2 %v10018_v26 }
 0x3c6   : > { %v6066_v46 = vpop.permute.xlu1 %1755  ;;  %2015 = vperm.xlu2 %4317, %v5581_v63   ;;  %v6069_v9 = vpop.permute.xlu2 %1811  ;;  %v10383_v63 = vld [vmem:[#allocation17_spill] sm:$0xff] }
 0x3c7   : > { %10375 = vst [vmem:[#allocation10_spill] sm:$0xff] %v6066_v46  ;;  %2019 = vperm.xlu1 %4316, %v5619_v3   ;;  %2372 = vrot.lane.b32.xlu0 %v10383_v63, %s4363_s18  ;;  %v10384_v3 = vld [vmem:[#allocation34_spill] sm:$0xff]  ;;  %v6092_v30 = vpop.permute.xlu0 %1579 }
 0x3c8   : > { %10376 = vst [vmem:[#allocation262_spill] sm:$0xff] %v6069_v9  ;;  %v6090_v49 = vmul.f32 %v5717_v14, %v10384_v3 }
 0x3c9   : > { %10386 = vst [vmem:[#allocation266_spill] sm:$0xff] %v6092_v30 }
 0x3ca   : > { %10385 = vst [vmem:[#allocation17_spill] sm:$0xff] %v6090_v49 }
 0x3ce   : > { %v6080_v52 = vpop.permute.xlu1 %1764  ;;  %2023 = vperm.xlu2 %4317, %v5625_v11   ;;  %v6083_v46 = vpop.permute.xlu2 %1819 }
 0x3cf   : > { %10381 = vst [vmem:[#allocation264_spill] sm:$0xff] %v6080_v52  ;;  %2031 = vperm.xlu1 %4316, %v6078_v17   ;;  %v10389_v52 = vld [vmem:[#allocation38_spill] sm:$0xff]  ;;  %v6107_v14 = vpop.permute.xlu0 %1588  ;;  %v10514_v17 = vld [vmem:[#allocation36_spill] sm:$0xff] }
 0x3d0   : > { %10382 = vst [vmem:[#allocation265_spill] sm:$0xff] %v6083_v46  ;;  %v6102_v46 = vmul.f32 %v5733_v8, %v10389_v52 }
 0x3d1   : > { %10392 = vst [vmem:[#allocation270_spill] sm:$0xff] %v6107_v14 }
 0x3d2   : > { %10390 = vst [vmem:[#allocation38_spill] sm:$0xff] %v6102_v46 }
 0x3d6   : > { %2035 = vperm.xlu2 %4317, %v5632_v31   ;;  %v6095_v42 = vpop.permute.xlu2 %1831  ;;  %v10394_v31 = vld [vmem:[#allocation40_spill] sm:$0xff] }
 0x3d7   : > { %10387 = vst [vmem:[#allocation267_spill] sm:$0xff] %v6095_v42  ;;  %2043 = vperm.xlu1 %4316, %v6090_v49   ;;  %v6098_v11 = vpop.permute.xlu1 %1807  ;;  %v6114_v42 = vmul.f32 %v5752_v47, %v10394_v31 }
 0x3d8   : > { %10388 = vst [vmem:[#allocation268_spill] sm:$0xff] %v6098_v11 }
 0x3d9   : > { %10395 = vst [vmem:[#allocation272_spill] sm:$0xff] %v6114_v42 }
 0x3de   : > { %2047 = vperm.xlu2 %4317, %v5640_v15   ;;  %v6105_v63 = vpop.permute.xlu2 %1843  ;;  %v6122_v15 = vpop.permute.xlu0 %1719 }
 0x3df   : > { %10391 = vst [vmem:[#allocation269_spill] sm:$0xff] %v6105_v63  ;;  %2055 = vperm.xlu1 %4316, %v6102_v46   ;;  %v6110_v30 = vpop.permute.xlu1 %1815  ;;  %v10401_v63 = vld [vmem:[#allocation194_spill] sm:$0xff] }
 0x3e0   : > { %10393 = vst [vmem:[#allocation271_spill] sm:$0xff] %v6110_v30 }
 0x3e1   : > { %10398 = vst [vmem:[#allocation275_spill] sm:$0xff] %v6122_v15 }
 0x3e6   : > { %2059 = vperm.xlu2 %4317, %v5648_v19   ;;  %v6117_v20 = vpop.permute.xlu2 %1855  ;;  %v6132_v19 = vpop.permute.xlu0 %1734 }
 0x3e7   : > { %10396 = vst [vmem:[#allocation273_spill] sm:$0xff] %v6117_v20  ;;  %2067 = vperm.xlu1 %4316, %v6114_v42   ;;  %v6120_v8 = vpop.permute.xlu1 %1827 }
 0x3e8   : > { %10397 = vst [vmem:[#allocation274_spill] sm:$0xff] %v6120_v8 }
 0x3e9   : > { %10402 = vst [vmem:[#allocation194_spill] sm:$0xff] %v6132_v19 }
 0x3ee   : > { %4318 = vset.pattern.permute.xlu2 %v10218_v54  ;;  %v6140_v30 = vpop.permute.xlu0 %1743 }
 0x3ef   : > { %4319 = vset.pattern.permute.xlu1 %v10218_v54  ;;  %v6126_v14 = vpop.permute.xlu1 %1839  ;;  %2135 = vperm.xlu2 %4318, %v5654_v56   ;;  %v6129_v47 = vpop.permute.xlu2 %1930  ;;  %10405 = vst [vmem:[#allocation280_spill] sm:$0xff] %v6140_v30  ;;  %v10407_v56 = vld [vmem:[#allocation198_spill] sm:$0xff] }
 0x3f0   : > { %10399 = vst [vmem:[#allocation276_spill] sm:$0xff] %v6126_v14  ;;  %2141 = vperm.xlu1 %4319, %v10401_v63   ;;  %v10409_v63 = vld [vmem:[#allocation20_spill] sm:$0xff] }
 0x3f1   : > { %10400 = vst [vmem:[#allocation277_spill] sm:$0xff] %v6129_v47  ;;  %2470 = vrot.lane.b32.xlu0 %v10409_v63, %s4364_s19  ;;  %v10488_v47 = vld [vmem:[#allocation55_spill] sm:$0xff] }
 0x3f7   : > { %v6134_v20 = vpop.permute.xlu1 %1851  ;;  %2144 = vperm.xlu2 %4318, %v5665_v23   ;;  %v6137_v8 = vpop.permute.xlu2 %1939 }
 0x3f8   : > { %10403 = vst [vmem:[#allocation278_spill] sm:$0xff] %v6134_v20  ;;  %2147 = vperm.xlu1 %4319, %v5673_v4   ;;  %v6150_v20 = vpop.permute.xlu0 %1752  ;;  %v10412_v4 = vld [vmem:[#allocation201_spill] sm:$0xff] }
 0x3f9   : > { %10404 = vst [vmem:[#allocation279_spill] sm:$0xff] %v6137_v8 }
 0x3fa   : > { %10410 = vst [vmem:[#allocation282_spill] sm:$0xff] %v6150_v20 }
 0x3ff   : > { %2150 = vperm.xlu2 %4318, %v5677_v37   ;;  %v6143_v14 = vpop.permute.xlu2 %1945  ;;  %v10414_v37 = vld [vmem:[#allocation24_spill] sm:$0xff] }
 0x400   : > { %10406 = vst [vmem:[#allocation281_spill] sm:$0xff] %v6143_v14  ;;  %2156 = vperm.xlu1 %4319, %v10407_v56   ;;  %v6146_v11 = vpop.permute.xlu1 %1927  ;;  %2476 = vrot.lane.b32.xlu0 %v10414_v37, %s4364_s19  ;;  %v10416_v14 = vld [vmem:[#allocation205_spill] sm:$0xff]  ;;  %v6166_v20 = vpop.permute.xlu0 %1761 }
 0x401   : > { %10408 = vst [vmem:[#allocation198_spill] sm:$0xff] %v6146_v11 }
 0x402   : > { %10418 = vst [vmem:[#allocation285_spill] sm:$0xff] %v6166_v20 }
 0x407   : > { %2159 = vperm.xlu2 %4318, %v5688_v50   ;;  %v6153_v23 = vpop.permute.xlu2 %1954  ;;  %v10419_v50 = vld [vmem:[#allocation236_spill] sm:$0xff] }
 0x408   : > { %10411 = vst [vmem:[#allocation283_spill] sm:$0xff] %v6153_v23  ;;  %2165 = vperm.xlu1 %4319, %v10412_v4   ;;  %v6156_v30 = vpop.permute.xlu1 %1936  ;;  %2482 = vrot.lane.b32.xlu0 %v10379_v61, %s4364_s19  ;;  %v6172_v4 = vmul.f32 %v10419_v50, %v5437_v5 }
 0x409   : > { %10413 = vst [vmem:[#allocation201_spill] sm:$0xff] %v6156_v30  ;;  %v10470_v30 = vld [vmem:[#allocation43_spill] sm:$0xff] }
 0x40a   : > { %10420 = vst [vmem:[#allocation236_spill] sm:$0xff] %v6172_v4 }
 0x40f   : > { %2168 = vperm.xlu2 %4318, %v5698_v12   ;;  %v6161_v56 = vpop.permute.xlu2 %1963 }
 0x410   : > { %10415 = vst [vmem:[#allocation284_spill] sm:$0xff] %v6161_v56  ;;  %2174 = vperm.xlu1 %4319, %v10416_v14   ;;  %v6164_v19 = vpop.permute.xlu1 %1942  ;;  %v6181_v14 = vpop.permute.xlu0 %1933  ;;  %2488 = vrot.lane.b32.xlu0 %v10384_v3, %s4364_s19 }
 0x411   : > { %10417 = vst [vmem:[#allocation205_spill] sm:$0xff] %v6164_v19 }
 0x412   : > { %10423 = vst [vmem:[#allocation288_spill] sm:$0xff] %v6181_v14 }
 0x417   : > { %2177 = vperm.xlu2 %4318, %v5712_v60   ;;  %v6175_v23 = vpop.permute.xlu2 %1972 }
 0x418   : > { %10421 = vst [vmem:[#allocation286_spill] sm:$0xff] %v6175_v23  ;;  %4320 = vset.pattern.permute.xlu1 %v10018_v26  ;;  %v6178_v12 = vpop.permute.xlu1 %1951  ;;  %2494 = vrot.lane.b32.xlu0 %v10389_v52, %s4364_s19  ;;  %v6194_v50 = vpop.permute.xlu0 %1948  ;;  %v10427_v23 = vld [vmem:[#allocation235_spill] sm:$0xff] }
 0x419   : > { %10422 = vst [vmem:[#allocation287_spill] sm:$0xff] %v6178_v12  ;;  %2215 = vperm.xlu1 %4320, %v6172_v4   ;;  %v6198_v56 = vmul.f32 %v10427_v23, %v10317_v58  ;;  %v10512_v4 = vld [vmem:[#allocation31_spill] sm:$0xff] }
 0x41a   : > { %10426 = vst [vmem:[#allocation291_spill] sm:$0xff] %v6194_v50 }
 0x41b   : > { %10428 = vst [vmem:[#allocation235_spill] sm:$0xff] %v6198_v56 }
 0x41f   : > { %4321 = vset.pattern.permute.xlu2 %v10018_v26 }
 0x420   : > { %v6186_v20 = vpop.permute.xlu1 %1960  ;;  %2219 = vperm.xlu2 %4321, %v5725_v45   ;;  %v6189_v60 = vpop.permute.xlu2 %2015  ;;  %2500 = vrot.lane.b32.xlu0 %v10394_v31, %s4364_s19  ;;  %v10431_v45 = vld [vmem:[#allocation237_spill] sm:$0xff] }
 0x421   : > { %10424 = vst [vmem:[#allocation289_spill] sm:$0xff] %v6186_v20  ;;  %2227 = vperm.xlu1 %4320, %v5737_v1   ;;  %v6210_v1 = vmul.f32 %v10431_v45, %v10323_v10  ;;  %v6212_v20 = vpop.permute.xlu0 %1957 }
 0x422   : > { %10425 = vst [vmem:[#allocation290_spill] sm:$0xff] %v6189_v60 }
 0x423   : > { %10432 = vst [vmem:[#allocation237_spill] sm:$0xff] %v6210_v1 }
 0x424   : > { %10433 = vst [vmem:[#allocation294_spill] sm:$0xff] %v6212_v20 }
 0x428   : > { %v6200_v12 = vpop.permute.xlu1 %1969  ;;  %2231 = vperm.xlu2 %4321, %v5746_v27   ;;  %v6203_v26 = vpop.permute.xlu2 %2023 }
 0x429   : > { %10429 = vst [vmem:[#allocation292_spill] sm:$0xff] %v6200_v12  ;;  %2235 = vperm.xlu1 %4320, %v6198_v56   ;;  %v6222_v12 = vmul.f32 %v5634_v36, %v10330_v7  ;;  %v6227_v45 = vpop.permute.xlu0 %1966  ;;  %v10510_v56 = vld [vmem:[#allocation26_spill] sm:$0xff] }
 0x42a   : > { %10430 = vst [vmem:[#allocation293_spill] sm:$0xff] %v6203_v26 }
 0x42b   : > { %10436 = vst [vmem:[#allocation297_spill] sm:$0xff] %v6222_v12 }
 0x42c   : > { %10438 = vst [vmem:[#allocation299_spill] sm:$0xff] %v6227_v45  ;;  %v10444_v45 = vld [vmem:[#allocation5_spill] sm:$0xff] }
 0x430   : > { %2239 = vperm.xlu2 %4321, %v5750_v55   ;;  %v6215_v23 = vpop.permute.xlu2 %2035  ;;  %v6234_v55 = vmul.f32 %v5643_v13, %v5428_v35 }
 0x431   : > { %10434 = vst [vmem:[#allocation295_spill] sm:$0xff] %v6215_v23  ;;  %2247 = vperm.xlu1 %4320, %v6210_v1   ;;  %v6218_v27 = vpop.permute.xlu1 %2011  ;;  %v10507_v1 = vld [vmem:[#allocation25_spill] sm:$0xff] }
 0x432   : > { %10435 = vst [vmem:[#allocation296_spill] sm:$0xff] %v6218_v27 }
 0x433   : > { %10440 = vst [vmem:[#allocation301_spill] sm:$0xff] %v6234_v55 }
 0x438   : > { %2251 = vperm.xlu2 %4321, %v5761_v40   ;;  %v6225_v50 = vpop.permute.xlu2 %2047  ;;  %v6242_v40 = vpop.permute.xlu0 %2138 }
 0x439   : > { %10437 = vst [vmem:[#allocation298_spill] sm:$0xff] %v6225_v50  ;;  %2259 = vperm.xlu1 %4320, %v6222_v12   ;;  %v6230_v20 = vpop.permute.xlu1 %2019  ;;  %v10504_v12 = vld [vmem:[#allocation21_spill] sm:$0xff] }
 0x43a   : > { %10439 = vst [vmem:[#allocation300_spill] sm:$0xff] %v6230_v20 }
 0x43b   : > { %10443 = vst [vmem:[#allocation304_spill] sm:$0xff] %v6242_v40  ;;  %v10495_v40 = vld [vmem:[#allocation71_spill] sm:$0xff] }
 0x440   : > { %2263 = vperm.xlu2 %4321, %v5771_v43   ;;  %v6237_v23 = vpop.permute.xlu2 %2059  ;;  %v6252_v13 = vpop.permute.xlu0 %2153  ;;  %v10448_v43 = vld [vmem:[#allocation2_spill] sm:$0xff] }
 0x441   : > { %10441 = vst [vmem:[#allocation302_spill] sm:$0xff] %v6237_v23  ;;  %2271 = vperm.xlu1 %4320, %v6234_v55   ;;  %v6240_v36 = vpop.permute.xlu1 %2031  ;;  %v10449_v23 = vld [vmem:[#allocation6_spill] sm:$0xff] }
 0x442   : > { %10442 = vst [vmem:[#allocation303_spill] sm:$0xff] %v6240_v36 }
 0x443   : > { %10447 = vst [vmem:[#allocation306_spill] sm:$0xff] %v6252_v13 }
 0x448   : > { %2275 = vperm.xlu2 %4321, %v5781_v44  }
 0x449   : > { %2344 = vrot.lane.b32.xlu1 %v10444_v45, %s4363_s18  ;;  %v6247_v50 = vpop.permute.xlu1 %2043  ;;  %v6249_v19 = vpop.permute.xlu2 %2135 }
 0x44a   : > { %10445 = vst [vmem:[#allocation5_spill] sm:$0xff] %v6247_v50  ;;  %4323 = vset.pattern.permute.xlu1 %v10000_v16  ;;  %v6263_v45 = vpop.permute.xlu0 %2162  ;;  %v10453_v50 = vld [vmem:[#allocation9_spill] sm:$0xff] }
 0x44b   : > { %10446 = vst [vmem:[#allocation305_spill] sm:$0xff] %v6249_v19  ;;  %v10496_v19 = vld [vmem:[#allocation54_spill] sm:$0xff] }
 0x44c   : > { %10452 = vst [vmem:[#allocation307_spill] sm:$0xff] %v6263_v45 }
 0x450   : > { %2346 = vrot.lane.b32.xlu2 %v10448_v43, %s4363_s18  ;;  %v10456_v43 = vld [vmem:[#allocation8_spill] sm:$0xff] }
 0x451   : > { %2350 = vrot.lane.b32.xlu1 %v10449_v23, %s4363_s18  ;;  %v6258_v36 = vpop.permute.xlu1 %2055  ;;  %v6260_v44 = vpop.permute.xlu2 %2144  ;;  %4324 = vset.pattern.permute.xlu2 %v10000_v16  ;;  %v10457_v23 = vld [vmem:[#allocation12_spill] sm:$0xff] }
 0x452   : > { %10450 = vst [vmem:[#allocation2_spill] sm:$0xff] %v6258_v36  ;;  %v6275_v36 = vpop.permute.xlu0 %2171 }
 0x453   : > { %10451 = vst [vmem:[#allocation6_spill] sm:$0xff] %v6260_v44  ;;  %v10460_v44 = vld [vmem:[#allocation11_spill] sm:$0xff] }
 0x454   : > { %10458 = vst [vmem:[#allocation8_spill] sm:$0xff] %v6275_v36  ;;  %v10467_v36 = vld [vmem:[#allocation18_spill] sm:$0xff] }
 0x458   : > { %2352 = vrot.lane.b32.xlu2 %v10453_v50, %s4363_s18  ;;  %v10462_v50 = vld [vmem:[#allocation15_spill] sm:$0xff] }
 0x459   : > { %v6267_v26 = vpop.permute.xlu1 %2067  ;;  %v6269_v13 = vpop.permute.xlu2 %2150  ;;  %2356 = vrot.lane.b32.xlu1 %v10456_v43, %s4363_s18 }
 0x45a   : > { %10454 = vst [vmem:[#allocation9_spill] sm:$0xff] %v6267_v26 }
 0x45b   : > { %10455 = vst [vmem:[#allocation308_spill] sm:$0xff] %v6269_v13  ;;  %v10464_v13 = vld [vmem:[#allocation14_spill] sm:$0xff] }
 0x460   : > { %2358 = vrot.lane.b32.xlu2 %v10457_v23, %s4363_s18  ;;  %v6291_v23 = vpop.permute.xlu0 %2180 }
 0x461   : > { %v6277_v8 = vpop.permute.xlu2 %2159  ;;  %2362 = vrot.lane.b32.xlu1 %v10460_v44, %s4363_s18  ;;  %10466 = vst [vmem:[#allocation309_spill] sm:$0xff] %v6291_v23  ;;  %v10473_v23 = vld [vmem:[#allocation48_spill] sm:$0xff] }
 0x462   : > { %10459 = vst [vmem:[#allocation12_spill] sm:$0xff] %v6277_v8  ;;  %v6281_v45 = vpop.permute.xlu1 %2141 }
 0x463   : > { %10461 = vst [vmem:[#allocation11_spill] sm:$0xff] %v6281_v45 }
 0x468   : > { %2364 = vrot.lane.b32.xlu2 %v10462_v50, %s4363_s18  ;;  %v6299_v20 = vpop.permute.xlu0 %2342 }
 0x469   : > { %v6285_v26 = vpop.permute.xlu2 %2168  ;;  %2368 = vrot.lane.b32.xlu1 %v10464_v13, %s4363_s18  ;;  %v2374_v50 = vadd.s32 %v6299_v20, %v10470_v30 }
 0x46a   : > { %10463 = vst [vmem:[#allocation15_spill] sm:$0xff] %v6285_v26  ;;  %v6289_v43 = vpop.permute.xlu1 %2147 }
 0x46b   : > { %10465 = vst [vmem:[#allocation14_spill] sm:$0xff] %v6289_v43 }
 0x470   : > { %2370 = vrot.lane.b32.xlu2 %v10467_v36, %s4363_s18  ;;  %v6307_v43 = vpop.permute.xlu0 %2348 }
 0x471   : > { %v6295_v8 = vpop.permute.xlu2 %2177  ;;  %2391 = vperm.xlu1 %4323, %v2374_v50   ;;  %v2377_v45 = vadd.s32 %v6307_v43, %v10473_v23 }
 0x472   : > { %10468 = vst [vmem:[#allocation18_spill] sm:$0xff] %v6295_v8  ;;  %v6297_v44 = vpop.permute.xlu1 %2156 }
 0x473   : > { %10469 = vst [vmem:[#allocation310_spill] sm:$0xff] %v6297_v44 }
 0x479   : > { %2400 = vperm.xlu1 %4323, %v2377_v45  }
 0x47a   : > { %v6303_v26 = vpop.permute.xlu1 %2165  ;;  %v6305_v13 = vpop.permute.xlu2 %2219 }
 0x47b   : > { %10471 = vst [vmem:[#allocation43_spill] sm:$0xff] %v6303_v26 }
 0x47c   : > { %10472 = vst [vmem:[#allocation311_spill] sm:$0xff] %v6305_v13 }
 0x482   : > { %v6311_v36 = vpop.permute.xlu1 %2174  ;;  %v6313_v8 = vpop.permute.xlu2 %2231 }
 0x483   : > { %10474 = vst [vmem:[#allocation48_spill] sm:$0xff] %v6311_v36 }
 0x484   : > { %10475 = vst [vmem:[#allocation312_spill] sm:$0xff] %v6313_v8 }
 0x48a   : > { %v6315_v44 = vpop.permute.xlu2 %2239 }
 0x48b   : > { %10476 = vst [vmem:[#allocation313_spill] sm:$0xff] %v6315_v44  ;;  %v6317_v60 = vpop.permute.xlu1 %2215 }
 0x48c   : > { %10477 = vst [vmem:[#allocation314_spill] sm:$0xff] %v6317_v60 }
 0x492   : > { %v6319_v9 = vpop.permute.xlu2 %2251 }
 0x493   : > { %10478 = vst [vmem:[#allocation315_spill] sm:$0xff] %v6319_v9  ;;  %v6321_v50 = vpop.permute.xlu1 %2227 }
 0x494   : > { %10479 = vst [vmem:[#allocation316_spill] sm:$0xff] %v6321_v50 }
 0x49a   : > { %v6323_v26 = vpop.permute.xlu2 %2263 }
 0x49b   : > { %10480 = vst [vmem:[#allocation317_spill] sm:$0xff] %v6323_v26  ;;  %v6325_v13 = vpop.permute.xlu1 %2235 }
 0x49c   : > { %10481 = vst [vmem:[#allocation318_spill] sm:$0xff] %v6325_v13  ;;  %v10491_v13 = vld [vmem:[#allocation63_spill] sm:$0xff] }
 0x4a2   : > { %v6327_v27 = vpop.permute.xlu2 %2275 }
 0x4a3   : > { %10482 = vst [vmem:[#allocation319_spill] sm:$0xff] %v6327_v27  ;;  %v6329_v6 = vpop.permute.xlu1 %2247 }
 0x4a4   : > { %10483 = vst [vmem:[#allocation320_spill] sm:$0xff] %v6329_v6  ;;  %v10492_v6 = vld [vmem:[#allocation49_spill] sm:$0xff] }
 0x4aa   : > { %v6331_v45 = vpop.permute.xlu2 %2346 }
 0x4ab   : > { %10484 = vst [vmem:[#allocation321_spill] sm:$0xff] %v6331_v45  ;;  %v6333_v36 = vpop.permute.xlu1 %2259 }
 0x4ac   : > { %10485 = vst [vmem:[#allocation322_spill] sm:$0xff] %v6333_v36  ;;  %v6349_v36 = vpop.permute.xlu0 %2354 }
 0x4ad   : > { %10493 = vst [vmem:[#allocation63_spill] sm:$0xff] %v6349_v36  ;;  %v2380_v28 = vadd.s32 %v6349_v36, %v10497_v41 }
 0x4b2   : > { %v6335_v8 = vpop.permute.xlu2 %2352 }
 0x4b3   : > { %10486 = vst [vmem:[#allocation323_spill] sm:$0xff] %v6335_v8  ;;  %v6337_v44 = vpop.permute.xlu1 %2271  ;;  %v2379_v9 = vadd.s32 %v6335_v8, %v10488_v47 }
 0x4b4   : > { %10487 = vst [vmem:[#allocation324_spill] sm:$0xff] %v6337_v44  ;;  %v6365_v62 = vpop.permute.xlu0 %2360 }
 0x4b5   : > { %2406 = vperm.xlu1 %4323, %v2379_v9   ;;  %10500 = vst [vmem:[#allocation54_spill] sm:$0xff] %v6365_v62 }
 0x4ba   : > { %v6341_v50 = vpop.permute.xlu2 %2358 }
 0x4bb   : > { %10489 = vst [vmem:[#allocation55_spill] sm:$0xff] %v6341_v50  ;;  %v6343_v26 = vpop.permute.xlu1 %2344  ;;  %v2382_v27 = vadd.s32 %v6341_v50, %v10491_v13 }
 0x4bc   : > { %10490 = vst [vmem:[#allocation325_spill] sm:$0xff] %v6343_v26  ;;  %v2375_v14 = vadd.s32 %v6343_v26, %v10492_v6  ;;  %v10501_v26 = vld [vmem:[#allocation70_spill] sm:$0xff] }
 0x4bd   : > { %2415 = vperm.xlu1 %4323, %v2382_v27   ;;  %v2383_v55 = vadd.s32 %v6365_v62, %v10501_v26 }
 0x4be   : > { %2394 = vperm.xlu2 %4324, %v2375_v14   ;;  %v10499_v14 = vld [vmem:[#allocation79_spill] sm:$0xff] }
 0x4c2   : > { %v6351_v60 = vpop.permute.xlu2 %2364 }
 0x4c3   : > { %10494 = vst [vmem:[#allocation49_spill] sm:$0xff] %v6351_v60  ;;  %v6353_v44 = vpop.permute.xlu1 %2350  ;;  %v2385_v9 = vadd.s32 %v6351_v60, %v10495_v40 }
 0x4c4   : > { %v2378_v11 = vadd.s32 %v6353_v44, %v10496_v19 }
 0x4c5   : > { %2424 = vperm.xlu1 %4323, %v2385_v9   ;;  %v6371_v9 = vpop.permute.xlu0 %2366 }
 0x4c6   : > { %2403 = vperm.xlu2 %4324, %v2378_v11   ;;  %10502 = vst [vmem:[#allocation62_spill] sm:$0xff] %v6371_v9  ;;  %v10503_v11 = vld [vmem:[#allocation78_spill] sm:$0xff] }
 0x4c7   : > { %v2386_v36 = vadd.s32 %v6371_v9, %v10503_v11 }
 0x4ca   : > { %v6361_v15 = vpop.permute.xlu2 %2370 }
 0x4cb   : > { %10498 = vst [vmem:[#allocation71_spill] sm:$0xff] %v6361_v15  ;;  %v2388_v27 = vadd.s32 %v6361_v15, %v10499_v14 }
 0x4cd   : > { %2433 = vperm.xlu1 %4323, %v2388_v27   ;;  %v6378_v27 = vpop.permute.xlu0 %2372 }
 0x4ce   : > { %2409 = vperm.xlu2 %4324, %v2380_v28   ;;  %10505 = vst [vmem:[#allocation79_spill] sm:$0xff] %v6378_v27  ;;  %v10506_v28 = vld [vmem:[#allocation85_spill] sm:$0xff] }
 0x4cf   : > { %v2389_v62 = vadd.s32 %v6378_v27, %v10506_v28  ;;  %v6395_v27 = vpop.permute.xlu1 %2356 }
 0x4d0   : > { %10511 = vst [vmem:[#allocation70_spill] sm:$0xff] %v6395_v27 }
 0x4d5   : > { %2472 = vrot.lane.b32.xlu1 %v10368_v48, %s4364_s19  ;;  %v6389_v9 = vpop.permute.xlu0 %2470 }
 0x4d6   : > { %2418 = vperm.xlu2 %4324, %v2383_v55   ;;  %4325 = vset.pattern.permute.xlu1 %v10218_v54  ;;  %v10508_v55 = vld [vmem:[#allocation22_spill] sm:$0xff] }
 0x4d7   : > { %v6403_v46 = vpop.permute.xlu1 %2362 }
 0x4d8   : > { %10513 = vst [vmem:[#allocation78_spill] sm:$0xff] %v6403_v46 }
 0x4dd   : > { %2478 = vrot.lane.b32.xlu1 %v10504_v12, %s4364_s19  ;;  %v6401_v42 = vpop.permute.xlu0 %2476 }
 0x4de   : > { %2427 = vperm.xlu2 %4324, %v2386_v36   ;;  %v10509_v36 = vld [vmem:[#allocation35_spill] sm:$0xff]  ;;  %v2521_v49 = vmul.f32 %v6401_v42, %v10414_v37 }
 0x4df   : > { %v6409_v24 = vpop.permute.xlu1 %2368 }
 0x4e0   : > { %10515 = vst [vmem:[#allocation85_spill] sm:$0xff] %v6409_v24 }
 0x4e5   : > { %2484 = vrot.lane.b32.xlu1 %v10507_v1, %s4364_s19 }
 0x4e6   : > { %2436 = vperm.xlu2 %4324, %v2389_v62   ;;  %v2518_v62 = vmul.f32 %v6389_v9, %v10409_v63 }
 0x4ed   : > { %2490 = vrot.lane.b32.xlu1 %v10170_v39, %s4364_s19 }
 0x4ee   : > { %2474 = vrot.lane.b32.xlu2 %v10508_v55, %s4364_s19 }
 0x4ef   : > { %4326 = vset.pattern.permute.xlu2 %v10218_v54 }
 0x4f5   : > { %2496 = vrot.lane.b32.xlu1 %v10509_v36, %s4364_s19 }
 0x4f6   : > { %2480 = vrot.lane.b32.xlu2 %v10510_v56, %s4364_s19 }
 0x4fd   : > { %2536 = vperm.xlu1 %4325, %v2518_v62   ;;  %v6413_v62 = vpop.permute.xlu1 %2391 }
 0x4fe   : > { %2486 = vrot.lane.b32.xlu2 %v10512_v4, %s4364_s19  ;;  %10517 = vst [vmem:[#allocation25_spill] sm:$0xff] %v6413_v62 }
 0x505   : > { %2551 = vperm.xlu1 %4325, %v2521_v49   ;;  %v6417_v63 = vpop.permute.xlu1 %2400 }
 0x506   : > { %2492 = vrot.lane.b32.xlu2 %v10514_v17, %s4364_s19  ;;  %10519 = vst [vmem:[#allocation327_spill] sm:$0xff] %v6417_v63 }
 0x50e   : > { %2498 = vrot.lane.b32.xlu2 %v10516_v57, %s4364_s19 }
 0x518   : > { %v6415_v59 = vpop.permute.xlu2 %2394 }
 0x519   : > { %10518 = vst [vmem:[#allocation326_spill] sm:$0xff] %v6415_v59 }
 0x520   : > { %v6419_v15 = vpop.permute.xlu2 %2403 }
 0x521   : > { %10520 = vst [vmem:[#allocation328_spill] sm:$0xff] %v6419_v15 }
 0x527   : > { %v6421_v60 = vpop.permute.xlu1 %2406 }
 0x528   : > { %10521 = vst [vmem:[#allocation329_spill] sm:$0xff] %v6421_v60  ;;  %v6423_v37 = vpop.permute.xlu2 %2409 }
 0x529   : > { %10522 = vst [vmem:[#allocation330_spill] sm:$0xff] %v6423_v37 }
 0x52f   : > { %v6425_v49 = vpop.permute.xlu1 %2415 }
 0x530   : > { %10523 = vst [vmem:[#allocation331_spill] sm:$0xff] %v6425_v49  ;;  %v6427_v46 = vpop.permute.xlu2 %2418 }
 0x531   : > { %10524 = vst [vmem:[#allocation332_spill] sm:$0xff] %v6427_v46  ;;  %v6445_v46 = vpop.permute.xlu0 %2482 }
 0x532   : > { %v2524_v49 = vmul.f32 %v6445_v46, %v10379_v61 }
 0x537   : > { %v6429_v24 = vpop.permute.xlu1 %2424 }
 0x538   : > { %10525 = vst [vmem:[#allocation333_spill] sm:$0xff] %v6429_v24  ;;  %v6431_v50 = vpop.permute.xlu2 %2427 }
 0x539   : > { %10526 = vst [vmem:[#allocation334_spill] sm:$0xff] %v6431_v50 }
 0x53f   : > { %v6433_v27 = vpop.permute.xlu1 %2433 }
 0x540   : > { %10527 = vst [vmem:[#allocation335_spill] sm:$0xff] %v6433_v27  ;;  %v6435_v62 = vpop.permute.xlu2 %2436 }
 0x541   : > { %10528 = vst [vmem:[#allocation336_spill] sm:$0xff] %v6435_v62 }
 0x547   : > { %v6437_v59 = vpop.permute.xlu1 %2472 }
 0x548   : > { %v2519_v15 = vmul.f32 %v6437_v59, %v10368_v48  ;;  %v6441_v60 = vpop.permute.xlu2 %2474  ;;  %v6456_v48 = vpop.permute.xlu0 %2488 }
 0x549   : > { %v2520_v37 = vmul.f32 %v6441_v60, %v10508_v55 }
 0x54a   : > { %2541 = vperm.xlu2 %4326, %v2519_v15  }
 0x54b   : > { %2546 = vperm.xlu0 %4322, %v2520_v37  }
 0x54f   : > { %v6447_v24 = vpop.permute.xlu1 %2478 }
 0x550   : > { %v2522_v50 = vmul.f32 %v6447_v24, %v10504_v12  ;;  %v2481_v62 = vpop.permute.xlu2 %2480  ;;  %v6468_v8 = vpop.permute.xlu0 %2494 }
 0x551   : > { %v2523_v27 = vmul.f32 %v2481_v62, %v10510_v56 }
 0x552   : > { %2556 = vperm.xlu2 %4326, %v2522_v50   ;;  %v2527_v50 = vmul.f32 %v6456_v48, %v10384_v3 }
 0x553   : > { %2561 = vperm.xlu1 %4325, %v2523_v27  }
 0x557   : > { %v6454_v63 = vpop.permute.xlu1 %2484 }
 0x558   : > { %v2525_v15 = vmul.f32 %v6454_v63, %v10507_v1  ;;  %v2487_v37 = vpop.permute.xlu2 %2486 }
 0x559   : > { %v2526_v55 = vmul.f32 %v2487_v37, %v10512_v4 }
 0x55a   : > { %2566 = vperm.xlu2 %4326, %v2524_v49   ;;  %2571 = vperm.xlu0 %4322, %v2525_v15   ;;  %v2530_v49 = vmul.f32 %v6468_v8, %v10389_v52 }
 0x55b   : > { %2576 = vperm.xlu1 %4325, %v2526_v55  }
 0x55f   : > { %v6463_v27 = vpop.permute.xlu1 %2490 }
 0x560   : > { %v2528_v61 = vmul.f32 %v6463_v27, %v10170_v39  ;;  %v2493_v56 = vpop.permute.xlu2 %2492 }
 0x561   : > { %v2529_v12 = vmul.f32 %v2493_v56, %v10514_v17  ;;  %v6477_v17 = vpop.permute.xlu0 %2500 }
 0x562   : > { %2581 = vperm.xlu2 %4326, %v2527_v50   ;;  %2586 = vperm.xlu0 %4322, %v2528_v61   ;;  %v2533_v61 = vmul.f32 %v6477_v17, %v10394_v31  ;;  %v10530_v50 = vld [vmem:[#allocation109_spill] sm:$0xff] }
 0x563   : > { %2591 = vperm.xlu1 %4325, %v2529_v12   ;;  %v10529_v12 = vld [vmem:[#allocation84_spill] sm:$0xff] }
 0x567   : > { %v6472_v55 = vpop.permute.xlu1 %2496 }
 0x568   : > { %v2531_v15 = vmul.f32 %v6472_v55, %v10509_v36  ;;  %v2499_v3 = vpop.permute.xlu2 %2498  ;;  %v10531_v36 = vld [vmem:[#allocation89_spill] sm:$0xff] }
 0x569   : > { %v2532_v4 = vmul.f32 %v2499_v3, %v10516_v57 }
 0x56a   : > { %2596 = vperm.xlu2 %4326, %v2530_v49   ;;  %2601 = vperm.xlu0 %4322, %v2531_v15   ;;  %v10532_v49 = vld [vmem:[#allocation111_spill] sm:$0xff]  ;;  %v10534_v15 = vld [vmem:[#allocation93_spill] sm:$0xff] }
 0x56b   : > { %2606 = vperm.xlu1 %4325, %v2532_v4   ;;  %v10533_v4 = vld [vmem:[#allocation112_spill] sm:$0xff] }
 0x572   : > { %2611 = vperm.xlu2 %4326, %v2533_v61   ;;  %2646 = vrot.lane.b32.xlu0 %v10529_v12, %s4363_s18  ;;  %v10535_v61 = vld [vmem:[#allocation114_spill] sm:$0xff]  ;;  %v10536_v12 = vld [vmem:[#allocation115_spill] sm:$0xff] }
 0x573   : > { %2648 = vrot.lane.b32.xlu1 %v10530_v50, %s4363_s18  ;;  %v10537_v50 = vld [vmem:[#allocation97_spill] sm:$0xff] }
 0x574   : > { %4327 = vset.pattern.permute.xlu1 %v10000_v16 }
 0x57a   : > { %2652 = vrot.lane.b32.xlu0 %v10531_v36, %s4363_s18  ;;  %2650 = vrot.lane.b32.xlu2 %v10532_v49, %s4363_s18  ;;  %v10538_v36 = vld [vmem:[#allocation118_spill] sm:$0xff]  ;;  %v10539_v49 = vld [vmem:[#allocation119_spill] sm:$0xff] }
 0x57b   : > { %2654 = vrot.lane.b32.xlu1 %v10533_v4, %s4363_s18  ;;  %4328 = vset.pattern.permute.xlu2 %v10000_v16  ;;  %v10540_v4 = vld [vmem:[#allocation100_spill] sm:$0xff] }
 0x582   : > { %2658 = vrot.lane.b32.xlu0 %v10534_v15, %s4363_s18  ;;  %2656 = vrot.lane.b32.xlu2 %v10535_v61, %s4363_s18  ;;  %v10541_v15 = vld [vmem:[#allocation123_spill] sm:$0xff]  ;;  %v10542_v61 = vld [vmem:[#allocation124_spill] sm:$0xff] }
 0x583   : > { %2660 = vrot.lane.b32.xlu1 %v10536_v12, %s4363_s18  ;;  %v10543_v12 = vld [vmem:[#allocation104_spill] sm:$0xff] }
 0x58a   : > { %2664 = vrot.lane.b32.xlu0 %v10537_v50, %s4363_s18  ;;  %2662 = vrot.lane.b32.xlu2 %v10538_v36, %s4363_s18  ;;  %v10544_v50 = vld [vmem:[#allocation128_spill] sm:$0xff]  ;;  %v2774_v36 = vmul.f32 %v6389_v9, %v5437_v5  ;;  %v2788_v9 = vmul.f32 %v2499_v3, %v5428_v35 }
 0x58b   : > { %2666 = vrot.lane.b32.xlu1 %v10539_v49, %s4363_s18 }
 0x592   : > { %2670 = vrot.lane.b32.xlu0 %v10540_v4, %s4363_s18  ;;  %2668 = vrot.lane.b32.xlu2 %v10541_v15, %s4363_s18  ;;  %v2779_v4 = vmul.f32 %v2481_v62, %v10317_v58  ;;  %v2782_v15 = vmul.f32 %v2487_v37, %v10323_v10 }
 0x593   : > { %2672 = vrot.lane.b32.xlu1 %v10542_v61, %s4363_s18  ;;  %v6523_v61 = vpop.permute.xlu1 %2536 }
 0x594   : > { %10546 = vst [vmem:[#allocation109_spill] sm:$0xff] %v6523_v61 }
 0x59a   : > { %2676 = vrot.lane.b32.xlu0 %v10543_v12, %s4363_s18  ;;  %2674 = vrot.lane.b32.xlu2 %v10544_v50, %s4363_s18  ;;  %v2785_v12 = vmul.f32 %v2493_v56, %v10330_v7 }
 0x59b   : > { %v6528_v50 = vpop.permute.xlu1 %2551 }
 0x5a2   : > { %2792 = vperm.xlu0 %4322, %v2774_v36  }
 0x5a4   : > { %v6517_v49 = vpop.permute.xlu2 %2541 }
 0x5a5   : > { %10545 = vst [vmem:[#allocation84_spill] sm:$0xff] %v6517_v49 }
 0x5aa   : > { %2817 = vperm.xlu0 %4322, %v2779_v4  }
 0x5ac   : > { %v6521_v31 = vpop.permute.xlu2 %2556 }
 0x5b2   : > { %2832 = vperm.xlu0 %4322, %v2782_v15  }
 0x5b4   : > { %v6526_v57 = vpop.permute.xlu2 %2566 }
 0x5b5   : > { %10547 = vst [vmem:[#allocation89_spill] sm:$0xff] %v6526_v57 }
 0x5ba   : > { %2847 = vperm.xlu0 %4322, %v2785_v12  }
 0x5bc   : > { %v6533_v62 = vpop.permute.xlu2 %2581 }
 0x5bd   : > { %v6531_v36 = vpop.permute.xlu0 %2546  ;;  %10549 = vst [vmem:[#allocation112_spill] sm:$0xff] %v6533_v62 }
 0x5be   : > { %10548 = vst [vmem:[#allocation111_spill] sm:$0xff] %v6531_v36 }
 0x5c2   : > { %2862 = vperm.xlu0 %4322, %v2788_v9  }
 0x5c4   : > { %v6543_v15 = vpop.permute.xlu2 %2596 }
 0x5c5   : > { %v6535_v37 = vpop.permute.xlu1 %2561  ;;  %10552 = vst [vmem:[#allocation115_spill] sm:$0xff] %v6543_v15 }
 0x5ca   : > { %3034 = vrot.lane.b32.xlu0 %v5228_v22, %s4364_s19 }
 0x5cc   : > { %v6539_v4 = vpop.permute.xlu0 %2571  ;;  %v6551_v9 = vpop.permute.xlu2 %2611 }
 0x5cd   : > { %10550 = vst [vmem:[#allocation93_spill] sm:$0xff] %v6539_v4  ;;  %v6541_v56 = vpop.permute.xlu1 %2576 }
 0x5ce   : > { %10551 = vst [vmem:[#allocation114_spill] sm:$0xff] %v6541_v56 }
 0x5cf   : > { %10555 = vst [vmem:[#allocation119_spill] sm:$0xff] %v6551_v9 }
 0x5d2   : > { %3040 = vrot.lane.b32.xlu0 %v10317_v58, %s4364_s19 }
 0x5d4   : > { %v6547_v3 = vpop.permute.xlu0 %2586  ;;  %v6559_v49 = vpop.permute.xlu2 %2650 }
 0x5d5   : > { %10553 = vst [vmem:[#allocation97_spill] sm:$0xff] %v6547_v3  ;;  %v6549_v12 = vpop.permute.xlu1 %2591 }
 0x5d6   : > { %10554 = vst [vmem:[#allocation118_spill] sm:$0xff] %v6549_v12 }
 0x5d7   : > { %10558 = vst [vmem:[#allocation124_spill] sm:$0xff] %v6559_v49 }
 0x5da   : > { %3046 = vrot.lane.b32.xlu0 %v10323_v10, %s4364_s19 }
 0x5dc   : > { %v6555_v62 = vpop.permute.xlu0 %2601 }
 0x5dd   : > { %10556 = vst [vmem:[#allocation100_spill] sm:$0xff] %v6555_v62  ;;  %v6557_v57 = vpop.permute.xlu1 %2606  ;;  %v6571_v62 = vpop.permute.xlu2 %2656 }
 0x5de   : > { %10557 = vst [vmem:[#allocation123_spill] sm:$0xff] %v6557_v57  ;;  %v10580_v57 = vld [vmem:[#allocation71_spill] sm:$0xff] }
 0x5e2   : > { %3052 = vrot.lane.b32.xlu0 %v10330_v7, %s4364_s19 }
 0x5e4   : > { %v6563_v15 = vpop.permute.xlu0 %2646 }
 0x5e5   : > { %v2678_v3 = vadd.s32 %v6563_v15, %v10470_v30  ;;  %v6567_v4 = vpop.permute.xlu1 %2648 }
 0x5e6   : > { %v2679_v9 = vadd.s32 %v6567_v4, %v10492_v6  ;;  %v2683_v6 = vadd.s32 %v6571_v62, %v10488_v47 }
 0x5e7   : > { %2695 = vperm.xlu1 %4327, %v2678_v3  }
 0x5e8   : > { %2698 = vperm.xlu2 %4328, %v2679_v9   ;;  %v6587_v9 = vpop.permute.xlu2 %2662 }
 0x5ea   : > { %3058 = vrot.lane.b32.xlu0 %v5428_v35, %s4364_s19 }
 0x5ec   : > { %v6575_v36 = vpop.permute.xlu0 %2652 }
 0x5ed   : > { %v2681_v7 = vadd.s32 %v6575_v36, %v10473_v23  ;;  %v6579_v61 = vpop.permute.xlu1 %2654  ;;  %v2686_v23 = vadd.s32 %v6587_v9, %v10491_v13 }
 0x5ee   : > { %v2682_v30 = vadd.s32 %v6579_v61, %v10496_v19 }
 0x5ef   : > { %2704 = vperm.xlu1 %4327, %v2681_v7  }
 0x5f0   : > { %2707 = vperm.xlu2 %4328, %v2682_v30   ;;  %v6597_v19 = vpop.permute.xlu2 %2668 }
 0x5f1   : > { %v2689_v47 = vadd.s32 %v6597_v19, %v10495_v40  ;;  %v2775_v40 = vmul.f32 %v6437_v59, %v5152_v34  ;;  %v2780_v59 = vmul.f32 %v6445_v46, %v5202_v18 }
 0x5f4   : > { %v6585_v3 = vpop.permute.xlu0 %2658 }
 0x5f5   : > { %v2684_v35 = vadd.s32 %v6585_v3, %v10497_v41  ;;  %v6635_v46 = vpop.permute.xlu1 %2660 }
 0x5f6   : > { %10561 = vst [vmem:[#allocation337_spill] sm:$0xff] %v6635_v46 }
 0x5f7   : > { %2710 = vperm.xlu1 %4327, %v2683_v6  }
 0x5f8   : > { %2713 = vperm.xlu2 %4328, %v2684_v35   ;;  %v6605_v41 = vpop.permute.xlu2 %2674 }
 0x5f9   : > { %10559 = vst [vmem:[#allocation104_spill] sm:$0xff] %v6605_v41  ;;  %v2692_v13 = vadd.s32 %v6605_v41, %v10499_v14  ;;  %v2777_v14 = vmul.f32 %v6401_v42, %v5176_v53  ;;  %v2787_v42 = vmul.f32 %v6472_v55, %v5329_v32 }
 0x5fc   : > { %v6593_v49 = vpop.permute.xlu0 %2664 }
 0x5fd   : > { %v2687_v7 = vadd.s32 %v6593_v49, %v10501_v26 }
 0x5ff   : > { %2719 = vperm.xlu1 %4327, %v2686_v23   ;;  %v2783_v23 = vmul.f32 %v6456_v48, %v5225_v38  ;;  %v2934_v48 = vadd.s32 %v6299_v20, %v5348_v33  ;;  %v10564_v20 = vld [vmem:[#allocation179_spill] sm:$0xff] }
 0x600   : > { %2722 = vperm.xlu2 %4328, %v2687_v7   ;;  %v2784_v7 = vmul.f32 %v6463_v27, %v5306_v25 }
 0x604   : > { %v6601_v30 = vpop.permute.xlu0 %2670 }
 0x605   : > { %v2690_v35 = vadd.s32 %v6601_v30, %v10503_v11  ;;  %v2776_v11 = vmul.f32 %v6441_v60, %v5228_v22  ;;  %v2781_v60 = vmul.f32 %v6454_v63, %v5281_v2  ;;  %v2789_v63 = vmul.f32 %v6477_v17, %v5278_v51 }
 0x607   : > { %2728 = vperm.xlu1 %4327, %v2689_v47   ;;  %v10563_v47 = vld [vmem:[#allocation177_spill] sm:$0xff] }
 0x608   : > { %2731 = vperm.xlu2 %4328, %v2690_v35   ;;  %v2936_v55 = vadd.s32 %v6331_v45, %v10563_v47  ;;  %v2937_v35 = vadd.s32 %v6307_v43, %v5375_v0  ;;  %v10578_v47 = vld [vmem:[#allocation85_spill] sm:$0xff] }
 0x60c   : > { %v6609_v26 = vpop.permute.xlu0 %2676 }
 0x60d   : > { %10560 = vst [vmem:[#allocation128_spill] sm:$0xff] %v6609_v26  ;;  %v2693_v6 = vadd.s32 %v6609_v26, %v10506_v28  ;;  %v2778_v28 = vmul.f32 %v6447_v24, %v5255_v29  ;;  %v2786_v24 = vmul.f32 %v6468_v8, %v5252_v21  ;;  %v6644_v8 = vpop.permute.xlu1 %2666  ;;  %v10612_v26 = vld [vmem:[#allocation20_spill] sm:$0xff] }
 0x60f   : > { %2737 = vperm.xlu1 %4327, %v2692_v13   ;;  %v2938_v13 = vadd.s32 %v6353_v44, %v10564_v20  ;;  %v10573_v44 = vld [vmem:[#allocation184_spill] sm:$0xff] }
 0x610   : > { %2740 = vperm.xlu2 %4328, %v2693_v6  }
 0x615   : > { %v6655_v6 = vpop.permute.xlu1 %2672 }
 0x616   : > { %10565 = vst [vmem:[#allocation179_spill] sm:$0xff] %v6655_v6 }
 0x617   : > { %4329 = vset.pattern.permute.xlu1 %v10218_v54 }
 0x618   : > { %4330 = vset.pattern.permute.xlu2 %v10218_v54  ;;  %2797 = vperm.xlu1 %4329, %v2775_v40   ;;  %v10566_v40 = vld [vmem:[#allocation188_spill] sm:$0xff] }
 0x619   : > { %2802 = vperm.xlu2 %4330, %v2776_v11   ;;  %v10567_v11 = vld [vmem:[#allocation323_spill] sm:$0xff] }
 0x620   : > { %2807 = vperm.xlu1 %4329, %v2777_v14   ;;  %v2939_v14 = vadd.s32 %v10567_v11, %v10566_v40 }
 0x621   : > { %2812 = vperm.xlu2 %4330, %v2778_v28  }
 0x628   : > { %2822 = vperm.xlu1 %4329, %v2780_v59   ;;  %v10568_v59 = vld [vmem:[#allocation181_spill] sm:$0xff] }
 0x629   : > { %2827 = vperm.xlu2 %4330, %v2781_v60   ;;  %v10569_v60 = vld [vmem:[#allocation70_spill] sm:$0xff] }
 0x62a   : > { %v2941_v43 = vadd.s32 %v10569_v60, %v10568_v59  ;;  %v10577_v59 = vld [vmem:[#allocation187_spill] sm:$0xff]  ;;  %v211_v60 = vlaneseq }
 0x62b   : > { %v2947_v46 = vadd.s32 %v10578_v47, %v10577_v59 }
 0x630   : > { %2837 = vperm.xlu1 %4329, %v2783_v23   ;;  %v10570_v23 = vld [vmem:[#allocation191_spill] sm:$0xff] }
 0x631   : > { %2842 = vperm.xlu2 %4330, %v2784_v7   ;;  %v10571_v7 = vld [vmem:[#allocation55_spill] sm:$0xff] }
 0x638   : > { %2852 = vperm.xlu1 %4329, %v2786_v24   ;;  %v2942_v24 = vadd.s32 %v10571_v7, %v10570_v23  ;;  %v10579_v7 = vld [vmem:[#allocation197_spill] sm:$0xff] }
 0x639   : > { %2857 = vperm.xlu2 %4330, %v2787_v42  }
 0x640   : > { %2867 = vperm.xlu1 %4329, %v2789_v63  }
 0x641   : > { %4331 = vset.pattern.permute.xlu2 %v10000_v16 }
 0x642   : > { %2951 = vperm.xlu2 %4331, %v2934_v48   ;;  %v6642_v27 = vpop.permute.xlu2 %2698  ;;  %v10574_v48 = vld [vmem:[#allocation78_spill] sm:$0xff] }
 0x643   : > { %10562 = vst [vmem:[#allocation338_spill] sm:$0xff] %v6642_v27  ;;  %v10576_v27 = vld [vmem:[#allocation49_spill] sm:$0xff] }
 0x648   : > { %4332 = vset.pattern.permute.xlu1 %v10000_v16 }
 0x649   : > { %2957 = vperm.xlu1 %4332, %v2936_v55   ;;  %v2944_v55 = vadd.s32 %v10574_v48, %v10573_v44 }
 0x64a   : > { %2960 = vperm.xlu2 %4331, %v2937_v35   ;;  %v6651_v17 = vpop.permute.xlu2 %2707  ;;  %v10575_v35 = vld [vmem:[#allocation193_spill] sm:$0xff] }
 0x64b   : > { %v2945_v11 = vadd.s32 %v10576_v27, %v10575_v35 }
 0x651   : > { %2963 = vperm.xlu1 %4332, %v2938_v13  }
 0x652   : > { %2966 = vperm.xlu2 %4331, %v2939_v14   ;;  %v2714_v28 = vpop.permute.xlu2 %2713 }
 0x659   : > { %v6663_v42 = vpop.permute.xlu1 %2695  ;;  %2972 = vperm.xlu1 %4332, %v2941_v43  }
 0x65a   : > { %10572 = vst [vmem:[#allocation188_spill] sm:$0xff] %v6663_v42  ;;  %2975 = vperm.xlu2 %4331, %v2942_v24   ;;  %v2723_v63 = vpop.permute.xlu2 %2722  ;;  %v2948_v42 = vadd.s32 %v10580_v57, %v10579_v7  ;;  %v6677_v24 = vpop.permute.xlu0 %2792  ;;  %v10613_v7 = vld [vmem:[#allocation162_spill] sm:$0xff] }
 0x65b   : > { %10581 = vst [vmem:[#allocation323_spill] sm:$0xff] %v6677_v24 }
 0x661   : > { %v6669_v13 = vpop.permute.xlu1 %2704  ;;  %2981 = vperm.xlu1 %4332, %v2944_v55  }
 0x662   : > { %2984 = vperm.xlu2 %4331, %v2945_v11   ;;  %v2732_v14 = vpop.permute.xlu2 %2731  ;;  %v6689_v57 = vpop.permute.xlu0 %2817 }
 0x669   : > { %v6675_v43 = vpop.permute.xlu1 %2710  ;;  %2990 = vperm.xlu1 %4332, %v2947_v46  }
 0x66a   : > { %2993 = vperm.xlu2 %4331, %v2948_v42   ;;  %v2741_v48 = vpop.permute.xlu2 %2740  ;;  %v6699_v55 = vpop.permute.xlu0 %2832 }
 0x66b   : > { %10585 = vst [vmem:[#allocation193_spill] sm:$0xff] %v6699_v55  ;;  %v10607_v55 = vld [vmem:[#allocation16_spill] sm:$0xff] }
 0x671   : > { %v6679_v12 = vpop.permute.xlu1 %2719  ;;  %3030 = vrot.lane.b32.xlu1 %v5437_v5, %s4364_s19 }
 0x672   : > { %10582 = vst [vmem:[#allocation191_spill] sm:$0xff] %v6679_v12  ;;  %3032 = vrot.lane.b32.xlu2 %v5152_v34, %s4364_s19  ;;  %4334 = vset.pattern.permute.xlu1 %v10218_v54  ;;  %v6709_v24 = vpop.permute.xlu0 %2847 }
 0x673   : > { %v6686_v27 = vpop.permute.xlu2 %2802  ;;  %4333 = vset.pattern.permute.xlu2 %v10218_v54  ;;  %10588 = vst [vmem:[#allocation71_spill] sm:$0xff] %v6709_v24  ;;  %v6729_v24 = vand.u32 127, %v211_v60  ;;  %v10596_v60 = vld [vmem:[#allocation22_spill] sm:$0xff] }
 0x674   : > { %10583 = vst [vmem:[#allocation55_spill] sm:$0xff] %v6686_v27 }
 0x675   : > { %vm2754_vm0 = vcmp.eq.s32.totalorder %v6729_v24, %v2714_v28  ;;  %vm2760_vm2 = vcmp.eq.s32.totalorder %v6729_v24, %v2723_v63  ;;  %vm2766_vm4 = vcmp.eq.s32.totalorder %v6729_v24, %v2732_v14  ;;  %vm2772_vm6 = vcmp.eq.s32.totalorder %v6729_v24, %v2741_v48 }
 0x676   : > { %vm2750_vm11 = vcmp.eq.s32.totalorder %v6729_v24, %v6651_v17  ;;  %vm2748_vm13 = vcmp.eq.s32.totalorder %v6729_v24, %v6669_v13 }
 0x679   : > { %v6691_v46 = vpop.permute.xlu1 %2728  ;;  %3036 = vrot.lane.b32.xlu1 %v5176_v53, %s4364_s19 }
 0x67a   : > { %10584 = vst [vmem:[#allocation184_spill] sm:$0xff] %v6691_v46  ;;  %3038 = vrot.lane.b32.xlu2 %v5255_v29, %s4364_s19 }
 0x67b   : > { %v6697_v42 = vpop.permute.xlu2 %2812 }
 0x681   : > { %3042 = vrot.lane.b32.xlu1 %v5202_v18, %s4364_s19  ;;  %v6703_v11 = vpop.permute.xlu1 %2737 }
 0x682   : > { %10586 = vst [vmem:[#allocation49_spill] sm:$0xff] %v6703_v11  ;;  %3044 = vrot.lane.b32.xlu2 %v5281_v2, %s4364_s19  ;;  %v6721_v11 = vpop.permute.xlu0 %2862 }
 0x683   : > { %v6707_v27 = vpop.permute.xlu2 %2827  ;;  %10591 = vst [vmem:[#allocation341_spill] sm:$0xff] %v6721_v11 }
 0x684   : > { %10587 = vst [vmem:[#allocation187_spill] sm:$0xff] %v6707_v27 }
 0x689   : > { %3048 = vrot.lane.b32.xlu1 %v5225_v38, %s4364_s19 }
 0x68a   : > { %v6713_v29 = vpop.permute.xlu1 %2797  ;;  %3050 = vrot.lane.b32.xlu2 %v5306_v25, %s4364_s19 }
 0x68b   : > { %10589 = vst [vmem:[#allocation339_spill] sm:$0xff] %v6713_v29  ;;  %v6717_v47 = vpop.permute.xlu2 %2842  ;;  %v6732_v29 = vadd.s32 128, %v6729_v24 }
 0x68c   : > { %10590 = vst [vmem:[#allocation340_spill] sm:$0xff] %v6717_v47 }
 0x68d   : > { %vm2755_vm1 = vcmp.eq.s32.totalorder %v6732_v29, %v2714_v28  ;;  %vm2761_vm3 = vcmp.eq.s32.totalorder %v6732_v29, %v2723_v63  ;;  %vm2767_vm5 = vcmp.eq.s32.totalorder %v6732_v29, %v2732_v14  ;;  %vm2773_vm7 = vcmp.eq.s32.totalorder %v6732_v29, %v2741_v48 }
 0x68e   : > { %vm2751_vm12 = vcmp.eq.s32.totalorder %v6732_v29, %v6651_v17  ;;  %vm2749_vm14 = vcmp.eq.s32.totalorder %v6732_v29, %v6669_v13 }
 0x691   : > { %3054 = vrot.lane.b32.xlu1 %v5252_v21, %s4364_s19  ;;  %v3035_v21 = vpop.permute.xlu0 %3034 }
 0x692   : > { %v6723_v46 = vpop.permute.xlu1 %2807  ;;  %3056 = vrot.lane.b32.xlu2 %v5329_v32, %s4364_s19 }
 0x693   : > { %v6727_v27 = vpop.permute.xlu2 %2857  ;;  %v2877_v17 = vsel %vm2749_vm14, %v6723_v46, 0.0 }
 0x694   : > { %10592 = vst [vmem:[#allocation342_spill] sm:$0xff] %v6727_v27  ;;  %v3080_v27 = vmul.f32 %v3035_v21, %v10596_v60 }
 0x699   : > { %3060 = vrot.lane.b32.xlu1 %v5278_v51, %s4364_s19 }
 0x69a   : > { %v2823_v47 = vpop.permute.xlu1 %2822 }
 0x69b   : > { %v6738_v25 = vsel %vm2754_vm0, %v2823_v47, 0.0  ;;  %v6740_v11 = vsel %vm2755_vm1, %v2823_v47, 0.0  ;;  %vm2752_vm0 = vcmp.eq.s32.totalorder %v6729_v24, %v6675_v43  ;;  %vm2753_vm1 = vcmp.eq.s32.totalorder %v6732_v29, %v6675_v43 }
 0x69c   : > { %10593 = vst [vmem:[#allocation343_spill] sm:$0xff] %v6738_v25  ;;  %v6742_v32 = vpop.permute.xlu2 %2951 }
 0x69d   : > { %10594 = vst [vmem:[#allocation344_spill] sm:$0xff] %v6740_v11 }
 0x69e   : > { %10595 = vst [vmem:[#allocation345_spill] sm:$0xff] %v6742_v32 }
 0x6a1   : > { %3106 = vperm.xlu1 %4334, %v3080_v27  }
 0x6a2   : > { %v2838_v51 = vpop.permute.xlu1 %2837 }
 0x6a3   : > { %v6747_v45 = vsel %vm2760_vm2, %v2838_v51, 0.0  ;;  %v6749_v56 = vsel %vm2761_vm3, %v2838_v51, 0.0 }
 0x6a4   : > { %10597 = vst [vmem:[#allocation22_spill] sm:$0xff] %v6747_v45  ;;  %v6751_v28 = vpop.permute.xlu2 %2960 }
 0x6a5   : > { %10598 = vst [vmem:[#allocation346_spill] sm:$0xff] %v6749_v56  ;;  %vm3004_vm2 = vcmp.eq.s32.totalorder %v6729_v24, %v6751_v28  ;;  %vm3005_vm3 = vcmp.eq.s32.totalorder %v6732_v29, %v6751_v28 }
 0x6aa   : > { %v2853_v47 = vpop.permute.xlu1 %2852 }
 0x6ab   : > { %v6755_v11 = vsel %vm2766_vm4, %v2853_v47, 0.0  ;;  %v6757_v60 = vsel %vm2767_vm5, %v2853_v47, 0.0 }
 0x6ac   : > { %10599 = vst [vmem:[#allocation347_spill] sm:$0xff] %v6755_v11  ;;  %v6759_v27 = vpop.permute.xlu2 %2966 }
 0x6ad   : > { %10600 = vst [vmem:[#allocation348_spill] sm:$0xff] %v6757_v60 }
 0x6b2   : > { %v2868_v63 = vpop.permute.xlu1 %2867 }
 0x6b3   : > { %v6763_v51 = vsel %vm2772_vm6, %v2868_v63, 0.0  ;;  %v6765_v25 = vsel %vm2773_vm7, %v2868_v63, 0.0 }
 0x6b4   : > { %10601 = vst [vmem:[#allocation349_spill] sm:$0xff] %v6763_v51  ;;  %v6767_v56 = vpop.permute.xlu2 %2975 }
 0x6b5   : > { %10602 = vst [vmem:[#allocation350_spill] sm:$0xff] %v6765_v25  ;;  %v10610_v25 = vld [vmem:[#allocation21_spill] sm:$0xff] }
 0x6b6   : > { %10603 = vst [vmem:[#allocation351_spill] sm:$0xff] %v6767_v56 }
 0x6bb   : > { %v6769_v45 = vpop.permute.xlu1 %2957 }
 0x6bc   : > { %10604 = vst [vmem:[#allocation352_spill] sm:$0xff] %v6769_v45  ;;  %v6771_v14 = vpop.permute.xlu2 %2984 }
 0x6bd   : > { %10605 = vst [vmem:[#allocation353_spill] sm:$0xff] %v6771_v14 }
 0x6c3   : > { %v6773_v11 = vpop.permute.xlu1 %2963 }
 0x6c4   : > { %v6775_v47 = vpop.permute.xlu2 %2993  ;;  %vm3006_vm4 = vcmp.eq.s32.totalorder %v6729_v24, %v6773_v11  ;;  %vm3007_vm5 = vcmp.eq.s32.totalorder %v6732_v29, %v6773_v11  ;;  %v2880_v11 = vsel %vm2752_vm0, %v6689_v57, 0.0 }
 0x6c5   : > { %10606 = vst [vmem:[#allocation354_spill] sm:$0xff] %v6775_v47 }
 0x6cb   : > { %v6777_v60 = vpop.permute.xlu1 %2972 }
 0x6cc   : > { %v3033_v32 = vpop.permute.xlu2 %3032 }
 0x6cd   : > { %v3079_v48 = vmul.f32 %v3033_v32, %v10607_v55  ;;  %v3239_v55 = vadd.s32 %v6567_v4, %v10613_v7 }
 0x6cf   : > { %3101 = vperm.xlu0 %4322, %v3079_v48  }
 0x6d3   : > { %v6780_v12 = vpop.permute.xlu1 %2981 }
 0x6d4   : > { %10608 = vst [vmem:[#allocation16_spill] sm:$0xff] %v6780_v12  ;;  %v6782_v63 = vpop.permute.xlu2 %3038  ;;  %v10614_v12 = vld [vmem:[#allocation24_spill] sm:$0xff] }
 0x6d5   : > { %10609 = vst [vmem:[#allocation355_spill] sm:$0xff] %v6782_v63  ;;  %v3082_v51 = vmul.f32 %v6782_v63, %v10610_v25  ;;  %v10616_v63 = vld [vmem:[#allocation29_spill] sm:$0xff] }
 0x6d7   : > { %3116 = vperm.xlu1 %4334, %v3082_v51   ;;  %v3336_v51 = vmul.f32 %v3035_v21, %v5228_v22  ;;  %v3238_v22 = vadd.s32 %v6563_v15, %v5348_v33  ;;  %v3243_v21 = vadd.s32 %v6571_v62, %v10566_v40  ;;  %v3241_v15 = vadd.s32 %v6575_v36, %v5375_v0  ;;  %v10621_v0 = vld [vmem:[#allocation220_spill] sm:$0xff] }
 0x6d8   : > { %v10622_v36 = vld [vmem:[#allocation168_spill] sm:$0xff] }
 0x6d9   : > { %v3247_v40 = vadd.s32 %v6593_v49, %v10622_v36  ;;  %v10627_v49 = vld [vmem:[#allocation31_spill] sm:$0xff] }
 0x6db   : > { %v6786_v45 = vpop.permute.xlu1 %2990 }
 0x6dc   : > { %10611 = vst [vmem:[#allocation21_spill] sm:$0xff] %v6786_v45  ;;  %v3045_v14 = vpop.permute.xlu2 %3044  ;;  %v3041_v45 = vpop.permute.xlu0 %3040 }
 0x6dd   : > { %v3085_v56 = vmul.f32 %v3045_v14, %v10507_v1  ;;  %v10615_v1 = vld [vmem:[#allocation26_spill] sm:$0xff]  ;;  %v3341_v62 = vmul.f32 %v3045_v14, %v5281_v2  ;;  %v3339_v2 = vmul.f32 %v3041_v45, %v10317_v58 }
 0x6df   : > { %3131 = vperm.xlu1 %4334, %v3085_v56   ;;  %v3083_v56 = vmul.f32 %v3041_v45, %v10615_v1  ;;  %v10633_v1 = vld [vmem:[#allocation175_spill] sm:$0xff] }
 0x6e3   : > { %v3031_v47 = vpop.permute.xlu1 %3030 }
 0x6e4   : > { %v3078_v41 = vmul.f32 %v3031_v47, %v10612_v26  ;;  %v6831_v14 = vpop.permute.xlu2 %3050 }
 0x6e5   : > { %10624 = vst [vmem:[#allocation162_spill] sm:$0xff] %v6831_v14  ;;  %v3088_v58 = vmul.f32 %v6831_v14, %v10170_v39 }
 0x6e6   : > { %3096 = vperm.xlu2 %4333, %v3078_v41   ;;  %v3334_v41 = vmul.f32 %v3031_v47, %v5437_v5  ;;  %v10618_v5 = vld [vmem:[#allocation165_spill] sm:$0xff] }
 0x6e7   : > { %4337 = vset.pattern.permute.xlu1 %v10000_v16  ;;  %v3244_v33 = vadd.s32 %v6585_v3, %v10618_v5  ;;  %v3246_v3 = vadd.s32 %v6587_v9, %v10570_v23  ;;  %v10625_v9 = vld [vmem:[#allocation87_spill] sm:$0xff] }
 0x6e8   : > { %3258 = vperm.xlu1 %4337, %v3239_v55   ;;  %v10629_v55 = vld [vmem:[#allocation172_spill] sm:$0xff] }
 0x6eb   : > { %v3037_v48 = vpop.permute.xlu1 %3036 }
 0x6ec   : > { %v3081_v25 = vmul.f32 %v3037_v48, %v10614_v12  ;;  %v3337_v4 = vmul.f32 %v3037_v48, %v5176_v53  ;;  %v3335_v12 = vmul.f32 %v3033_v32, %v5152_v34  ;;  %v10617_v53 = vld [vmem:[#allocation209_spill] sm:$0xff]  ;;  %v3242_v34 = vadd.s32 %v6579_v61, %v10564_v20  ;;  %v10620_v32 = vld [vmem:[#allocation30_spill] sm:$0xff]  ;;  %v3047_v20 = vpop.permute.xlu0 %3046  ;;  %v10630_v48 = vld [vmem:[#allocation36_spill] sm:$0xff]  ;;  %v6847_v39 = vpop.permute.xlu2 %3056 }
 0x6ed   : > { %v3086_v47 = vmul.f32 %v3047_v20, %v10627_v49  ;;  %10631 = vst [vmem:[#allocation29_spill] sm:$0xff] %v6847_v39 }
 0x6ee   : > { %3111 = vperm.xlu2 %4333, %v3081_v25  }
 0x6f0   : > { %4339 = vset.pattern.permute.xlu1 %v10218_v54 }
 0x6f1   : > { %3362 = vperm.xlu1 %4339, %v3336_v51  }
 0x6f3   : > { %v3043_v26 = vpop.permute.xlu1 %3042 }
 0x6f4   : > { %v3084_v6 = vmul.f32 %v3043_v26, %v10616_v63  ;;  %v3340_v23 = vmul.f32 %v3043_v26, %v5202_v18  ;;  %v6841_v63 = vpop.permute.xlu0 %3052  ;;  %v3342_v18 = vmul.f32 %v3047_v20, %v10323_v10  ;;  %v10637_v10 = vld [vmem:[#allocation35_spill] sm:$0xff] }
 0x6f5   : > { %10628 = vst [vmem:[#allocation26_spill] sm:$0xff] %v6841_v63  ;;  %v3089_v25 = vmul.f32 %v6841_v63, %v10630_v48  ;;  %v10647_v48 = vld [vmem:[#allocation329_spill] sm:$0xff] }
 0x6f6   : > { %3121 = vperm.xlu2 %4333, %v3083_v56   ;;  %3126 = vperm.xlu0 %4322, %v3084_v6   ;;  %v10619_v6 = vld [vmem:[#allocation213_spill] sm:$0xff]  ;;  %vm2448_vm6 = vcmp.eq.s32.totalorder %v6729_v24, %v10647_v48  ;;  %vm2449_vm7 = vcmp.eq.s32.totalorder %v6732_v29, %v10647_v48  ;;  %v10675_v48 = vld [vmem:[#allocation236_spill] sm:$0xff] }
 0x6f7   : > { %v10763_v63 = vld [vmem:[#allocation53_spill] sm:$0xff] }
 0x6f9   : > { %3367 = vperm.xlu1 %4339, %v3337_v4   ;;  %v10634_v4 = vld [vmem:[#allocation101_spill] sm:$0xff] }
 0x6fb   : > { %v6829_v61 = vpop.permute.xlu1 %3048 }
 0x6fc   : > { %10623 = vst [vmem:[#allocation20_spill] sm:$0xff] %v6829_v61  ;;  %v3343_v26 = vmul.f32 %v6829_v61, %v5225_v38  ;;  %v2878_v38 = vsel %vm2750_vm11, %v6697_v42, 0.0  ;;  %vm3013_vm11 = vcmp.eq.s32.totalorder %v6732_v29, %v6777_v60 }
 0x6fe   : > { %4335 = vset.pattern.permute.xlu2 %v10000_v16  ;;  %3352 = vperm.xlu0 %4322, %v3334_v41  }
 0x6ff   : > { %3255 = vperm.xlu2 %4335, %v3238_v22  }
 0x701   : > { %4342 = vset.pattern.permute.xlu1 %v10000_v16 }
 0x702   : > { %3270 = vperm.xlu1 %4342, %v3243_v21   ;;  %v3091_v21 = vmul.f32 %v6847_v39, %v10637_v10  ;;  %v10757_v39 = vld [vmem:[#allocation190_spill] sm:$0xff] }
 0x703   : > { %v6838_v45 = vpop.permute.xlu1 %3054 }
 0x704   : > { %10626 = vst [vmem:[#allocation24_spill] sm:$0xff] %v6838_v45  ;;  %v3090_v56 = vmul.f32 %v6838_v45, %v10389_v52  ;;  %v10639_v52 = vld [vmem:[#allocation328_spill] sm:$0xff]  ;;  %v10758_v45 = vld [vmem:[#allocation122_spill] sm:$0xff] }
 0x705   : > { %vm2446_vm10 = vcmp.eq.s32.totalorder %v6729_v24, %v10639_v52  ;;  %vm2447_vm15 = vcmp.eq.s32.totalorder %v6732_v29, %v10639_v52 }
 0x706   : > { %4336 = vset.pattern.permute.xlu0 %v10000_v16 }
 0x707   : > { %4338 = vset.pattern.permute.xlu2 %v10218_v54  ;;  %562 = vperm.xlu0 %4336, %v10617_v53   ;;  %v2879_v53 = vsel %vm2751_vm12, %v6697_v42, 0.0  ;;  %v3248_v42 = vadd.s32 %v6644_v8, %v10573_v44 }
 0x708   : > { %3357 = vperm.xlu2 %4338, %v3335_v12   ;;  %v10638_v12 = vld [vmem:[#allocation327_spill] sm:$0xff] }
 0x709   : > { %vm2444_vm8 = vcmp.eq.s32.totalorder %v6729_v24, %v10638_v12  ;;  %vm2445_vm9 = vcmp.eq.s32.totalorder %v6732_v29, %v10638_v12 }
 0x70a   : > { %3273 = vperm.xlu1 %4342, %v3244_v33   ;;  %v2876_v33 = vsel %vm2748_vm13, %v6723_v46, 0.0 }
 0x70b   : > { %v6849_v51 = vpop.permute.xlu1 %3060 }
 0x70c   : > { %10632 = vst [vmem:[#allocation209_spill] sm:$0xff] %v6849_v51 }
 0x70f   : > { %587 = vperm.xlu0 %4336, %v10619_v6   ;;  %v2622_v6 = vsel %vm2446_vm10, %v6521_v31, 0.0  ;;  %vm3012_vm10 = vcmp.eq.s32.totalorder %v6729_v24, %v6777_v60 }
 0x710   : > { %4340 = vset.pattern.permute.xlu2 %v10000_v16  ;;  %v2910_v13 = vadd.f32 %v2878_v38, %v2622_v6 }
 0x711   : > { %3264 = vperm.xlu2 %4340, %v3241_v15   ;;  %v2620_v15 = vsel %vm2444_vm8, %v6528_v50, 0.0  ;;  %vm3008_vm8 = vcmp.eq.s32.totalorder %v6729_v24, %v6759_v27 }
 0x712   : > { %4345 = vset.pattern.permute.xlu1 %v10218_v54 }
 0x713   : > { %3387 = vperm.xlu1 %4345, %v3341_v62   ;;  %v6859_v22 = vpop.permute.xlu1 %3106  ;;  %v2621_v62 = vsel %vm2445_vm9, %v6528_v50, 0.0  ;;  %v10640_v50 = vld [vmem:[#allocation105_spill] sm:$0xff]  ;;  %vm3009_vm9 = vcmp.eq.s32.totalorder %v6732_v29, %v6759_v27 }
 0x714   : > { %10636 = vst [vmem:[#allocation213_spill] sm:$0xff] %v6859_v22  ;;  %v2909_v46 = vadd.f32 %v2877_v17, %v2621_v62  ;;  %v10658_v17 = vld [vmem:[#allocation17_spill] sm:$0xff]  ;;  %v10759_v22 = vld [vmem:[#allocation192_spill] sm:$0xff] }
 0x717   : > { %602 = vperm.xlu0 %4336, %v10620_v32  }
 0x719   : > { %3267 = vperm.xlu2 %4340, %v3242_v34   ;;  %v2623_v34 = vsel %vm2447_vm15, %v6521_v31, 0.0  ;;  %v6900_v31 = vpop.permute.xlu0 %3058 }
 0x71a   : > { %v2911_v32 = vadd.f32 %v2879_v53, %v2623_v34  ;;  %10641 = vst [vmem:[#allocation30_spill] sm:$0xff] %v6900_v31  ;;  %v10654_v53 = vld [vmem:[#allocation263_spill] sm:$0xff] }
 0x71b   : > { %4346 = vset.pattern.permute.xlu1 %v10000_v16  ;;  %v10660_v34 = vld [vmem:[#allocation179_spill] sm:$0xff] }
 0x71c   : > { %3279 = vperm.xlu1 %4346, %v3246_v3   ;;  %v2908_v3 = vadd.f32 %v2876_v33, %v2620_v15  ;;  %v10655_v33 = vld [vmem:[#allocation173_spill] sm:$0xff] }
 0x71d   : > { %v3250_v60 = vadd.s32 %v6601_v30, %v10655_v33 }
 0x71f   : > { %617 = vperm.xlu0 %4336, %v10621_v0  }
 0x721   : > { %4343 = vset.pattern.permute.xlu2 %v10218_v54 }
 0x722   : > { %3377 = vperm.xlu2 %4343, %v3339_v2   ;;  %v10642_v2 = vld [vmem:[#allocation39_spill] sm:$0xff] }
 0x723   : > { %v3092_v0 = vmul.f32 %v6900_v31, %v10642_v2  ;;  %v10751_v31 = vld [vmem:[#allocation147_spill] sm:$0xff] }
 0x724   : > { %3282 = vperm.xlu1 %4346, %v3247_v40  }
 0x727   : > { %808 = vperm.xlu0 %4336, %v10625_v9  }
 0x72a   : > { %3382 = vperm.xlu2 %4343, %v3340_v23  }
 0x72c   : > { %4348 = vset.pattern.permute.xlu1 %v10218_v54 }
 0x72d   : > { %3146 = vperm.xlu1 %4348, %v3088_v58  }
 0x72f   : > { %833 = vperm.xlu0 %4336, %v10629_v55  }
 0x732   : > { %3136 = vperm.xlu2 %4343, %v3086_v47  }
 0x735   : > { %3151 = vperm.xlu1 %4348, %v3089_v25   ;;  %v2881_v25 = vsel %vm2753_vm1, %v6689_v57, 0.0 }
 0x737   : > { %848 = vperm.xlu0 %4336, %v10633_v1   ;;  %v2625_v1 = vsel %vm2449_vm7, %v6535_v37, 0.0 }
 0x738   : > { %v2913_v10 = vadd.f32 %v2881_v25, %v2625_v1 }
 0x73a   : > { %3392 = vperm.xlu2 %4343, %v3342_v18   ;;  %v2624_v18 = vsel %vm2448_vm6, %v6535_v37, 0.0  ;;  %v10649_v37 = vld [vmem:[#allocation40_spill] sm:$0xff] }
 0x73d   : > { %3156 = vperm.xlu1 %4348, %v3090_v56   ;;  %v3249_v56 = vadd.s32 %v6597_v19, %v10575_v35  ;;  %v3093_v19 = vmul.f32 %v6849_v51, %v10649_v37  ;;  %v10682_v37 = vld [vmem:[#allocation237_spill] sm:$0xff] }
 0x73f   : > { %863 = vperm.xlu0 %4336, %v10634_v4   ;;  %v10648_v4 = vld [vmem:[#allocation7_spill] sm:$0xff] }
 0x740   : > { %v6857_v41 = vpop.permute.xlu2 %3096 }
 0x741   : > { %10635 = vst [vmem:[#allocation165_spill] sm:$0xff] %v6857_v41  ;;  %v6958_v6 = vpop.permute.xlu0 %3101  ;;  %v10766_v41 = vld [vmem:[#allocation208_spill] sm:$0xff] }
 0x742   : > { %3397 = vperm.xlu2 %4343, %v3343_v26   ;;  %v2912_v26 = vadd.f32 %v2880_v11, %v2624_v18  ;;  %10659 = vst [vmem:[#allocation328_spill] sm:$0xff] %v6958_v6 }
 0x745   : > { %3161 = vperm.xlu1 %4348, %v3091_v21  }
 0x747   : > { %878 = vperm.xlu0 %4336, %v10640_v50   ;;  %v10665_v50 = vld [vmem:[#allocation197_spill] sm:$0xff] }
 0x748   : > { %v3112_v44 = vpop.permute.xlu2 %3111 }
 0x749   : > { %v3117_v40 = vpop.permute.xlu1 %3116  ;;  %v3180_v20 = vsel %vm3004_vm2, %v3112_v44, 0.0  ;;  %v3181_v9 = vsel %vm3005_vm3, %v3112_v44, 0.0 }
 0x74a   : > { %v3182_v23 = vsel %vm3006_vm4, %v3117_v40, 0.0  ;;  %v3183_v58 = vsel %vm3007_vm5, %v3117_v40, 0.0  ;;  %v6906_v49 = vadd.f32 %v3180_v20, %v2908_v3  ;;  %v6908_v28 = vadd.f32 %v3181_v9, %v2909_v46  ;;  %4349 = vset.pattern.permute.xlu2 %v10000_v16  ;;  %v10663_v3 = vld [vmem:[#allocation38_spill] sm:$0xff]  ;;  %v10666_v46 = vld [vmem:[#allocation104_spill] sm:$0xff] }
 0x74b   : > { %v6911_v47 = vadd.f32 %v3182_v23, %v2910_v13  ;;  %v6913_v55 = vadd.f32 %v3183_v58, %v2911_v32  ;;  %3285 = vperm.xlu2 %4349, %v3248_v42   ;;  %v3251_v42 = vadd.s32 %v10660_v34, %v10577_v59  ;;  %v3252_v44 = vadd.s32 %v10666_v46, %v10665_v50  ;;  %v10669_v40 = vld [vmem:[#allocation272_spill] sm:$0xff]  ;;  %v10686_v46 = vld [vmem:[#allocation351_spill] sm:$0xff]  ;;  %v10767_v16 = vld [vmem:[#allocation210_spill] sm:$0xff] }
 0x74c   : > { %10643 = vst [vmem:[#allocation220_spill] sm:$0xff] %v6906_v49  ;;  %v10671_v20 = vld [vmem:[#allocation176_spill] sm:$0xff]  ;;  %vm3014_vm0 = vcmp.eq.s32.totalorder %v6729_v24, %v10686_v46  ;;  %vm3015_vm1 = vcmp.eq.s32.totalorder %v6732_v29, %v10686_v46  ;;  %v10697_v46 = vld [vmem:[#allocation71_spill] sm:$0xff] }
 0x74d   : > { %10644 = vst [vmem:[#allocation168_spill] sm:$0xff] %v6908_v28  ;;  %3166 = vperm.xlu1 %4348, %v3092_v0   ;;  %v10672_v9 = vld [vmem:[#allocation128_spill] sm:$0xff]  ;;  %v10717_v28 = vld [vmem:[#allocation354_spill] sm:$0xff] }
 0x74e   : > { %10645 = vst [vmem:[#allocation87_spill] sm:$0xff] %v6911_v47  ;;  %v3253_v23 = vadd.s32 %v10672_v9, %v10671_v20 }
 0x74f   : > { %10646 = vst [vmem:[#allocation31_spill] sm:$0xff] %v6913_v55  ;;  %1149 = vperm.xlu0 %4336, %v10648_v4   ;;  %v10716_v55 = vld [vmem:[#allocation124_spill] sm:$0xff] }
 0x750   : > { %v3122_v43 = vpop.permute.xlu2 %3121 }
 0x751   : > { %v3132_v35 = vpop.permute.xlu1 %3131  ;;  %v3184_v57 = vsel %vm3008_vm8, %v3122_v43, 0.0  ;;  %v3185_v21 = vsel %vm3009_vm9, %v3122_v43, 0.0  ;;  %v10681_v43 = vld [vmem:[#allocation191_spill] sm:$0xff] }
 0x752   : > { %v6942_v12 = vsel %vm3012_vm10, %v3132_v35, 0.0  ;;  %v6944_v52 = vsel %vm3013_vm11, %v3132_v35, 0.0  ;;  %v6946_v38 = vadd.f32 %v3184_v57, %v2912_v26  ;;  %v6948_v27 = vadd.f32 %v3185_v21, %v2913_v10 }
 0x753   : > { %10650 = vst [vmem:[#allocation172_spill] sm:$0xff] %v6942_v12  ;;  %3288 = vperm.xlu2 %4349, %v3249_v56   ;;  %v10678_v56 = vld [vmem:[#allocation235_spill] sm:$0xff]  ;;  %vm2758_vm12 = vcmp.eq.s32.totalorder %v6729_v24, %v10681_v43  ;;  %vm2759_vm13 = vcmp.eq.s32.totalorder %v6732_v29, %v10681_v43  ;;  %v10690_v43 = vld [vmem:[#allocation297_spill] sm:$0xff] }
 0x754   : > { %10651 = vst [vmem:[#allocation36_spill] sm:$0xff] %v6944_v52  ;;  %v10756_v12 = vld [vmem:[#allocation69_spill] sm:$0xff] }
 0x755   : > { %10652 = vst [vmem:[#allocation175_spill] sm:$0xff] %v6946_v38  ;;  %3171 = vperm.xlu1 %4348, %v3093_v19   ;;  %v10683_v19 = vld [vmem:[#allocation193_spill] sm:$0xff] }
 0x756   : > { %10653 = vst [vmem:[#allocation101_spill] sm:$0xff] %v6948_v27  ;;  %v2886_v35 = vsel %vm2758_vm12, %v10683_v19, 0.0  ;;  %v2887_v57 = vsel %vm2759_vm13, %v10683_v19, 0.0  ;;  %v10705_v27 = vld [vmem:[#allocation64_spill] sm:$0xff]  ;;  %vm3026_vm12 = vcmp.eq.s32.totalorder %v6729_v24, %v10717_v28  ;;  %vm3027_vm13 = vcmp.eq.s32.totalorder %v6732_v29, %v10717_v28 }
 0x757   : > { %1174 = vperm.xlu0 %4336, %v10654_v53   ;;  %v10684_v53 = vld [vmem:[#allocation331_spill] sm:$0xff] }
 0x758   : > { %vm2454_vm14 = vcmp.eq.s32.totalorder %v6729_v24, %v10684_v53  ;;  %vm2455_vm15 = vcmp.eq.s32.totalorder %v6732_v29, %v10684_v53  ;;  %v10693_v53 = vld [vmem:[#allocation42_spill] sm:$0xff] }
 0x759   : > { %v6953_v15 = vpop.permute.xlu2 %3255  ;;  %v2680_v47 = vadd.s32 %v10716_v55, %v10693_v53 }
 0x75a   : > { %10656 = vst [vmem:[#allocation35_spill] sm:$0xff] %v6953_v15  ;;  %v6955_v62 = vpop.permute.xlu1 %3258 }
 0x75b   : > { %10657 = vst [vmem:[#allocation327_spill] sm:$0xff] %v6955_v62  ;;  %3291 = vperm.xlu2 %4349, %v3250_v60   ;;  %v10685_v60 = vld [vmem:[#allocation114_spill] sm:$0xff] }
 0x75f   : > { %1189 = vperm.xlu0 %4336, %v10658_v17   ;;  %v2630_v17 = vsel %vm2454_vm14, %v10685_v60, 0.0 }
 0x762   : > { %v6962_v13 = vpop.permute.xlu2 %3357 }
 0x763   : > { %10661 = vst [vmem:[#allocation105_spill] sm:$0xff] %v6962_v13  ;;  %v6964_v32 = vpop.permute.xlu1 %3362  ;;  %3294 = vperm.xlu2 %4349, %v3251_v42   ;;  %v2631_v42 = vsel %vm2455_vm15, %v10685_v60, 0.0  ;;  %v10694_v60 = vld [vmem:[#allocation321_spill] sm:$0xff]  ;;  %v10744_v13 = vld [vmem:[#allocation144_spill] sm:$0xff] }
 0x764   : > { %10662 = vst [vmem:[#allocation39_spill] sm:$0xff] %v6964_v32  ;;  %v2919_v50 = vadd.f32 %v2887_v57, %v2631_v42  ;;  %v10736_v32 = vld [vmem:[#allocation139_spill] sm:$0xff] }
 0x767   : > { %1204 = vperm.xlu0 %4336, %v10663_v3   ;;  %v2918_v3 = vadd.f32 %v2886_v35, %v2630_v17  ;;  %v10692_v35 = vld [vmem:[#allocation301_spill] sm:$0xff]  ;;  %v2376_v17 = vadd.s32 %v10694_v60, %v10693_v53  ;;  %v10701_v60 = vld [vmem:[#allocation118_spill] sm:$0xff]  ;;  %v3500_v53 = vld [vmem:[%s9293_s1 + $0x30] sm:$0xff] }
 0x768   : > { %v6967_v30 = vpop.permute.xlu0 %3126 }
 0x769   : > { %10664 = vst [vmem:[#allocation329_spill] sm:$0xff] %v6967_v30 }
 0x76b   : > { %v6971_v2 = vpop.permute.xlu1 %3367  ;;  %3297 = vperm.xlu2 %4349, %v3252_v44   ;;  %v6973_v0 = vpop.permute.xlu2 %3264 }
 0x76c   : > { %10667 = vst [vmem:[#allocation7_spill] sm:$0xff] %v6971_v2 }
 0x76d   : > { %10668 = vst [vmem:[#allocation40_spill] sm:$0xff] %v6973_v0  ;;  %v10735_v0 = vld [vmem:[#allocation138_spill] sm:$0xff] }
 0x76f   : > { %1219 = vperm.xlu0 %4336, %v10669_v40  }
 0x770   : > { %v6976_v59 = vpop.permute.xlu0 %3352 }
 0x771   : > { %10670 = vst [vmem:[#allocation263_spill] sm:$0xff] %v6976_v59  ;;  %v10765_v59 = vld [vmem:[#allocation58_spill] sm:$0xff] }
 0x773   : > { %3300 = vperm.xlu2 %4349, %v3253_v23   ;;  %v6980_v58 = vpop.permute.xlu2 %3267 }
 0x774   : > { %10673 = vst [vmem:[#allocation173_spill] sm:$0xff] %v6980_v58  ;;  %v6982_v11 = vpop.permute.xlu1 %3270 }
 0x775   : > { %10674 = vst [vmem:[#allocation17_spill] sm:$0xff] %v6982_v11 }
 0x777   : > { %1400 = vperm.xlu0 %4336, %v10675_v48  }
 0x779   : > { %v6985_v25 = vpop.permute.xlu0 %562 }
 0x77c   : > { %v6987_v18 = vpop.permute.xlu2 %3377  ;;  %v6989_v1 = vpop.permute.xlu1 %3273 }
 0x77d   : > { %10676 = vst [vmem:[#allocation179_spill] sm:$0xff] %v6987_v18  ;;  %v10715_v18 = vld [vmem:[#allocation123_spill] sm:$0xff] }
 0x77e   : > { %10677 = vst [vmem:[#allocation38_spill] sm:$0xff] %v6989_v1 }
 0x77f   : > { %1425 = vperm.xlu0 %4336, %v10678_v56  }
 0x781   : > { %v6992_v26 = vpop.permute.xlu0 %587 }
 0x784   : > { %v6994_v4 = vpop.permute.xlu2 %3382 }
 0x785   : > { %10679 = vst [vmem:[#allocation197_spill] sm:$0xff] %v6994_v4  ;;  %v6996_v10 = vpop.permute.xlu1 %3387 }
 0x786   : > { %10680 = vst [vmem:[#allocation104_spill] sm:$0xff] %v6996_v10 }
 0x787   : > { %1440 = vperm.xlu0 %4336, %v10682_v37  }
 0x789   : > { %v7005_v21 = vpop.permute.xlu0 %602 }
 0x78c   : > { %v3137_v44 = vpop.permute.xlu2 %3136 }
 0x78d   : > { %v3190_v40 = vsel %vm3014_vm0, %v3137_v44, 0.0  ;;  %v3191_v9 = vsel %vm3015_vm1, %v3137_v44, 0.0 }
 0x78e   : > { %v7017_v23 = vadd.f32 %v3190_v40, %v2918_v3  ;;  %v7019_v48 = vadd.f32 %v3191_v9, %v2919_v50  ;;  %v7021_v56 = vpop.permute.xlu1 %3279  ;;  %v10696_v3 = vld [vmem:[#allocation184_spill] sm:$0xff] }
 0x78f   : > { %10689 = vst [vmem:[#allocation128_spill] sm:$0xff] %v7021_v56  ;;  %1455 = vperm.xlu0 %4336, %v10690_v43   ;;  %vm2764_vm2 = vcmp.eq.s32.totalorder %v6729_v24, %v10696_v3  ;;  %vm2765_vm3 = vcmp.eq.s32.totalorder %v6732_v29, %v10696_v3  ;;  %v10698_v9 = vld [vmem:[#allocation56_spill] sm:$0xff]  ;;  %v10699_v43 = vld [vmem:[#allocation70_spill] sm:$0xff]  ;;  %v10702_v56 = vld [vmem:[#allocation353_spill] sm:$0xff] }
 0x790   : > { %10687 = vst [vmem:[#allocation272_spill] sm:$0xff] %v7017_v23  ;;  %v2892_v44 = vsel %vm2764_vm2, %v10697_v46, 0.0  ;;  %v2893_v40 = vsel %vm2765_vm3, %v10697_v46, 0.0  ;;  %vm3020_vm6 = vcmp.eq.s32.totalorder %v6729_v24, %v10702_v56  ;;  %vm3021_vm7 = vcmp.eq.s32.totalorder %v6732_v29, %v10702_v56  ;;  %v3525_v56 = vld [vmem:[%s9293_s1 + $0xf8] sm:$0xff] }
 0x791   : > { %10688 = vst [vmem:[#allocation176_spill] sm:$0xff] %v7019_v48  ;;  %v7024_v37 = vpop.permute.xlu0 %617  ;;  %3655 = vmatpush.msra.mxu1 %v3525_v56  ;;  %4224 = vmatpush.msra.mxu3 %v3525_v56 }
 0x796   : > { %v7026_v19 = vpop.permute.xlu1 %3282 }
 0x797   : > { %10691 = vst [vmem:[#allocation236_spill] sm:$0xff] %v7026_v19  ;;  %1470 = vperm.xlu0 %4336, %v10692_v35   ;;  %v2381_v35 = vadd.s32 %v10699_v43, %v10698_v9  ;;  %v10700_v19 = vld [vmem:[#allocation333_spill] sm:$0xff] }
 0x798   : > { %vm2460_vm4 = vcmp.eq.s32.totalorder %v6729_v24, %v10700_v19  ;;  %vm2461_vm5 = vcmp.eq.s32.totalorder %v6732_v29, %v10700_v19 }
 0x799   : > { %v7029_v57 = vpop.permute.xlu0 %808  ;;  %v2637_v48 = vsel %vm2461_vm5, %v10701_v60, 0.0 }
 0x79a   : > { %v2925_v23 = vadd.f32 %v2893_v40, %v2637_v48  ;;  %v3509_v48 = vld [vmem:[%s9293_s1 + $0x78] sm:$0xff] }
 0x79b   : > { %3590 = vmatpush.msra.mxu0 %v3509_v48  ;;  %4208 = vmatpush.msra.mxu2 %v3509_v48  ;;  %v10709_v48 = vld [vmem:[#allocation85_spill] sm:$0xff] }
 0x79f   : > { %v7033_v42 = vpop.permute.xlu1 %3146  ;;  %2397 = vperm.xlu0 %4336, %v2376_v17   ;;  %v2636_v17 = vsel %vm2460_vm4, %v10701_v60, 0.0  ;;  %v10706_v60 = vld [vmem:[#allocation78_spill] sm:$0xff] }
 0x7a0   : > { %10695 = vst [vmem:[#allocation235_spill] sm:$0xff] %v7033_v42  ;;  %v2924_v3 = vadd.f32 %v2892_v44, %v2636_v17  ;;  %v2384_v44 = vadd.s32 %v10706_v60, %v10705_v27  ;;  %v3507_v17 = vld [vmem:[%s9293_s1 + $0x68] sm:$0xff]  ;;  %v3505_v60 = vld [vmem:[%s9293_s1 + $0x58] sm:$0xff] }
 0x7a1   : > { %v7039_v50 = vpop.permute.xlu0 %833  ;;  %v10752_v42 = vld [vmem:[#allocation185_spill] sm:$0xff] }
 0x7a7   : > { %v3152_v46 = vpop.permute.xlu1 %3151  ;;  %2412 = vperm.xlu0 %4336, %v2381_v35  }
 0x7a8   : > { %v3196_v43 = vsel %vm3020_vm6, %v3152_v46, 0.0  ;;  %v3197_v10 = vsel %vm3021_vm7, %v3152_v46, 0.0  ;;  %v3506_v46 = vld [vmem:[%s9293_s1 + $0x60] sm:$0xff] }
 0x7a9   : > { %v7055_v4 = vadd.f32 %v3196_v43, %v2924_v3  ;;  %v7057_v1 = vadd.f32 %v3197_v10, %v2925_v23  ;;  %v7059_v19 = vpop.permute.xlu0 %848  ;;  %v3508_v10 = vld [vmem:[%s9293_s1 + $0x70] sm:$0xff]  ;;  %v3523_v3 = vld [vmem:[%s9293_s1 + $0xe8] sm:$0xff]  ;;  %v3522_v43 = vld [vmem:[%s9293_s1 + $0xe0] sm:$0xff] }
 0x7aa   : > { %v3524_v23 = vld [vmem:[%s9293_s1 + $0xf0] sm:$0xff]  ;;  %3591 = vmatpush.msra.mxu0 %v3508_v10  ;;  %4209 = vmatpush.msra.mxu2 %v3508_v10  ;;  %v3521_v10 = vld [vmem:[%s9293_s1 + $0xd8] sm:$0xff] }
 0x7ab   : > { %10703 = vst [vmem:[#allocation191_spill] sm:$0xff] %v7055_v4  ;;  %3656 = vmatpush.msra.mxu1 %v3524_v23  ;;  %4225 = vmatpush.msra.mxu3 %v3524_v23  ;;  %v3504_v23 = vld [vmem:[%s9293_s1 + $0x50] sm:$0xff]  ;;  %v10713_v4 = vld [vmem:[#allocation341_spill] sm:$0xff] }
 0x7ac   : > { %10704 = vst [vmem:[#allocation237_spill] sm:$0xff] %v7057_v1  ;;  %3592 = vmatpush.msra.mxu0 %v3507_v17  ;;  %4210 = vmatpush.msra.mxu2 %v3507_v17  ;;  %v3520_v17 = vld [vmem:[%s9293_s1 + $0xd0] sm:$0xff] }
 0x7ad   : > { %3657 = vmatpush.msra.mxu1 %v3523_v3  ;;  %4226 = vmatpush.msra.mxu3 %v3523_v3 }
 0x7ae   : > { %3593 = vmatpush.msra.mxu0 %v3506_v46  ;;  %4211 = vmatpush.msra.mxu2 %v3506_v46  ;;  %v3503_v46 = vld [vmem:[%s9293_s1 + $0x48] sm:$0xff] }
 0x7af   : > { %v7069_v40 = vpop.permute.xlu1 %3156  ;;  %2421 = vperm.xlu0 %4336, %v2384_v44   ;;  %v10708_v44 = vld [vmem:[#allocation72_spill] sm:$0xff]  ;;  %3658 = vmatpush.msra.mxu1 %v3522_v43 }
 0x7b0   : > { %10707 = vst [vmem:[#allocation193_spill] sm:$0xff] %v7069_v40  ;;  %v2387_v56 = vadd.s32 %v10709_v48, %v10708_v44  ;;  %3594 = vmatpush.msra.mxu0 %v3505_v60  ;;  %v10711_v48 = vld [vmem:[#allocation49_spill] sm:$0xff]  ;;  %4227 = vmatpush.msra.mxu3 %v3522_v43  ;;  %v3502_v43 = vld [vmem:[%s9293_s1 + $0x40] sm:$0xff] }
 0x7b1   : > { %v7077_v35 = vpop.permute.xlu0 %863  ;;  %vm2770_vm8 = vcmp.eq.s32.totalorder %v6729_v24, %v10711_v48  ;;  %3659 = vmatpush.msra.mxu1 %v3521_v10  ;;  %vm2771_vm9 = vcmp.eq.s32.totalorder %v6732_v29, %v10711_v48  ;;  %4212 = vmatpush.msra.mxu2 %v3505_v60  ;;  %v3518_v60 = vld [vmem:[%s9293_s1 + $0xc0] sm:$0xff]  ;;  %v10714_v48 = vld [vmem:[#allocation335_spill] sm:$0xff] }
 0x7b2   : > { %3595 = vmatpush.msra.mxu0 %v3504_v23  ;;  %4228 = vmatpush.msra.mxu3 %v3521_v10  ;;  %v2898_v30 = vsel %vm2770_vm8, %v10713_v4, 0.0  ;;  %vm2466_vm10 = vcmp.eq.s32.totalorder %v6729_v24, %v10714_v48  ;;  %v2899_v38 = vsel %vm2771_vm9, %v10713_v4, 0.0  ;;  %v3501_v10 = vld [vmem:[%s9293_s1 + $0x38] sm:$0xff]  ;;  %vm2467_vm11 = vcmp.eq.s32.totalorder %v6732_v29, %v10714_v48 }
 0x7b3   : > { %3660 = vmatpush.msra.mxu1 %v3520_v17  ;;  %4213 = vmatpush.msra.mxu2 %v3504_v23  ;;  %v2642_v11 = vsel %vm2466_vm10, %v10715_v18, 0.0  ;;  %v3517_v23 = vld [vmem:[%s9293_s1 + $0xb8] sm:$0xff]  ;;  %v2643_v4 = vsel %vm2467_vm11, %v10715_v18, 0.0 }
 0x7b4   : > { %3596 = vmatpush.msra.mxu0 %v3503_v46  ;;  %4229 = vmatpush.msra.mxu3 %v3520_v17  ;;  %v2930_v58 = vadd.f32 %v2898_v30, %v2642_v11  ;;  %v2931_v17 = vadd.f32 %v2899_v38, %v2643_v4  ;;  %v3516_v30 = vld [vmem:[%s9293_s1 + $0xb0] sm:$0xff]  ;;  %v10720_v4 = vld [vmem:[#allocation337_spill] sm:$0xff] }
 0x7b5   : > { %4214 = vmatpush.msra.mxu2 %v3503_v46 }
 0x7b6   : > { %3597 = vmatpush.msra.mxu0 %v3502_v43 }
 0x7b7   : > { %v7099_v1 = vpop.permute.xlu1 %3161  ;;  %2430 = vperm.xlu0 %4336, %v2387_v56   ;;  %v3519_v56 = vld [vmem:[%s9293_s1 + $0xc8] sm:$0xff]  ;;  %4215 = vmatpush.msra.mxu2 %v3502_v43  ;;  %v3514_v43 = vld [vmem:[%s9293_s1 + $0xa0] sm:$0xff] }
 0x7b8   : > { %10710 = vst [vmem:[#allocation331_spill] sm:$0xff] %v7099_v1  ;;  %3661 = vmatpush.msra.mxu1 %v3519_v56  ;;  %4230 = vmatpush.msra.mxu3 %v3519_v56  ;;  %v3515_v56 = vld [vmem:[%s9293_s1 + $0xa8] sm:$0xff] }
 0x7b9   : > { %v7111_v3 = vpop.permute.xlu0 %878  ;;  %3598 = vmatpush.msra.mxu0 %v3501_v10  ;;  %4216 = vmatpush.msra.mxu2 %v3501_v10  ;;  %v3513_v10 = vld [vmem:[%s9293_s1 + $0x98] sm:$0xff] }
 0x7ba   : > { %10712 = vst [vmem:[#allocation114_spill] sm:$0xff] %v7111_v3  ;;  %3662 = vmatpush.msra.mxu1 %v3518_v60  ;;  %4231 = vmatpush.msra.mxu3 %v3518_v60  ;;  %v3497_v60 = vld [vmem:[%s9293_s1 + $0x18] sm:$0xff] }
 0x7bb   : > { %3599 = vmatpush.msra.mxu0 %v3500_v53  ;;  %4217 = vmatpush.msra.mxu2 %v3500_v53  ;;  %v3495_v53 = vld [vmem:[%s9293_s1 + $0x8] sm:$0xff] }
 0x7bc   : > { %3663 = vmatpush.msra.mxu1 %v3517_v23  ;;  %4232 = vmatpush.msra.mxu3 %v3517_v23  ;;  %v3496_v23 = vld [vmem:[%s9293_s1 + $0x10] sm:$0xff] }
 0x7be   : > { %3664 = vmatpush.msra.mxu1 %v3516_v30  ;;  %4233 = vmatpush.msra.mxu3 %v3516_v30  ;;  %v3511_v30 = vld [vmem:[%s9293_s1 + $0x88] sm:$0xff] }
 0x7bf   : > { %v3167_v48 = vpop.permute.xlu1 %3166  ;;  %2701 = vperm.xlu0 %4336, %v2680_v47   ;;  %v3499_v47 = vld [vmem:[%s9293_s1 + $0x28] sm:$0xff] }
 0x7c0   : > { %v3202_v11 = vsel %vm3026_vm12, %v3167_v48, 0.0  ;;  %v3203_v18 = vsel %vm3027_vm13, %v3167_v48, 0.0  ;;  %3600 = vmatpush.msra.mxu0 %v3499_v47  ;;  %3665 = vmatpush.msra.mxu1 %v3515_v56  ;;  %v3512_v48 = vld [vmem:[%s9293_s1 + $0x90] sm:$0xff] }
 0x7c1   : > { %v7151_v38 = vadd.f32 %v3202_v11, %v2930_v58  ;;  %v7153_v46 = vadd.f32 %v3203_v18, %v2931_v17  ;;  %v7155_v28 = vpop.permute.xlu0 %1149  ;;  %v3498_v58 = vld [vmem:[%s9293_s1 + $0x20] sm:$0xff]  ;;  %v2685_v17 = vadd.s32 %v10720_v4, %v10698_v9  ;;  %4218 = vmatpush.msra.mxu2 %v3499_v47  ;;  %4234 = vmatpush.msra.mxu3 %v3515_v56 }
 0x7c2   : > { %3601 = vmatpush.msra.mxu0 %v3498_v58  ;;  %3666 = vmatpush.msra.mxu1 %v3514_v43  ;;  %v3494_v11 = vld [vmem:[%s9293_s1] sm:$0xff]  ;;  %v2688_v47 = vadd.s32 %v6644_v8, %v10705_v27  ;;  %v10722_v8 = vld [vmem:[#allocation113_spill] sm:$0xff]  ;;  %v10723_v27 = vld [vmem:[#allocation116_spill] sm:$0xff] }
 0x7c3   : > { %10718 = vst [vmem:[#allocation351_spill] sm:$0xff] %v7151_v38  ;;  %4219 = vmatpush.msra.mxu2 %v3498_v58  ;;  %4235 = vmatpush.msra.mxu3 %v3514_v43  ;;  %v3510_v18 = vld [vmem:[%s9293_s1 + $0x80] sm:$0xff]  ;;  %v2691_v58 = vadd.s32 %v10660_v34, %v10708_v44  ;;  %vm446_vm0 = vcmp.eq.s32.totalorder %v6729_v24, %v10722_v8  ;;  %v10724_v34 = vld [vmem:[#allocation117_spill] sm:$0xff]  ;;  %v10725_v44 = vld [vmem:[#allocation120_spill] sm:$0xff] }
 0x7c4   : > { %10719 = vst [vmem:[#allocation297_spill] sm:$0xff] %v7153_v46  ;;  %3602 = vmatpush.msra.mxu0 %v3497_v60  ;;  %3667 = vmatpush.msra.mxu1 %v3513_v10  ;;  %v10721_v43 = vld [vmem:[#allocation110_spill] sm:$0xff]  ;;  %vm447_vm1 = vcmp.eq.s32.totalorder %v6732_v29, %v10722_v8  ;;  %vm450_vm2 = vcmp.eq.s32.totalorder %v6729_v24, %v10723_v27  ;;  %v10734_v38 = vld [vmem:[#allocation325_spill] sm:$0xff] }
 0x7c5   : > { %4220 = vmatpush.msra.mxu2 %v3497_v60  ;;  %4236 = vmatpush.msra.mxu3 %v3513_v10  ;;  %vm440_vm14 = vcmp.eq.s32.totalorder %v6729_v24, %v10721_v43  ;;  %vm441_vm15 = vcmp.eq.s32.totalorder %v6732_v29, %v10721_v43  ;;  %vm451_vm3 = vcmp.eq.s32.totalorder %v6732_v29, %v10723_v27  ;;  %v10727_v10 = vld [vmem:[#allocation125_spill] sm:$0xff]  ;;  %v10742_v27 = vld [vmem:[#allocation143_spill] sm:$0xff] }
 0x7c6   : > { %3603 = vmatpush.msra.mxu0 %v3496_v23  ;;  %3668 = vmatpush.msra.mxu1 %v3512_v48  ;;  %vm438_vm4 = vcmp.eq.s32.totalorder %v6729_v24, %v10724_v34  ;;  %vm439_vm5 = vcmp.eq.s32.totalorder %v6732_v29, %v10724_v34  ;;  %v2935_v49 = vadd.s32 %v10734_v38, %v10613_v7  ;;  %v7287_v7 = vsel %vm450_vm2, %v10736_v32, 0.0  ;;  %v10737_v8 = vld [vmem:[#allocation141_spill] sm:$0xff]  ;;  %v10739_v34 = vld [vmem:[#allocation142_spill] sm:$0xff] }
 0x7c7   : > { %2716 = vperm.xlu0 %4336, %v2685_v17   ;;  %4221 = vmatpush.msra.mxu2 %v3496_v23  ;;  %v10726_v17 = vld [vmem:[#allocation121_spill] sm:$0xff]  ;;  %v10728_v23 = vld [vmem:[#allocation126_spill] sm:$0xff]  ;;  %v630_v43 = vsel %vm438_vm4, %v10735_v0, 0.0  ;;  %v7293_v38 = vsel %vm451_vm3, %v10736_v32, 0.0  ;;  %vm10745_vm2 = vcmp.eq.s32.totalorder %v6729_v24, %v10727_v10  ;;  %vm10746_vm3 = vcmp.eq.s32.totalorder %v6732_v29, %v10727_v10 }
 0x7c8   : > { %3604 = vmatpush.msra.mxu0 %v3495_v53  ;;  %3669 = vmatpush.msra.mxu1 %v3511_v30  ;;  %vm444_vm8 = vcmp.eq.s32.totalorder %v6729_v24, %v10726_v17  ;;  %vm449_vm13 = vcmp.eq.s32.totalorder %v6732_v29, %v10728_v23  ;;  %v10750_v10 = vld [vmem:[#allocation146_spill] sm:$0xff] }
 0x7c9   : > { %v7183_v9 = vpop.permute.xlu0 %1174  ;;  %4237 = vmatpush.msra.mxu3 %v3512_v48  ;;  %4222 = vmatpush.msra.mxu2 %v3495_v53  ;;  %v10729_v48 = vld [vmem:[#allocation129_spill] sm:$0xff]  ;;  %v10730_v53 = vld [vmem:[#allocation130_spill] sm:$0xff] }
 0x7ca   : > { %3605 = vmatpush.msra.mxu0 %v3494_v11  ;;  %3670 = vmatpush.msra.mxu1 %v3510_v18  ;;  %vm468_vm7 = vcmp.eq.s32.totalorder %v6729_v24, %v10729_v48  ;;  %vm469_vm6 = vcmp.eq.s32.totalorder %v6732_v29, %v10729_v48  ;;  %vm454_vm9 = vcmp.eq.s32.totalorder %v6729_v24, %v10730_v53  ;;  %v10754_v48 = vld [vmem:[#allocation186_spill] sm:$0xff] }
 0x7cb   : > { %4238 = vmatpush.msra.mxu3 %v3511_v30  ;;  %4223 = vmatpush.msra.mxu2 %v3494_v11  ;;  %vm455_vm10 = vcmp.eq.s32.totalorder %v6732_v29, %v10730_v53  ;;  %v10731_v30 = vld [vmem:[#allocation132_spill] sm:$0xff]  ;;  %v10732_v11 = vld [vmem:[#allocation133_spill] sm:$0xff]  ;;  %v7365_v6 = vsel %vm468_vm7, %v10750_v10, 0.0  ;;  %vm764_vm7 = vcmp.eq.s32.totalorder %v6729_v24, %v10752_v42 }
 0x7cc   : > { %vm460_vm11 = vcmp.eq.s32.totalorder %v6729_v24, %v10731_v30  ;;  %vm461_vm12 = vcmp.eq.s32.totalorder %v6732_v29, %v10731_v30 }
 0x7cd   : > { %4239 = vmatpush.msra.mxu3 %v3510_v18  ;;  %v7253_v18 = vsel %vm440_vm14, %v10732_v11, 0.0  ;;  %vm10738_vm14 = vcmp.eq.s32.totalorder %v6732_v29, %v10726_v17  ;;  %v7379_v53 = vsel %vm460_vm11, %v10751_v31, 0.0  ;;  %vm767_vm11 = vcmp.eq.s32.totalorder %v6732_v29, %v10754_v48 }
 0x7cf   : > { %2725 = vperm.xlu0 %4336, %v2688_v47   ;;  %v7259_v47 = vsel %vm441_vm15, %v10732_v11, 0.0  ;;  %v631_v11 = vsel %vm439_vm5, %v10735_v0, 0.0  ;;  %v7305_v0 = vsel %vm10738_vm14, %v10737_v8, 0.0  ;;  %vm10740_vm15 = vcmp.eq.s32.totalorder %v6729_v24, %v10725_v44 }
 0x7d0   : > { %v7311_v40 = vsel %vm10740_vm15, %v10739_v34, 0.0  ;;  %vm770_vm14 = vcmp.eq.s32.totalorder %v6729_v24, %v10757_v39  ;;  %vm771_vm15 = vcmp.eq.s32.totalorder %v6732_v29, %v10757_v39  ;;  %v3589_v39 = vld [vmem:[%s9293_s1 + $0x2f8] sm:$0xff] }
 0x7d1   : > { %v7199_v56 = vpop.permute.xlu0 %1189  ;;  %3915 = vmatpush.msrb.mxu1 %v3589_v39  ;;  %v10780_v39 = vld [vmem:[#allocation217_spill] sm:$0xff] }
 0x7d7   : > { %2734 = vperm.xlu0 %4336, %v2691_v58   ;;  %v10733_v58 = vld [vmem:[#allocation136_spill] sm:$0xff] }
 0x7d8   : > { %v7265_v46 = vsel %vm446_vm0, %v10733_v58, 0.0  ;;  %v7273_v2 = vsel %vm447_vm1, %v10733_v58, 0.0  ;;  %v7299_v58 = vsel %vm444_vm8, %v10737_v8, 0.0  ;;  %vm10741_vm0 = vcmp.eq.s32.totalorder %v6732_v29, %v10725_v44 }
 0x7d9   : > { %v7223_v60 = vpop.permute.xlu0 %1204  ;;  %v7317_v32 = vsel %vm10741_vm0, %v10739_v34, 0.0  ;;  %vm10743_vm1 = vcmp.eq.s32.totalorder %v6729_v24, %v10728_v23  ;;  %v7329_v8 = vsel %vm449_vm13, %v10742_v27, 0.0  ;;  %v7341_v44 = vsel %vm10746_vm3, %v10744_v13, 0.0  ;;  %v10747_v34 = vld [vmem:[#allocation145_spill] sm:$0xff]  ;;  %v10748_v23 = vld [vmem:[#allocation182_spill] sm:$0xff] }
 0x7da   : > { %v7323_v17 = vsel %vm10743_vm1, %v10742_v27, 0.0  ;;  %v7347_v62 = vsel %vm454_vm9, %v10747_v34, 0.0  ;;  %vm758_vm4 = vcmp.eq.s32.totalorder %v6729_v24, %v10748_v23  ;;  %vm759_vm5 = vcmp.eq.s32.totalorder %v6732_v29, %v10748_v23 }
 0x7db   : > { %v886_v51 = vsel %vm758_vm4, %v7029_v57, 0.0  ;;  %v887_v1 = vsel %vm759_vm5, %v7029_v57, 0.0  ;;  %v7373_v23 = vsel %vm469_vm6, %v10750_v10, 0.0  ;;  %v10753_v57 = vld [vmem:[#allocation183_spill] sm:$0xff]  ;;  %vm765_vm9 = vcmp.eq.s32.totalorder %v6732_v29, %v10752_v42 }
 0x7dc   : > { %vm760_vm8 = vcmp.eq.s32.totalorder %v6729_v24, %v10753_v57  ;;  %vm761_vm6 = vcmp.eq.s32.totalorder %v6732_v29, %v10753_v57  ;;  %v918_v10 = vadd.f32 %v886_v51, %v630_v43  ;;  %v919_v52 = vadd.f32 %v887_v1, %v631_v11  ;;  %v10761_v1 = vld [vmem:[#allocation223_spill] sm:$0xff] }
 0x7dd   : > { %vm763_vm13 = vcmp.eq.s32.totalorder %v6732_v29, %v10756_v12  ;;  %vm442_vm0 = vcmp.eq.s32.totalorder %v6729_v24, %v10758_v45  ;;  %vm776_vm1 = vcmp.eq.s32.totalorder %v6729_v24, %v10759_v22  ;;  %vm1031_vm3 = vcmp.eq.s32.totalorder %v6732_v29, %v10761_v1  ;;  %v10762_v11 = vld [vmem:[#allocation207_spill] sm:$0xff] }
 0x7de   : > { %vm1350_vm5 = vcmp.eq.s32.totalorder %v6729_v24, %v10765_v59 }
 0x7df   : > { %2954 = vperm.xlu0 %4336, %v2935_v49   ;;  %v7335_v49 = vsel %vm10745_vm2, %v10744_v13, 0.0  ;;  %v7359_v13 = vsel %vm455_vm10, %v10747_v34, 0.0  ;;  %v7385_v34 = vsel %vm461_vm12, %v10751_v31, 0.0  ;;  %vm766_vm10 = vcmp.eq.s32.totalorder %v6729_v24, %v10754_v48  ;;  %v10755_v31 = vld [vmem:[#allocation63_spill] sm:$0xff] }
 0x7e0   : > { %v2940_v30 = vadd.s32 %v10755_v31, %v10618_v5  ;;  %vm762_vm12 = vcmp.eq.s32.totalorder %v6729_v24, %v10756_v12  ;;  %v10760_v5 = vld [vmem:[#allocation203_spill] sm:$0xff]  ;;  %vm1030_vm2 = vcmp.eq.s32.totalorder %v6729_v24, %v10761_v1  ;;  %v892_v31 = vsel %vm764_vm7, %v10762_v11, 0.0 }
 0x7e1   : > { %v7353_v27 = vpop.permute.xlu0 %1219  ;;  %v888_v51 = vsel %vm760_vm8, %v10760_v5, 0.0  ;;  %v889_v43 = vsel %vm761_vm6, %v10760_v5, 0.0  ;;  %v10764_v1 = vld [vmem:[#allocation19_spill] sm:$0xff]  ;;  %vm1351_vm6 = vcmp.eq.s32.totalorder %v6732_v29, %v10765_v59  ;;  %v894_v14 = vsel %vm766_vm10, %v10766_v41, 0.0 }
 0x7e2   : > { %10749 = vst [vmem:[#allocation301_spill] sm:$0xff] %v7353_v27  ;;  %v1222_v27 = vsel %vm1030_vm2, %v10763_v63, 0.0  ;;  %vm774_vm8 = vcmp.eq.s32.totalorder %v6729_v24, %v10764_v1  ;;  %vm775_vm4 = vcmp.eq.s32.totalorder %v6732_v29, %v10764_v1  ;;  %vm1032_vm7 = vcmp.eq.s32.totalorder %v6729_v24, %v10767_v16 }
 0x7e3   : > { %v1254_v5 = vadd.f32 %v1222_v27, %v918_v10  ;;  %vm1033_vm2 = vcmp.eq.s32.totalorder %v6732_v29, %v10767_v16  ;;  %v10768_v27 = vld [vmem:[#allocation135_spill] sm:$0xff]  ;;  %v920_v42 = vadd.f32 %v888_v51, %v7253_v18  ;;  %v895_v10 = vsel %vm767_vm11, %v10766_v41, 0.0  ;;  %v10772_v18 = vld [vmem:[#allocation204_spill] sm:$0xff] }
 0x7e4   : > { %v921_v16 = vadd.f32 %v889_v43, %v7259_v47  ;;  %v890_v47 = vsel %vm762_vm12, %v10772_v18, 0.0  ;;  %v7481_v48 = vadd.f32 %v892_v31, %v7299_v58  ;;  %v7487_v43 = vadd.f32 %v894_v14, %v7265_v46  ;;  %v3572_v14 = vld [vmem:[%s9293_s1 + $0x270] sm:$0xff] }
 0x7e5   : > { %v891_v58 = vsel %vm763_vm13, %v10772_v18, 0.0  ;;  %v7500_v31 = vadd.f32 %v895_v10, %v7273_v2  ;;  %v3588_v46 = vld [vmem:[%s9293_s1 + $0x2f0] sm:$0xff]  ;;  %v10773_v2 = vld [vmem:[#allocation215_spill] sm:$0xff]  ;;  %vm10774_vm11 = vcmp.eq.s32.totalorder %v6732_v29, %v10759_v22  ;;  %vm10775_vm12 = vcmp.eq.s32.totalorder %v6732_v29, %v10758_v45  ;;  %v3586_v18 = vld [vmem:[%s9293_s1 + $0x2e0] sm:$0xff] }
 0x7e6   : > { %v10776_v10 = vld [vmem:[#allocation47_spill] sm:$0xff]  ;;  %v902_v22 = vsel %vm774_vm8, %v7059_v19, 0.0  ;;  %v903_v45 = vsel %vm775_vm4, %v7059_v19, 0.0  ;;  %3916 = vmatpush.msrb.mxu1 %v3588_v46  ;;  %vm1048_vm4 = vcmp.eq.s32.totalorder %v6729_v24, %v10780_v39 }
 0x7e7   : > { %2969 = vperm.xlu0 %4336, %v2940_v30   ;;  %v1223_v30 = vsel %vm1031_vm3, %v10763_v63, 0.0  ;;  %v893_v63 = vsel %vm765_vm9, %v10762_v11, 0.0  ;;  %vm466_vm3 = vcmp.eq.s32.totalorder %v6729_v24, %v10768_v27  ;;  %v1224_v11 = vsel %vm1032_vm7, %v7155_v28, 0.0 }
 0x7e8   : > { %v1255_v15 = vadd.f32 %v1223_v30, %v919_v52  ;;  %v1225_v30 = vsel %vm1033_vm2, %v7155_v28, 0.0  ;;  %v7484_v51 = vadd.f32 %v893_v63, %v7305_v0  ;;  %v1256_v0 = vadd.f32 %v1224_v11, %v920_v42 }
 0x7e9   : > { %v1401_v57 = vpop.permute.xlu0 %1400  ;;  %vm1352_vm13 = vcmp.eq.s32.totalorder %v6729_v24, %v10776_v10 }
 0x7ea   : > { %v1478_v3 = vsel %vm1350_vm5, %v1401_v57, 0.0  ;;  %v1479_v61 = vsel %vm1351_vm6, %v1401_v57, 0.0  ;;  %v10769_v57 = vld [vmem:[#allocation196_spill] sm:$0xff] }
 0x7eb   : > { %v1510_v59 = vadd.f32 %v1478_v3, %v1254_v5  ;;  %v1511_v52 = vadd.f32 %v1479_v61, %v1255_v15  ;;  %vm782_vm9 = vcmp.eq.s32.totalorder %v6729_v24, %v10769_v57  ;;  %vm783_vm10 = vcmp.eq.s32.totalorder %v6732_v29, %v10769_v57  ;;  %v10770_v61 = vld [vmem:[#allocation211_spill] sm:$0xff]  ;;  %v10771_v3 = vld [vmem:[#allocation54_spill] sm:$0xff] }
 0x7ec   : > { %v898_v15 = vsel %vm770_vm14, %v10770_v61, 0.0  ;;  %v899_v41 = vsel %vm771_vm15, %v10770_v61, 0.0  ;;  %v2943_v28 = vadd.s32 %v10771_v3, %v10622_v36  ;;  %v3573_v36 = vld [vmem:[%s9293_s1 + $0x278] sm:$0xff]  ;;  %v1257_v5 = vadd.f32 %v1225_v30, %v921_v16  ;;  %v3571_v16 = vld [vmem:[%s9293_s1 + $0x268] sm:$0xff]  ;;  %v10786_v57 = vld [vmem:[#allocation230_spill] sm:$0xff] }
 0x7ed   : > { %3606 = vmatmul.f32.vlgmr.msra.gmra.mxu0 %v1510_v59  ;;  %3671 = vmatmul.f32.vlgmr.msra.gmra.mxu1 %v1511_v52  ;;  %v7509_v63 = vadd.f32 %v898_v15, %v7287_v7  ;;  %v7512_v12 = vadd.f32 %v899_v41, %v7293_v38  ;;  %v904_v59 = vsel %vm776_vm1, %v10773_v2, 0.0  ;;  %v634_v52 = vsel %vm442_vm0, %v6985_v25, 0.0  ;;  %v3587_v61 = vld [vmem:[%s9293_s1 + $0x2e8] sm:$0xff]  ;;  %v10778_v15 = vld [vmem:[#allocation202_spill] sm:$0xff] }
 0x7ee   : > { %3850 = vmatpush.msrb.mxu0 %v3573_v36  ;;  %v905_v7 = vsel %vm10774_vm11, %v10773_v2, 0.0  ;;  %v635_v38 = vsel %vm10775_vm12, %v6985_v25, 0.0  ;;  %vm1353_vm14 = vcmp.eq.s32.totalorder %v6732_v29, %v10776_v10  ;;  %v10777_v25 = vld [vmem:[#allocation98_spill] sm:$0xff]  ;;  %vm778_vm15 = vcmp.eq.s32.totalorder %v6729_v24, %v10778_v15  ;;  %3917 = vmatpush.msrb.mxu1 %v3587_v61 }
 0x7ef   : > { %2978 = vperm.xlu0 %4336, %v2943_v28   ;;  %v1480_v11 = vsel %vm1352_vm13, %v10777_v25, 0.0  ;;  %v1481_v30 = vsel %vm1353_vm14, %v10777_v25, 0.0  ;;  %v7555_v41 = vadd.f32 %v904_v59, %v7311_v40  ;;  %v922_v19 = vadd.f32 %v890_v47, %v634_v52  ;;  %v3570_v28 = vld [vmem:[%s9293_s1 + $0x260] sm:$0xff]  ;;  %v10779_v40 = vld [vmem:[#allocation225_spill] sm:$0xff]  ;;  %v3584_v25 = vld [vmem:[%s9293_s1 + $0x2d0] sm:$0xff] }
 0x7f0   : > { %3851 = vmatpush.msrb.mxu0 %v3572_v14  ;;  %v1512_v1 = vadd.f32 %v1480_v11, %v1256_v0  ;;  %v1513_v3 = vadd.f32 %v1481_v30, %v1257_v5  ;;  %vm779_vm0 = vcmp.eq.s32.totalorder %v6732_v29, %v10778_v15  ;;  %v7566_v36 = vadd.f32 %v905_v7, %v7317_v32  ;;  %v10781_v0 = vld [vmem:[#allocation149_spill] sm:$0xff]  ;;  %v10782_v14 = vld [vmem:[#allocation62_spill] sm:$0xff] }
 0x7f1   : > { %v7530_v42 = vpop.permute.xlu0 %1425  ;;  %vm1034_vm1 = vcmp.eq.s32.totalorder %v6729_v24, %v10779_v40  ;;  %v923_v47 = vadd.f32 %v891_v58, %v635_v38  ;;  %v7576_v5 = vsel %vm466_vm3, %v10781_v0, 0.0  ;;  %v2946_v46 = vadd.s32 %v10782_v14, %v10655_v33  ;;  %v10783_v58 = vld [vmem:[#allocation218_spill] sm:$0xff]  ;;  %3918 = vmatpush.msrb.mxu1 %v3586_v18  ;;  %v10785_v38 = vld [vmem:[#allocation131_spill] sm:$0xff]  ;;  %v10787_v11 = vld [vmem:[#allocation81_spill] sm:$0xff] }
 0x7f2   : > { %3852 = vmatpush.msrb.mxu0 %v3571_v16  ;;  %v934_v32 = vadd.f32 %v902_v22, %v7347_v62  ;;  %v935_v2 = vadd.f32 %v903_v45, %v7359_v13  ;;  %v910_v59 = vsel %vm782_vm9, %v10783_v58, 0.0  ;;  %v911_v52 = vsel %vm783_vm10, %v10783_v58, 0.0  ;;  %v10784_v33 = vld [vmem:[#allocation86_spill] sm:$0xff]  ;;  %v3569_v62 = vld [vmem:[%s9293_s1 + $0x258] sm:$0xff]  ;;  %v3568_v45 = vld [vmem:[%s9293_s1 + $0x250] sm:$0xff] }
 0x7f3   : > { %vm1035_vm5 = vcmp.eq.s32.totalorder %v6732_v29, %v10779_v40  ;;  %v1226_v7 = vsel %vm1034_vm1, %v10784_v33, 0.0  ;;  %v3585_v13 = vld [vmem:[%s9293_s1 + $0x2d8] sm:$0xff]  ;;  %vm458_vm8 = vcmp.eq.s32.totalorder %v6729_v24, %v10785_v38  ;;  %vm1046_vm6 = vcmp.eq.s32.totalorder %v6729_v24, %v10786_v57  ;;  %v10788_v61 = vld [vmem:[#allocation46_spill] sm:$0xff] }
 0x7f4   : > { %3853 = vmatpush.msrb.mxu0 %v3570_v28  ;;  %vm1047_vm7 = vcmp.eq.s32.totalorder %v6732_v29, %v10786_v57  ;;  %v1227_v10 = vsel %vm1035_vm5, %v10784_v33, 0.0  ;;  %v1258_v22 = vadd.f32 %v1226_v7, %v922_v19  ;;  %vm459_vm2 = vcmp.eq.s32.totalorder %v6732_v29, %v10785_v38  ;;  %3919 = vmatpush.msrb.mxu1 %v3585_v13  ;;  %v10789_v19 = vld [vmem:[#allocation76_spill] sm:$0xff]  ;;  %v3583_v33 = vld [vmem:[%s9293_s1 + $0x2c8] sm:$0xff] }
 0x7f5   : > { %3609 = vmatmul.f32.gmra.mxu0 %v1512_v1  ;;  %3674 = vmatmul.f32.gmra.mxu1 %v1513_v3  ;;  %v1238_v30 = vsel %vm1046_vm6, %v10787_v11, 0.0  ;;  %v1239_v16 = vsel %vm1047_vm7, %v10787_v11, 0.0  ;;  %vm1354_vm3 = vcmp.eq.s32.totalorder %v6729_v24, %v10788_v61  ;;  %v1259_v1 = vadd.f32 %v1227_v10, %v923_v47  ;;  %v3567_v47 = vld [vmem:[%s9293_s1 + $0x248] sm:$0xff]  ;;  %v10791_v13 = vld [vmem:[#allocation216_spill] sm:$0xff]  ;;  %v10792_v11 = vld [vmem:[#allocation226_spill] sm:$0xff] }
 0x7f6   : > { %3854 = vmatpush.msrb.mxu0 %v3569_v62  ;;  %vm1366_vm9 = vcmp.eq.s32.totalorder %v6729_v24, %v10789_v19  ;;  %vm1367_vm10 = vcmp.eq.s32.totalorder %v6732_v29, %v10789_v19  ;;  %v1270_v28 = vadd.f32 %v1238_v30, %v934_v32  ;;  %v1271_v18 = vadd.f32 %v1239_v16, %v935_v2  ;;  %v10793_v30 = vld [vmem:[#allocation79_spill] sm:$0xff]  ;;  %v10794_v19 = vld [vmem:[#allocation65_spill] sm:$0xff] }
 0x7f7   : > { %2987 = vperm.xlu0 %4336, %v2946_v46   ;;  %v10790_v46 = vld [vmem:[#allocation91_spill] sm:$0xff]  ;;  %vm1355_vm11 = vcmp.eq.s32.totalorder %v6732_v29, %v10788_v61  ;;  %3920 = vmatpush.msrb.mxu1 %v3584_v25  ;;  %vm467_vm12 = vcmp.eq.s32.totalorder %v6732_v29, %v10768_v27  ;;  %v906_v57 = vsel %vm778_vm15, %v10791_v13, 0.0  ;;  %vm1049_vm13 = vcmp.eq.s32.totalorder %v6732_v29, %v10780_v39  ;;  %v3582_v61 = vld [vmem:[%s9293_s1 + $0x2c0] sm:$0xff] }
 0x7f8   : > { %v1482_v58 = vsel %vm1354_vm3, %v10790_v46, 0.0  ;;  %3855 = vmatpush.msrb.mxu0 %v3568_v45  ;;  %v1483_v7 = vsel %vm1355_vm11, %v10790_v46, 0.0  ;;  %v1240_v10 = vsel %vm1048_vm4, %v7199_v56, 0.0  ;;  %v907_v25 = vsel %vm779_vm0, %v10791_v13, 0.0 }
 0x7f9   : > { %v1441_v3 = vpop.permute.xlu0 %1440  ;;  %v1514_v32 = vadd.f32 %v1482_v58, %v1258_v22  ;;  %v1515_v45 = vadd.f32 %v1483_v7, %v1259_v1  ;;  %3921 = vmatpush.msrb.mxu1 %v3583_v33  ;;  %v3566_v22 = vld [vmem:[%s9293_s1 + $0x240] sm:$0xff]  ;;  %vm1036_vm14 = vcmp.eq.s32.totalorder %v6729_v24, %v10792_v11  ;;  %v2949_v16 = vadd.s32 %v10793_v30, %v10671_v20  ;;  %v3541_v20 = vld [vmem:[%s9293_s1 + $0x178] sm:$0xff]  ;;  %v3556_v33 = vld [vmem:[%s9293_s1 + $0x1f0] sm:$0xff] }
 0x7fa   : > { %v1494_v40 = vsel %vm1366_vm9, %v1441_v3, 0.0  ;;  %v1495_v14 = vsel %vm1367_vm10, %v1441_v3, 0.0  ;;  %3856 = vmatpush.msrb.mxu0 %v3567_v47  ;;  %v1241_v39 = vsel %vm1049_vm13, %v7199_v56, 0.0  ;;  %v7660_v1 = vadd.f32 %v910_v59, %v7335_v49  ;;  %v3557_v56 = vld [vmem:[%s9293_s1 + $0x1f8] sm:$0xff]  ;;  %v10796_v59 = vld [vmem:[#allocation227_spill] sm:$0xff]  ;;  %v10798_v58 = vld [vmem:[#allocation102_spill] sm:$0xff]  ;;  %3720 = vmatpush.msrb.mxu2 %v3541_v20 }
 0x7fb   : > { %v1526_v2 = vadd.f32 %v1494_v40, %v1270_v28  ;;  %v1527_v62 = vadd.f32 %v1495_v14, %v1271_v18  ;;  %v7663_v15 = vadd.f32 %v911_v52, %v7341_v44  ;;  %vm1037_vm15 = vcmp.eq.s32.totalorder %v6732_v29, %v10792_v11  ;;  %v3565_v49 = vld [vmem:[%s9293_s1 + $0x238] sm:$0xff]  ;;  %v10795_v44 = vld [vmem:[#allocation200_spill] sm:$0xff]  ;;  %v10797_v18 = vld [vmem:[#allocation66_spill] sm:$0xff]  ;;  %3922 = vmatpush.msrb.mxu1 %v3582_v61 }
 0x7fc   : > { %v1228_v3 = vsel %vm1036_vm14, %v10794_v19, 0.0  ;;  %vm788_vm0 = vcmp.eq.s32.totalorder %v6729_v24, %v10795_v44  ;;  %vm1038_vm1 = vcmp.eq.s32.totalorder %v6729_v24, %v10796_v59  ;;  %v1229_v52 = vsel %vm1037_vm15, %v10794_v19, 0.0  ;;  %3857 = vmatpush.msrb.mxu0 %v3566_v22  ;;  %v3581_v40 = vld [vmem:[%s9293_s1 + $0x2b8] sm:$0xff]  ;;  %v3540_v14 = vld [vmem:[%s9293_s1 + $0x170] sm:$0xff]  ;;  %v10800_v7 = vld [vmem:[#allocation195_spill] sm:$0xff]  ;;  %3785 = vmatpush.msrb.mxu3 %v3557_v56 }
 0x7fd   : > { %3612 = vmatmul.f32.gmra.mxu0 %v1514_v32  ;;  %3630 = vmatmul.f32.vlgmr.msra.gmra.mxu2 %v1526_v2  ;;  %v1272_v28 = vadd.f32 %v1240_v10, %v7555_v41  ;;  %vm1356_vm4 = vcmp.eq.s32.totalorder %v6729_v24, %v10797_v18  ;;  %v650_v46 = vsel %vm458_vm8, %v7005_v21, 0.0  ;;  %v1273_v41 = vadd.f32 %v1241_v39, %v7566_v36  ;;  %v3564_v32 = vld [vmem:[%s9293_s1 + $0x230] sm:$0xff]  ;;  %v10799_v2 = vld [vmem:[#allocation189_spill] sm:$0xff]  ;;  %v3539_v11 = vld [vmem:[%s9293_s1 + $0x168] sm:$0xff] }
 0x7fe   : > { %3677 = vmatmul.f32.gmra.mxu1 %v1515_v45  ;;  %3695 = vmatmul.f32.vlgmr.msra.gmra.mxu3 %v1527_v62  ;;  %v1484_v47 = vsel %vm1356_vm4, %v10798_v58, 0.0  ;;  %vm1357_vm5 = vcmp.eq.s32.totalorder %v6732_v29, %v10797_v18  ;;  %v651_v36 = vsel %vm459_vm2, %v7005_v21, 0.0  ;;  %vm768_vm8 = vcmp.eq.s32.totalorder %v6729_v24, %v10799_v2  ;;  %v10801_v10 = vld [vmem:[#allocation60_spill] sm:$0xff]  ;;  %v3579_v18 = vld [vmem:[%s9293_s1 + $0x2a8] sm:$0xff] }
 0x7ff   : > { %2996 = vperm.xlu0 %4336, %v2949_v16   ;;  %vm780_vm6 = vcmp.eq.s32.totalorder %v6729_v24, %v10800_v7  ;;  %v1260_v13 = vadd.f32 %v1228_v3, %v7481_v48  ;;  %vm1368_vm7 = vcmp.eq.s32.totalorder %v6729_v24, %v10801_v10  ;;  %v1485_v45 = vsel %vm1357_vm5, %v10798_v58, 0.0  ;;  %3858 = vmatpush.msrb.mxu0 %v3565_v49  ;;  %v3580_v21 = vld [vmem:[%s9293_s1 + $0x2b0] sm:$0xff]  ;;  %v10804_v49 = vld [vmem:[#allocation231_spill] sm:$0xff]  ;;  %v3554_v58 = vld [vmem:[%s9293_s1 + $0x1e0] sm:$0xff] }
 0x800   : > { %vm1039_vm2 = vcmp.eq.s32.totalorder %v6732_v29, %v10796_v59  ;;  %vm769_vm3 = vcmp.eq.s32.totalorder %v6732_v29, %v10799_v2  ;;  %vm781_vm9 = vcmp.eq.s32.totalorder %v6732_v29, %v10800_v7  ;;  %v10802_v48 = vld [vmem:[#allocation108_spill] sm:$0xff]  ;;  %v1261_v22 = vadd.f32 %v1229_v52, %v7484_v51  ;;  %3923 = vmatpush.msrb.mxu1 %v3581_v40  ;;  %v10805_v52 = vld [vmem:[#allocation238_spill] sm:$0xff] }
 0x801   : > { %v7713_v62 = vpop.permute.xlu0 %1455  ;;  %v1496_v38 = vsel %vm1368_vm7, %v10802_v48, 0.0  ;;  %vm1369_vm10 = vcmp.eq.s32.totalorder %v6732_v29, %v10801_v10  ;;  %3721 = vmatpush.msrb.mxu2 %v3540_v14  ;;  %vm789_vm11 = vcmp.eq.s32.totalorder %v6732_v29, %v10795_v44  ;;  %v938_v30 = vadd.f32 %v906_v57, %v650_v46  ;;  %3786 = vmatpush.msrb.mxu3 %v3556_v33  ;;  %v3555_v57 = vld [vmem:[%s9293_s1 + $0x1e8] sm:$0xff]  ;;  %v10803_v56 = vld [vmem:[#allocation228_spill] sm:$0xff]  ;;  %v10807_v14 = vld [vmem:[#allocation153_spill] sm:$0xff] }
 0x802   : > { %v1516_v16 = vadd.f32 %v1484_v47, %v1260_v13  ;;  %v1528_v39 = vadd.f32 %v1496_v38, %v1272_v28  ;;  %v1497_v61 = vsel %vm1369_vm10, %v10802_v48, 0.0  ;;  %3859 = vmatpush.msrb.mxu0 %v3564_v32  ;;  %v7742_v51 = vsel %vm467_vm12, %v10781_v0, 0.0  ;;  %3924 = vmatpush.msrb.mxu1 %v3580_v21  ;;  %v10806_v0 = vld [vmem:[#allocation177_spill] sm:$0xff]  ;;  %v3563_v28 = vld [vmem:[%s9293_s1 + $0x228] sm:$0xff]  ;;  %v10808_v46 = vld [vmem:[#allocation52_spill] sm:$0xff] }
 0x803   : > { %v939_v19 = vadd.f32 %v907_v25, %v651_v36  ;;  %v1517_v3 = vadd.f32 %v1485_v45, %v1261_v22  ;;  %v1529_v20 = vadd.f32 %v1497_v61, %v1273_v41  ;;  %3722 = vmatpush.msrb.mxu2 %v3539_v11  ;;  %vm1040_vm13 = vcmp.eq.s32.totalorder %v6729_v24, %v10803_v56  ;;  %v3538_v41 = vld [vmem:[%s9293_s1 + $0x160] sm:$0xff]  ;;  %v10809_v47 = vld [vmem:[#allocation95_spill] sm:$0xff]  ;;  %v3537_v38 = vld [vmem:[%s9293_s1 + $0x158] sm:$0xff] }
 0x804   : > { %vm1050_vm14 = vcmp.eq.s32.totalorder %v6729_v24, %v10804_v49  ;;  %v1230_v27 = vsel %vm1038_vm1, %v10805_v52, 0.0  ;;  %v3240_v25 = vadd.s32 %v10716_v55, %v10806_v0  ;;  %vm1051_vm12 = vcmp.eq.s32.totalorder %v6732_v29, %v10804_v49  ;;  %3787 = vmatpush.msrb.mxu3 %v3555_v57  ;;  %v3562_v36 = vld [vmem:[%s9293_s1 + $0x220] sm:$0xff]  ;;  %3860 = vmatpush.msrb.mxu0 %v3563_v28  ;;  %v3553_v22 = vld [vmem:[%s9293_s1 + $0x1d8] sm:$0xff]  ;;  %v10811_v11 = vld [vmem:[#allocation199_spill] sm:$0xff] }
 0x805   : > { %3615 = vmatmul.f32.gmra.mxu0 %v1516_v16  ;;  %3633 = vmatmul.f32.gmra.mxu2 %v1528_v39  ;;  %v1231_v40 = vsel %vm1039_vm2, %v10805_v52, 0.0  ;;  %v1242_v55 = vsel %vm1050_vm14, %v10807_v14, 0.0  ;;  %vm1358_vm15 = vcmp.eq.s32.totalorder %v6729_v24, %v10808_v46  ;;  %vm1041_vm1 = vcmp.eq.s32.totalorder %v6732_v29, %v10803_v56  ;;  %v3578_v13 = vld [vmem:[%s9293_s1 + $0x2a0] sm:$0xff]  ;;  %v3561_v61 = vld [vmem:[%s9293_s1 + $0x218] sm:$0xff]  ;;  %v10813_v57 = vld [vmem:[#allocation103_spill] sm:$0xff] }
 0x806   : > { %3680 = vmatmul.f32.gmra.mxu1 %v1517_v3  ;;  %3698 = vmatmul.f32.gmra.mxu3 %v1529_v20  ;;  %v1243_v59 = vsel %vm1051_vm12, %v10807_v14, 0.0  ;;  %v1486_v33 = vsel %vm1358_vm15, %v10809_v47, 0.0  ;;  %v1274_v32 = vadd.f32 %v1242_v55, %v938_v30  ;;  %v10810_v10 = vld [vmem:[#allocation222_spill] sm:$0xff]  ;;  %v1262_v21 = vadd.f32 %v1230_v27, %v7487_v43  ;;  %v10812_v43 = vld [vmem:[#allocation61_spill] sm:$0xff] }
 0x807   : > { %3261 = vperm.xlu0 %4336, %v3240_v25   ;;  %v7792_v45 = vsel %vm788_vm0, %v10810_v10, 0.0  ;;  %vm1359_vm4 = vcmp.eq.s32.totalorder %v6732_v29, %v10808_v46  ;;  %v1275_v48 = vadd.f32 %v1243_v59, %v939_v19  ;;  %3925 = vmatpush.msrb.mxu1 %v3579_v18  ;;  %vm772_vm0 = vcmp.eq.s32.totalorder %v6729_v24, %v10811_v11  ;;  %v3577_v19 = vld [vmem:[%s9293_s1 + $0x298] sm:$0xff]  ;;  %v10814_v0 = vld [vmem:[#allocation214_spill] sm:$0xff] }
 0x808   : > { %vm1370_vm5 = vcmp.eq.s32.totalorder %v6729_v24, %v10812_v43  ;;  %v1263_v16 = vadd.f32 %v1231_v40, %v7500_v31  ;;  %v1487_v39 = vsel %vm1359_vm4, %v10809_v47, 0.0  ;;  %vm1371_vm7 = vcmp.eq.s32.totalorder %v6732_v29, %v10812_v43  ;;  %3723 = vmatpush.msrb.mxu2 %v3538_v41  ;;  %3788 = vmatpush.msrb.mxu3 %v3554_v58  ;;  %v10815_v25 = vld [vmem:[#allocation221_spill] sm:$0xff]  ;;  %v3536_v40 = vld [vmem:[%s9293_s1 + $0x150] sm:$0xff]  ;;  %v10817_v14 = vld [vmem:[#allocation206_spill] sm:$0xff] }
 0x809   : > { %v7805_v30 = vpop.permute.xlu0 %1470  ;;  %vm773_vm2 = vcmp.eq.s32.totalorder %v6732_v29, %v10811_v11  ;;  %v896_v31 = vsel %vm768_vm8, %v7039_v50, 0.0  ;;  %v908_v3 = vsel %vm780_vm6, %v7077_v35, 0.0  ;;  %v1518_v20 = vadd.f32 %v1486_v33, %v1262_v21  ;;  %3861 = vmatpush.msrb.mxu0 %v3562_v36  ;;  %3926 = vmatpush.msrb.mxu1 %v3578_v13  ;;  %v10818_v44 = vld [vmem:[#allocation73_spill] sm:$0xff]  ;;  %v3552_v58 = vld [vmem:[%s9293_s1 + $0x1d0] sm:$0xff]  ;;  %v10819_v47 = vld [vmem:[#allocation170_spill] sm:$0xff] }
 0x80a   : > { %v1498_v49 = vsel %vm1370_vm5, %v10813_v57, 0.0  ;;  %v897_v52 = vsel %vm769_vm3, %v7039_v50, 0.0  ;;  %v909_v27 = vsel %vm781_vm9, %v7077_v35, 0.0  ;;  %vm1042_vm8 = vcmp.eq.s32.totalorder %v6729_v24, %v10814_v0  ;;  %3724 = vmatpush.msrb.mxu2 %v3537_v38  ;;  %3789 = vmatpush.msrb.mxu3 %v3553_v22  ;;  %v10816_v35 = vld [vmem:[#allocation232_spill] sm:$0xff]  ;;  %v10820_v33 = vld [vmem:[#allocation355_spill] sm:$0xff]  ;;  %v10822_v56 = vld [vmem:[#allocation137_spill] sm:$0xff] }
 0x80b   : > { %vm1054_vm6 = vcmp.eq.s32.totalorder %v6729_v24, %v10815_v25  ;;  %v1530_v28 = vadd.f32 %v1498_v49, %v1274_v32  ;;  %v1499_v18 = vsel %vm1371_vm7, %v10813_v57, 0.0  ;;  %v917_v50 = vsel %vm789_vm11, %v10810_v10, 0.0  ;;  %3862 = vmatpush.msrb.mxu0 %v3561_v61  ;;  %3927 = vmatpush.msrb.mxu1 %v3577_v19  ;;  %v3560_v36 = vld [vmem:[%s9293_s1 + $0x210] sm:$0xff]  ;;  %v10821_v10 = vld [vmem:[#allocation127_spill] sm:$0xff]  ;;  %v10823_v21 = vld [vmem:[#allocation134_spill] sm:$0xff] }
 0x80c   : > { %vm1052_vm3 = vcmp.eq.s32.totalorder %v6729_v24, %v10816_v35  ;;  %vm1043_vm9 = vcmp.eq.s32.totalorder %v6732_v29, %v10814_v0  ;;  %vm1055_vm10 = vcmp.eq.s32.totalorder %v6732_v29, %v10815_v25  ;;  %v1519_v2 = vadd.f32 %v1487_v39, %v1263_v16  ;;  %v3576_v13 = vld [vmem:[%s9293_s1 + $0x290] sm:$0xff]  ;;  %3725 = vmatpush.msrb.mxu2 %v3536_v40  ;;  %v3535_v22 = vld [vmem:[%s9293_s1 + $0x148] sm:$0xff]  ;;  %v10832_v25 = vld [vmem:[#allocation181_spill] sm:$0xff] }
 0x80d   : > { %v1531_v7 = vadd.f32 %v1499_v18, %v1275_v48  ;;  %vm784_vm11 = vcmp.eq.s32.totalorder %v6729_v24, %v10817_v14  ;;  %vm1053_vm14 = vcmp.eq.s32.totalorder %v6732_v29, %v10816_v35  ;;  %v1232_v55 = vsel %vm1040_vm13, %v10818_v44, 0.0  ;;  %3618 = vmatmul.f32.gmra.mxu0 %v1518_v20  ;;  %3636 = vmatmul.f32.gmra.mxu2 %v1530_v28  ;;  %v10824_v48 = vld [vmem:[#allocation67_spill] sm:$0xff]  ;;  %v10825_v38 = vld [vmem:[#allocation88_spill] sm:$0xff] }
 0x80e   : > { %v928_v46 = vadd.f32 %v896_v31, %v7323_v17  ;;  %v940_v41 = vadd.f32 %v908_v3, %v7379_v53  ;;  %vm785_vm12 = vcmp.eq.s32.totalorder %v6732_v29, %v10817_v14  ;;  %v1233_v59 = vsel %vm1041_vm1, %v10818_v44, 0.0  ;;  %3683 = vmatmul.f32.gmra.mxu1 %v1519_v2  ;;  %v3551_v43 = vld [vmem:[%s9293_s1 + $0x1c8] sm:$0xff]  ;;  %3790 = vmatpush.msrb.mxu3 %v3552_v58  ;;  %v10826_v28 = vld [vmem:[#allocation212_spill] sm:$0xff]  ;;  %v10829_v58 = vld [vmem:[#allocation234_spill] sm:$0xff] }
 0x80f   : > { %v3338_v32 = vmul.f32 %v10820_v33, %v10819_v47  ;;  %v929_v17 = vadd.f32 %v897_v52, %v7329_v8  ;;  %v941_v53 = vadd.f32 %v909_v27, %v7385_v34  ;;  %3701 = vmatmul.f32.gmra.mxu3 %v1531_v7  ;;  %vm452_vm13 = vcmp.eq.s32.totalorder %v6729_v24, %v10821_v10  ;;  %v3559_v61 = vld [vmem:[%s9293_s1 + $0x208] sm:$0xff]  ;;  %v3534_v52 = vld [vmem:[%s9293_s1 + $0x140] sm:$0xff]  ;;  %v3533_v33 = vld [vmem:[%s9293_s1 + $0x138] sm:$0xff] }
 0x810   : > { %v1244_v8 = vsel %vm1052_vm3, %v10822_v56, 0.0  ;;  %v1245_v34 = vsel %vm1053_vm14, %v10822_v56, 0.0  ;;  %vm464_vm15 = vcmp.eq.s32.totalorder %v6729_v24, %v10823_v21  ;;  %vm1360_vm1 = vcmp.eq.s32.totalorder %v6729_v24, %v10824_v48  ;;  %4341 = vset.pattern.permute.xlu0 %v10218_v54  ;;  %v3575_v19 = vld [vmem:[%s9293_s1 + $0x288] sm:$0xff]  ;;  %3863 = vmatpush.msrb.mxu0 %v3560_v36  ;;  %v3550_v27 = vld [vmem:[%s9293_s1 + $0x1c0] sm:$0xff]  ;;  %v10833_v56 = vld [vmem:[#allocation57_spill] sm:$0xff] }
 0x811   : > { %vm1372_vm4 = vcmp.eq.s32.totalorder %v6729_v24, %v10825_v38  ;;  %vm453_vm5 = vcmp.eq.s32.totalorder %v6732_v29, %v10821_v10  ;;  %vm465_vm7 = vcmp.eq.s32.totalorder %v6732_v29, %v10823_v21  ;;  %vm1361_vm3 = vcmp.eq.s32.totalorder %v6732_v29, %v10824_v48  ;;  %3372 = vperm.xlu0 %4341, %v3338_v32   ;;  %v7929_v20 = vpop.permute.xlu0 %2397  ;;  %v10830_v32 = vld [vmem:[#allocation219_spill] sm:$0xff]  ;;  %v3532_v14 = vld [vmem:[%s9293_s1 + $0x130] sm:$0xff]  ;;  %v10835_v48 = vld [vmem:[#allocation74_spill] sm:$0xff] }
 0x812   : > { %v1488_v16 = vsel %vm1360_vm1, %v7530_v42, 0.0  ;;  %vm1373_vm14 = vcmp.eq.s32.totalorder %v6732_v29, %v10825_v38  ;;  %v1500_v39 = vsel %vm1372_vm4, %v7713_v62, 0.0  ;;  %v1489_v31 = vsel %vm1361_vm3, %v7530_v42, 0.0  ;;  %3928 = vmatpush.msrb.mxu1 %v3576_v13  ;;  %3726 = vmatpush.msrb.mxu2 %v3535_v22  ;;  %v3548_v38 = vld [vmem:[%s9293_s1 + $0x1b0] sm:$0xff] }
 0x813   : > { %v1501_v3 = vsel %vm1373_vm14, %v7713_v62, 0.0  ;;  %v1264_v57 = vadd.f32 %v1232_v55, %v928_v46  ;;  %v1276_v49 = vadd.f32 %v1244_v8, %v940_v41  ;;  %v7941_v42 = vsel %vm772_vm0, %v10826_v28, 0.0  ;;  %3791 = vmatpush.msrb.mxu3 %v3551_v43  ;;  %3864 = vmatpush.msrb.mxu0 %v3559_v61  ;;  %v10827_v55 = vld [vmem:[#allocation229_spill] sm:$0xff]  ;;  %v3574_v46 = vld [vmem:[%s9293_s1 + $0x280] sm:$0xff]  ;;  %v10839_v21 = vld [vmem:[#allocation244_spill] sm:$0xff] }
 0x814   : > { %v7945_v62 = vadd.f32 %v7792_v45, %v7365_v6  ;;  %v1265_v18 = vadd.f32 %v1233_v59, %v929_v17  ;;  %v1277_v35 = vadd.f32 %v1245_v34, %v941_v53  ;;  %v7951_v2 = vsel %vm773_vm2, %v10826_v28, 0.0  ;;  %3929 = vmatpush.msrb.mxu1 %v3575_v19  ;;  %3727 = vmatpush.msrb.mxu2 %v3534_v52  ;;  %v10828_v41 = vld [vmem:[#allocation233_spill] sm:$0xff] }
 0x815   : > { %v7954_v7 = vadd.f32 %v917_v50, %v7373_v23  ;;  %v1520_v40 = vadd.f32 %v1488_v16, %v1264_v57  ;;  %v1532_v44 = vadd.f32 %v1500_v39, %v1276_v49  ;;  %vm1044_vm0 = vcmp.eq.s32.totalorder %v6729_v24, %v10827_v55  ;;  %3792 = vmatpush.msrb.mxu3 %v3550_v27  ;;  %v3558_v50 = vld [vmem:[%s9293_s1 + $0x200] sm:$0xff]  ;;  %v10837_v16 = vld [vmem:[#allocation68_spill] sm:$0xff] }
 0x816   : > { %v1234_v6 = vsel %vm1042_vm8, %v7183_v9, 0.0  ;;  %v1246_v45 = vsel %vm1054_vm6, %v7223_v60, 0.0  ;;  %v1521_v11 = vadd.f32 %v1489_v31, %v1265_v18  ;;  %v1533_v23 = vadd.f32 %v1501_v3, %v1277_v35  ;;  %3865 = vmatpush.msrb.mxu0 %v3558_v50  ;;  %3930 = vmatpush.msrb.mxu1 %v3574_v46  ;;  %v3547_v35 = vld [vmem:[%s9293_s1 + $0x1a8] sm:$0xff]  ;;  %v10843_v46 = vld [vmem:[#allocation34_spill] sm:$0xff] }
 0x817   : > { %vm1045_vm2 = vcmp.eq.s32.totalorder %v6732_v29, %v10827_v55  ;;  %vm1056_vm8 = vcmp.eq.s32.totalorder %v6729_v24, %v10828_v41  ;;  %vm1058_vm6 = vcmp.eq.s32.totalorder %v6729_v24, %v10829_v58  ;;  %v1235_v59 = vsel %vm1043_vm9, %v7183_v9, 0.0  ;;  %3621 = vmatmul.f32.gmra.mxu0 %v1520_v40  ;;  %3639 = vmatmul.f32.gmra.mxu2 %v1532_v44  ;;  %v10831_v9 = vld [vmem:[#allocation44_spill] sm:$0xff]  ;;  %v3530_v40 = vld [vmem:[%s9293_s1 + $0x120] sm:$0xff]  ;;  %v10840_v44 = vld [vmem:[#allocation151_spill] sm:$0xff] }
 0x818   : > { %v1247_v47 = vsel %vm1055_vm10, %v7223_v60, 0.0  ;;  %v912_v17 = vsel %vm784_vm11, %v10830_v32, 0.0  ;;  %vm1057_vm1 = vcmp.eq.s32.totalorder %v6732_v29, %v10828_v41  ;;  %vm1059_vm9 = vcmp.eq.s32.totalorder %v6732_v29, %v10829_v58  ;;  %3686 = vmatmul.f32.gmra.mxu1 %v1521_v11  ;;  %3704 = vmatmul.f32.gmra.mxu3 %v1533_v23  ;;  %v3549_v60 = vld [vmem:[%s9293_s1 + $0x1b8] sm:$0xff]  ;;  %v10842_v23 = vld [vmem:[#allocation156_spill] sm:$0xff] }
 0x819   : > { %vm1362_vm10 = vcmp.eq.s32.totalorder %v6729_v24, %v10831_v9  ;;  %vm1363_vm4 = vcmp.eq.s32.totalorder %v6732_v29, %v10831_v9  ;;  %v913_v0 = vsel %vm785_vm12, %v10830_v32, 0.0  ;;  %v3245_v53 = vadd.s32 %v10720_v4, %v10832_v25  ;;  %3728 = vmatpush.msrb.mxu2 %v3533_v33  ;;  %v8045_v43 = vpop.permute.xlu0 %2412  ;;  %3793 = vmatpush.msrb.mxu3 %v3549_v60  ;;  %v10844_v58 = vld [vmem:[#allocation20_spill] sm:$0xff]  ;;  %v10845_v33 = vld [vmem:[#allocation77_spill] sm:$0xff] }
 0x81a   : > { %v1266_v36 = vadd.f32 %v1234_v6, %v7509_v63  ;;  %v1278_v13 = vadd.f32 %v1246_v45, %v7660_v1  ;;  %vm1364_vm11 = vcmp.eq.s32.totalorder %v6729_v24, %v10833_v56  ;;  %vm1365_vm3 = vcmp.eq.s32.totalorder %v6732_v29, %v10833_v56  ;;  %v10841_v6 = vld [vmem:[#allocation239_spill] sm:$0xff]  ;;  %v10846_v32 = vld [vmem:[#allocation240_spill] sm:$0xff]  ;;  %v3529_v60 = vld [vmem:[%s9293_s1 + $0x118] sm:$0xff] }
 0x81b   : > { %v644_v4 = vsel %vm452_vm13, %v6992_v26, 0.0  ;;  %v656_v63 = vsel %vm464_vm15, %v7024_v37, 0.0  ;;  %v1267_v1 = vadd.f32 %v1235_v59, %v7512_v12  ;;  %v1279_v8 = vadd.f32 %v1247_v47, %v7663_v15  ;;  %v10836_v15 = vld [vmem:[#allocation80_spill] sm:$0xff]  ;;  %3729 = vmatpush.msrb.mxu2 %v3532_v14  ;;  %3794 = vmatpush.msrb.mxu3 %v3548_v38  ;;  %v3546_v47 = vld [vmem:[%s9293_s1 + $0x1a0] sm:$0xff]  ;;  %v10851_v38 = vld [vmem:[#allocation157_spill] sm:$0xff] }
 0x81c   : > { %v10834_v34 = vmov 0   ;;  %vm1376_vm12 = vcmp.eq.s32.totalorder %v6729_v24, %v10835_v48  ;;  %v645_v22 = vsel %vm453_vm5, %v6992_v26, 0.0  ;;  %v657_v12 = vsel %vm465_vm7, %v7024_v37, 0.0  ;;  %v3531_v26 = vld [vmem:[%s9293_s1 + $0x128] sm:$0xff]  ;;  %v10838_v37 = vld [vmem:[#allocation106_spill] sm:$0xff]  ;;  %v10848_v14 = vld [vmem:[#allocation188_spill] sm:$0xff] }
 0x81d   : > { %4344 = vset.pattern.permute.xlu0 %v10834_v34  ;;  %vm786_vm13 = vcmp.eq.s32.totalorder %v6729_v24, %v10836_v15  ;;  %vm1374_vm15 = vcmp.eq.s32.totalorder %v6729_v24, %v10837_v16  ;;  %vm1375_vm14 = vcmp.eq.s32.totalorder %v6732_v29, %v10837_v16  ;;  %vm787_vm5 = vcmp.eq.s32.totalorder %v6732_v29, %v10836_v15  ;;  %v10854_v16 = vld [vmem:[#allocation25_spill] sm:$0xff] }
 0x81e   : > { %3276 = vperm.xlu0 %4344, %v3245_v53   ;;  %v1490_v10 = vsel %vm1362_vm10, %v10838_v37, 0.0  ;;  %v1502_v39 = vsel %vm1374_vm15, %v10839_v21, 0.0  ;;  %v1491_v61 = vsel %vm1363_vm4, %v10838_v37, 0.0  ;;  %v1503_v19 = vsel %vm1375_vm14, %v10839_v21, 0.0  ;;  %3730 = vmatpush.msrb.mxu2 %v3531_v26  ;;  %v10855_v21 = vld [vmem:[#allocation259_spill] sm:$0xff] }
 0x81f   : > { %v932_v31 = vadd.f32 %v7941_v42, %v644_v4  ;;  %v944_v3 = vadd.f32 %v912_v17, %v656_v63  ;;  %v1522_v57 = vadd.f32 %v1490_v10, %v1266_v36  ;;  %v1534_v49 = vadd.f32 %v1502_v39, %v1278_v13  ;;  %3795 = vmatpush.msrb.mxu3 %v3547_v35  ;;  %v3545_v13 = vld [vmem:[%s9293_s1 + $0x198] sm:$0xff]  ;;  %v10849_v63 = vld [vmem:[#allocation107_spill] sm:$0xff]  ;;  %v10860_v35 = vld [vmem:[#allocation148_spill] sm:$0xff] }
 0x820   : > { %v933_v52 = vadd.f32 %v7951_v2, %v645_v22  ;;  %v945_v27 = vadd.f32 %v913_v0, %v657_v12  ;;  %v1523_v28 = vadd.f32 %v1491_v61, %v1267_v1  ;;  %v1535_v18 = vadd.f32 %v1503_v19, %v1279_v8  ;;  %3731 = vmatpush.msrb.mxu2 %v3530_v40  ;;  %v10847_v0 = vld [vmem:[#allocation99_spill] sm:$0xff]  ;;  %v10850_v8 = vld [vmem:[#allocation245_spill] sm:$0xff]  ;;  %v10853_v12 = vld [vmem:[#allocation224_spill] sm:$0xff] }
 0x821   : > { %v8078_v42 = vsel %vm1058_vm6, %v10840_v44, 0.0  ;;  %v8084_v2 = vsel %vm1059_vm9, %v10840_v44, 0.0  ;;  %v1236_v45 = vsel %vm1044_vm0, %v10841_v6, 0.0  ;;  %3624 = vmatmul.f32.gmra.mxu0 %v1522_v57  ;;  %3642 = vmatmul.f32.gmra.mxu2 %v1534_v49  ;;  %vm1377_vm7 = vcmp.eq.s32.totalorder %v6732_v29, %v10835_v48  ;;  %v8131_v4 = vpop.permute.xlu0 %2421  ;;  %v10852_v48 = vld [vmem:[#allocation114_spill] sm:$0xff]  ;;  %v10856_v39 = vld [vmem:[#allocation323_spill] sm:$0xff]  ;;  %v10858_v49 = vld [vmem:[#allocation109_spill] sm:$0xff] }
 0x822   : > { %v1237_v11 = vsel %vm1045_vm2, %v10841_v6, 0.0  ;;  %v1248_v50 = vsel %vm1056_vm8, %v10842_v23, 0.0  ;;  %v3087_v59 = vmul.f32 %v10844_v58, %v10843_v46  ;;  %3689 = vmatmul.f32.gmra.mxu1 %v1523_v28  ;;  %3707 = vmatmul.f32.gmra.mxu3 %v1535_v18  ;;  %vm1380_vm0 = vcmp.eq.s32.totalorder %v6729_v24, %v10845_v33  ;;  %v10857_v57 = vld [vmem:[#allocation243_spill] sm:$0xff]  ;;  %v10859_v28 = vld [vmem:[#allocation345_spill] sm:$0xff]  ;;  %v10862_v44 = vld [vmem:[#allocation162_spill] sm:$0xff] }
 0x823   : > { %v1249_v55 = vsel %vm1057_vm1, %v10842_v23, 0.0  ;;  %vm1378_vm2 = vcmp.eq.s32.totalorder %v6729_v24, %v10846_v32  ;;  %v1268_v17 = vadd.f32 %v1236_v45, %v932_v31  ;;  %v1280_v9 = vadd.f32 %v1248_v50, %v944_v3  ;;  %3796 = vmatpush.msrb.mxu3 %v3546_v47  ;;  %3732 = vmatpush.msrb.mxu2 %v3529_v60  ;;  %v3544_v31 = vld [vmem:[%s9293_s1 + $0x190] sm:$0xff]  ;;  %v3527_v3 = vld [vmem:[%s9293_s1 + $0x108] sm:$0xff]  ;;  %v10863_v45 = vld [vmem:[#allocation165_spill] sm:$0xff] }
 0x824   : > { %vm1379_vm8 = vcmp.eq.s32.totalorder %v6732_v29, %v10846_v32  ;;  %v1492_v41 = vsel %vm1364_vm11, %v10847_v0, 0.0  ;;  %v1269_v25 = vadd.f32 %v1237_v11, %v933_v52  ;;  %v1493_v53 = vsel %vm1365_vm3, %v10847_v0, 0.0  ;;  %v10861_v40 = vld [vmem:[#allocation27_spill] sm:$0xff]  ;;  %v3526_v50 = vld [vmem:[%s9293_s1 + $0x100] sm:$0xff]  ;;  %v10868_v32 = vld [vmem:[#allocation301_spill] sm:$0xff] }
 0x825   : > { %v1281_v36 = vadd.f32 %v1249_v55, %v945_v27  ;;  %vm2742_vm6 = vcmp.eq.s32.totalorder %v6729_v24, %v10848_v14  ;;  %v1504_v1 = vsel %vm1376_vm12, %v10849_v63, 0.0  ;;  %v1505_v56 = vsel %vm1377_vm7, %v10849_v63, 0.0  ;;  %3797 = vmatpush.msrb.mxu3 %v3545_v13  ;;  %v10864_v47 = vld [vmem:[#allocation35_spill] sm:$0xff]  ;;  %v3542_v0 = vld [vmem:[%s9293_s1 + $0x180] sm:$0xff] }
 0x826   : > { %4347 = vset.pattern.permute.xlu0 %v10218_v54  ;;  %v8146_v34 = vsel %vm1380_vm0, %v10850_v8, 0.0  ;;  %vm1381_vm1 = vcmp.eq.s32.totalorder %v6732_v29, %v10845_v33  ;;  %v3528_v54 = vld [vmem:[%s9293_s1 + $0x110] sm:$0xff]  ;;  %vm1594_vm9 = vcmp.eq.s32.totalorder %v6729_v24, %v10851_v38  ;;  %vm1595_vm10 = vcmp.eq.s32.totalorder %v6732_v29, %v10851_v38  ;;  %v10871_v38 = vld [vmem:[#allocation249_spill] sm:$0xff] }
 0x827   : > { %vm2743_vm4 = vcmp.eq.s32.totalorder %v6732_v29, %v10848_v14  ;;  %v914_v22 = vsel %vm786_vm13, %v10852_v48, 0.0  ;;  %vm1060_vm11 = vcmp.eq.s32.totalorder %v6729_v24, %v10853_v12  ;;  %3141 = vperm.xlu0 %4347, %v3087_v59   ;;  %vm2438_vm3 = vcmp.eq.s32.totalorder %v6729_v24, %v10854_v16  ;;  %3733 = vmatpush.msrb.mxu2 %v3528_v54  ;;  %v10867_v14 = vld [vmem:[#allocation82_spill] sm:$0xff] }
 0x828   : > { %v915_v26 = vsel %vm787_vm5, %v10852_v48, 0.0  ;;  %v1524_v37 = vadd.f32 %v1492_v41, %v1268_v17  ;;  %v1536_v10 = vadd.f32 %v1504_v1, %v1280_v9  ;;  %vm1592_vm12 = vcmp.eq.s32.totalorder %v6729_v24, %v10855_v21  ;;  %3798 = vmatpush.msrb.mxu3 %v3544_v31  ;;  %v10866_v17 = vld [vmem:[#allocation263_spill] sm:$0xff] }
 0x829   : > { %vm1593_vm13 = vcmp.eq.s32.totalorder %v6732_v29, %v10855_v21  ;;  %vm2439_vm15 = vcmp.eq.s32.totalorder %v6732_v29, %v10854_v16  ;;  %v2870_v61 = vsel %vm2742_vm6, %v10856_v39, 0.0  ;;  %vm1061_vm14 = vcmp.eq.s32.totalorder %v6732_v29, %v10853_v12  ;;  %3734 = vmatpush.msrb.mxu2 %v3527_v3  ;;  %v10870_v16 = vld [vmem:[#allocation159_spill] sm:$0xff]  ;;  %v10875_v12 = vld [vmem:[#allocation178_spill] sm:$0xff] }
 0x82a   : > { %v1525_v15 = vadd.f32 %v1493_v53, %v1269_v25  ;;  %v1537_v19 = vadd.f32 %v1505_v56, %v1281_v36  ;;  %vm1590_vm5 = vcmp.eq.s32.totalorder %v6729_v24, %v10857_v57  ;;  %v2614_v52 = vsel %vm2438_vm3, %v10858_v49, 0.0  ;;  %3627 = vmatmul.f32.gmra.mxu0 %v1524_v37  ;;  %3645 = vmatmul.f32.gmra.mxu2 %v1536_v10  ;;  %v8246_v36 = vpop.permute.xlu0 %2430 }
 0x82b   : > { %v2871_v27 = vsel %vm2743_vm4, %v10856_v39, 0.0  ;;  %vm2998_vm0 = vcmp.eq.s32.totalorder %v6729_v24, %v10859_v28  ;;  %v946_v18 = vadd.f32 %v914_v22, %v7576_v5  ;;  %vm2999_vm3 = vcmp.eq.s32.totalorder %v6732_v29, %v10859_v28  ;;  %v3543_v5 = vld [vmem:[%s9293_s1 + $0x188] sm:$0xff]  ;;  %3735 = vmatpush.msrb.mxu2 %v3526_v50  ;;  %v10880_v28 = vld [vmem:[#allocation26_spill] sm:$0xff] }
 0x82c   : > { %v3344_v6 = vmul.f32 %v10862_v44, %v10861_v40  ;;  %v3174_v11 = vsel %vm2998_vm0, %v10863_v45, 0.0  ;;  %v947_v23 = vadd.f32 %v915_v26, %v7742_v51  ;;  %3692 = vmatmul.f32.gmra.mxu1 %v1525_v15  ;;  %3710 = vmatmul.f32.gmra.mxu3 %v1537_v19  ;;  %v2615_v46 = vsel %vm2439_vm15, %v10858_v49, 0.0  ;;  %v10865_v51 = vld [vmem:[#allocation275_spill] sm:$0xff]  ;;  %v10873_v15 = vld [vmem:[#allocation90_spill] sm:$0xff] }
 0x82d   : > { %v2902_v58 = vadd.f32 %v2870_v61, %v2614_v52  ;;  %v3175_v59 = vsel %vm2999_vm3, %v10863_v45, 0.0  ;;  %vm3302_vm4 = vcmp.eq.s32.totalorder %v6729_v24, %v10864_v47  ;;  %vm1766_vm0 = vcmp.eq.s32.totalorder %v6729_v24, %v10865_v51  ;;  %3799 = vmatpush.msrb.mxu3 %v3543_v5  ;;  %v10872_v39 = vld [vmem:[#allocation251_spill] sm:$0xff]  ;;  %v10878_v52 = vld [vmem:[#allocation242_spill] sm:$0xff] }
 0x82e   : > { %vm1767_vm7 = vcmp.eq.s32.totalorder %v6732_v29, %v10865_v51  ;;  %v2903_v55 = vadd.f32 %v2871_v27, %v2615_v46  ;;  %vm3303_vm6 = vcmp.eq.s32.totalorder %v6732_v29, %v10864_v47  ;;  %v3430_v9 = vsel %vm3302_vm4, %v10866_v17, 0.0  ;;  %v10879_v27 = vld [vmem:[#allocation33_spill] sm:$0xff]  ;;  %v10882_v45 = vld [vmem:[#allocation198_spill] sm:$0xff]  ;;  %v10885_v46 = vld [vmem:[#allocation55_spill] sm:$0xff] }
 0x82f   : > { %v1506_v60 = vsel %vm1378_vm2, %v7805_v30, 0.0  ;;  %v3206_v41 = vadd.f32 %v3174_v11, %v2902_v58  ;;  %v3431_v25 = vsel %vm3303_vm6, %v10866_v17, 0.0  ;;  %v1507_v53 = vsel %vm1379_vm8, %v7805_v30, 0.0  ;;  %3402 = vperm.xlu0 %4347, %v3344_v6   ;;  %3800 = vmatpush.msrb.mxu3 %v3542_v0  ;;  %v10883_v11 = vld [vmem:[#allocation352_spill] sm:$0xff] }
 0x830   : > { %v1282_v13 = vadd.f32 %v8078_v42, %v946_v18  ;;  %v8253_v63 = vsel %vm1594_vm9, %v10867_v14, 0.0  ;;  %v3207_v1 = vadd.f32 %v3175_v59, %v2903_v55  ;;  %v1283_v56 = vadd.f32 %v8084_v2, %v947_v23  ;;  %v10869_v2 = vld [vmem:[#allocation166_spill] sm:$0xff]  ;;  %v10884_v23 = vld [vmem:[#allocation111_spill] sm:$0xff] }
 0x831   : > { %v1509_v30 = vsel %vm1381_vm1, %v10850_v8, 0.0  ;;  %v8264_v42 = vsel %vm1595_vm10, %v10867_v14, 0.0  ;;  %v1252_v54 = vsel %vm1060_vm11, %v10868_v32, 0.0  ;;  %v3462_v22 = vadd.f32 %v3430_v9, %v3206_v41  ;;  %v10886_v9 = vld [vmem:[#allocation247_spill] sm:$0xff] }
 0x832   : > { %v1538_v48 = vadd.f32 %v1506_v60, %v1282_v13  ;;  %vm1768_vm2 = vcmp.eq.s32.totalorder %v6729_v24, %v10869_v2  ;;  %vm1769_vm8 = vcmp.eq.s32.totalorder %v6732_v29, %v10869_v2  ;;  %v1539_v33 = vadd.f32 %v1507_v53, %v1283_v56  ;;  %v10887_v60 = vld [vmem:[#allocation213_spill] sm:$0xff]  ;;  %v10890_v13 = vld [vmem:[#allocation24_spill] sm:$0xff] }
 0x833   : > { %v3463_v8 = vadd.f32 %v3431_v25, %v3207_v1  ;;  %vm1598_vm1 = vcmp.eq.s32.totalorder %v6729_v24, %v10870_v16  ;;  %v1688_v26 = vsel %vm1592_vm12, %v10871_v38, 0.0  ;;  %v1689_v37 = vsel %vm1593_vm13, %v10871_v38, 0.0  ;;  %3866 = vmatmul.f32.vlgmr.msrb.gmra.mxu0 %v3462_v22  ;;  %v10888_v25 = vld [vmem:[#allocation305_spill] sm:$0xff]  ;;  %v10891_v1 = vld [vmem:[#allocation304_spill] sm:$0xff]  ;;  %v10893_v22 = vld [vmem:[#allocation314_spill] sm:$0xff] }
 0x834   : > { %v1253_v10 = vsel %vm1061_vm14, %v10868_v32, 0.0  ;;  %3648 = vmatmul.f32.gmra.mxu2 %v1538_v48  ;;  %v8289_v61 = vsel %vm1598_vm1, %v10872_v39, 0.0  ;;  %v1686_v19 = vsel %vm1590_vm5, %v10873_v15, 0.0  ;;  %vm10874_vm9 = vcmp.eq.s32.totalorder %v6732_v29, %v10857_v57  ;;  %3713 = vmatmul.f32.gmra.mxu3 %v1539_v33  ;;  %v10889_v53 = vld [vmem:[#allocation169_spill] sm:$0xff]  ;;  %v10894_v33 = vld [vmem:[#allocation288_spill] sm:$0xff] }
 0x835   : > { %v1687_v21 = vsel %vm10874_vm9, %v10873_v15, 0.0  ;;  %v1284_v31 = vadd.f32 %v1252_v54, %v7945_v62  ;;  %3931 = vmatmul.f32.vlgmr.msrb.gmra.mxu1 %v3463_v8  ;;  %vm10876_vm10 = vcmp.eq.s32.totalorder %v6729_v24, %v10860_v35  ;;  %vm10877_vm11 = vcmp.eq.s32.totalorder %v6732_v29, %v10860_v35  ;;  %v10881_v35 = vld [vmem:[#allocation260_spill] sm:$0xff]  ;;  %v10892_v32 = vld [vmem:[#allocation257_spill] sm:$0xff] }
 0x836   : > { %v8304_v3 = vsel %vm10876_vm10, %v10875_v12, 0.0  ;;  %v8310_v49 = vsel %vm10877_vm11, %v10875_v12, 0.0  ;;  %v1864_v57 = vsel %vm1768_vm2, %v10878_v52, 0.0  ;;  %v1865_v62 = vsel %vm1769_vm8, %v10878_v52, 0.0  ;;  %v10895_v38 = vld [vmem:[#allocation277_spill] sm:$0xff] }
 0x837   : > { %v3345_v18 = vmul.f32 %v10880_v28, %v10879_v27  ;;  %v1285_v40 = vadd.f32 %v1253_v10, %v7954_v7  ;;  %vm2442_vm12 = vcmp.eq.s32.totalorder %v6729_v24, %v7929_v20  ;;  %vm2443_vm13 = vcmp.eq.s32.totalorder %v6732_v29, %v7929_v20  ;;  %v2702_v7 = vpop.permute.xlu0 %2701  ;;  %v10896_v52 = vld [vmem:[#allocation93_spill] sm:$0xff] }
 0x838   : > { %v1862_v44 = vsel %vm1766_vm0, %v10881_v35, 0.0  ;;  %v1863_v6 = vsel %vm1767_vm7, %v10881_v35, 0.0  ;;  %vm1974_vm15 = vcmp.eq.s32.totalorder %v6729_v24, %v10882_v45  ;;  %vm1975_vm14 = vcmp.eq.s32.totalorder %v6732_v29, %v10882_v45  ;;  %v10899_v35 = vld [vmem:[#allocation296_spill] sm:$0xff]  ;;  %v10900_v45 = vld [vmem:[#allocation262_spill] sm:$0xff] }
 0x839   : > { %vm3002_vm5 = vcmp.eq.s32.totalorder %v6729_v24, %v10883_v11  ;;  %vm2746_vm6 = vcmp.eq.s32.totalorder %v6729_v24, %v2702_v7  ;;  %vm2747_vm3 = vcmp.eq.s32.totalorder %v6732_v29, %v2702_v7  ;;  %3407 = vperm.xlu0 %4347, %v3345_v18   ;;  %v1540_v20 = vadd.f32 %v8146_v34, %v1284_v31 }
 0x83a   : > { %v2618_v5 = vsel %vm2442_vm12, %v10884_v23, 0.0  ;;  %v2619_v50 = vsel %vm2443_vm13, %v10884_v23, 0.0  ;;  %v2874_v58 = vsel %vm2746_vm6, %v10885_v46, 0.0  ;;  %v2875_v59 = vsel %vm2747_vm3, %v10885_v46, 0.0  ;;  %v10904_v46 = vld [vmem:[#allocation36_spill] sm:$0xff] }
 0x83b   : > { %vm3003_vm7 = vcmp.eq.s32.totalorder %v6732_v29, %v10883_v11  ;;  %v2906_v47 = vadd.f32 %v2874_v58, %v2618_v5  ;;  %v2907_v51 = vadd.f32 %v2875_v59, %v2619_v50  ;;  %v1541_v55 = vadd.f32 %v1509_v30, %v1285_v40  ;;  %v10901_v11 = vld [vmem:[#allocation32_spill] sm:$0xff] }
 0x83c   : > { %v1894_v17 = vadd.f32 %v1862_v44, %v1686_v19  ;;  %v2070_v34 = vsel %vm1974_vm15, %v10886_v9, 0.0  ;;  %v3178_v0 = vsel %vm3002_vm5, %v10887_v60, 0.0  ;;  %v3179_v41 = vsel %vm3003_vm7, %v10887_v60, 0.0  ;;  %3651 = vmatmul.f32.gmra.mxu2 %v1540_v20  ;;  %v10902_v20 = vld [vmem:[#allocation29_spill] sm:$0xff]  ;;  %v10903_v5 = vld [vmem:[#allocation172_spill] sm:$0xff] }
 0x83d   : > { %vm2182_vm4 = vcmp.eq.s32.totalorder %v6729_v24, %v10888_v25  ;;  %v3346_v14 = vmul.f32 %v10890_v13, %v10889_v53  ;;  %3716 = vmatmul.f32.gmra.mxu3 %v1541_v55  ;;  %vm2184_vm0 = vcmp.eq.s32.totalorder %v6729_v24, %v10891_v1  ;;  %vm2185_vm2 = vcmp.eq.s32.totalorder %v6732_v29, %v10891_v1  ;;  %v10906_v55 = vld [vmem:[#allocation311_spill] sm:$0xff] }
 0x83e   : > { %v8364_v56 = vadd.f32 %v3178_v0, %v2906_v47  ;;  %v8366_v30 = vadd.f32 %v3179_v41, %v2907_v51  ;;  %vm1770_vm8 = vcmp.eq.s32.totalorder %v6729_v24, %v10892_v32  ;;  %v1895_v54 = vadd.f32 %v1863_v6, %v1687_v21  ;;  %v10905_v47 = vld [vmem:[#allocation268_spill] sm:$0xff] }
 0x83f   : > { %v2071_v48 = vsel %vm1975_vm14, %v10886_v9, 0.0  ;;  %v2278_v2 = vsel %vm2182_vm4, %v10893_v22, 0.0  ;;  %vm1978_vm1 = vcmp.eq.s32.totalorder %v6729_v24, %v10894_v33  ;;  %vm1771_vm9 = vcmp.eq.s32.totalorder %v6732_v29, %v10892_v32  ;;  %v2717_v15 = vpop.permute.xlu0 %2716  ;;  %v10910_v32 = vld [vmem:[#allocation97_spill] sm:$0xff] }
 0x840   : > { %v2102_v8 = vadd.f32 %v2070_v34, %v1894_v17  ;;  %vm2183_vm10 = vcmp.eq.s32.totalorder %v6732_v29, %v10888_v25  ;;  %vm2452_vm11 = vcmp.eq.s32.totalorder %v6729_v24, %v8045_v43  ;;  %vm2453_vm12 = vcmp.eq.s32.totalorder %v6732_v29, %v8045_v43  ;;  %v10897_v43 = vld [vmem:[#allocation187_spill] sm:$0xff]  ;;  %v10907_v34 = vld [vmem:[#allocation258_spill] sm:$0xff] }
 0x841   : > { %vm1976_vm13 = vcmp.eq.s32.totalorder %v6729_v24, %v10895_v38  ;;  %v2279_v10 = vsel %vm2183_vm10, %v10893_v22, 0.0  ;;  %v1896_v19 = vadd.f32 %v1864_v57, %v1688_v26  ;;  %v1897_v21 = vadd.f32 %v1865_v62, %v1689_v37  ;;  %3412 = vperm.xlu0 %4347, %v3346_v14   ;;  %v10898_v62 = vld [vmem:[#allocation171_spill] sm:$0xff]  ;;  %v10908_v25 = vld [vmem:[#allocation290_spill] sm:$0xff]  ;;  %v10911_v22 = vld [vmem:[#allocation340_spill] sm:$0xff] }
 0x842   : > { %v2103_v31 = vadd.f32 %v2071_v48, %v1895_v54  ;;  %vm2756_vm15 = vcmp.eq.s32.totalorder %v6729_v24, %v2717_v15  ;;  %vm2757_vm14 = vcmp.eq.s32.totalorder %v6732_v29, %v2717_v15  ;;  %v2310_v12 = vadd.f32 %v2278_v2, %v2102_v8  ;;  %v10909_v14 = vld [vmem:[#allocation11_spill] sm:$0xff] }
 0x843   : > { %v2628_v27 = vsel %vm2452_vm11, %v10896_v52, 0.0  ;;  %v2629_v28 = vsel %vm2453_vm12, %v10896_v52, 0.0  ;;  %v2884_v18 = vsel %vm2756_vm15, %v10897_v43, 0.0  ;;  %v2885_v40 = vsel %vm2757_vm14, %v10897_v43, 0.0 }
 0x844   : > { %vm1979_vm5 = vcmp.eq.s32.totalorder %v6732_v29, %v10894_v33  ;;  %vm1977_vm6 = vcmp.eq.s32.totalorder %v6732_v29, %v10895_v38  ;;  %v2916_v26 = vadd.f32 %v2884_v18, %v2628_v27  ;;  %v2917_v37 = vadd.f32 %v2885_v40, %v2629_v28  ;;  %3736 = vmatmul.f32.vlgmr.msrb.gmra.mxu2 %v2310_v12  ;;  %v10912_v38 = vld [vmem:[#allocation16_spill] sm:$0xff]  ;;  %v10915_v33 = vld [vmem:[#allocation45_spill] sm:$0xff] }
 0x845   : > { %v2311_v57 = vadd.f32 %v2279_v10, %v2103_v31  ;;  %vm1772_vm3 = vcmp.eq.s32.totalorder %v6729_v24, %v10898_v62  ;;  %vm1773_vm7 = vcmp.eq.s32.totalorder %v6732_v29, %v10898_v62  ;;  %v2072_v44 = vsel %vm1976_vm13, %v10899_v35, 0.0  ;;  %v10913_v31 = vld [vmem:[#allocation235_spill] sm:$0xff] }
 0x846   : > { %v2073_v6 = vsel %vm1977_vm6, %v10899_v35, 0.0  ;;  %v1868_v7 = vsel %vm1772_vm3, %v10900_v45, 0.0  ;;  %v3347_v23 = vmul.f32 %v10902_v20, %v10901_v11  ;;  %v8411_v50 = vadd.f32 %v10903_v5, %v2916_v26 }
 0x847   : > { %3801 = vmatmul.f32.vlgmr.msrb.gmra.mxu3 %v2311_v57  ;;  %v8414_v58 = vadd.f32 %v10904_v46, %v2917_v37  ;;  %v1869_v59 = vsel %vm1773_vm7, %v10900_v45, 0.0  ;;  %v1866_v51 = vsel %vm1770_vm8, %v10905_v47, 0.0  ;;  %v2280_v17 = vsel %vm2184_vm0, %v10906_v55, 0.0  ;;  %v2726_v13 = vpop.permute.xlu0 %2725  ;;  %v10917_v37 = vld [vmem:[#allocation30_spill] sm:$0xff]  ;;  %v10919_v45 = vld [vmem:[#allocation300_spill] sm:$0xff] }
 0x848   : > { %v2281_v9 = vsel %vm2185_vm2, %v10906_v55, 0.0  ;;  %vm1774_vm4 = vcmp.eq.s32.totalorder %v6729_v24, %v10907_v34  ;;  %vm2458_vm10 = vcmp.eq.s32.totalorder %v6729_v24, %v8131_v4  ;;  %vm2459_vm11 = vcmp.eq.s32.totalorder %v6732_v29, %v8131_v4  ;;  %v10921_v46 = vld [vmem:[#allocation342_spill] sm:$0xff] }
 0x849   : > { %v2104_v60 = vadd.f32 %v2072_v44, %v1896_v19  ;;  %v2105_v0 = vadd.f32 %v2073_v6, %v1897_v21  ;;  %v1867_v41 = vsel %vm1771_vm9, %v10905_v47, 0.0  ;;  %v2074_v53 = vsel %vm1978_vm1, %v10908_v25, 0.0  ;;  %3417 = vperm.xlu0 %4347, %v3347_v23   ;;  %v10918_v44 = vld [vmem:[#allocation271_spill] sm:$0xff] }
 0x84a   : > { %vm2186_vm0 = vcmp.eq.s32.totalorder %v6729_v24, %v10909_v14  ;;  %vm2187_vm2 = vcmp.eq.s32.totalorder %v6732_v29, %v10909_v14  ;;  %vm2762_vm8 = vcmp.eq.s32.totalorder %v6729_v24, %v2726_v13  ;;  %vm2763_vm12 = vcmp.eq.s32.totalorder %v6732_v29, %v2726_v13  ;;  %v10926_v13 = vld [vmem:[#allocation209_spill] sm:$0xff] }
 0x84b   : > { %v2312_v4 = vadd.f32 %v2280_v17, %v2104_v60  ;;  %v2313_v1 = vadd.f32 %v2281_v9, %v2105_v0  ;;  %v2634_v54 = vsel %vm2458_vm10, %v10910_v32, 0.0  ;;  %v2635_v48 = vsel %vm2459_vm11, %v10910_v32, 0.0  ;;  %v10923_v60 = vld [vmem:[#allocation338_spill] sm:$0xff]  ;;  %v10924_v0 = vld [vmem:[#allocation331_spill] sm:$0xff] }
 0x84c   : > { %v2890_v2 = vsel %vm2762_vm8, %v10911_v22, 0.0  ;;  %v2891_v8 = vsel %vm2763_vm12, %v10911_v22, 0.0  ;;  %vm3018_vm1 = vcmp.eq.s32.totalorder %v6729_v24, %v10912_v38  ;;  %vm3019_vm9 = vcmp.eq.s32.totalorder %v6732_v29, %v10912_v38  ;;  %v10927_v32 = vld [vmem:[#allocation339_spill] sm:$0xff]  ;;  %v10928_v22 = vld [vmem:[#allocation6_spill] sm:$0xff] }
 0x84d   : > { %v2922_v10 = vadd.f32 %v2890_v2, %v2634_v54  ;;  %v2923_v15 = vadd.f32 %v2891_v8, %v2635_v48  ;;  %v1898_v19 = vadd.f32 %v1866_v51, %v8253_v63  ;;  %v2075_v21 = vsel %vm1979_vm5, %v10908_v25, 0.0  ;;  %3739 = vmatmul.f32.gmra.mxu2 %v2312_v4  ;;  %v10914_v63 = vld [vmem:[#allocation201_spill] sm:$0xff]  ;;  %v10929_v2 = vld [vmem:[#allocation326_spill] sm:$0xff]  ;;  %v10930_v8 = vld [vmem:[#allocation316_spill] sm:$0xff] }
 0x84e   : > { %v3194_v12 = vsel %vm3018_vm1, %v10913_v31, 0.0  ;;  %v3195_v52 = vsel %vm3019_vm9, %v10913_v31, 0.0  ;;  %v1900_v27 = vadd.f32 %v1868_v7, %v8304_v3  ;;  %v1899_v28 = vadd.f32 %v1867_v41, %v8264_v42  ;;  %v10916_v42 = vld [vmem:[#allocation37_spill] sm:$0xff] }
 0x84f   : > { %3804 = vmatmul.f32.gmra.mxu3 %v2313_v1  ;;  %v8466_v43 = vadd.f32 %v3194_v12, %v2922_v10  ;;  %v8468_v18 = vadd.f32 %v3195_v52, %v2923_v15  ;;  %vm1980_vm13 = vcmp.eq.s32.totalorder %v6729_v24, %v10914_v63  ;;  %v2106_v40 = vadd.f32 %v2074_v53, %v1898_v19  ;;  %v2735_v11 = vpop.permute.xlu0 %2734  ;;  %v10922_v51 = vld [vmem:[#allocation21_spill] sm:$0xff]  ;;  %v10925_v53 = vld [vmem:[#allocation174_spill] sm:$0xff]  ;;  %v10931_v15 = vld [vmem:[#allocation84_spill] sm:$0xff] }
 0x850   : > { %v2282_v26 = vsel %vm2186_vm0, %v10915_v33, 0.0  ;;  %v2283_v3 = vsel %vm2187_vm2, %v10915_v33, 0.0  ;;  %v3348_v57 = vmul.f32 %v10917_v37, %v10916_v42  ;;  %vm2464_vm15 = vcmp.eq.s32.totalorder %v6729_v24, %v8246_v36  ;;  %v10933_v37 = vld [vmem:[#allocation327_spill] sm:$0xff] }
 0x851   : > { %vm2465_vm14 = vcmp.eq.s32.totalorder %v6732_v29, %v8246_v36  ;;  %v2107_v62 = vadd.f32 %v2075_v21, %v1899_v28  ;;  %v1901_v35 = vadd.f32 %v1869_v59, %v8310_v49  ;;  %v8491_v6 = vsel %vm1774_vm4, %v10918_v44, 0.0  ;;  %v10920_v49 = vld [vmem:[#allocation100_spill] sm:$0xff] }
 0x852   : > { %vm1981_vm5 = vcmp.eq.s32.totalorder %v6732_v29, %v10914_v63  ;;  %v2076_v7 = vsel %vm1980_vm13, %v10919_v45, 0.0  ;;  %vm2768_vm6 = vcmp.eq.s32.totalorder %v6729_v24, %v2735_v11  ;;  %vm2769_vm3 = vcmp.eq.s32.totalorder %v6732_v29, %v2735_v11  ;;  %3422 = vperm.xlu0 %4347, %v3348_v57  }
 0x853   : > { %v2314_v36 = vadd.f32 %v2282_v26, %v2106_v40  ;;  %v2315_v20 = vadd.f32 %v2283_v3, %v2107_v62  ;;  %v2640_v23 = vsel %vm2464_vm15, %v10920_v49, 0.0  ;;  %v2641_v5 = vsel %vm2465_vm14, %v10920_v49, 0.0  ;;  %v10932_v40 = vld [vmem:[#allocation328_spill] sm:$0xff] }
 0x854   : > { %v2896_v59 = vsel %vm2768_vm6, %v10921_v46, 0.0  ;;  %v2897_v47 = vsel %vm2769_vm3, %v10921_v46, 0.0  ;;  %vm1775_vm7 = vcmp.eq.s32.totalorder %v6732_v29, %v10907_v34  ;;  %vm3024_vm4 = vcmp.eq.s32.totalorder %v6729_v24, %v10922_v51  ;;  %v10937_v46 = vld [vmem:[#allocation14_spill] sm:$0xff] }
 0x855   : > { %vm3025_vm10 = vcmp.eq.s32.totalorder %v6732_v29, %v10922_v51  ;;  %v2928_v55 = vadd.f32 %v2896_v59, %v2640_v23  ;;  %v2929_v17 = vadd.f32 %v2897_v47, %v2641_v5  ;;  %v2077_v9 = vsel %vm1981_vm5, %v10919_v45, 0.0  ;;  %3742 = vmatmul.f32.gmra.mxu2 %v2314_v36  ;;  %v10935_v45 = vld [vmem:[#allocation105_spill] sm:$0xff]  ;;  %v10938_v47 = vld [vmem:[#allocation312_spill] sm:$0xff] }
 0x856   : > { %vm2744_vm11 = vcmp.eq.s32.totalorder %v6729_v24, %v10923_v60  ;;  %v3200_v41 = vsel %vm3024_vm4, %v10924_v0, 0.0  ;;  %v3201_v25 = vsel %vm3025_vm10, %v10924_v0, 0.0  ;;  %vm1599_vm0 = vcmp.eq.s32.totalorder %v6732_v29, %v10870_v16  ;;  %v10936_v36 = vld [vmem:[#allocation293_spill] sm:$0xff] }
 0x857   : > { %vm2745_vm2 = vcmp.eq.s32.totalorder %v6732_v29, %v10923_v60  ;;  %v3349_v14 = vmul.f32 %v10926_v13, %v10925_v53  ;;  %3807 = vmatmul.f32.gmra.mxu3 %v2315_v20  ;;  %v8522_v4 = vadd.f32 %v3200_v41, %v2928_v55  ;;  %v8524_v1 = vadd.f32 %v3201_v25, %v2929_v17  ;;  %v2955_v31 = vpop.permute.xlu0 %2954  ;;  %v10941_v60 = vld [vmem:[#allocation265_spill] sm:$0xff]  ;;  %v10942_v25 = vld [vmem:[#allocation152_spill] sm:$0xff] }
 0x858   : > { %v2872_v54 = vsel %vm2744_vm11, %v10927_v32, 0.0  ;;  %v2873_v48 = vsel %vm2745_vm2, %v10927_v32, 0.0  ;;  %vm2188_vm8 = vcmp.eq.s32.totalorder %v6729_v24, %v10928_v22  ;;  %vm2189_vm12 = vcmp.eq.s32.totalorder %v6732_v29, %v10928_v22  ;;  %v10943_v13 = vld [vmem:[#allocation180_spill] sm:$0xff]  ;;  %v10944_v32 = vld [vmem:[#allocation167_spill] sm:$0xff] }
 0x859   : > { %vm2440_vm1 = vcmp.eq.s32.totalorder %v6729_v24, %v10929_v2  ;;  %vm2441_vm9 = vcmp.eq.s32.totalorder %v6732_v29, %v10929_v2  ;;  %v2284_v38 = vsel %vm2188_vm8, %v10930_v8, 0.0  ;;  %v2285_v10 = vsel %vm2189_vm12, %v10930_v8, 0.0  ;;  %v10945_v2 = vld [vmem:[#allocation308_spill] sm:$0xff] }
 0x85a   : > { %v2616_v19 = vsel %vm2440_vm1, %v10931_v15, 0.0  ;;  %v2617_v21 = vsel %vm2441_vm9, %v10931_v15, 0.0  ;;  %v2108_v12 = vadd.f32 %v2076_v7, %v1900_v27  ;;  %v2109_v52 = vadd.f32 %v2077_v9, %v1901_v35  ;;  %3427 = vperm.xlu0 %4347, %v3349_v14   ;;  %v10934_v35 = vld [vmem:[#allocation279_spill] sm:$0xff]  ;;  %v10947_v15 = vld [vmem:[#allocation318_spill] sm:$0xff] }
 0x85b   : > { %v2904_v28 = vadd.f32 %v2872_v54, %v2616_v19  ;;  %v2905_v63 = vadd.f32 %v2873_v48, %v2617_v21  ;;  %vm3000_vm13 = vcmp.eq.s32.totalorder %v6729_v24, %v2955_v31  ;;  %vm3001_vm15 = vcmp.eq.s32.totalorder %v6732_v29, %v2955_v31  ;;  %v10948_v21 = vld [vmem:[#allocation163_spill] sm:$0xff] }
 0x85c   : > { %v3176_v33 = vsel %vm3000_vm13, %v10932_v40, 0.0  ;;  %v3177_v26 = vsel %vm3001_vm15, %v10932_v40, 0.0  ;;  %v2316_v3 = vadd.f32 %v2284_v38, %v2108_v12  ;;  %v2317_v42 = vadd.f32 %v2285_v10, %v2109_v52  ;;  %v10946_v38 = vld [vmem:[#allocation75_spill] sm:$0xff]  ;;  %v10950_v40 = vld [vmem:[#allocation150_spill] sm:$0xff] }
 0x85d   : > { %vm3304_vm14 = vcmp.eq.s32.totalorder %v6729_v24, %v10933_v37  ;;  %vm3305_vm5 = vcmp.eq.s32.totalorder %v6732_v29, %v10933_v37  ;;  %v3208_v27 = vadd.f32 %v3176_v33, %v2904_v28  ;;  %v3209_v57 = vadd.f32 %v3177_v26, %v2905_v63  ;;  %v10949_v28 = vld [vmem:[#allocation261_spill] sm:$0xff] }
 0x85e   : > { %v1871_v62 = vsel %vm1775_vm7, %v10918_v44, 0.0  ;;  %vm1982_vm6 = vcmp.eq.s32.totalorder %v6729_v24, %v10934_v35  ;;  %v3432_v7 = vsel %vm3304_vm14, %v10935_v45, 0.0  ;;  %v3433_v11 = vsel %vm3305_vm5, %v10935_v45, 0.0  ;;  %3745 = vmatmul.f32.gmra.mxu2 %v2316_v3  ;;  %v10951_v3 = vld [vmem:[#allocation92_spill] sm:$0xff] }
 0x85f   : > { %vm1983_vm3 = vcmp.eq.s32.totalorder %v6732_v29, %v10934_v35  ;;  %v2078_v20 = vsel %vm1982_vm6, %v10936_v36, 0.0  ;;  %3810 = vmatmul.f32.gmra.mxu3 %v2317_v42  ;;  %v3464_v49 = vadd.f32 %v3432_v7, %v3208_v27  ;;  %v3465_v23 = vadd.f32 %v3433_v11, %v3209_v57  ;;  %v8571_v55 = vpop.permute.xlu0 %2969  ;;  %v10952_v27 = vld [vmem:[#allocation281_spill] sm:$0xff]  ;;  %v10954_v35 = vld [vmem:[#allocation23_spill] sm:$0xff] }
 0x860   : > { %v1695_v34 = vsel %vm1599_vm0, %v10872_v39, 0.0  ;;  %v1902_v44 = vadd.f32 %v8491_v6, %v8289_v61  ;;  %v2079_v5 = vsel %vm1983_vm3, %v10936_v36, 0.0  ;;  %vm2190_vm7 = vcmp.eq.s32.totalorder %v6729_v24, %v10937_v46  ;;  %v10939_v61 = vld [vmem:[#allocation194_spill] sm:$0xff]  ;;  %v10940_v6 = vld [vmem:[#allocation205_spill] sm:$0xff]  ;;  %v10955_v7 = vld [vmem:[#allocation303_spill] sm:$0xff] }
 0x861   : > { %v1903_v59 = vadd.f32 %v1871_v62, %v1695_v34  ;;  %3869 = vmatmul.f32.gmra.mxu0 %v3464_v49  ;;  %3934 = vmatmul.f32.gmra.mxu1 %v3465_v23  ;;  %v2286_v51 = vsel %vm2190_vm7, %v10938_v47, 0.0  ;;  %vm2191_vm4 = vcmp.eq.s32.totalorder %v6732_v29, %v10937_v46  ;;  %vm1776_vm10 = vcmp.eq.s32.totalorder %v6729_v24, %v10939_v61  ;;  %v10953_v62 = vld [vmem:[#allocation291_spill] sm:$0xff]  ;;  %v10956_v36 = vld [vmem:[#allocation280_spill] sm:$0xff]  ;;  %v10957_v34 = vld [vmem:[#allocation306_spill] sm:$0xff] }
 0x862   : > { %v2110_v16 = vadd.f32 %v2078_v20, %v1902_v44  ;;  %v2287_v39 = vsel %vm2191_vm4, %v10938_v47, 0.0  ;;  %vm1984_vm11 = vcmp.eq.s32.totalorder %v6729_v24, %v10940_v6  ;;  %vm1777_vm0 = vcmp.eq.s32.totalorder %v6732_v29, %v10939_v61  ;;  %v10958_v44 = vld [vmem:[#allocation50_spill] sm:$0xff]  ;;  %v10960_v47 = vld [vmem:[#allocation313_spill] sm:$0xff] }
 0x863   : > { %v2111_v17 = vadd.f32 %v2079_v5, %v1903_v59  ;;  %v1872_v0 = vsel %vm1776_vm10, %v10941_v60, 0.0  ;;  %vm1985_vm2 = vcmp.eq.s32.totalorder %v6732_v29, %v10940_v6  ;;  %vm1600_vm8 = vcmp.eq.s32.totalorder %v6729_v24, %v10942_v25  ;;  %v10959_v46 = vld [vmem:[#allocation334_spill] sm:$0xff] }
 0x864   : > { %v2318_v9 = vadd.f32 %v2286_v51, %v2110_v16  ;;  %v1873_v53 = vsel %vm1777_vm0, %v10941_v60, 0.0  ;;  %vm1601_vm12 = vcmp.eq.s32.totalorder %v6732_v29, %v10942_v25  ;;  %v1696_v14 = vsel %vm1600_vm8, %v10943_v13, 0.0  ;;  %v10961_v16 = vld [vmem:[#allocation115_spill] sm:$0xff] }
 0x865   : > { %v2319_v41 = vadd.f32 %v2287_v39, %v2111_v17  ;;  %v2080_v54 = vsel %vm1984_vm11, %v10944_v32, 0.0  ;;  %v1697_v48 = vsel %vm1601_vm12, %v10943_v13, 0.0  ;;  %v1904_v22 = vadd.f32 %v1872_v0, %v1696_v14  ;;  %v10962_v60 = vld [vmem:[#allocation347_spill] sm:$0xff]  ;;  %v10964_v14 = vld [vmem:[#allocation274_spill] sm:$0xff] }
 0x866   : > { %3748 = vmatmul.f32.gmra.mxu2 %v2318_v9  ;;  %vm2192_vm1 = vcmp.eq.s32.totalorder %v6729_v24, %v10945_v2  ;;  %v2081_v8 = vsel %vm1985_vm2, %v10944_v32, 0.0  ;;  %vm1778_vm9 = vcmp.eq.s32.totalorder %v6729_v24, %v10946_v38  ;;  %v1905_v10 = vadd.f32 %v1873_v53, %v1697_v48 }
 0x867   : > { %3813 = vmatmul.f32.gmra.mxu3 %v2319_v41  ;;  %v2288_v19 = vsel %vm2192_vm1, %v10947_v15, 0.0  ;;  %vm2193_vm13 = vcmp.eq.s32.totalorder %v6732_v29, %v10945_v2  ;;  %vm1604_vm15 = vcmp.eq.s32.totalorder %v6729_v24, %v10948_v21  ;;  %vm1779_vm14 = vcmp.eq.s32.totalorder %v6732_v29, %v10946_v38  ;;  %v8603_v31 = vpop.permute.xlu0 %2978  ;;  %v10963_v41 = vld [vmem:[#allocation348_spill] sm:$0xff] }
 0x868   : > { %v2112_v12 = vadd.f32 %v2080_v54, %v1904_v22  ;;  %v2289_v52 = vsel %vm2193_vm13, %v10947_v15, 0.0  ;;  %vm1602_vm5 = vcmp.eq.s32.totalorder %v6729_v24, %v10949_v28  ;;  %v2113_v63 = vadd.f32 %v2081_v8, %v1905_v10  ;;  %v10965_v54 = vld [vmem:[#allocation193_spill] sm:$0xff] }
 0x869   : > { %vm1603_vm6 = vcmp.eq.s32.totalorder %v6732_v29, %v10949_v28  ;;  %vm1605_vm3 = vcmp.eq.s32.totalorder %v6732_v29, %v10948_v21  ;;  %v1874_v33 = vsel %vm1778_vm9, %v10950_v40, 0.0  ;;  %v1700_v42 = vsel %vm1604_vm15, %v10951_v3, 0.0  ;;  %v10967_v28 = vld [vmem:[#allocation310_spill] sm:$0xff]  ;;  %v10969_v21 = vld [vmem:[#allocation267_spill] sm:$0xff] }
 0x86a   : > { %v2320_v26 = vadd.f32 %v2288_v19, %v2112_v12  ;;  %v1875_v37 = vsel %vm1779_vm14, %v10950_v40, 0.0  ;;  %vm1986_vm7 = vcmp.eq.s32.totalorder %v6729_v24, %v10952_v27  ;;  %v2321_v57 = vadd.f32 %v2289_v52, %v2113_v63  ;;  %v8647_v53 = vpop.f32.mrf.mxu0  ;;  %v8649_v13 = vpop.f32.mrf.mxu1  ;;  %v10966_v12 = vld [vmem:[#allocation295_spill] sm:$0xff]  ;;  %v10968_v63 = vld [vmem:[#allocation248_spill] sm:$0xff] }
 0x86b   : > { %vm1988_vm4 = vcmp.eq.s32.totalorder %v6729_v24, %v10953_v62  ;;  %v1698_v45 = vsel %vm1602_vm5, %v10954_v35, 0.0  ;;  %vm1987_vm10 = vcmp.eq.s32.totalorder %v6732_v29, %v10952_v27  ;;  %v2082_v11 = vsel %vm1986_vm7, %v10955_v7, 0.0  ;;  %v10971_v27 = vld [vmem:[#allocation13_spill] sm:$0xff] }
 0x86c   : > { %vm1782_vm11 = vcmp.eq.s32.totalorder %v6729_v24, %v10956_v36  ;;  %v1699_v20 = vsel %vm1603_vm6, %v10954_v35, 0.0  ;;  %v2083_v49 = vsel %vm1987_vm10, %v10955_v7, 0.0  ;;  %v1906_v23 = vadd.f32 %v1874_v33, %v1698_v45  ;;  %v10973_v35 = vld [vmem:[#allocation164_spill] sm:$0xff]  ;;  %v10974_v7 = vld [vmem:[#allocation119_spill] sm:$0xff] }
 0x86d   : > { %vm2194_vm0 = vcmp.eq.s32.totalorder %v6729_v24, %v10957_v34  ;;  %vm1780_vm2 = vcmp.eq.s32.totalorder %v6729_v24, %v10958_v44  ;;  %vm1781_vm8 = vcmp.eq.s32.totalorder %v6732_v29, %v10958_v44  ;;  %v1907_v5 = vadd.f32 %v1875_v37, %v1699_v20  ;;  %v10970_v37 = vld [vmem:[#allocation287_spill] sm:$0xff]  ;;  %v10975_v44 = vld [vmem:[#allocation349_spill] sm:$0xff] }
 0x86e   : > { %3751 = vmatmul.f32.gmra.mxu2 %v2320_v26  ;;  %vm2195_vm12 = vcmp.eq.s32.totalorder %v6732_v29, %v10957_v34  ;;  %vm2462_vm1 = vcmp.eq.s32.totalorder %v6729_v24, %v10959_v46  ;;  %vm2463_vm9 = vcmp.eq.s32.totalorder %v6732_v29, %v10959_v46  ;;  %v2114_v59 = vadd.f32 %v2082_v11, %v1906_v23  ;;  %v10976_v46 = vld [vmem:[#allocation350_spill] sm:$0xff] }
 0x86f   : > { %3816 = vmatmul.f32.gmra.mxu3 %v2321_v57  ;;  %v2290_v51 = vsel %vm2194_vm0, %v10960_v47, 0.0  ;;  %v2638_v39 = vsel %vm2462_vm1, %v10961_v16, 0.0  ;;  %v2639_v17 = vsel %vm2463_vm9, %v10961_v16, 0.0  ;;  %v2988_v61 = vpop.permute.xlu0 %2987  ;;  %v2115_v6 = vadd.f32 %v2083_v49, %v1907_v5  ;;  %v3172_v57 = vpop.permute.xlu1 %3171 }
 0x870   : > { %v2291_v9 = vsel %vm2195_vm12, %v10960_v47, 0.0  ;;  %v2926_v0 = vadd.f32 %v10962_v60, %v2638_v39  ;;  %v2927_v25 = vadd.f32 %v10963_v41, %v2639_v17  ;;  %vm3022_vm13 = vcmp.eq.s32.totalorder %v6729_v24, %v2988_v61  ;;  %v10978_v41 = vld [vmem:[#allocation155_spill] sm:$0xff] }
 0x871   : > { %vm3023_vm15 = vcmp.eq.s32.totalorder %v6732_v29, %v2988_v61  ;;  %v1876_v32 = vsel %vm1780_vm2, %v10964_v14, 0.0  ;;  %v3198_v48 = vsel %vm3022_vm13, %v10965_v54, 0.0  ;;  %v2322_v2 = vadd.f32 %v2290_v51, %v2114_v59 }
 0x872   : > { %v3199_v22 = vsel %vm3023_vm15, %v10965_v54, 0.0  ;;  %vm1783_vm14 = vcmp.eq.s32.totalorder %v6732_v29, %v10956_v36  ;;  %v1877_v8 = vsel %vm1781_vm8, %v10964_v14, 0.0  ;;  %v2323_v38 = vadd.f32 %v2291_v9, %v2115_v6  ;;  %v3610_v47 = vpop.f32.mrf.mxu0  ;;  %v3675_v51 = vpop.f32.mrf.mxu1  ;;  %v10977_v6 = vld [vmem:[#allocation266_spill] sm:$0xff] }
 0x873   : > { %v8663_v10 = vadd.f32 %v3198_v48, %v2926_v0  ;;  %v8665_v15 = vadd.f32 %v3199_v22, %v2927_v25  ;;  %v1701_v19 = vsel %vm1605_vm3, %v10951_v3, 0.0  ;;  %vm1989_vm5 = vcmp.eq.s32.totalorder %v6732_v29, %v10953_v62  ;;  %v10979_v25 = vld [vmem:[#allocation94_spill] sm:$0xff]  ;;  %v10981_v22 = vld [vmem:[#allocation255_spill] sm:$0xff] }
 0x874   : > { %v2084_v52 = vsel %vm1988_vm4, %v10966_v12, 0.0  ;;  %vm2196_vm6 = vcmp.eq.s32.totalorder %v6729_v24, %v10967_v28  ;;  %vm1610_vm7 = vcmp.eq.s32.totalorder %v6729_v24, %v10968_v63  ;;  %v1908_v40 = vadd.f32 %v1876_v32, %v1700_v42  ;;  %v10972_v42 = vld [vmem:[#allocation336_spill] sm:$0xff]  ;;  %v10980_v48 = vld [vmem:[#allocation250_spill] sm:$0xff] }
 0x875   : > { %v2085_v33 = vsel %vm1989_vm5, %v10966_v12, 0.0  ;;  %vm2197_vm3 = vcmp.eq.s32.totalorder %v6732_v29, %v10967_v28  ;;  %vm1611_vm10 = vcmp.eq.s32.totalorder %v6732_v29, %v10968_v63  ;;  %v1878_v26 = vsel %vm1782_vm11, %v10969_v21, 0.0  ;;  %v10983_v36 = vld [vmem:[#allocation158_spill] sm:$0xff]  ;;  %v10985_v63 = vld [vmem:[#allocation83_spill] sm:$0xff] }
 0x876   : > { %3754 = vmatmul.f32.gmra.mxu2 %v2322_v2  ;;  %v1909_v3 = vadd.f32 %v1877_v8, %v1701_v19  ;;  %vm1990_vm4 = vcmp.eq.s32.totalorder %v6729_v24, %v10970_v37  ;;  %vm1608_vm0 = vcmp.eq.s32.totalorder %v6729_v24, %v10971_v27  ;;  %vm2468_vm2 = vcmp.eq.s32.totalorder %v6729_v24, %v10972_v42  ;;  %v10982_v8 = vld [vmem:[#allocation161_spill] sm:$0xff] }
 0x877   : > { %3819 = vmatmul.f32.gmra.mxu3 %v2323_v38  ;;  %vm2469_vm8 = vcmp.eq.s32.totalorder %v6732_v29, %v10972_v42  ;;  %v2116_v62 = vadd.f32 %v2084_v52, %v1908_v40  ;;  %v2292_v45 = vsel %vm2196_vm6, %v10973_v35, 0.0  ;;  %v2644_v11 = vsel %vm2468_vm2, %v10974_v7, 0.0  ;;  %v2997_v49 = vpop.permute.xlu0 %2996  ;;  %v10984_v52 = vld [vmem:[#allocation12_spill] sm:$0xff] }
 0x878   : > { %v2645_v20 = vsel %vm2469_vm8, %v10974_v7, 0.0  ;;  %v2117_v23 = vadd.f32 %v2085_v33, %v1909_v3  ;;  %v2293_v34 = vsel %vm2197_vm3, %v10973_v35, 0.0  ;;  %v2932_v5 = vadd.f32 %v10975_v44, %v2644_v11  ;;  %v10986_v33 = vld [vmem:[#allocation320_spill] sm:$0xff]  ;;  %v10987_v3 = vld [vmem:[#allocation241_spill] sm:$0xff]  ;;  %v10991_v44 = vld [vmem:[#allocation39_spill] sm:$0xff] }
 0x879   : > { %v2933_v59 = vadd.f32 %v10976_v46, %v2645_v20  ;;  %vm3028_vm11 = vcmp.eq.s32.totalorder %v6729_v24, %v2997_v49  ;;  %vm3029_vm12 = vcmp.eq.s32.totalorder %v6732_v29, %v2997_v49  ;;  %v8706_v16 = vadd.f32 %v3675_v51, %v3610_v47  ;;  %v10990_v20 = vld [vmem:[#allocation140_spill] sm:$0xff] }
 0x87a   : > { %v3204_v39 = vsel %vm3028_vm11, %v3172_v57, 0.0  ;;  %v3205_v17 = vsel %vm3029_vm12, %v3172_v57, 0.0  ;;  %v2324_v61 = vadd.f32 %v2292_v45, %v2116_v62  ;;  %vm1609_vm1 = vcmp.eq.s32.totalorder %v6732_v29, %v10971_v27  ;;  %v10989_v45 = vld [vmem:[#allocation282_spill] sm:$0xff]  ;;  %v3613_v7 = vpop.f32.mrf.mxu0  ;;  %v10995_v27 = vld [vmem:[#allocation5_spill] sm:$0xff] }
 0x87b   : > { %vm1614_vm9 = vcmp.eq.s32.totalorder %v6729_v24, %v10977_v6  ;;  %vm1991_vm13 = vcmp.eq.s32.totalorder %v6732_v29, %v10970_v37  ;;  %v8714_v9 = vadd.f32 %v3204_v39, %v2932_v5  ;;  %v8716_v60 = vadd.f32 %v3205_v17, %v2933_v59  ;;  %v10992_v17 = vld [vmem:[#allocation294_spill] sm:$0xff] }
 0x87c   : > { %v2325_v0 = vadd.f32 %v2293_v34, %v2117_v23  ;;  %vm1606_vm15 = vcmp.eq.s32.totalorder %v6729_v24, %v10978_v41  ;;  %vm1607_vm5 = vcmp.eq.s32.totalorder %v6732_v29, %v10978_v41  ;;  %v8726_v14 = vsel %vm1610_vm7, %v10979_v25, 0.0  ;;  %v3678_v23 = vpop.f32.mrf.mxu1 }
 0x87d   : > { %v1879_v32 = vsel %vm1783_vm14, %v10969_v21, 0.0  ;;  %v8736_v54 = vsel %vm1611_vm10, %v10979_v25, 0.0  ;;  %vm1616_vm6 = vcmp.eq.s32.totalorder %v6729_v24, %v10980_v48  ;;  %v1702_v2 = vsel %vm1606_vm15, %v10981_v22, 0.0 }
 0x87e   : > { %3757 = vmatmul.f32.gmra.mxu2 %v2324_v61  ;;  %v2086_v38 = vsel %vm1990_vm4, %v10982_v8, 0.0  ;;  %vm1612_vm14 = vcmp.eq.s32.totalorder %v6729_v24, %v10983_v36  ;;  %vm1613_vm7 = vcmp.eq.s32.totalorder %v6732_v29, %v10983_v36  ;;  %v1703_v19 = vsel %vm1607_vm5, %v10981_v22, 0.0  ;;  %v10997_v22 = vld [vmem:[#allocation307_spill] sm:$0xff] }
 0x87f   : > { %3822 = vmatmul.f32.gmra.mxu3 %v2325_v0  ;;  %v1910_v12 = vadd.f32 %v1878_v26, %v1702_v2  ;;  %vm2198_vm3 = vcmp.eq.s32.totalorder %v6729_v24, %v10984_v52  ;;  %v2087_v28 = vsel %vm1991_vm13, %v10982_v8, 0.0  ;;  %vm1784_vm10 = vcmp.eq.s32.totalorder %v6729_v24, %v10985_v63  ;;  %v10988_v26 = vld [vmem:[#allocation96_spill] sm:$0xff]  ;;  %v3262_v62 = vpop.permute.xlu0 %3261 }
 0x880   : > { %v1911_v40 = vadd.f32 %v1879_v32, %v1703_v19  ;;  %v2294_v21 = vsel %vm2198_vm3, %v10986_v33, 0.0  ;;  %vm2199_vm4 = vcmp.eq.s32.totalorder %v6732_v29, %v10984_v52  ;;  %v8762_v42 = vsel %vm1616_vm6, %v10987_v3, 0.0  ;;  %v10993_v0 = vld [vmem:[#allocation252_spill] sm:$0xff]  ;;  %v3631_v52 = vpop.f32.mrf.mxu2 }
 0x881   : > { %v1704_v57 = vsel %vm1608_vm0, %v10988_v26, 0.0  ;;  %v2118_v37 = vadd.f32 %v2086_v38, %v1910_v12  ;;  %v2295_v35 = vsel %vm2199_vm4, %v10986_v33, 0.0  ;;  %vm1788_vm2 = vcmp.eq.s32.totalorder %v6729_v24, %v10989_v45  ;;  %v10996_v32 = vld [vmem:[#allocation40_spill] sm:$0xff]  ;;  %v11000_v33 = vld [vmem:[#allocation3_spill] sm:$0xff] }
 0x882   : > { %vm1785_vm8 = vcmp.eq.s32.totalorder %v6732_v29, %v10985_v63  ;;  %vm3306_vm11 = vcmp.eq.s32.totalorder %v6729_v24, %v3262_v62  ;;  %vm3307_vm12 = vcmp.eq.s32.totalorder %v6732_v29, %v3262_v62  ;;  %v2119_v11 = vadd.f32 %v2087_v28, %v1911_v40  ;;  %v10998_v38 = vld [vmem:[#allocation256_spill] sm:$0xff]  ;;  %v10999_v28 = vld [vmem:[#allocation315_spill] sm:$0xff] }
 0x883   : > { %v1880_v49 = vsel %vm1784_vm10, %v10990_v20, 0.0  ;;  %v2326_v34 = vadd.f32 %v2294_v21, %v2118_v37  ;;  %v3434_v5 = vsel %vm3306_vm11, %v10991_v44, 0.0  ;;  %v3435_v46 = vsel %vm3307_vm12, %v10991_v44, 0.0  ;;  %v3696_v21 = vpop.f32.mrf.mxu3  ;;  %v11001_v62 = vld [vmem:[#allocation7_spill] sm:$0xff]  ;;  %v11004_v44 = vld [vmem:[#allocation276_spill] sm:$0xff] }
 0x884   : > { %vm1789_vm0 = vcmp.eq.s32.totalorder %v6732_v29, %v10989_v45  ;;  %v8780_v59 = vadd.f32 %v3678_v23, %v3613_v7  ;;  %v2327_v47 = vadd.f32 %v2295_v35, %v2119_v11  ;;  %v3466_v51 = vadd.f32 %v3434_v5, %v8364_v56  ;;  %v3616_v35 = vpop.f32.mrf.mxu0  ;;  %v11003_v23 = vld [vmem:[#allocation269_spill] sm:$0xff] }
 0x885   : > { %v3467_v39 = vadd.f32 %v3435_v46, %v8366_v30  ;;  %vm1994_vm13 = vcmp.eq.s32.totalorder %v6729_v24, %v10992_v17  ;;  %vm1995_vm15 = vcmp.eq.s32.totalorder %v6732_v29, %v10992_v17  ;;  %v1705_v61 = vsel %vm1609_vm1, %v10988_v26, 0.0  ;;  %v10994_v30 = vld [vmem:[#allocation283_spill] sm:$0xff]  ;;  %v3681_v46 = vpop.f32.mrf.mxu1  ;;  %v11011_v17 = vld [vmem:[#allocation41_spill] sm:$0xff] }
 0x886   : > { %v8796_v41 = vsel %vm1614_vm9, %v10993_v0, 0.0  ;;  %v1881_v56 = vsel %vm1785_vm8, %v10990_v20, 0.0  ;;  %vm1992_vm5 = vcmp.eq.s32.totalorder %v6729_v24, %v10994_v30  ;;  %3760 = vmatmul.f32.gmra.mxu2 %v2326_v34  ;;  %vm1993_vm6 = vcmp.eq.s32.totalorder %v6732_v29, %v10994_v30  ;;  %3872 = vmatmul.f32.gmra.mxu0 %v3466_v51 }
 0x887   : > { %v2088_v25 = vsel %vm1992_vm5, %v10995_v27, 0.0  ;;  %vm3308_vm1 = vcmp.eq.s32.totalorder %v6729_v24, %v10996_v32  ;;  %3825 = vmatmul.f32.gmra.mxu3 %v2327_v47  ;;  %vm2200_vm9 = vcmp.eq.s32.totalorder %v6729_v24, %v10997_v22  ;;  %v2089_v2 = vsel %vm1993_vm6, %v10995_v27, 0.0  ;;  %3937 = vmatmul.f32.gmra.mxu1 %v3467_v39  ;;  %v3373_v7 = vpop.permute.xlu0 %3372 }
 0x888   : > { %vm3309_vm3 = vcmp.eq.s32.totalorder %v6732_v29, %v10996_v32  ;;  %v1912_v8 = vadd.f32 %v1880_v49, %v1704_v57  ;;  %vm2201_vm10 = vcmp.eq.s32.totalorder %v6732_v29, %v10997_v22  ;;  %v1708_v19 = vsel %vm1612_vm14, %v10998_v38, 0.0  ;;  %v11002_v49 = vld [vmem:[#allocation10_spill] sm:$0xff]  ;;  %v11007_v22 = vld [vmem:[#allocation43_spill] sm:$0xff] }
 0x889   : > { %v1709_v12 = vsel %vm1613_vm7, %v10998_v38, 0.0  ;;  %v2296_v63 = vsel %vm2200_vm9, %v10999_v28, 0.0  ;;  %v1913_v40 = vadd.f32 %v1881_v56, %v1705_v61  ;;  %vm1786_vm4 = vcmp.eq.s32.totalorder %v6729_v24, %v11000_v33  ;;  %v11005_v56 = vld [vmem:[#allocation220_spill] sm:$0xff] }
 0x88a   : > { %v2120_v26 = vadd.f32 %v2088_v25, %v1912_v8  ;;  %v2297_v57 = vsel %vm2201_vm10, %v10999_v28, 0.0  ;;  %v3436_v37 = vsel %vm3308_vm1, %v11001_v62, 0.0  ;;  %vm1787_vm14 = vcmp.eq.s32.totalorder %v6732_v29, %v11000_v33  ;;  %v11006_v25 = vld [vmem:[#allocation168_spill] sm:$0xff]  ;;  %v11008_v8 = vld [vmem:[#allocation298_spill] sm:$0xff]  ;;  %v3634_v33 = vpop.f32.mrf.mxu2 }
 0x88b   : > { %v8834_v36 = vadd.f32 %v3696_v21, %v3631_v52  ;;  %v2121_v11 = vadd.f32 %v2089_v2, %v1913_v40  ;;  %v3437_v20 = vsel %vm3309_vm3, %v11001_v62, 0.0  ;;  %vm1790_vm7 = vcmp.eq.s32.totalorder %v6729_v24, %v11002_v49  ;;  %v11010_v40 = vld [vmem:[#allocation173_spill] sm:$0xff] }
 0x88c   : > { %v1884_v34 = vsel %vm1788_vm2, %v11003_v23, 0.0  ;;  %v1882_v5 = vsel %vm1786_vm4, %v11004_v44, 0.0  ;;  %v2328_v47 = vadd.f32 %v2296_v63, %v2120_v26  ;;  %vm1615_vm8 = vcmp.eq.s32.totalorder %v6732_v29, %v10977_v6  ;;  %v11009_v63 = vld [vmem:[#allocation289_spill] sm:$0xff]  ;;  %v3699_v26 = vpop.f32.mrf.mxu3  ;;  %v11019_v6 = vld [vmem:[#allocation2_spill] sm:$0xff] }
 0x88d   : > { %v1883_v51 = vsel %vm1787_vm14, %v11004_v44, 0.0  ;;  %v8850_v39 = vadd.f32 %v3681_v46, %v3616_v35  ;;  %v2329_v61 = vadd.f32 %v2297_v57, %v2121_v11  ;;  %v3468_v30 = vadd.f32 %v3436_v37, %v11005_v56  ;;  %v3619_v35 = vpop.f32.mrf.mxu0  ;;  %v11012_v11 = vld [vmem:[#allocation28_spill] sm:$0xff]  ;;  %v11015_v56 = vld [vmem:[#allocation322_spill] sm:$0xff] }
 0x88e   : > { %v1885_v27 = vsel %vm1789_vm0, %v11003_v23, 0.0  ;;  %3763 = vmatmul.f32.gmra.mxu2 %v2328_v47  ;;  %v3469_v32 = vadd.f32 %v3437_v20, %v11006_v25  ;;  %vm2202_vm2 = vcmp.eq.s32.totalorder %v6729_v24, %v11007_v22  ;;  %vm2203_vm11 = vcmp.eq.s32.totalorder %v6732_v29, %v11007_v22  ;;  %v11013_v47 = vld [vmem:[#allocation15_spill] sm:$0xff] }
 0x88f   : > { %vm1791_vm12 = vcmp.eq.s32.totalorder %v6732_v29, %v11002_v49  ;;  %v1916_v2 = vadd.f32 %v1884_v34, %v1708_v19  ;;  %v2090_v38 = vsel %vm1994_vm13, %v11008_v8, 0.0  ;;  %v2091_v45 = vsel %vm1995_vm15, %v11008_v8, 0.0  ;;  %3828 = vmatmul.f32.gmra.mxu3 %v2329_v61  ;;  %3875 = vmatmul.f32.gmra.mxu0 %v3468_v30  ;;  %v3684_v34 = vpop.f32.mrf.mxu1  ;;  %v11021_v49 = vld [vmem:[#allocation332_spill] sm:$0xff] }
 0x890   : > { %v1914_v52 = vadd.f32 %v1882_v5, %v8726_v14  ;;  %v1915_v28 = vadd.f32 %v1883_v51, %v8736_v54  ;;  %vm1996_vm0 = vcmp.eq.s32.totalorder %v6729_v24, %v11009_v63  ;;  %vm1997_vm5 = vcmp.eq.s32.totalorder %v6732_v29, %v11009_v63  ;;  %3940 = vmatmul.f32.gmra.mxu1 %v3469_v32  ;;  %v8900_v44 = vpop.permute.xlu0 %3276  ;;  %v11014_v51 = vld [vmem:[#allocation87_spill] sm:$0xff]  ;;  %v11018_v63 = vld [vmem:[#allocation284_spill] sm:$0xff] }
 0x891   : > { %v1917_v19 = vadd.f32 %v1885_v27, %v1709_v12  ;;  %vm3310_vm13 = vcmp.eq.s32.totalorder %v6729_v24, %v11010_v40  ;;  %v2298_v21 = vsel %vm2202_vm2, %v11011_v17, 0.0  ;;  %v2299_v14 = vsel %vm2203_vm11, %v11011_v17, 0.0  ;;  %v11016_v32 = vld [vmem:[#allocation31_spill] sm:$0xff] }
 0x892   : > { %vm3311_vm15 = vcmp.eq.s32.totalorder %v6732_v29, %v11010_v40  ;;  %v3438_v54 = vsel %vm3310_vm13, %v3373_v7, 0.0  ;;  %v2122_v12 = vadd.f32 %v2090_v38, %v1914_v52  ;;  %v2123_v57 = vadd.f32 %v2091_v45, %v1915_v28  ;;  %v11017_v45 = vld [vmem:[#allocation154_spill] sm:$0xff]  ;;  %v3637_v17 = vpop.f32.mrf.mxu2 }
 0x893   : > { %v3439_v62 = vsel %vm3311_vm15, %v3373_v7, 0.0  ;;  %v8890_v37 = vadd.f32 %v3699_v26, %v3634_v33  ;;  %v2092_v20 = vsel %vm1996_vm0, %v11012_v11, 0.0  ;;  %v2093_v23 = vsel %vm1997_vm5, %v11012_v11, 0.0  ;;  %v11022_v33 = vld [vmem:[#allocation17_spill] sm:$0xff] }
 0x894   : > { %v2330_v5 = vadd.f32 %v2298_v21, %v2122_v12  ;;  %v2331_v46 = vadd.f32 %v2299_v14, %v2123_v57  ;;  %vm2204_vm6 = vcmp.eq.s32.totalorder %v6729_v24, %v11013_v47  ;;  %vm2205_vm1 = vcmp.eq.s32.totalorder %v6732_v29, %v11013_v47  ;;  %v11023_v21 = vld [vmem:[#allocation89_spill] sm:$0xff]  ;;  %v11025_v12 = vld [vmem:[#allocation179_spill] sm:$0xff]  ;;  %v11027_v47 = vld [vmem:[#allocation346_spill] sm:$0xff] }
 0x895   : > { %v8906_v7 = vadd.f32 %v3684_v34, %v3619_v35  ;;  %v3470_v61 = vadd.f32 %v3438_v54, %v11014_v51  ;;  %v2300_v30 = vsel %vm2204_vm6, %v11015_v56, 0.0  ;;  %v2301_v27 = vsel %vm2205_vm1, %v11015_v56, 0.0  ;;  %v11024_v54 = vld [vmem:[#allocation112_spill] sm:$0xff] }
 0x896   : > { %v1711_v25 = vsel %vm1615_vm8, %v10993_v0, 0.0  ;;  %3766 = vmatmul.f32.gmra.mxu2 %v2330_v5  ;;  %v3471_v22 = vadd.f32 %v3439_v62, %v11016_v32  ;;  %v2124_v8 = vadd.f32 %v2092_v20, %v1916_v2  ;;  %v2125_v38 = vadd.f32 %v2093_v23, %v1917_v19  ;;  %v11020_v2 = vld [vmem:[#allocation330_spill] sm:$0xff]  ;;  %v3702_v62 = vpop.f32.mrf.mxu3  ;;  %v3622_v23 = vpop.f32.mrf.mxu0 }
 0x897   : > { %v1886_v52 = vsel %vm1790_vm7, %v11017_v45, 0.0  ;;  %v1887_v28 = vsel %vm1791_vm12, %v11017_v45, 0.0  ;;  %vm1998_vm9 = vcmp.eq.s32.totalorder %v6729_v24, %v11018_v63  ;;  %vm1999_vm3 = vcmp.eq.s32.totalorder %v6732_v29, %v11018_v63  ;;  %3831 = vmatmul.f32.gmra.mxu3 %v2331_v46  ;;  %3878 = vmatmul.f32.gmra.mxu0 %v3470_v61  ;;  %v11026_v5 = vld [vmem:[#allocation22_spill] sm:$0xff]  ;;  %v3687_v61 = vpop.f32.mrf.mxu1  ;;  %v11035_v63 = vld [vmem:[#allocation4_spill] sm:$0xff] }
 0x898   : > { %v2094_v0 = vsel %vm1998_vm9, %v11019_v6, 0.0  ;;  %vm2450_vm10 = vcmp.eq.s32.totalorder %v6729_v24, %v11020_v2  ;;  %3943 = vmatmul.f32.gmra.mxu1 %v3471_v22  ;;  %v2332_v19 = vadd.f32 %v2300_v30, %v2124_v8  ;;  %v2333_v40 = vadd.f32 %v2301_v27, %v2125_v38  ;;  %v11028_v27 = vld [vmem:[#allocation175_spill] sm:$0xff]  ;;  %v11029_v22 = vld [vmem:[#allocation329_spill] sm:$0xff] }
 0x899   : > { %vm2451_vm4 = vcmp.eq.s32.totalorder %v6732_v29, %v11020_v2  ;;  %vm2456_vm14 = vcmp.eq.s32.totalorder %v6729_v24, %v11021_v49  ;;  %vm2457_vm7 = vcmp.eq.s32.totalorder %v6732_v29, %v11021_v49  ;;  %vm3312_vm8 = vcmp.eq.s32.totalorder %v6729_v24, %v11022_v33  ;;  %v3142_v30 = vpop.permute.xlu0 %3141  ;;  %v11031_v49 = vld [vmem:[#allocation343_spill] sm:$0xff] }
 0x89a   : > { %v2626_v14 = vsel %vm2450_vm10, %v11023_v21, 0.0  ;;  %v2632_v26 = vsel %vm2456_vm14, %v11024_v54, 0.0  ;;  %vm3313_vm2 = vcmp.eq.s32.totalorder %v6732_v29, %v11022_v33  ;;  %v3440_v57 = vsel %vm3312_vm8, %v11025_v12, 0.0 }
 0x89b   : > { %v2633_v35 = vsel %vm2457_vm7, %v11024_v54, 0.0  ;;  %v3441_v11 = vsel %vm3313_vm2, %v11025_v12, 0.0  ;;  %vm3010_vm11 = vcmp.eq.s32.totalorder %v6729_v24, %v8571_v55  ;;  %v8948_v20 = vadd.f32 %v3702_v62, %v3637_v17  ;;  %v3640_v62 = vpop.f32.mrf.mxu2 }
 0x89c   : > { %v2627_v34 = vsel %vm2451_vm4, %v11023_v21, 0.0  ;;  %v2920_v46 = vadd.f32 %v11026_v5, %v2632_v26  ;;  %v2921_v51 = vadd.f32 %v11027_v47, %v2633_v35  ;;  %vm3011_vm12 = vcmp.eq.s32.totalorder %v6732_v29, %v8571_v55  ;;  %v11030_v55 = vld [vmem:[#allocation101_spill] sm:$0xff]  ;;  %v11032_v26 = vld [vmem:[#allocation344_spill] sm:$0xff]  ;;  %v11037_v47 = vld [vmem:[#allocation278_spill] sm:$0xff] }
 0x89d   : > { %vm1617_vm0 = vcmp.eq.s32.totalorder %v6732_v29, %v10980_v48  ;;  %vm3016_vm5 = vcmp.eq.s32.totalorder %v6729_v24, %v8603_v31  ;;  %vm3017_vm13 = vcmp.eq.s32.totalorder %v6732_v29, %v8603_v31  ;;  %v8961_v56 = vadd.f32 %v3687_v61, %v3622_v23  ;;  %v11034_v35 = vld [vmem:[#allocation317_spill] sm:$0xff]  ;;  %v11043_v48 = vld [vmem:[#allocation104_spill] sm:$0xff] }
 0x89e   : > { %v3472_v32 = vadd.f32 %v3440_v57, %v11028_v27  ;;  %v3186_v8 = vsel %vm3010_vm11, %v11029_v22, 0.0  ;;  %v3192_v38 = vsel %vm3016_vm5, %v3142_v30, 0.0  ;;  %v3193_v45 = vsel %vm3017_vm13, %v3142_v30, 0.0  ;;  %3769 = vmatmul.f32.gmra.mxu2 %v2332_v19  ;;  %v8977_v19 = vpop.permute.xlu2 %3392  ;;  %v11033_v57 = vld [vmem:[#allocation8_spill] sm:$0xff]  ;;  %v11038_v61 = vld [vmem:[#allocation197_spill] sm:$0xff] }
 0x89f   : > { %v3473_v2 = vadd.f32 %v3441_v11, %v11030_v55  ;;  %v2914_v33 = vadd.f32 %v11031_v49, %v2626_v14  ;;  %v3187_v17 = vsel %vm3011_vm12, %v11029_v22, 0.0  ;;  %v8968_v21 = vadd.f32 %v3192_v38, %v2920_v46  ;;  %3834 = vmatmul.f32.gmra.mxu3 %v2333_v40  ;;  %v3690_v30 = vpop.f32.mrf.mxu1  ;;  %v11040_v49 = vld [vmem:[#allocation48_spill] sm:$0xff] }
 0x8a0   : > { %v8970_v54 = vadd.f32 %v3193_v45, %v2921_v51  ;;  %3881 = vmatmul.f32.gmra.mxu0 %v3472_v32  ;;  %v2095_v31 = vsel %vm1999_vm3, %v11019_v6, 0.0  ;;  %v2915_v12 = vadd.f32 %v11032_v26, %v2627_v34  ;;  %v1918_v14 = vadd.f32 %v1886_v52, %v8796_v41  ;;  %v3705_v6 = vpop.f32.mrf.mxu3  ;;  %v11036_v41 = vld [vmem:[#allocation38_spill] sm:$0xff]  ;;  %v11039_v45 = vld [vmem:[#allocation299_spill] sm:$0xff] }
 0x8a1   : > { %3946 = vmatmul.f32.gmra.mxu1 %v3473_v2  ;;  %vm2206_vm15 = vcmp.eq.s32.totalorder %v6729_v24, %v11033_v57  ;;  %v1919_v40 = vadd.f32 %v1887_v28, %v1711_v25  ;;  %vm2207_vm6 = vcmp.eq.s32.totalorder %v6732_v29, %v11033_v57  ;;  %v3218_v23 = vadd.f32 %v3186_v8, %v2914_v33  ;;  %v3625_v25 = vpop.f32.mrf.mxu0  ;;  %v11041_v33 = vld [vmem:[#allocation302_spill] sm:$0xff] }
 0x8a2   : > { %v2302_v11 = vsel %vm2206_vm15, %v11034_v35, 0.0  ;;  %vm1792_vm1 = vcmp.eq.s32.totalorder %v6729_v24, %v11035_v63  ;;  %v2126_v34 = vadd.f32 %v2094_v0, %v1918_v14  ;;  %v2303_v5 = vsel %vm2207_vm6, %v11034_v35, 0.0 }
 0x8a3   : > { %v3219_v46 = vadd.f32 %v3187_v17, %v2915_v12  ;;  %vm1793_vm9 = vcmp.eq.s32.totalorder %v6732_v29, %v11035_v63  ;;  %vm3314_vm3 = vcmp.eq.s32.totalorder %v6729_v24, %v11036_v41  ;;  %v8992_v52 = vadd.f32 %v3705_v6, %v3640_v62  ;;  %v11042_v62 = vld [vmem:[#allocation59_spill] sm:$0xff] }
 0x8a4   : > { %v2127_v28 = vadd.f32 %v2095_v31, %v1919_v40  ;;  %v1888_v51 = vsel %vm1792_vm1, %v11037_v47, 0.0  ;;  %vm3315_vm10 = vcmp.eq.s32.totalorder %v6732_v29, %v11036_v41  ;;  %v3442_v0 = vsel %vm3314_vm3, %v11038_v61, 0.0  ;;  %v3643_v57 = vpop.f32.mrf.mxu2  ;;  %v11045_v41 = vld [vmem:[#allocation273_spill] sm:$0xff] }
 0x8a5   : > { %v2334_v27 = vadd.f32 %v2302_v11, %v2126_v34  ;;  %v3443_v32 = vsel %vm3315_vm10, %v11038_v61, 0.0  ;;  %v8999_v22 = vadd.f32 %v3690_v30, %v3625_v25  ;;  %v3474_v38 = vadd.f32 %v3442_v0, %v3218_v23  ;;  %v11047_v30 = vld [vmem:[#allocation160_spill] sm:$0xff] }
 0x8a6   : > { %v2335_v8 = vadd.f32 %v2303_v5, %v2127_v28  ;;  %vm2000_vm4 = vcmp.eq.s32.totalorder %v6729_v24, %v11039_v45  ;;  %v1889_v55 = vsel %vm1793_vm9, %v11037_v47, 0.0  ;;  %v3475_v2 = vadd.f32 %v3443_v32, %v3219_v46  ;;  %v9022_v11 = vpop.permute.xlu2 %3397  ;;  %v11046_v28 = vld [vmem:[#allocation292_spill] sm:$0xff] }
 0x8a7   : > { %3772 = vmatmul.f32.gmra.mxu2 %v2334_v27  ;;  %vm2208_vm14 = vcmp.eq.s32.totalorder %v6729_v24, %v11040_v49  ;;  %vm2001_vm7 = vcmp.eq.s32.totalorder %v6732_v29, %v11039_v45  ;;  %v2096_v17 = vsel %vm2000_vm4, %v11041_v33, 0.0  ;;  %vm3316_vm8 = vcmp.eq.s32.totalorder %v6729_v24, %v8900_v44 }
 0x8a8   : > { %3837 = vmatmul.f32.gmra.mxu3 %v2335_v8  ;;  %3884 = vmatmul.f32.gmra.mxu0 %v3474_v38  ;;  %vm2209_vm2 = vcmp.eq.s32.totalorder %v6732_v29, %v11040_v49  ;;  %v1713_v31 = vsel %vm1617_vm0, %v10987_v3, 0.0  ;;  %v1920_v26 = vadd.f32 %v1888_v51, %v8762_v42  ;;  %v2097_v12 = vsel %vm2001_vm7, %v11041_v33, 0.0  ;;  %v3708_v40 = vpop.f32.mrf.mxu3  ;;  %v11044_v42 = vld [vmem:[#allocation285_spill] sm:$0xff]  ;;  %v11048_v8 = vld [vmem:[#allocation51_spill] sm:$0xff]  ;;  %v11051_v33 = vld [vmem:[#allocation18_spill] sm:$0xff] }
 0x8a9   : > { %vm3317_vm11 = vcmp.eq.s32.totalorder %v6732_v29, %v8900_v44  ;;  %3949 = vmatmul.f32.gmra.mxu1 %v3475_v2  ;;  %v1921_v14 = vadd.f32 %v1889_v55, %v1713_v31  ;;  %v2304_v35 = vsel %vm2208_vm14, %v11042_v62, 0.0  ;;  %v2305_v63 = vsel %vm2209_vm2, %v11042_v62, 0.0  ;;  %v3628_v34 = vpop.f32.mrf.mxu0  ;;  %v3693_v47 = vpop.f32.mrf.mxu1  ;;  %v11049_v55 = vld [vmem:[#allocation253_spill] sm:$0xff]  ;;  %v11050_v2 = vld [vmem:[#allocation264_spill] sm:$0xff] }
 0x8aa   : > { %v2128_v23 = vadd.f32 %v2096_v17, %v1920_v26  ;;  %v3444_v3 = vsel %vm3316_vm8, %v11043_v48, 0.0  ;;  %vm1794_vm12 = vcmp.eq.s32.totalorder %v6729_v24, %v11044_v42  ;;  %v9031_v6 = vadd.f32 %v3708_v40, %v3643_v57  ;;  %v11052_v31 = vld [vmem:[#allocation128_spill] sm:$0xff] }
 0x8ab   : > { %v2129_v5 = vadd.f32 %v2097_v12, %v1921_v14  ;;  %v3445_v46 = vsel %vm3317_vm11, %v11043_v48, 0.0  ;;  %vm1795_vm0 = vcmp.eq.s32.totalorder %v6732_v29, %v11044_v42  ;;  %v1890_v25 = vsel %vm1794_vm12, %v11045_v41, 0.0  ;;  %v11053_v12 = vld [vmem:[#allocation324_spill] sm:$0xff] }
 0x8ac   : > { %vm2002_vm5 = vcmp.eq.s32.totalorder %v6729_v24, %v11046_v28  ;;  %v2336_v44 = vadd.f32 %v2304_v35, %v2128_v23  ;;  %vm2003_vm13 = vcmp.eq.s32.totalorder %v6732_v29, %v11046_v28  ;;  %v9041_v51 = vadd.f32 %v3693_v47, %v3628_v34  ;;  %v11054_v34 = vld [vmem:[#allocation246_spill] sm:$0xff] }
 0x8ad   : > { %v2337_v61 = vadd.f32 %v2305_v63, %v2129_v5  ;;  %v3476_v0 = vadd.f32 %v3444_v3, %v8411_v50  ;;  %vm1618_vm15 = vcmp.eq.s32.totalorder %v6729_v24, %v11047_v30  ;;  %vm1619_vm6 = vcmp.eq.s32.totalorder %v6732_v29, %v11047_v30  ;;  %v3646_v26 = vpop.f32.mrf.mxu2  ;;  %v11056_v47 = vld [vmem:[#allocation270_spill] sm:$0xff] }
 0x8ae   : > { %v1891_v27 = vsel %vm1795_vm0, %v11045_v41, 0.0  ;;  %v3477_v32 = vadd.f32 %v3445_v46, %v8414_v58  ;;  %v1714_v38 = vsel %vm1618_vm15, %v11048_v8, 0.0  ;;  %v1715_v45 = vsel %vm1619_vm6, %v11048_v8, 0.0  ;;  %v3286_v3 = vpop.permute.xlu2 %3285  ;;  %v3403_v46 = vpop.permute.xlu0 %3402  ;;  %v11059_v30 = vld [vmem:[#allocation254_spill] sm:$0xff] }
 0x8af   : > { %3775 = vmatmul.f32.gmra.mxu2 %v2336_v44  ;;  %v2098_v50 = vsel %vm2002_vm5, %v11049_v55, 0.0  ;;  %vm1796_vm1 = vcmp.eq.s32.totalorder %v6729_v24, %v11050_v2  ;;  %v1922_v49 = vadd.f32 %v1890_v25, %v1714_v38  ;;  %vm2210_vm9 = vcmp.eq.s32.totalorder %v6729_v24, %v11051_v33  ;;  %v11055_v25 = vld [vmem:[#allocation272_spill] sm:$0xff] }
 0x8b0   : > { %3840 = vmatmul.f32.gmra.mxu3 %v2337_v61  ;;  %3887 = vmatmul.f32.gmra.mxu0 %v3476_v0  ;;  %v2099_v58 = vsel %vm2003_vm13, %v11049_v55, 0.0  ;;  %v1923_v17 = vadd.f32 %v1891_v27, %v1715_v45  ;;  %vm3318_vm3 = vcmp.eq.s32.totalorder %v6729_v24, %v11052_v31  ;;  %v2306_v14 = vsel %vm2210_vm9, %v11053_v12, 0.0  ;;  %v3711_v62 = vpop.f32.mrf.mxu3  ;;  %v11058_v61 = vld [vmem:[#allocation176_spill] sm:$0xff] }
 0x8b1   : > { %3952 = vmatmul.f32.gmra.mxu1 %v3477_v32  ;;  %vm2211_vm10 = vcmp.eq.s32.totalorder %v6732_v29, %v11051_v33  ;;  %vm3319_vm4 = vcmp.eq.s32.totalorder %v6732_v29, %v11052_v31  ;;  %v3446_v57 = vsel %vm3318_vm3, %v8977_v19, 0.0  ;;  %v2130_v35 = vadd.f32 %v2098_v50, %v1922_v49  ;;  %v11060_v32 = vld [vmem:[#allocation9_spill] sm:$0xff]  ;;  %v11062_v49 = vld [vmem:[#allocation319_spill] sm:$0xff] }
 0x8b2   : > { %v2307_v40 = vsel %vm2211_vm10, %v11053_v12, 0.0  ;;  %vm1797_vm14 = vcmp.eq.s32.totalorder %v6732_v29, %v11050_v2  ;;  %v3447_v23 = vsel %vm3319_vm4, %v8977_v19, 0.0  ;;  %v9076_v63 = vadd.f32 %v3711_v62, %v3646_v26  ;;  %v11057_v19 = vld [vmem:[#allocation286_spill] sm:$0xff]  ;;  %v11061_v50 = vld [vmem:[#allocation309_spill] sm:$0xff]  ;;  %v11063_v12 = vld [vmem:[#allocation236_spill] sm:$0xff] }
 0x8b3   : > { %v2131_v48 = vadd.f32 %v2099_v58, %v1923_v17  ;;  %v2338_v42 = vadd.f32 %v2306_v14, %v2130_v35  ;;  %v1892_v5 = vsel %vm1796_vm1, %v11054_v34, 0.0  ;;  %v3478_v28 = vadd.f32 %v3446_v57, %v11055_v25 }
 0x8b4   : > { %vm1620_vm7 = vcmp.eq.s32.totalorder %v6729_v24, %v11056_v47  ;;  %v1893_v44 = vsel %vm1797_vm14, %v11054_v34, 0.0  ;;  %vm2004_vm8 = vcmp.eq.s32.totalorder %v6729_v24, %v11057_v19  ;;  %v3479_v0 = vadd.f32 %v3447_v23, %v11058_v61 }
 0x8b5   : > { %v2339_v41 = vadd.f32 %v2307_v40, %v2131_v48  ;;  %vm1621_vm2 = vcmp.eq.s32.totalorder %v6732_v29, %v11056_v47  ;;  %v1716_v27 = vsel %vm1620_vm7, %v11059_v30, 0.0  ;;  %vm2005_vm11 = vcmp.eq.s32.totalorder %v6732_v29, %v11057_v19 }
 0x8b6   : > { %v2100_v8 = vsel %vm2004_vm8, %v11060_v32, 0.0  ;;  %v1717_v38 = vsel %vm1621_vm2, %v11059_v30, 0.0  ;;  %v2101_v45 = vsel %vm2005_vm11, %v11060_v32, 0.0  ;;  %v1924_v55 = vadd.f32 %v1892_v5, %v1716_v27  ;;  %v3408_v5 = vpop.permute.xlu0 %3407 }
 0x8b7   : > { %3778 = vmatmul.f32.gmra.mxu2 %v2338_v42  ;;  %vm2212_vm12 = vcmp.eq.s32.totalorder %v6729_v24, %v11061_v50  ;;  %v3649_v2 = vpop.f32.mrf.mxu2  ;;  %v1925_v58 = vadd.f32 %v1893_v44, %v1717_v38  ;;  %vm2213_vm0 = vcmp.eq.s32.totalorder %v6732_v29, %v11061_v50  ;;  %vm3320_vm5 = vcmp.eq.s32.totalorder %v6729_v24, %v11063_v12  ;;  %v3289_v42 = vpop.permute.xlu2 %3288 }
 0x8b8   : > { %3843 = vmatmul.f32.gmra.mxu3 %v2339_v41  ;;  %3890 = vmatmul.f32.gmra.mxu0 %v3478_v28  ;;  %v2308_v33 = vsel %vm2212_vm12, %v11062_v49, 0.0  ;;  %v3714_v17 = vpop.f32.mrf.mxu3  ;;  %v2132_v31 = vadd.f32 %v2100_v8, %v1924_v55  ;;  %v2309_v26 = vsel %vm2213_vm0, %v11062_v49, 0.0  ;;  %vm3321_vm13 = vcmp.eq.s32.totalorder %v6732_v29, %v11063_v12  ;;  %v11064_v8 = vld [vmem:[#allocation191_spill] sm:$0xff]  ;;  %v3932_v50 = vpop.f32.mrf.mxu1 }
 0x8b9   : > { %3955 = vmatmul.f32.gmra.mxu1 %v3479_v0  ;;  %v9105_v14 = vadd.f32 %v3714_v17, %v3649_v2  ;;  %v2133_v57 = vadd.f32 %v2101_v45, %v1925_v58  ;;  %v3448_v62 = vsel %vm3320_vm5, %v9022_v11, 0.0  ;;  %v3449_v40 = vsel %vm3321_vm13, %v9022_v11, 0.0  ;;  %v11065_v45 = vld [vmem:[#allocation237_spill] sm:$0xff] }
 0x8ba   : > { %v2340_v35 = vadd.f32 %v2308_v33, %v2132_v31  ;;  %v3480_v48 = vadd.f32 %v3448_v62, %v8968_v21  ;;  %v3481_v34 = vadd.f32 %v3449_v40, %v8970_v54  ;;  %vm3322_vm15 = vcmp.eq.s32.totalorder %v6729_v24, %v3286_v3 }
 0x8bb   : > { %v2341_v23 = vadd.f32 %v2309_v26, %v2133_v57  ;;  %vm3323_vm6 = vcmp.eq.s32.totalorder %v6732_v29, %v3286_v3  ;;  %v3450_v25 = vsel %vm3322_vm15, %v3403_v46, 0.0  ;;  %v3673_v19 = vadd.f32 %v8649_v13, %v8647_v53 }
 0x8bc   : > { %v3451_v47 = vsel %vm3323_vm6, %v3403_v46, 0.0  ;;  %v3482_v21 = vadd.f32 %v3450_v25, %v8466_v43  ;;  %vm3324_vm1 = vcmp.eq.s32.totalorder %v6729_v24, %v3289_v42  ;;  %vm3325_vm9 = vcmp.eq.s32.totalorder %v6732_v29, %v3289_v42  ;;  %v3867_v43 = vpop.f32.mrf.mxu0 }
 0x8bd   : > { %v3483_v44 = vadd.f32 %v3451_v47, %v8468_v18  ;;  %v3452_v3 = vsel %vm3324_vm1, %v3408_v5, 0.0  ;;  %v3453_v30 = vsel %vm3325_vm9, %v3408_v5, 0.0  ;;  %vm4124_vm12 = vcmask 261120  }
 0x8be   : > { %v3413_v61 = vpop.permute.xlu0 %3412  ;;  %v3484_v18 = vadd.f32 %v3452_v3, %v11064_v8  ;;  %v3485_v55 = vadd.f32 %v3453_v30, %v11065_v45 }
 0x8bf   : > { %3781 = vmatmul.f32.gmra.mxu2 %v2340_v35  ;;  %v3652_v41 = vpop.f32.mrf.mxu2  ;;  %v3292_v54 = vpop.permute.xlu2 %3291 }
 0x8c0   : > { %3846 = vmatmul.f32.gmra.mxu3 %v2341_v23  ;;  %3893 = vmatmul.f32.gmra.mxu0 %v3480_v48  ;;  %v3717_v28 = vpop.f32.mrf.mxu3  ;;  %vm3326_vm3 = vcmp.eq.s32.totalorder %v6729_v24, %v3292_v54  ;;  %vm3327_vm10 = vcmp.eq.s32.totalorder %v6732_v29, %v3292_v54 }
 0x8c1   : > { %3958 = vmatmul.f32.gmra.mxu1 %v3481_v34  ;;  %v9115_v11 = vadd.f32 %v3717_v28, %v3652_v41  ;;  %v3454_v2 = vsel %vm3326_vm3, %v3413_v61, 0.0  ;;  %v3455_v49 = vsel %vm3327_vm10, %v3413_v61, 0.0 }
 0x8c2   : > { %v3486_v58 = vadd.f32 %v3454_v2, %v8663_v10  ;;  %v3487_v31 = vadd.f32 %v3455_v49, %v8665_v15 }
 0x8c6   : > { %v3418_v33 = vpop.permute.xlu0 %3417 }
 0x8c7   : > { %v3737_v0 = vpop.f32.mrf.mxu2  ;;  %v3295_v13 = vpop.permute.xlu2 %3294 }
 0x8c8   : > { %3896 = vmatmul.f32.gmra.mxu0 %v3482_v21  ;;  %v3738_v46 = vadd.f32 %v3737_v0, %v3673_v19  ;;  %vm3328_vm4 = vcmp.eq.s32.totalorder %v6729_v24, %v3295_v13  ;;  %vm3329_vm14 = vcmp.eq.s32.totalorder %v6732_v29, %v3295_v13 }
 0x8c9   : > { %3961 = vmatmul.f32.gmra.mxu1 %v3483_v44  ;;  %v3456_v12 = vsel %vm3328_vm4, %v3418_v33, 0.0  ;;  %v3457_v57 = vsel %vm3329_vm14, %v3418_v33, 0.0 }
 0x8ca   : > { %v3802_v27 = vpop.f32.mrf.mxu3  ;;  %v3488_v48 = vadd.f32 %v3456_v12, %v8522_v4  ;;  %v3489_v42 = vadd.f32 %v3457_v57, %v8524_v1  ;;  %v11066_v4 = vld [vmem:[#allocation351_spill] sm:$0xff]  ;;  %v11067_v1 = vld [vmem:[#allocation297_spill] sm:$0xff] }
 0x8cb   : > { %v3803_v32 = vadd.f32 %v3802_v27, %v3738_v46 }
 0x8cd   : > { %v3868_v38 = vadd.f32 %v3867_v43, %v3803_v32 }
 0x8ce   : > { %v3423_v40 = vpop.permute.xlu0 %3422 }
 0x8cf   : > { %v9125_v53 = vadd.f32 %v3932_v50, %v3868_v38  ;;  %v3298_v62 = vpop.permute.xlu2 %3297 }
 0x8d0   : > { %3899 = vmatmul.f32.gmra.mxu0 %v3484_v18  ;;  %v3740_v17 = vpop.f32.mrf.mxu2  ;;  %vm3330_vm7 = vcmp.eq.s32.totalorder %v6729_v24, %v3298_v62  ;;  %vm3331_vm8 = vcmp.eq.s32.totalorder %v6732_v29, %v3298_v62 }
 0x8d1   : > { %3964 = vmatmul.f32.gmra.mxu1 %v3485_v55  ;;  %3996 = vrot.lane.b32.xlu1 %v9125_v53, %s4365_s10  ;;  %v3741_v26 = vadd.f32 %v3740_v17, %v8706_v16  ;;  %v3458_v5 = vsel %vm3330_vm7, %v3423_v40, 0.0  ;;  %v3459_v25 = vsel %vm3331_vm8, %v3423_v40, 0.0 }
 0x8d2   : > { %v3805_v35 = vpop.f32.mrf.mxu3  ;;  %v3490_v28 = vadd.f32 %v3458_v5, %v11066_v4  ;;  %v3491_v21 = vadd.f32 %v3459_v25, %v11067_v1 }
 0x8d3   : > { %v3806_v23 = vadd.f32 %v3805_v35, %v3741_v26 }
 0x8d6   : > { %v3428_v44 = vpop.permute.xlu0 %3427 }
 0x8d7   : > { %v3301_v47 = vpop.permute.xlu2 %3300 }
 0x8d8   : > { %3902 = vmatmul.f32.gmra.mxu0 %v3486_v58  ;;  %v3743_v41 = vpop.f32.mrf.mxu2  ;;  %vm3332_vm2 = vcmp.eq.s32.totalorder %v6729_v24, %v3301_v47  ;;  %vm3333_vm11 = vcmp.eq.s32.totalorder %v6732_v29, %v3301_v47 }
 0x8d9   : > { %3967 = vmatmul.f32.gmra.mxu1 %v3487_v31  ;;  %v3460_v19 = vsel %vm3332_vm2, %v3428_v44, 0.0  ;;  %v3461_v61 = vsel %vm3333_vm11, %v3428_v44, 0.0  ;;  %v3744_v43 = vadd.f32 %v3743_v41, %v8780_v59 }
 0x8da   : > { %v3808_v54 = vpop.f32.mrf.mxu3  ;;  %v3492_v3 = vadd.f32 %v3460_v19, %v8714_v9  ;;  %v3493_v46 = vadd.f32 %v3461_v61, %v8716_v60 }
 0x8db   : > { %v3809_v18 = vadd.f32 %v3808_v54, %v3744_v43 }
 0x8de   : > { %v3870_v10 = vpop.f32.mrf.mxu0  ;;  %v3935_v34 = vpop.f32.mrf.mxu1 }
 0x8df   : > { %v3871_v15 = vadd.f32 %v3870_v10, %v3806_v23 }
 0x8e0   : > { %3905 = vmatmul.f32.gmra.mxu0 %v3488_v48 }
 0x8e1   : > { %3970 = vmatmul.f32.gmra.mxu1 %v3489_v42  ;;  %v9139_v16 = vadd.f32 %v3935_v34, %v3871_v15  ;;  %v3746_v0 = vpop.f32.mrf.mxu2 }
 0x8e2   : > { %v3811_v30 = vpop.f32.mrf.mxu3  ;;  %v3747_v55 = vadd.f32 %v3746_v0, %v8850_v39 }
 0x8e3   : > { %3998 = vrot.lane.b32.xlu2 %v9139_v16, %s4365_s10 }
 0x8e4   : > { %v3812_v60 = vadd.f32 %v3811_v30, %v3747_v55 }
 0x8e8   : > { %3908 = vmatmul.f32.gmra.mxu0 %v3490_v28 }
 0x8e9   : > { %3973 = vmatmul.f32.gmra.mxu1 %v3491_v21  ;;  %v3749_v27 = vpop.f32.mrf.mxu2 }
 0x8ea   : > { %v3814_v32 = vpop.f32.mrf.mxu3  ;;  %v3750_v59 = vadd.f32 %v3749_v27, %v8906_v7 }
 0x8ec   : > { %v3815_v17 = vadd.f32 %v3814_v32, %v3750_v59 }
 0x8f0   : > { %3911 = vmatmul.f32.gmra.mxu0 %v3492_v3 }
 0x8f1   : > { %3976 = vmatmul.f32.gmra.mxu1 %v3493_v46  ;;  %v3752_v8 = vpop.f32.mrf.mxu2 }
 0x8f2   : > { %v3817_v29 = vpop.f32.mrf.mxu3  ;;  %v3753_v57 = vadd.f32 %v3752_v8, %v8961_v56 }
 0x8f4   : > { %v3818_v7 = vadd.f32 %v3817_v29, %v3753_v57 }
 0x8f9   : > { %v3755_v9 = vpop.f32.mrf.mxu2 }
 0x8fa   : > { %v3820_v58 = vpop.f32.mrf.mxu3  ;;  %v3756_v42 = vadd.f32 %v3755_v9, %v8999_v22 }
 0x8fc   : > { %v3821_v34 = vadd.f32 %v3820_v58, %v3756_v42 }
 0x901   : > { %v3758_v39 = vpop.f32.mrf.mxu2 }
 0x902   : > { %v3823_v35 = vpop.f32.mrf.mxu3  ;;  %v3759_v4 = vadd.f32 %v3758_v39, %v9041_v51 }
 0x903   : > { %v3873_v38 = vpop.f32.mrf.mxu0 }
 0x904   : > { %v3874_v24 = vadd.f32 %v3873_v38, %v3809_v18  ;;  %v3938_v45 = vpop.f32.mrf.mxu1  ;;  %v3824_v1 = vadd.f32 %v3823_v35, %v3759_v4 }
 0x906   : > { %v9152_v50 = vadd.f32 %v3938_v45, %v3874_v24 }
 0x908   : > { %4000 = vrot.lane.b32.xlu0 %v9152_v50, %s4365_s10 }
 0x909   : > { %v3761_v10 = vpop.f32.mrf.mxu2 }
 0x90a   : > { %v3826_v56 = vpop.f32.mrf.mxu3  ;;  %v3762_v19 = vadd.f32 %v3761_v10, %v8834_v36 }
 0x90c   : > { %v3876_v13 = vpop.f32.mrf.mxu0  ;;  %v3827_v51 = vadd.f32 %v3826_v56, %v3762_v19 }
 0x90d   : > { %v3877_v2 = vadd.f32 %v3876_v13, %v3812_v60  ;;  %v3941_v49 = vpop.f32.mrf.mxu1 }
 0x90f   : > { %v9157_v33 = vadd.f32 %v3941_v49, %v3877_v2 }
 0x911   : > { %4002 = vrot.lane.b32.xlu1 %v9157_v33, %s4365_s10  ;;  %v3764_v47 = vpop.f32.mrf.mxu2 }
 0x912   : > { %v3829_v54 = vpop.f32.mrf.mxu3  ;;  %v3765_v27 = vadd.f32 %v3764_v47, %v8890_v37 }
 0x914   : > { %v3879_v31 = vpop.f32.mrf.mxu0  ;;  %v3830_v8 = vadd.f32 %v3829_v54, %v3765_v27 }
 0x915   : > { %v3880_v26 = vadd.f32 %v3879_v31, %v3815_v17  ;;  %v3944_v12 = vpop.f32.mrf.mxu1 }
 0x917   : > { %v9162_v62 = vadd.f32 %v3944_v12, %v3880_v26 }
 0x919   : > { %4004 = vrot.lane.b32.xlu2 %v9162_v62, %s4365_s10  ;;  %v3767_v0 = vpop.f32.mrf.mxu2 }
 0x91a   : > { %v3832_v43 = vpop.f32.mrf.mxu3  ;;  %v3768_v45 = vadd.f32 %v3767_v0, %v8948_v20 }
 0x91c   : > { %v3833_v37 = vadd.f32 %v3832_v43, %v3768_v45 }
 0x91d   : > { %v3882_v40 = vpop.f32.mrf.mxu0 }
 0x91e   : > { %v3883_v23 = vadd.f32 %v3882_v40, %v3818_v7  ;;  %v3947_v48 = vpop.f32.mrf.mxu1 }
 0x920   : > { %v9167_v15 = vadd.f32 %v3947_v48, %v3883_v23 }
 0x921   : > { %v3770_v36 = vpop.f32.mrf.mxu2 }
 0x922   : > { %4006 = vrot.lane.b32.xlu0 %v9167_v15, %s4365_s10  ;;  %v3835_v55 = vpop.f32.mrf.mxu3  ;;  %v3771_v49 = vadd.f32 %v3770_v36, %v8992_v52 }
 0x924   : > { %v3836_v58 = vadd.f32 %v3835_v55, %v3771_v49 }
 0x925   : > { %v3885_v5 = vpop.f32.mrf.mxu0 }
 0x926   : > { %v3886_v41 = vadd.f32 %v3885_v5, %v3821_v34  ;;  %v3950_v25 = vpop.f32.mrf.mxu1 }
 0x928   : > { %v9172_v28 = vadd.f32 %v3950_v25, %v3886_v41 }
 0x92a   : > { %4008 = vrot.lane.b32.xlu1 %v9172_v28, %s4365_s10  ;;  %v3773_v2 = vpop.f32.mrf.mxu2 }
 0x92b   : > { %v3838_v20 = vpop.f32.mrf.mxu3  ;;  %v3774_v26 = vadd.f32 %v3773_v2, %v9031_v6 }
 0x92d   : > { %v3888_v22 = vpop.f32.mrf.mxu0  ;;  %v3839_v35 = vadd.f32 %v3838_v20, %v3774_v26 }
 0x92e   : > { %v3889_v21 = vadd.f32 %v3888_v22, %v3824_v1  ;;  %v3953_v44 = vpop.f32.mrf.mxu1 }
 0x930   : > { %v9177_v61 = vadd.f32 %v3953_v44, %v3889_v21 }
 0x932   : > { %4010 = vrot.lane.b32.xlu2 %v9177_v61, %s4365_s10  ;;  %v3776_v57 = vpop.f32.mrf.mxu2 }
 0x933   : > { %v3841_v23 = vpop.f32.mrf.mxu3  ;;  %v3777_v48 = vadd.f32 %v3776_v57, %v9076_v63 }
 0x935   : > { %v3891_v3 = vpop.f32.mrf.mxu0  ;;  %v3842_v6 = vadd.f32 %v3841_v23, %v3777_v48 }
 0x936   : > { %v3892_v46 = vadd.f32 %v3891_v3, %v3827_v51  ;;  %v3956_v30 = vpop.f32.mrf.mxu1 }
 0x938   : > { %v9182_v32 = vadd.f32 %v3956_v30, %v3892_v46 }
 0x93a   : > { %4012 = vrot.lane.b32.xlu0 %v9182_v32, %s4365_s10  ;;  %v3779_v42 = vpop.f32.mrf.mxu2 }
 0x93b   : > { %v3780_v41 = vadd.f32 %v3779_v42, %v9105_v14  ;;  %v3844_v4 = vpop.f32.mrf.mxu3 }
 0x93d   : > { %v3894_v18 = vpop.f32.mrf.mxu0  ;;  %v3845_v47 = vadd.f32 %v3844_v4, %v3780_v41 }
 0x93e   : > { %v3895_v38 = vadd.f32 %v3894_v18, %v3830_v8  ;;  %v3959_v24 = vpop.f32.mrf.mxu1 }
 0x940   : > { %v9187_v29 = vadd.f32 %v3959_v24, %v3895_v38 }
 0x942   : > { %4014 = vrot.lane.b32.xlu1 %v9187_v29, %s4365_s10  ;;  %v3782_v63 = vpop.f32.mrf.mxu2 }
 0x943   : > { %v3783_v44 = vadd.f32 %v3782_v63, %v9115_v11  ;;  %v3847_v14 = vpop.f32.mrf.mxu3  ;;  %v3999_v11 = vpop.permute.xlu2 %3998 }
 0x944   : > { %v3997_v18 = vpop.permute.xlu1 %3996 }
 0x945   : > { %v3897_v9 = vpop.f32.mrf.mxu0  ;;  %v3848_v19 = vadd.f32 %v3847_v14, %v3783_v44  ;;  %v4044_v38 = vmul.f32 %v3997_v18, %v9125_v53 }
 0x946   : > { %v3898_v60 = vadd.f32 %v3897_v9, %v3833_v37  ;;  %v3962_v13 = vpop.f32.mrf.mxu1 }
 0x948   : > { %v9192_v59 = vadd.f32 %v3962_v13, %v3898_v60 }
 0x94a   : > { %4016 = vrot.lane.b32.xlu2 %v9192_v59, %s4365_s10 }
 0x94d   : > { %v3900_v17 = vpop.f32.mrf.mxu0 }
 0x94e   : > { %v3901_v39 = vadd.f32 %v3900_v17, %v3836_v58  ;;  %v3965_v31 = vpop.f32.mrf.mxu1 }
 0x950   : > { %v9197_v12 = vadd.f32 %v3965_v31, %v3901_v39 }
 0x952   : > { %4018 = vrot.lane.b32.xlu0 %v9197_v12, %s4365_s10 }
 0x955   : > { %v3903_v52 = vpop.f32.mrf.mxu0 }
 0x956   : > { %v3904_v7 = vadd.f32 %v3903_v52, %v3839_v35  ;;  %v3968_v40 = vpop.f32.mrf.mxu1  ;;  %v4045_v52 = vmul.f32 %v3999_v11, %v9139_v16 }
 0x958   : > { %v9202_v10 = vadd.f32 %v3968_v40, %v3904_v7 }
 0x95a   : > { %4020 = vrot.lane.b32.xlu1 %v9202_v10, %s4365_s10 }
 0x95d   : > { %v3906_v34 = vpop.f32.mrf.mxu0 }
 0x95e   : > { %v3907_v56 = vadd.f32 %v3906_v34, %v3842_v6  ;;  %v3971_v5 = vpop.f32.mrf.mxu1 }
 0x960   : > { %v9207_v25 = vadd.f32 %v3971_v5, %v3907_v56 }
 0x962   : > { %4022 = vrot.lane.b32.xlu2 %v9207_v25, %s4365_s10 }
 0x965   : > { %v3909_v1 = vpop.f32.mrf.mxu0 }
 0x966   : > { %v3910_v22 = vadd.f32 %v3909_v1, %v3845_v47  ;;  %v3974_v21 = vpop.f32.mrf.mxu1 }
 0x968   : > { %v9212_v54 = vadd.f32 %v3974_v21, %v3910_v22 }
 0x96a   : > { %4060 = vrot.lane.b32.xlu2 %v9125_v53, %s4366_s13  ;;  %4024 = vrot.lane.b32.xlu0 %v9212_v54, %s4365_s10 }
 0x96d   : > { %v3912_v0 = vpop.f32.mrf.mxu0 }
 0x96e   : > { %v3913_v51 = vadd.f32 %v3912_v0, %v3848_v19  ;;  %v3977_v3 = vpop.f32.mrf.mxu1 }
 0x970   : > { %v3978_v46 = vadd.f32 %v3977_v3, %v3913_v51 }
 0x972   : > { %4066 = vrot.lane.b32.xlu2 %v9157_v33, %s4366_s13  ;;  %4062 = vrot.lane.b32.xlu0 %v9139_v16, %s4366_s13 }
 0x973   : > { %4026 = vrot.lane.b32.xlu1 %v3978_v46, %s4365_s10  ;;  %v4005_v30 = vpop.permute.xlu2 %4004 }
 0x97a   : > { %4072 = vrot.lane.b32.xlu2 %v9172_v28, %s4366_s13  ;;  %4068 = vrot.lane.b32.xlu0 %v9162_v62, %s4366_s13  ;;  %v4001_v8 = vpop.permute.xlu0 %4000 }
 0x97b   : > { %4064 = vrot.lane.b32.xlu1 %v9152_v50, %s4366_s13  ;;  %v4046_v34 = vmul.f32 %v4001_v8, %v9152_v50 }
 0x982   : > { %4078 = vrot.lane.b32.xlu2 %v9187_v29, %s4366_s13  ;;  %4074 = vrot.lane.b32.xlu0 %v9177_v61, %s4366_s13 }
 0x983   : > { %4070 = vrot.lane.b32.xlu1 %v9167_v15, %s4366_s13  ;;  %v4003_v55 = vpop.permute.xlu1 %4002 }
 0x984   : > { %v4047_v9 = vmul.f32 %v4003_v55, %v9157_v33 }
 0x98a   : > { %4084 = vrot.lane.b32.xlu2 %v9202_v10, %s4366_s13  ;;  %4080 = vrot.lane.b32.xlu0 %v9192_v59, %s4366_s13 }
 0x98b   : > { %4076 = vrot.lane.b32.xlu1 %v9182_v32, %s4366_s13 }
 0x98c   : > { %v4011_v27 = vpop.permute.xlu2 %4010 }
 0x992   : > { %4086 = vrot.lane.b32.xlu0 %v9207_v25, %s4366_s13  ;;  %4090 = vrot.lane.b32.xlu2 %v3978_v46, %s4366_s13 }
 0x993   : > { %4082 = vrot.lane.b32.xlu1 %v9197_v12, %s4366_s13 }
 0x994   : > { %v4007_v24 = vpop.permute.xlu0 %4006 }
 0x995   : > { %v4049_v50 = vmul.f32 %v4007_v24, %v9167_v15 }
 0x99b   : > { %4088 = vrot.lane.b32.xlu1 %v9212_v54, %s4366_s13 }
 0x99c   : > { %v4009_v13 = vpop.permute.xlu1 %4008 }
 0x99d   : > { %v4050_v49 = vmul.f32 %v4009_v13, %v9172_v28 }
 0x9a4   : > { %v4017_v43 = vpop.permute.xlu2 %4016 }
 0x9a5   : > { %v4054_v21 = vmul.f32 %v4017_v43, %v9192_v59 }
 0x9ac   : > { %v4013_v60 = vpop.permute.xlu0 %4012 }
 0x9ad   : > { %v4052_v44 = vmul.f32 %v4013_v60, %v9182_v32 }
 0x9b4   : > { %v4015_v17 = vpop.permute.xlu1 %4014 }
 0x9b5   : > { %v4053_v31 = vmul.f32 %v4015_v17, %v9187_v29  ;;  %v4048_v29 = vmul.f32 %v4005_v30, %v9162_v62  ;;  %v4051_v62 = vmul.f32 %v4011_v27, %v9177_v61 }
 0x9bc   : > { %v9232_v36 = vpop.permute.xlu2 %4022 }
 0x9bd   : > { %v4057_v15 = vmul.f32 %v9232_v36, %v9207_v25 }
 0x9c4   : > { %v4061_v45 = vpop.permute.xlu2 %4060  ;;  %v4019_v58 = vpop.permute.xlu0 %4018 }
 0x9c5   : > { %v4108_v37 = vmul.f32 %v4061_v45, %v4044_v38  ;;  %v4055_v51 = vmul.f32 %v4019_v58, %v9197_v12 }
 0x9c7   : > { %4125 = vst.msk [vmem:[%s9240_s16] sm:$0xff] %vm4124_vm12, %v4108_v37 }
 0x9cc   : > { %v4067_v53 = vpop.permute.xlu2 %4066  ;;  %v4021_v57 = vpop.permute.xlu1 %4020 }
 0x9cd   : > { %v4111_v2 = vmul.f32 %v4067_v53, %v4047_v9  ;;  %v4056_v28 = vmul.f32 %v4021_v57, %v9202_v10 }
 0x9cf   : > { %4128 = vst.msk [vmem:[%s9240_s16 + $0x18] sm:$0xff] %vm4124_vm12, %v4111_v2 }
 0x9d4   : > { %v4073_v20 = vpop.permute.xlu2 %4072 }
 0x9d5   : > { %v4114_v39 = vmul.f32 %v4073_v20, %v4050_v49 }
 0x9d7   : > { %4131 = vst.msk [vmem:[%s9240_s16 + $0x30] sm:$0xff] %vm4124_vm12, %v4114_v39 }
 0x9dc   : > { %v4025_v33 = vpop.permute.xlu0 %4024  ;;  %v4079_v26 = vpop.permute.xlu2 %4078 }
 0x9dd   : > { %v4117_v35 = vmul.f32 %v4079_v26, %v4053_v31  ;;  %v4058_v32 = vmul.f32 %v4025_v33, %v9212_v54 }
 0x9df   : > { %4134 = vst.msk [vmem:[%s9240_s16 + $0x48] sm:$0xff] %vm4124_vm12, %v4117_v35 }
 0x9e4   : > { %v4063_v7 = vpop.permute.xlu0 %4062  ;;  %v4085_v40 = vpop.permute.xlu2 %4084 }
 0x9e5   : > { %v4109_v23 = vmul.f32 %v4063_v7, %v4045_v52  ;;  %v4027_v48 = vpop.permute.xlu1 %4026  ;;  %v4120_v42 = vmul.f32 %v4085_v40, %v4056_v28 }
 0x9e6   : > { %v4059_v6 = vmul.f32 %v4027_v48, %v3978_v46 }
 0x9e7   : > { %4126 = vst.msk [vmem:[%s9240_s16 + $0x8] sm:$0xff] %vm4124_vm12, %v4109_v23 }
 0x9e8   : > { %4137 = vst.msk [vmem:[%s9240_s16 + $0x60] sm:$0xff] %vm4124_vm12, %v4120_v42 }
 0x9ec   : > { %v4069_v16 = vpop.permute.xlu0 %4068  ;;  %v4091_v10 = vpop.permute.xlu2 %4090 }
 0x9ed   : > { %v4112_v56 = vmul.f32 %v4069_v16, %v4048_v29  ;;  %v4065_v5 = vpop.permute.xlu1 %4064  ;;  %v4123_v41 = vmul.f32 %v4091_v10, %v4059_v6 }
 0x9ee   : > { %v4110_v4 = vmul.f32 %v4065_v5, %v4046_v34 }
 0x9ef   : > { %4129 = vst.msk [vmem:[%s9240_s16 + $0x20] sm:$0xff] %vm4124_vm12, %v4112_v56 }
 0x9f0   : > { %4127 = vst.msk [vmem:[%s9240_s16 + $0x10] sm:$0xff] %vm4124_vm12, %v4110_v4 }
 0x9f1   : > { %4140 = vst.msk [vmem:[%s9240_s16 + $0x78] sm:$0xff] %vm4124_vm12, %v4123_v41 }
 0x9f4   : > { %v4075_v47 = vpop.permute.xlu0 %4074 }
 0x9f5   : > { %v4115_v63 = vmul.f32 %v4075_v47, %v4051_v62  ;;  %v4071_v1 = vpop.permute.xlu1 %4070 }
 0x9f6   : > { %v4113_v22 = vmul.f32 %v4071_v1, %v4049_v50 }
 0x9f7   : > { %4132 = vst.msk [vmem:[%s9240_s16 + $0x38] sm:$0xff] %vm4124_vm12, %v4115_v63 }
 0x9f8   : > { %4130 = vst.msk [vmem:[%s9240_s16 + $0x28] sm:$0xff] %vm4124_vm12, %v4113_v22 }
 0x9fc   : > { %v4081_v14 = vpop.permute.xlu0 %4080 }
 0x9fd   : > { %v4118_v19 = vmul.f32 %v4081_v14, %v4054_v21  ;;  %v4077_v61 = vpop.permute.xlu1 %4076 }
 0x9fe   : > { %v4116_v0 = vmul.f32 %v4077_v61, %v4052_v44 }
 0x9ff   : > { %4135 = vst.msk [vmem:[%s9240_s16 + $0x50] sm:$0xff] %vm4124_vm12, %v4118_v19 }
 0xa00   : > { %4133 = vst.msk [vmem:[%s9240_s16 + $0x40] sm:$0xff] %vm4124_vm12, %v4116_v0 }
 0xa04   : > { %v4087_v3 = vpop.permute.xlu0 %4086 }
 0xa05   : > { %v4121_v46 = vmul.f32 %v4087_v3, %v4057_v15  ;;  %v4083_v11 = vpop.permute.xlu1 %4082 }
 0xa06   : > { %v4119_v59 = vmul.f32 %v4083_v11, %v4055_v51 }
 0xa07   : > { %4138 = vst.msk [vmem:[%s9240_s16 + $0x68] sm:$0xff] %vm4124_vm12, %v4121_v46 }
 0xa08   : > { %4136 = vst.msk [vmem:[%s9240_s16 + $0x58] sm:$0xff] %vm4124_vm12, %v4119_v59 }
 0xa0d   : > { %v4089_v30 = vpop.permute.xlu1 %4088 }
 0xa0e   : > { %v4122_v27 = vmul.f32 %v4089_v30, %v4058_v32 }
 0xa10   : > { %4139 = vst.msk [vmem:[%s9240_s16 + $0x70] sm:$0xff] %vm4124_vm12, %v4122_v27 }
 0xa11 PF: > { %s12_s9 = sadd.s32 1, %s4356_s9  }
 0xa12   : > { %p9_p4 = scmp.ge.s32.totalorder %s12_s9, 4  }
 0xa14   :  { %11 = sbr.rel (!%p9_p4) target bundleno = 1 (0x1), region = 58 }

</bundles_post_ra>
